<compile_context>
chip_gen: v7x
topology: tpu7x:2x2x1
jax: 0.10.0
libtpu: 0.0.40
codegen_flags: <defaults>
</compile_context>

<pallas_src>
import functools

import jax
import jax.numpy as jnp
from jax.experimental import pallas as pl
from jax.experimental.pallas import tpu as pltpu

DROPOUT_P = 0.7            # matches `dropout = 0.7` in the torch module
K1, K1_PAD = 10241, 10368  # layer-1 input features, padded to a multiple of 128
VMEM_LIMIT = 48 * 1024 * 1024   # <= v7x 64 MiB physical VMEM


def _linear_kernel(x_ref, w_ref, b_ref, m_ref, o_ref, *, apply_relu):
    """One output-feature tile: y = x @ W[:, tile] + b[tile]; optional ReLU; dropout mask mul."""
    y = jnp.dot(x_ref[...].astype(jnp.bfloat16), w_ref[...],
                preferred_element_type=jnp.float32)
    y = y + b_ref[...]                       # (B, tn) + (1, tn) broadcast
    if apply_relu:
        y = jnp.maximum(y, 0.0)
    y = y * m_ref[...]                       # pre-scaled inverted-dropout mask (ones in eval)
    o_ref[...] = y.astype(o_ref.dtype)


def linear_pallas(x, w, b, mask, *, apply_relu=False, tn=512):
    """y = (relu(x @ w + b)) * mask, tiled over output features. x:(B,K) w:(K,N) b,mask lane-tiled."""
    B, K = x.shape
    K2, N = w.shape
    assert K == K2 and b.shape == (1, N) and mask.shape == (B, N)
    tn = min(tn, N)
    assert N % tn == 0

    kernel = functools.partial(_linear_kernel, apply_relu=apply_relu)
    return pl.pallas_call(
        kernel,
        out_shape=jax.ShapeDtypeStruct((B, N), jnp.float32),
        grid_spec=pltpu.PrefetchScalarGridSpec(
            num_scalar_prefetch=0,
            grid=(N // tn,),
            in_specs=[
                pl.BlockSpec((B, K), lambda j: (0, 0)),     # activations (full K resident)
                pl.BlockSpec((K, tn), lambda j: (0, j)),    # bf16 weight column tile
                pl.BlockSpec((1, tn), lambda j: (0, j)),    # bias tile
                pl.BlockSpec((B, tn), lambda j: (0, j)),    # dropout-mask tile
            ],
            out_specs=pl.BlockSpec((B, tn), lambda j: (0, j)),
        ),
        compiler_params=pltpu.CompilerParams(
            dimension_semantics=("parallel",),   # N tiles are independent
            vmem_limit_bytes=VMEM_LIMIT,
        ),
    )(x, w, b, mask)


def _fused_tail_kernel(x_ref, w3_ref, b3_ref, m3_ref, w4_ref, b4_ref, o_ref):
    """Fused layer3 (2048->1024, ReLU+dropout) and layer4 (1024->1, padded to 128 lanes)."""
    h = jnp.dot(x_ref[...].astype(jnp.bfloat16), w3_ref[...],
                preferred_element_type=jnp.float32)
    h = jnp.maximum(h + b3_ref[...], 0.0) * m3_ref[...]
    y = jnp.dot(h.astype(jnp.bfloat16), w4_ref[...],
                preferred_element_type=jnp.float32)
    o_ref[...] = (y + b4_ref[...]).astype(o_ref.dtype)


def fused_tail_pallas(x, w3, b3, mask3, w4p, b4p):
    B, K = x.shape            # K = 2048
    _, H = w3.shape           # H = 1024
    _, Np = w4p.shape         # Np = 128 (padded out_features)
    return pl.pallas_call(
        _fused_tail_kernel,
        out_shape=jax.ShapeDtypeStruct((B, Np), jnp.float32),
        grid_spec=pltpu.PrefetchScalarGridSpec(
            num_scalar_prefetch=0,
            grid=(1,),
            in_specs=[
                pl.BlockSpec((B, K), lambda i: (0, 0)),
                pl.BlockSpec((K, H), lambda i: (0, 0)),
                pl.BlockSpec((1, H), lambda i: (0, 0)),
                pl.BlockSpec((B, H), lambda i: (0, 0)),
                pl.BlockSpec((H, Np), lambda i: (0, 0)),
                pl.BlockSpec((1, Np), lambda i: (0, 0)),
            ],
            out_specs=pl.BlockSpec((B, Np), lambda i: (0, 0)),
        ),
        compiler_params=pltpu.CompilerParams(
            dimension_semantics=("arbitrary",),
            vmem_limit_bytes=VMEM_LIMIT,
        ),
    )(x, w3, b3, mask3, w4p, b4p)


def init_linear(key, fan_in, fan_out):
    """Matches torch.nn.Linear's default U(-1/sqrt(fan_in), +1/sqrt(fan_in))."""
    kw, kb = jax.random.split(key)
    bound = 1.0 / (fan_in ** 0.5)
    w = jax.random.uniform(kw, (fan_in, fan_out), jnp.float32, -bound, bound)
    b = jax.random.uniform(kb, (1, fan_out), jnp.float32, -bound, bound)
    return w, b


def init_dqn_params(key):
    k1, k2, k3, k4 = jax.random.split(key, 4)
    w1, b1 = init_linear(k1, K1, 4096)
    w2, b2 = init_linear(k2, 4096, 2048)
    w3, b3 = init_linear(k3, 2048, 1024)
    w4, b4 = init_linear(k4, 1024, 1)
    # Pad layer-1 K to a multiple of 128 with zero rows (input is zero-padded to match).
    w1p = jnp.pad(w1, ((0, K1_PAD - K1), (0, 0)))
    # Pad the final (1024, 1) layer to 128 lanes so the output block is lane-aligned.
    w4p = jnp.zeros((1024, 128), jnp.float32).at[:, :1].set(w4)
    b4p = jnp.zeros((1, 128), jnp.float32).at[:, :1].set(b4)
    # Weights stream from HBM in bf16 (f32 accumulation in-kernel); biases stay f32.
    bf16 = lambda a: a.astype(jnp.bfloat16)
    return (bf16(w1p), b1), (bf16(w2), b2), (bf16(w3), b3), (bf16(w4p), b4p)


def _dropout_mask(key, shape, p):
    """Inverted-dropout mask, pre-scaled: value 1/(1-p) with prob (1-p), else 0."""
    keep = jax.random.bernoulli(key, 1.0 - p, shape)
    return keep.astype(jnp.float32) * (1.0 / (1.0 - p))


def dqn_forward(x, params, *, training=True, rng=None):
    # TODO(synk): torch.nn.Dropout consumes torch's RNG stream; exact bit-for-bit
    # mask reproduction is impossible — masks come from jax.random with the same
    # inverted-dropout semantics. Caller must vary `rng` per training step.
    (w1, b1), (w2, b2), (w3, b3), (w4p, b4p) = params
    B = x.shape[0]
    xp = jnp.pad(x, ((0, 0), (0, K1_PAD - x.shape[1])))   # zero-pad K to 10368

    if training:
        if rng is None:
            rng = jax.random.PRNGKey(0)
        k1, k2, k3 = jax.random.split(rng, 3)
        m1 = _dropout_mask(k1, (B, 4096), DROPOUT_P)
        m2 = _dropout_mask(k2, (B, 2048), DROPOUT_P)
        m3 = _dropout_mask(k3, (B, 1024), DROPOUT_P)
    else:
        m1 = jnp.ones((B, 4096), jnp.float32)
        m2 = jnp.ones((B, 2048), jnp.float32)
        m3 = jnp.ones((B, 1024), jnp.float32)

    # Layer 1: tn=512 keeps the (10368 x 512) bf16 weight tile ~10 MiB per buffer (v7x-safe).
    h = linear_pallas(xp, w1, b1, m1, apply_relu=True, tn=512)
    # Layer 2: smaller K -> larger tile is fine on all generations.
    h = linear_pallas(h, w2, b2, m2, apply_relu=True, tn=1024)
    # Layers 3 + 4 fused (weights ~4.25 MiB bf16, fits VMEM everywhere).
    y = fused_tail_pallas(h, w3, b3, m3, w4p, b4p)
    return y[:, :1]   # un-pad final layer back to out_features = 1


if __name__ == "__main__":
    key = jax.random.PRNGKey(0)
    kp, kx, kd = jax.random.split(key, 3)
    params = init_dqn_params(kp)

    batch = 2
    x = jax.random.normal(kx, (batch, K1), jnp.float32)

    out = dqn_forward(x, params, training=True, rng=kd)
    out = jax.block_until_ready(out)
    assert out.shape == (batch, 1) and out.dtype == jnp.float32
    print("KERNEL_OK")
</pallas_src>

<mosaic_0001>
module attributes {stable_mosaic.version = 11 : i64} {
  func.func @_linear_kernel(%arg0: i32, %arg1: memref<2x10368xf32, #tpu.memory_space<vmem>>, %arg2: memref<10368x512xbf16, #tpu.memory_space<vmem>>, %arg3: memref<1x512xf32, #tpu.memory_space<vmem>>, %arg4: memref<2x512xf32, #tpu.memory_space<vmem>>, %arg5: memref<2x512xf32, #tpu.memory_space<vmem>>) attributes {dimension_semantics = [#tpu.dimension_semantics<parallel>], iteration_bounds = array<i64: 8>, scalar_prefetch = 0 : i64, scratch_operands = 0 : i64, tpu.core_type = #tpu.core_type<tc>, window_params = [{pipeline_mode = #tpu.pipeline_mode<synchronous>, transform_indices = @transform_0, window_bounds = array<i64: 2, 10368>}, {transform_indices = @transform_1, window_bounds = array<i64: 10368, 512>}, {transform_indices = @transform_2, window_bounds = array<i64: 1, 512>}, {transform_indices = @transform_3, window_bounds = array<i64: 2, 512>}, {transform_indices = @transform_4, window_bounds = array<i64: 2, 512>}]} {
    %c0 = arith.constant 0 : index
    %c0_0 = arith.constant 0 : index
    %0 = vector.load %arg1[%c0, %c0_0] : memref<2x10368xf32, #tpu.memory_space<vmem>>, vector<2x10368xf32>
    %1 = arith.truncf %0 : vector<2x10368xf32> to vector<2x10368xbf16>
    %c0_1 = arith.constant 0 : index
    %c0_2 = arith.constant 0 : index
    %2 = vector.load %arg2[%c0_1, %c0_2] : memref<10368x512xbf16, #tpu.memory_space<vmem>>, vector<10368x512xbf16>
    %cst = arith.constant dense<0.000000e+00> : vector<2x512xf32>
    %3 = tpu.matmul %1, %2, %cst {dimension_numbers = #tpu.dot_dimension_numbers<[1], [0], [0], [1], [0, 0, 1, 1], [], []>} : vector<2x10368xbf16>, vector<10368x512xbf16>, vector<2x512xf32> -> vector<2x512xf32>
    %c0_3 = arith.constant 0 : index
    %c0_4 = arith.constant 0 : index
    %4 = vector.load %arg3[%c0_3, %c0_4] : memref<1x512xf32, #tpu.memory_space<vmem>>, vector<1x512xf32>
    %5 = vector.broadcast %4 : vector<1x512xf32> to vector<2x512xf32>
    %6 = arith.addf %3, %5 : vector<2x512xf32>
    %cst_5 = arith.constant 0.000000e+00 : f32
    %7 = vector.broadcast %cst_5 : f32 to vector<2x512xf32>
    %8 = arith.maximumf %6, %7 : vector<2x512xf32>
    %c0_6 = arith.constant 0 : index
    %c0_7 = arith.constant 0 : index
    %9 = vector.load %arg4[%c0_6, %c0_7] : memref<2x512xf32, #tpu.memory_space<vmem>>, vector<2x512xf32>
    %10 = arith.mulf %8, %9 : vector<2x512xf32>
    %c0_8 = arith.constant 0 : index
    %c0_9 = arith.constant 0 : index
    %11 = vector.load %arg5[%c0_8, %c0_9] : memref<2x512xf32, #tpu.memory_space<vmem>>, vector<2x512xf32>
    tpu.vector_store %arg5[%c0_8, %c0_9], %10 {strides = array<i32>} : memref<2x512xf32, #tpu.memory_space<vmem>>, vector<2x512xf32>,
    return
  }
  func.func @transform_0(%arg0: i32) -> (i32, i32) {
    %c0_i32 = arith.constant 0 : i32
    %c0_i32_0 = arith.constant 0 : i32
    %c0_i32_1 = arith.constant 0 : i32
    return %c0_i32, %c0_i32_0 : i32, i32
  }
  func.func @transform_1(%arg0: i32) -> (i32, i32) {
    %c0_i32 = arith.constant 0 : i32
    %c0_i32_0 = arith.constant 0 : i32
    return %c0_i32, %arg0 : i32, i32
  }
  func.func @transform_2(%arg0: i32) -> (i32, i32) {
    %c0_i32 = arith.constant 0 : i32
    %c0_i32_0 = arith.constant 0 : i32
    return %c0_i32, %arg0 : i32, i32
  }
  func.func @transform_3(%arg0: i32) -> (i32, i32) {
    %c0_i32 = arith.constant 0 : i32
    %c0_i32_0 = arith.constant 0 : i32
    return %c0_i32, %arg0 : i32, i32
  }
  func.func @transform_4(%arg0: i32) -> (i32, i32) {
    %c0_i32 = arith.constant 0 : i32
    %c0_i32_0 = arith.constant 0 : i32
    return %c0_i32, %arg0 : i32, i32
  }
}

</mosaic_0001>

<bundles_post_ra>
// kernel: tpu_custom_call.1
= control target key start
LH: loop header
LB: loop body
LE: loop exit
PB: predicated region body
PF: predicated region fallthrough
CT: control target
= control target key end

     0   :  { %s30394_s0 = inlined_call_operand.hbm [shape: f32[2,10368], index: 0, kind: input, shape index: {}]   ;;  %s30395_s1 = inlined_call_operand.hbm [shape: bf16[10368,4096], index: 1, kind: input, shape index: {}]   ;;  %s30396_s2 = inlined_call_operand.hbm [shape: f32[1,4096], index: 2, kind: input, shape index: {}]   ;;  %s30397_s3 = inlined_call_operand.hbm [shape: f32[2,4096], index: 3, kind: input, shape index: {}]   ;;  %s30398_s4 = inlined_call_operand.hbm [shape: f32[2,4096], index: 4, kind: output, shape index: {}]  }
   0x1   :  { %30409 = sst [smem:[#allocation17_spill]] %s30395_s1 }
   0x2   :  { %9 = vsyncpa [#allocation3], 0 }
   0x3   :  { %10 = vsyncpa [#allocation6], 0 }
   0x4   :  { %12 = vsyncpa [#allocation6 + $0x1], 0 }
   0x5   :  { %13 = vsyncpa [#allocation9], 0 }
   0x6   :  { %15 = vsyncpa [#allocation9 + $0x1], 0 }
   0x7   :  { %16 = vsyncpa [#allocation4], 0 }
   0x8   :  { %18 = vsyncpa [#allocation4 + $0x1], 0  ;;  %s27143_s15 = smov 0   ;;  %s27145_s16 = smov 0  }
   0x9   :  { %s27147_s17 = smov 0   ;;  %s27149_s18 = smov 0  }
   0xa LB: > { %30410 = sst [smem:[#allocation15_spill]] %s27102_s17  ;;  %s27164_s19 = sadd.s32 1, %s27106_s18   ;;  %s27106_s18 = sphi %s27149_s18, %s30434_s18   ;;  %s27102_s17 = sphi %s27147_s17, %s30431_s17   ;;  %s27098_s16 = sphi %s27145_s16, %s30433_s16   ;;  %s27094_s15 = sphi %s27143_s15, %s30432_s15  }
   0xb   : > { %s52_s20 = sadd.s32 1, %s27102_s17  ;;  %s49_s21 = ssub.s32 %s27106_s18, %s27164_s19 }
   0xc   : > { %p30399_p0 = scmp.ne.s32.totalorder %s27102_s17, %s27098_s16  ;;  %p50_p1 = scmp.eq.s32.totalorder %s49_s21, 0 }
   0xd   : > { %p60_p2 = scmp.eq.s32.totalorder %s27106_s18, 0  ;;  %p22964_p3 = scmp.lt.s32.totalorder %s27106_s18, 8 }
   0xe   : > { %s27174_s22 = scalar_select %p50_p1, %s27102_s17, %s52_s20  }
   0xf   : > { %p61_p4 = por %p60_p2, %p30399_p0  ;;  %s178_s23 = sand.u32 1, %s27106_s18  }
  0x10   : > { %30411 = sst [smem:[#allocation16_spill]] %s27174_s22  ;;  %s27181_s24 = sand.u32 1, %s27102_s17  }
  0x11   : > { %s22931_s25 = smul.u32 20736, %s27181_s24  ;;  %s22603_s26 = sshll.u32 %s27106_s18, 8 }
  0x12   : > { %s30412_s1 = sld [smem:[#allocation17_spill]]  ;;  %p27190_p5 = pnand %p22964_p3, %p61_p4 }
  0x13   : > { %s182_s5 = scalar_lea.vmem [#allocation5], %s22931_s25  ;;  %s27196_s7 = scalar_lea.sflag [#allocation6], %s178_s23 }
  0x14   : > { %s30413_s30 = scalar_select %p27190_p5, 1, 0 }
  0x15   : > { %s189_s6 = sshll.u32 %s182_s5, 4  ;;  %p27202_p7 = pneg %p27190_p5  ;;  %s27194_s6 = int_to_ptr.vmem [resolvable:$true] %s189_s6 }
  0x17   : > { %s30414_s9 = scalar_select %p27202_p7, 1, 0 }
  0x18   : > { %s27188_s29 = scalar_lea.hbm %s30412_s1, %s22603_s26  ;;  %s26919_s12 = scalar_lea.hbm %s30412_s1, 2654208 }
  0x19   : > { %s26914_s8 = scalar_lea.hbm %s27188_s29, 331776  ;;  %p26920_p10 = scmp.lt.u32.totalorder %s27188_s29, %s30412_s1 }
  0x1a   : > { %p26915_p6 = scmp.ne.s32.totalorder %s27188_s29, %s26914_s8  ;;  %p26921_p11 = scmp.lt.u32.totalorder %s26919_s12, %s26914_s8 }
  0x1b   : > { %p26923_p13 = scmp.lt.u32.totalorder %s26914_s8, %s27188_s29 }
  0x1c   : > { %p26917_p8 = pnand %p27202_p7, %p26915_p6  ;;  %p26922_p12 = por %p26921_p11, %p26920_p10 }
  0x1e   : > { %p26918_p9 = pneg %p26917_p8  ;;  %p26924_p1 = por %p26923_p13, %p26922_p12 }
  0x20   : > { %p26925_p2 = pnand %p26924_p1, %p26918_p9 }
  0x22   : > { %26928 = shalt.err (!%p26925_p2)
}
  0x23   : > { %s26929_s20 = scalar_lea.vmem %s27194_s6, 331776  ;;  %s27108_s21 = smov [#allocation5]  }
  0x24   : > { %p26930_p3 = scmp.ne.s32.totalorder %s27194_s6, %s26929_s20  ;;  %s26934_s23 = sshll.u32 %s27108_s21, 4  ;;  %s26935_s23 = int_to_ptr.vmem [resolvable:$false] %s26934_s23 }
  0x25   : > { %s26936_s25 = scalar_lea.vmem %s26935_s23, 663552  ;;  %p26937_p8 = scmp.lt.s32.totalorder %s27194_s6, %s26935_s23 }
  0x26   : > { %p26932_p4 = pnand %p26930_p3, %p27202_p7  ;;  %p26938_p0 = scmp.lt.s32.totalorder %s26936_s25, %s26929_s20 }
  0x28   : > { %p26933_p6 = pneg %p26932_p4  ;;  %p26939_p10 = por %p26938_p0, %p26937_p8 }
  0x2a   : > { %p26940_p11 = pnand %p26939_p10, %p26933_p6 }
  0x2c   : > { %26943 = shalt.err (!%p26940_p11)
}
  0x2d   : > { %s27109_s26 = smov 2048   ;;  %s27110_s27 = smov 256  }
  0x2e   : > { %s27111_s28 = smov 16   ;;  %s27227_s5 = sadd.s32 4294967295, %s27106_s18  }
  0x2f   : > { %22952 = dma.hbm_to_vmem [thread:$0]  (!%p27190_p5), %s27188_s29, 331776, %s27194_s6, %s27196_s7, %s27109_s26, %s27110_s27, %s27111_s28  }
  0x30   : > { %s19988_s8 = sadd.s32 4294967294, %s27106_s18   ;;  %p65_p0 = scmp.ne.s32.totalorder %s27098_s16, %s27094_s15 }
  0x31   : > { %p30401_p9 = scmp.eq.s32.totalorder %s27227_s5, 0  ;;  %p141_p12 = scmp.eq.s32.totalorder %s27227_s5, 7 }
  0x32   : > { %p147_p13 = scmp.eq.s32.totalorder %s19988_s8, 7  ;;  %p19989_p1 = scmp.ge.s32.totalorder %s27106_s18, 1 }
  0x33   : > { %p27237_p2 = por %p30401_p9, %p65_p0  ;;  %p30416_p3 = scmp.ne.s32.totalorder %s27102_s17, %s27098_s16 }
  0x34   : > { %p27248_p6 = por %p147_p13, %p65_p0  ;;  %p154_p8 = scmp.lt.s32.totalorder %s27106_s18, 9 }
  0x35   : > { %s30415_s10 = scalar_select %p27237_p2, 1, 0 }
  0x36   : > { %p27244_p4 = por %p141_p12, %p30416_p3  ;;  %p27253_p10 = pnand %p19989_p1, %p154_p8 }
  0x37   : > { %s30418_s6 = scalar_select %p27248_p6, 1, 0 }
  0x38   : > { %s30417_s29 = scalar_select %p27244_p4, 1, 0 }
  0x39   : > { %s30419_s11 = scalar_select %p27253_p10, 1, 0 }
  0x3a   : > { %s27112_s12 = smov [#allocation2]   ;;  %s19994_s14 = sshll.u32 %s27181_s24, 2 }
  0x3b   : > { %s167_s13 = sshll.u32 %s27112_s12, 4  ;;  %p22945_p11 = pneg %p27253_p10  ;;  %s168_s13 = int_to_ptr.vmem [resolvable:$true] %s167_s13 }
  0x3c   : > { %s22604_s20 = sshll.u32 %s27106_s18, 6  ;;  %s203_s21 = scalar_lea.vmem [#allocation7], %s19994_s14 }
  0x3d   : > { %s211_s23 = sshll.u32 %s203_s21, 4  ;;  %p27263_p0 = pnand %p22945_p11, %p30401_p9  ;;  %s27272_s23 = int_to_ptr.vmem [resolvable:$true] %s211_s23 }
  0x3e   : > { %s27270_s28 = scalar_lea.hbm %s30396_s2, %s22604_s20  ;;  %s19997_s8 = sshll.u32 %s27181_s24, 3 }
  0x3f   : > { %s26944_s22 = scalar_lea.hbm %s30394_s0, 2592  ;;  %p26946_p13 = pneg %p27263_p0 }
  0x40   : > { %p26945_p12 = scmp.ne.s32.totalorder %s30394_s0, %s26944_s22  ;;  %p26951_p8 = scmp.lt.u32.totalorder %s26944_s22, %s30394_s0 }
  0x42   : > { %p26947_p1 = pnand %p26946_p13, %p26945_p12 }
  0x44   : > { %p26948_p3 = pneg %p26947_p1 }
  0x46   : > { %p26953_p11 = pnand %p26951_p8, %p26948_p3 }
  0x48   : > { %26956 = shalt.err (!%p26953_p11)
}
  0x49   : > { %s26957_s20 = scalar_lea.vmem %s168_s13, 2592  ;;  %p26965_p2 = scmp.lt.s32.totalorder %s168_s13, %s168_s13 }
  0x4a   : > { %p26958_p9 = scmp.ne.s32.totalorder %s168_s13, %s26957_s20  ;;  %p26966_p10 = scmp.lt.s32.totalorder %s26957_s20, %s26957_s20 }
  0x4c   : > { %p26960_p6 = pnand %p26958_p9, %p26946_p13  ;;  %p26967_p5 = por %p26966_p10, %p26965_p2 }
  0x4e   : > { %p26961_p4 = pneg %p26960_p6 }
  0x50   : > { %p26968_p7 = pnand %p26967_p5, %p26961_p4 }
  0x52   : > { %26971 = shalt.err (!%p26968_p7)
}
  0x53   : > { %22948 = dma.hbm_to_vmem [thread:$0]  (!%p27263_p0), %s30394_s0, 2592, %s168_s13, [#allocation3]  }
  0x54   : > { %s26972_s17 = scalar_lea.hbm %s27270_s28, 64  ;;  %p30421_p9 = scmp.ne.s32.totalorder %s30414_s9, 0 }
  0x55   : > { %p26973_p12 = scmp.ne.s32.totalorder %s27270_s28, %s26972_s17  ;;  %s26977_s14 = scalar_lea.hbm %s30396_s2, 512 }
  0x56   : > { %p26978_p5 = scmp.lt.u32.totalorder %s27270_s28, %s30396_s2  ;;  %p26979_p7 = scmp.lt.u32.totalorder %s26977_s14, %s26972_s17 }
  0x57   : > { %p26975_p6 = pnand %p26973_p12, %p30421_p9  ;;  %p26981_p4 = scmp.lt.u32.totalorder %s26972_s17, %s27270_s28 }
  0x58   : > { %p26980_p2 = por %p26979_p7, %p26978_p5 }
  0x59   : > { %p26976_p13 = pneg %p26975_p6 }
  0x5a   : > { %p26982_p10 = por %p26981_p4, %p26980_p2 }
  0x5c   : > { %p26983_p1 = pnand %p26982_p10, %p26976_p13 }
  0x5e   : > { %26986 = shalt.err (!%p26983_p1)
}
  0x5f   : > { %s26987_s13 = scalar_lea.vmem %s27272_s23, 64  ;;  %s27113_s26 = smov [#allocation7]  }
  0x60   : > { %p26988_p0 = scmp.ne.s32.totalorder %s27272_s23, %s26987_s13  ;;  %s26992_s20 = sshll.u32 %s27113_s26, 4  ;;  %s26993_s20 = int_to_ptr.vmem [resolvable:$false] %s26992_s20 }
  0x61   : > { %s26994_s1 = scalar_lea.vmem %s26993_s20, 128  ;;  %p26995_p11 = scmp.lt.s32.totalorder %s27272_s23, %s26993_s20 }
  0x62   : > { %p26990_p3 = pnand %p26988_p0, %p30421_p9  ;;  %p26996_p12 = scmp.lt.s32.totalorder %s26994_s1, %s26987_s13 }
  0x64   : > { %p26991_p8 = pneg %p26990_p3  ;;  %p26997_p6 = por %p26996_p12, %p26995_p11 }
  0x66   : > { %p26998_p5 = pnand %p26997_p6, %p26991_p8 }
  0x68   : > { %27001 = shalt.err (!%p26998_p5)
}
  0x69   : > { %p30422_p13 = scmp.ne.s32.totalorder %s30413_s30, 0  ;;  %s22605_s27 = sshll.u32 %s27106_s18, 7 }
  0x6a   : > { %s27317_s12 = scalar_lea.hbm %s30397_s3, %s22605_s27  ;;  %s222_s14 = scalar_lea.vmem [#allocation8], %s19997_s8 }
  0x6b   : > { %22955 = dma.hbm_to_vmem [thread:$0]  (!%p30422_p13), %s27270_s28, 64, %s27272_s23, %s27196_s7  }
  0x6c   : > { %s230_s21 = sshll.u32 %s222_s14, 4  ;;  %s219_s25 = scalar_lea.sflag [#allocation9], %s27181_s24  ;;  %s231_s21 = int_to_ptr.vmem [resolvable:$true] %s230_s21 }
  0x6d   : > { %s27002_s13 = scalar_lea.hbm %s27317_s12, 128  ;;  %s27007_s28 = scalar_lea.hbm %s30397_s3, 1024 }
  0x6e   : > { %p27003_p7 = scmp.ne.s32.totalorder %s27317_s12, %s27002_s13  ;;  %p27008_p10 = scmp.lt.u32.totalorder %s27317_s12, %s30397_s3 }
  0x6f   : > { %p27009_p1 = scmp.lt.u32.totalorder %s27007_s28, %s27002_s13  ;;  %p27011_p3 = scmp.lt.u32.totalorder %s27002_s13, %s27317_s12 }
  0x70   : > { %p27005_p2 = pnand %p27003_p7, %p30421_p9 }
  0x71   : > { %p27010_p0 = por %p27009_p1, %p27008_p10 }
  0x72   : > { %p27006_p4 = pneg %p27005_p2 }
  0x73   : > { %p27012_p8 = por %p27011_p3, %p27010_p0 }
  0x75   : > { %p27013_p11 = pnand %p27012_p8, %p27006_p4 }
  0x77   : > { %27016 = shalt.err (!%p27013_p11)
}
  0x78   : > { %s27017_s24 = scalar_lea.vmem %s231_s21, 128  ;;  %s27114_s8 = smov [#allocation8]  }
  0x79   : > { %p27018_p12 = scmp.ne.s32.totalorder %s231_s21, %s27017_s24  ;;  %s27022_s1 = sshll.u32 %s27114_s8, 4  ;;  %s27023_s1 = int_to_ptr.vmem [resolvable:$false] %s27022_s1 }
  0x7a   : > { %s27024_s27 = scalar_lea.vmem %s27023_s1, 256  ;;  %p27025_p7 = scmp.lt.s32.totalorder %s231_s21, %s27023_s1 }
  0x7b   : > { %p27020_p6 = pnand %p27018_p12, %p30421_p9  ;;  %p27026_p2 = scmp.lt.s32.totalorder %s27024_s27, %s27017_s24 }
  0x7d   : > { %p27021_p5 = pneg %p27020_p6  ;;  %p27027_p13 = por %p27026_p2, %p27025_p7 }
  0x7f   : > { %p27028_p1 = pnand %p27027_p13, %p27021_p5 }
  0x81   : > { %27031 = shalt.err (!%p27028_p1)
}
  0x82   : > { %p30423_p10 = scmp.ne.s32.totalorder %s30413_s30, 0  ;;  %p30424_p4 = scmp.ne.s32.totalorder %s30419_s11, 0 }
  0x83   : > { %p30425_p0 = scmp.eq.s32.totalorder (!%p30424_p4), %s27227_s5, 0 }
  0x84   : > { %22958 = dma.hbm_to_vmem [thread:$0]  (!%p30423_p10), %s27317_s12, 128, %s231_s21, %s219_s25  }
  0x85   : > { %239 = sbr.rel (%p30424_p4) target bundleno = 2982 (0xba6), region = 36 }
  0x8c   : > { %27077 = dma.done.wait (%p30425_p0), [#allocation3], 2592   ;;  %p30426_p9 = pmov %p30425_p0 }
  0x8d   : > { %s245_s9 = sand.u32 1, %s27227_s5   ;;  %s27347_s17 = sand.u32 1, %s27098_s16  }
  0x8e   : > { %27079 = vsyncadd (%p30426_p9), [#allocation3], 4294964704  ;;  %s22932_s22 = smul.u32 20736, %s27347_s17  ;;  %s246_s30 = scalar_lea.sflag [#allocation6], %s245_s9 }
  0x8f   : > { %p30427_p13 = scmp.ne.s32.totalorder %s30415_s10, 0 }
  0x90   : > { %s27350_s14 = scalar_lea.vmem [#allocation5], %s22932_s22 }
  0x91   : > { %27081 = dma.done.wait (%p30427_p13), %s246_s30, 331840  }
  0x92   : > { %27083 = vsyncadd (%p30427_p13), %s246_s30, 4294635456  ;;  %s20002_s11 = sshll.u32 %s27347_s17, 2  ;;  %s20003_s12 = sshll.u32 %s27347_s17, 3 }
  0x93   : > { %s27358_s21 = scalar_lea.vmem [#allocation7], %s20002_s11  ;;  %s264_s25 = scalar_lea.sflag [#allocation9], %s27347_s17 }
  0x94   : > { %s27363_s13 = scalar_lea.vmem [#allocation8], %s20003_s12 }
  0x95   : > { %27085 = dma.done.wait (%p30427_p13), %s264_s25, 128  }
  0x96   : > { %27087 = vsyncadd (%p30427_p13), %s264_s25, 4294967168  ;;  %v23005_v0 = vld [vmem:[%s27350_s14 + $0x4] ss:$16 sps:$4 sm:$0xff]   ;;  %v23007_v1 = vld [vmem:[%s27350_s14 + $0xc] ss:$16 sps:$4 sm:$0xff]   ;;  %v353_v38 = vlaneseq  ;;  %s22606_s10 = sshll.u32 %s27227_s5, 7 }
  0x97   : > { %16432 = vmatprep.subr.bf16.mxu0 %v23005_v0  ;;  %v23009_v2 = vld [vmem:[%s27350_s14] ss:$16 sps:$4 sm:$0xff]   ;;  %v23010_v3 = vld [vmem:[%s27350_s14 + $0x8] ss:$16 sps:$4 sm:$0xff]   ;;  %18113 = vmatprep.subr.bf16.mxu1 %v23007_v1  ;;  %v23011_v4 = vld [vmem:[%s27350_s14 + $0x24] ss:$16 sps:$4 sm:$0xff]   ;;  %s30351_s20 = scalar_lea.hbm %s30398_s4, %s22606_s10 }
  0x98   : > { %16433 = vmatpush1.bf16.msra.mxu0 %v23009_v2  ;;  %18114 = vmatpush1.bf16.msra.mxu1 %v23010_v3  ;;  %v23013_v5 = vld [vmem:[%s27350_s14 + $0x2c] ss:$16 sps:$4 sm:$0xff]   ;;  %v23015_v6 = vld [vmem:[%s27350_s14 + $0x20] ss:$16 sps:$4 sm:$0xff]   ;;  %v23016_v7 = vld [vmem:[%s27350_s14 + $0x28] ss:$16 sps:$4 sm:$0xff]  }
  0x99   : > { %16434 = vmatprep.subr.bf16.mxu0 %v23011_v4  ;;  %18115 = vmatprep.subr.bf16.mxu1 %v23013_v5  ;;  %v23017_v8 = vld [vmem:[%s27350_s14 + $0x44] ss:$16 sps:$4 sm:$0xff]   ;;  %v23019_v9 = vld [vmem:[%s27350_s14 + $0x4c] ss:$16 sps:$4 sm:$0xff]   ;;  %v23021_v10 = vld [vmem:[%s27350_s14 + $0x40] ss:$16 sps:$4 sm:$0xff]  }
  0x9a   : > { %v23022_v11 = vld [vmem:[%s27350_s14 + $0x48] ss:$16 sps:$4 sm:$0xff]   ;;  %v23023_v12 = vld [vmem:[%s27350_s14 + $0x64] ss:$16 sps:$4 sm:$0xff]   ;;  %v23025_v13 = vld [vmem:[%s27350_s14 + $0x6c] ss:$16 sps:$4 sm:$0xff]  }
  0x9b   : > { %v23027_v14 = vld [vmem:[%s27350_s14 + $0x60] ss:$16 sps:$4 sm:$0xff]   ;;  %v23028_v15 = vld [vmem:[%s27350_s14 + $0x68] ss:$16 sps:$4 sm:$0xff]   ;;  %v23029_v16 = vld [vmem:[%s27350_s14 + $0x84] ss:$16 sps:$4 sm:$0xff]  }
  0x9c   : > { %16435 = vmatpush1.bf16.msra.mxu0 %v23015_v6  ;;  %18116 = vmatpush1.bf16.msra.mxu1 %v23016_v7  ;;  %v23031_v17 = vld [vmem:[%s27350_s14 + $0x8c] ss:$16 sps:$4 sm:$0xff]   ;;  %v23033_v18 = vld [vmem:[%s27350_s14 + $0x80] ss:$16 sps:$4 sm:$0xff]   ;;  %v23034_v19 = vld [vmem:[%s27350_s14 + $0x88] ss:$16 sps:$4 sm:$0xff]  }
  0x9d   : > { %16436 = vmatprep.subr.bf16.mxu0 %v23017_v8  ;;  %18117 = vmatprep.subr.bf16.mxu1 %v23019_v9  ;;  %v23035_v20 = vld [vmem:[%s27350_s14 + $0xa4] ss:$16 sps:$4 sm:$0xff]   ;;  %v23037_v21 = vld [vmem:[%s27350_s14 + $0xac] ss:$16 sps:$4 sm:$0xff]   ;;  %v23039_v22 = vld [vmem:[%s27350_s14 + $0xa0] ss:$16 sps:$4 sm:$0xff]  }
  0x9e   : > { %v23040_v23 = vld [vmem:[%s27350_s14 + $0xa8] ss:$16 sps:$4 sm:$0xff]   ;;  %v23041_v24 = vld [vmem:[%s27350_s14 + $0xc4] ss:$16 sps:$4 sm:$0xff]   ;;  %v23043_v25 = vld [vmem:[%s27350_s14 + $0xcc] ss:$16 sps:$4 sm:$0xff]  }
  0x9f   : > { %v23045_v26 = vld [vmem:[%s27350_s14 + $0xc0] ss:$16 sps:$4 sm:$0xff]   ;;  %v23046_v27 = vld [vmem:[%s27350_s14 + $0xc8] ss:$16 sps:$4 sm:$0xff]   ;;  %v23047_v28 = vld [vmem:[%s27350_s14 + $0xe4] ss:$16 sps:$4 sm:$0xff]  }
  0xa0   : > { %16437 = vmatpush1.bf16.msra.mxu0 %v23021_v10  ;;  %18118 = vmatpush1.bf16.msra.mxu1 %v23022_v11  ;;  %v23049_v29 = vld [vmem:[%s27350_s14 + $0xec] ss:$16 sps:$4 sm:$0xff]   ;;  %v23051_v30 = vld [vmem:[%s27350_s14 + $0xe0] ss:$16 sps:$4 sm:$0xff]   ;;  %v23052_v31 = vld [vmem:[%s27350_s14 + $0xe8] ss:$16 sps:$4 sm:$0xff]  }
  0xa1   : > { %16438 = vmatprep.subr.bf16.mxu0 %v23023_v12  ;;  %18119 = vmatprep.subr.bf16.mxu1 %v23025_v13  ;;  %v23053_v32 = vld [vmem:[%s27350_s14 + $0x104] ss:$16 sps:$4 sm:$0xff]   ;;  %v23055_v33 = vld [vmem:[%s27350_s14 + $0x10c] ss:$16 sps:$4 sm:$0xff]   ;;  %v23057_v34 = vld [vmem:[%s27350_s14 + $0x100] ss:$16 sps:$4 sm:$0xff]  }
  0xa2   : > { %v23058_v35 = vld [vmem:[%s27350_s14 + $0x108] ss:$16 sps:$4 sm:$0xff]   ;;  %v27115_v36 = vmov 1983009808   ;;  %v23059_v39 = vld [vmem:[%s27350_s14 + $0x124] ss:$16 sps:$4 sm:$0xff]  }
  0xa3   : > { %v351_v37 = vunpack.c.l.s4 %v27115_v36  ;;  %v23061_v40 = vld [vmem:[%s27350_s14 + $0x12c] ss:$16 sps:$4 sm:$0xff]   ;;  %v23063_v41 = vld [vmem:[%s27350_s14 + $0x120] ss:$16 sps:$4 sm:$0xff]   ;;  %v27408_v43 = vshrl.u32 %v353_v38, 7  ;;  %s301_s7 = scalar_lea.vmem [#allocation10], %s20003_s12 }
  0xa4   : > { %16439 = vmatpush1.bf16.msra.mxu0 %v23027_v14  ;;  %18120 = vmatpush1.bf16.msra.mxu1 %v23028_v15  ;;  %v23064_v44 = vld [vmem:[%s27350_s14 + $0x128] ss:$16 sps:$4 sm:$0xff]   ;;  %v23065_v45 = vld [vmem:[%s27350_s14 + $0x144] ss:$16 sps:$4 sm:$0xff]   ;;  %v23067_v46 = vld [vmem:[%s27350_s14 + $0x14c] ss:$16 sps:$4 sm:$0xff]  }
  0xa5   : > { %16440 = vmatprep.subr.bf16.mxu0 %v23029_v16  ;;  %18121 = vmatprep.subr.bf16.mxu1 %v23031_v17  ;;  %v352_v42 = vunpack.c.0.s8 %v351_v37  ;;  %v23069_v47 = vld [vmem:[%s27350_s14 + $0x140] ss:$16 sps:$4 sm:$0xff]   ;;  %v23070_v48 = vld [vmem:[%s27350_s14 + $0x148] ss:$16 sps:$4 sm:$0xff]   ;;  %v23071_v50 = vld [vmem:[%s27350_s14 + $0x164] ss:$16 sps:$4 sm:$0xff]  }
  0xa6   : > { %v23073_v51 = vld [vmem:[%s27350_s14 + $0x16c] ss:$16 sps:$4 sm:$0xff]   ;;  %v23075_v53 = vld [vmem:[%s27350_s14 + $0x160] ss:$16 sps:$4 sm:$0xff]   ;;  %v23076_v55 = vld [vmem:[%s27350_s14 + $0x168] ss:$16 sps:$4 sm:$0xff]  }
  0xa7   : > { %v27416_v49 = vsub.s32 %v352_v42, %v27408_v43  ;;  %v307_v52 = vld [vmem:[#allocation2] sm:$0xff]  ;;  %v23082_v61 = vld [vmem:[%s27350_s14 + $0x188] ss:$16 sps:$4 sm:$0xff]   ;;  %s19863_s23 = sshll.u32 %s301_s7, 4  ;;  %s19849_s5 = scalar_lea.sflag [#allocation4], %s27347_s17  ;;  %s30353_s23 = int_to_ptr.vmem [resolvable:$true] %s19863_s23 }
  0xa8   : > { %16441 = vmatpush1.bf16.msra.mxu0 %v23033_v18  ;;  %18122 = vmatpush1.bf16.msra.mxu1 %v23034_v19  ;;  %v23077_v56 = vld [vmem:[%s27350_s14 + $0x184] ss:$16 sps:$4 sm:$0xff]   ;;  %v23079_v57 = vld [vmem:[%s27350_s14 + $0x18c] ss:$16 sps:$4 sm:$0xff]   ;;  %v23081_v59 = vld [vmem:[%s27350_s14 + $0x180] ss:$16 sps:$4 sm:$0xff]   ;;  %v349_v4 = vcombine.high %v307_v52, %v307_v52 }
  0xa9   : > { %16442 = vmatprep.subr.bf16.mxu0 %v23035_v20  ;;  %18123 = vmatprep.subr.bf16.mxu1 %v23037_v21  ;;  %v356_v54 = vrot.slane %v307_v52, %v27416_v49  ;;  %v23083_v62 = vld [vmem:[%s27350_s14 + $0x1a4] ss:$16 sps:$4 sm:$0xff]   ;;  %v23085_v63 = vld [vmem:[%s27350_s14 + $0x1ac] ss:$16 sps:$4 sm:$0xff]   ;;  %v23087_v0 = vld [vmem:[%s27350_s14 + $0x1a0] ss:$16 sps:$4 sm:$0xff]  }
  0xaa   : > { %v23088_v1 = vld [vmem:[%s27350_s14 + $0x1a8] ss:$16 sps:$4 sm:$0xff]   ;;  %v23089_v2 = vld [vmem:[%s27350_s14 + $0x1c4] ss:$16 sps:$4 sm:$0xff]   ;;  %v23091_v3 = vld [vmem:[%s27350_s14 + $0x1cc] ss:$16 sps:$4 sm:$0xff]   ;;  %v27438_v9 = vrot.slane %v349_v4, %v27416_v49 }
  0xab   : > { %v364_v58 = vcombine.high %v356_v54, %v356_v54  ;;  %v23093_v5 = vld [vmem:[%s27350_s14 + $0x1c0] ss:$16 sps:$4 sm:$0xff]   ;;  %v23094_v6 = vld [vmem:[%s27350_s14 + $0x1c8] ss:$16 sps:$4 sm:$0xff]   ;;  %v23095_v7 = vld [vmem:[%s27350_s14 + $0x1e4] ss:$16 sps:$4 sm:$0xff]   ;;  %v777_v16 = vpack.c.bf16 %v356_v54, %v356_v54 }
  0xac   : > { %16443 = vmatpush1.bf16.msra.mxu0 %v23039_v22  ;;  %18124 = vmatpush1.bf16.msra.mxu1 %v23040_v23  ;;  %v23097_v8 = vld [vmem:[%s27350_s14 + $0x1ec] ss:$16 sps:$4 sm:$0xff]   ;;  %v23099_v10 = vld [vmem:[%s27350_s14 + $0x1e0] ss:$16 sps:$4 sm:$0xff]   ;;  %v23100_v11 = vld [vmem:[%s27350_s14 + $0x1e8] ss:$16 sps:$4 sm:$0xff]   ;;  %v365_v14 = vcombine.high %v27438_v9, %v27438_v9 }
  0xad   : > { %16444 = vmatprep.subr.bf16.mxu0 %v23041_v24  ;;  %18125 = vmatprep.subr.bf16.mxu1 %v23043_v25  ;;  %v778_v60 = vpack.c.bf16 %v364_v58, %v364_v58  ;;  %v23104_v12 = vld [vmem:[%s27350_s14 + $0x204] ss:$16 sps:$4 sm:$0xff]   ;;  %v23107_v13 = vld [vmem:[%s27350_s14 + $0x20c] ss:$16 sps:$4 sm:$0xff]   ;;  %v23102_v15 = vld [vmem:[%s27350_s14 + $0x200] ss:$16 sps:$4 sm:$0xff]  }
  0xae   : > { %v23105_v17 = vld [vmem:[%s27350_s14 + $0x208] ss:$16 sps:$4 sm:$0xff]   ;;  %v23110_v18 = vld [vmem:[%s27350_s14 + $0x224] ss:$16 sps:$4 sm:$0xff]   ;;  %v23113_v19 = vld [vmem:[%s27350_s14 + $0x22c] ss:$16 sps:$4 sm:$0xff]   ;;  %v780_v20 = vpack.c.bf16 %v365_v14, %v365_v14 }
  0xaf   : > { %16464 = vmatprep.mubr.bf16.mxu0 %v778_v60  ;;  %18145 = vmatprep.mubr.bf16.mxu1 %v778_v60  ;;  %v23108_v21 = vld [vmem:[%s27350_s14 + $0x220] ss:$16 sps:$4 sm:$0xff]   ;;  %v23111_v22 = vld [vmem:[%s27350_s14 + $0x228] ss:$16 sps:$4 sm:$0xff]   ;;  %v23116_v23 = vld [vmem:[%s27350_s14 + $0x244] ss:$16 sps:$4 sm:$0xff]  }
  0xb0   : > { %16445 = vmatpush1.bf16.msra.mxu0 %v23045_v26  ;;  %18126 = vmatpush1.bf16.msra.mxu1 %v23046_v27  ;;  %v23119_v24 = vld [vmem:[%s27350_s14 + $0x24c] ss:$16 sps:$4 sm:$0xff]   ;;  %v23114_v25 = vld [vmem:[%s27350_s14 + $0x240] ss:$16 sps:$4 sm:$0xff]   ;;  %v23117_v26 = vld [vmem:[%s27350_s14 + $0x248] ss:$16 sps:$4 sm:$0xff]  }
  0xb1   : > { %16446 = vmatprep.subr.bf16.mxu0 %v23047_v28  ;;  %18127 = vmatprep.subr.bf16.mxu1 %v23049_v29  ;;  %v23122_v27 = vld [vmem:[%s27350_s14 + $0x264] ss:$16 sps:$4 sm:$0xff]   ;;  %v23125_v28 = vld [vmem:[%s27350_s14 + $0x26c] ss:$16 sps:$4 sm:$0xff]   ;;  %v23120_v29 = vld [vmem:[%s27350_s14 + $0x260] ss:$16 sps:$4 sm:$0xff]  }
  0xb2   : > { %v23137_v36 = vld [vmem:[%s27350_s14 + $0x2ac] ss:$16 sps:$4 sm:$0xff]   ;;  %v23132_v37 = vld [vmem:[%s27350_s14 + $0x2a0] ss:$16 sps:$4 sm:$0xff]   ;;  %v23135_v38 = vld [vmem:[%s27350_s14 + $0x2a8] ss:$16 sps:$4 sm:$0xff]  }
  0xb3   : > { %v23141_v42 = vld [vmem:[%s27350_s14 + $0x2c8] ss:$16 sps:$4 sm:$0xff]   ;;  %v23161_v54 = vld [vmem:[%s27350_s14 + $0x32c] ss:$16 sps:$4 sm:$0xff]   ;;  %v23194_v14 = vld [vmem:[%s27350_s14 + $0x3e4] ss:$16 sps:$4 sm:$0xff]  }
  0xb4   : > { %16447 = vmatpush1.bf16.msra.mxu0 %v23051_v30  ;;  %18128 = vmatpush1.bf16.msra.mxu1 %v23052_v31  ;;  %v23123_v30 = vld [vmem:[%s27350_s14 + $0x268] ss:$16 sps:$4 sm:$0xff]   ;;  %v23128_v31 = vld [vmem:[%s27350_s14 + $0x284] ss:$16 sps:$4 sm:$0xff]   ;;  %v23167_v58 = vld [vmem:[%s27350_s14 + $0x34c] ss:$16 sps:$4 sm:$0xff]  }
  0xb5   : > { %16448 = vmatprep.subr.bf16.mxu0 %v23053_v32  ;;  %18129 = vmatprep.subr.bf16.mxu1 %v23055_v33  ;;  %v23131_v32 = vld [vmem:[%s27350_s14 + $0x28c] ss:$16 sps:$4 sm:$0xff]   ;;  %v23126_v33 = vld [vmem:[%s27350_s14 + $0x280] ss:$16 sps:$4 sm:$0xff]   ;;  %v23153_v52 = vld [vmem:[%s27350_s14 + $0x308] ss:$16 sps:$4 sm:$0xff]  }
  0xb6   : > { %v23165_v60 = vld [vmem:[%s27350_s14 + $0x348] ss:$16 sps:$4 sm:$0xff]   ;;  %s27032_s24 = scalar_lea.vmem %s30353_s23, 128  ;;  %p30428_p8 = scmp.ne.s32.totalorder %s30417_s29, 0 }
  0xb7   : > { %v23177_v4 = vld [vmem:[%s27350_s14 + $0x388] ss:$16 sps:$4 sm:$0xff]   ;;  %p27033_p3 = scmp.ne.s32.totalorder %s30353_s23, %s27032_s24  ;;  %s27117_s8 = smov [#allocation10]  }
  0xb8   : > { %16449 = vmatpush1.bf16.msra.mxu0 %v23057_v34  ;;  %18130 = vmatpush1.bf16.msra.mxu1 %v23058_v35  ;;  %v23129_v34 = vld [vmem:[%s27350_s14 + $0x288] ss:$16 sps:$4 sm:$0xff]   ;;  %v23134_v35 = vld [vmem:[%s27350_s14 + $0x2a4] ss:$16 sps:$4 sm:$0xff]   ;;  %s27036_s1 = sshll.u32 %s27117_s8, 4  ;;  %s27037_s1 = int_to_ptr.vmem [resolvable:$false] %s27036_s1 }
  0xb9   : > { %16450 = vmatprep.subr.bf16.mxu0 %v23059_v39  ;;  %18131 = vmatprep.subr.bf16.mxu1 %v23061_v40  ;;  %v23140_v39 = vld [vmem:[%s27350_s14 + $0x2c4] ss:$16 sps:$4 sm:$0xff]   ;;  %v23143_v40 = vld [vmem:[%s27350_s14 + $0x2cc] ss:$16 sps:$4 sm:$0xff]   ;;  %p27034_p11 = pnand %p27033_p3, %p30428_p8  ;;  %s27038_s27 = scalar_lea.vmem %s27037_s1, 256 }
  0xba   : > { %p27039_p6 = scmp.lt.s32.totalorder %s30353_s23, %s27037_s1  ;;  %p27040_p5 = scmp.lt.s32.totalorder %s27038_s27, %s27032_s24 }
  0xbb   : > { %p27035_p12 = pneg %p27034_p11 }
  0xbc   : > { %16451 = vmatpush1.bf16.msra.mxu0 %v23063_v41  ;;  %18132 = vmatpush1.bf16.msra.mxu1 %v23064_v44  ;;  %v23138_v41 = vld [vmem:[%s27350_s14 + $0x2c0] ss:$16 sps:$4 sm:$0xff]   ;;  %v23146_v44 = vld [vmem:[%s27350_s14 + $0x2e4] ss:$16 sps:$4 sm:$0xff]   ;;  %p27041_p7 = por %p27040_p5, %p27039_p6 }
  0xbd   : > { %16452 = vmatprep.subr.bf16.mxu0 %v23065_v45  ;;  %18133 = vmatprep.subr.bf16.mxu1 %v23067_v46  ;;  %v23149_v45 = vld [vmem:[%s27350_s14 + $0x2ec] ss:$16 sps:$4 sm:$0xff]   ;;  %v23144_v46 = vld [vmem:[%s27350_s14 + $0x2e0] ss:$16 sps:$4 sm:$0xff]  }
  0xbe   : > { %p27042_p2 = pnand %p27041_p7, %p27035_p12 }
  0xc0   : > { %16453 = vmatpush1.bf16.msra.mxu0 %v23069_v47  ;;  %18134 = vmatpush1.bf16.msra.mxu1 %v23070_v48  ;;  %v23147_v47 = vld [vmem:[%s27350_s14 + $0x2e8] ss:$16 sps:$4 sm:$0xff]   ;;  %v23152_v48 = vld [vmem:[%s27350_s14 + $0x304] ss:$16 sps:$4 sm:$0xff]  }
  0xc1   : > { %16454 = vmatprep.subr.bf16.mxu0 %v23071_v50  ;;  %18135 = vmatprep.subr.bf16.mxu1 %v23073_v51  ;;  %v23155_v50 = vld [vmem:[%s27350_s14 + $0x30c] ss:$16 sps:$4 sm:$0xff]   ;;  %v23150_v51 = vld [vmem:[%s27350_s14 + $0x300] ss:$16 sps:$4 sm:$0xff]  }
  0xc4   : > { %16455 = vmatpush1.bf16.msra.mxu0 %v23075_v53  ;;  %18136 = vmatpush1.bf16.msra.mxu1 %v23076_v55  ;;  %v23158_v53 = vld [vmem:[%s27350_s14 + $0x324] ss:$16 sps:$4 sm:$0xff]   ;;  %v23156_v55 = vld [vmem:[%s27350_s14 + $0x320] ss:$16 sps:$4 sm:$0xff]  }
  0xc5   : > { %16456 = vmatprep.subr.bf16.mxu0 %v23077_v56  ;;  %18137 = vmatprep.subr.bf16.mxu1 %v23079_v57  ;;  %v23159_v56 = vld [vmem:[%s27350_s14 + $0x328] ss:$16 sps:$4 sm:$0xff]   ;;  %v23164_v57 = vld [vmem:[%s27350_s14 + $0x344] ss:$16 sps:$4 sm:$0xff]  }
  0xc8   : > { %16457 = vmatpush1.bf16.msra.mxu0 %v23081_v59  ;;  %18138 = vmatpush1.bf16.msra.mxu1 %v23082_v61  ;;  %v23162_v59 = vld [vmem:[%s27350_s14 + $0x340] ss:$16 sps:$4 sm:$0xff]   ;;  %v23170_v61 = vld [vmem:[%s27350_s14 + $0x364] ss:$16 sps:$4 sm:$0xff]  }
  0xc9   : > { %16458 = vmatprep.subr.bf16.mxu0 %v23083_v62  ;;  %18139 = vmatprep.subr.bf16.mxu1 %v23085_v63  ;;  %v23173_v62 = vld [vmem:[%s27350_s14 + $0x36c] ss:$16 sps:$4 sm:$0xff]   ;;  %v23168_v63 = vld [vmem:[%s27350_s14 + $0x360] ss:$16 sps:$4 sm:$0xff]  }
  0xcc   : > { %16459 = vmatpush1.bf16.msra.mxu0 %v23087_v0  ;;  %18140 = vmatpush1.bf16.msra.mxu1 %v23088_v1  ;;  %v23171_v0 = vld [vmem:[%s27350_s14 + $0x368] ss:$16 sps:$4 sm:$0xff]   ;;  %v23176_v1 = vld [vmem:[%s27350_s14 + $0x384] ss:$16 sps:$4 sm:$0xff]  }
  0xcd   : > { %16460 = vmatprep.subr.bf16.mxu0 %v23089_v2  ;;  %18141 = vmatprep.subr.bf16.mxu1 %v23091_v3  ;;  %v23179_v2 = vld [vmem:[%s27350_s14 + $0x38c] ss:$16 sps:$4 sm:$0xff]   ;;  %v23174_v3 = vld [vmem:[%s27350_s14 + $0x380] ss:$16 sps:$4 sm:$0xff]  }
  0xd0   : > { %16461 = vmatpush1.bf16.msra.mxu0 %v23093_v5  ;;  %18142 = vmatpush1.bf16.msra.mxu1 %v23094_v6  ;;  %v23182_v5 = vld [vmem:[%s27350_s14 + $0x3a4] ss:$16 sps:$4 sm:$0xff]   ;;  %v23185_v6 = vld [vmem:[%s27350_s14 + $0x3ac] ss:$16 sps:$4 sm:$0xff]  }
  0xd1   : > { %16462 = vmatprep.subr.bf16.mxu0 %v23095_v7  ;;  %18143 = vmatprep.subr.bf16.mxu1 %v23097_v8  ;;  %v23180_v7 = vld [vmem:[%s27350_s14 + $0x3a0] ss:$16 sps:$4 sm:$0xff]   ;;  %v23183_v8 = vld [vmem:[%s27350_s14 + $0x3a8] ss:$16 sps:$4 sm:$0xff]  }
  0xd4   : > { %16463 = vmatpush1.bf16.msra.mxu0 %v23099_v10  ;;  %18144 = vmatpush1.bf16.msra.mxu1 %v23100_v11  ;;  %v23188_v10 = vld [vmem:[%s27350_s14 + $0x3c4] ss:$16 sps:$4 sm:$0xff]   ;;  %v23191_v11 = vld [vmem:[%s27350_s14 + $0x3cc] ss:$16 sps:$4 sm:$0xff]  }
  0xd5   : > { %16473 = vmatprep.subr.bf16.mxu0 %v23104_v12  ;;  %18154 = vmatprep.subr.bf16.mxu1 %v23107_v13  ;;  %v23186_v12 = vld [vmem:[%s27350_s14 + $0x3c0] ss:$16 sps:$4 sm:$0xff]   ;;  %v23189_v13 = vld [vmem:[%s27350_s14 + $0x3c8] ss:$16 sps:$4 sm:$0xff]  }
  0xd7   : > { %16465 = vmatmul.mubr.bf16.vlgmr.msra.gmra.mrb[0].mxu0 %v777_v16  ;;  %18146 = vmatmul.mubr.bf16.vlgmr.msra.gmra.mrb[0].mxu1 %v777_v16  ;;  %v23192_v16 = vld [vmem:[%s27350_s14 + $0x3e0] ss:$16 sps:$4 sm:$0xff]  }
  0xd8   : > { %16474 = vmatpush1.bf16.msra.mxu0 %v23102_v15  ;;  %18155 = vmatpush1.bf16.msra.mxu1 %v23105_v17  ;;  %v23197_v15 = vld [vmem:[%s27350_s14 + $0x3ec] ss:$16 sps:$4 sm:$0xff]   ;;  %v23195_v17 = vld [vmem:[%s27350_s14 + $0x3e8] ss:$16 sps:$4 sm:$0xff]  }
  0xd9   : > { %16475 = vmatprep.subr.bf16.mxu0 %v23110_v18  ;;  %18156 = vmatprep.subr.bf16.mxu1 %v23113_v19  ;;  %v23200_v18 = vld [vmem:[%s27350_s14 + $0x404] ss:$16 sps:$4 sm:$0xff]   ;;  %v23203_v19 = vld [vmem:[%s27350_s14 + $0x40c] ss:$16 sps:$4 sm:$0xff]  }
  0xda   : > { %16505 = vmatprep.mubr.bf16.mxu0 %v780_v20  ;;  %18186 = vmatprep.mubr.bf16.mxu1 %v780_v20  ;;  %v23198_v20 = vld [vmem:[%s27350_s14 + $0x400] ss:$16 sps:$4 sm:$0xff]  }
  0xdc   : > { %16476 = vmatpush1.bf16.msra.mxu0 %v23108_v21  ;;  %18157 = vmatpush1.bf16.msra.mxu1 %v23111_v22  ;;  %v779_v21 = vpack.c.bf16 %v27438_v9, %v27438_v9  ;;  %v23201_v22 = vld [vmem:[%s27350_s14 + $0x408] ss:$16 sps:$4 sm:$0xff]  }
  0xdd   : > { %16477 = vmatprep.subr.bf16.mxu0 %v23116_v23  ;;  %18158 = vmatprep.subr.bf16.mxu1 %v23119_v24  ;;  %v27514_v23 = vld [vmem:[#allocation2 + $0x8] sm:$0xff] }
  0xde   : > { %v23206_v24 = vld [vmem:[%s27350_s14 + $0x424] ss:$16 sps:$4 sm:$0xff]  }
  0xe0   : > { %16478 = vmatpush1.bf16.msra.mxu0 %v23114_v25  ;;  %18159 = vmatpush1.bf16.msra.mxu1 %v23117_v26  ;;  %v23209_v25 = vld [vmem:[%s27350_s14 + $0x42c] ss:$16 sps:$4 sm:$0xff]   ;;  %v27520_v26 = vrot.slane %v27514_v23, %v27416_v49 }
  0xe1   : > { %16479 = vmatprep.subr.bf16.mxu0 %v23122_v27  ;;  %18160 = vmatprep.subr.bf16.mxu1 %v23125_v28  ;;  %v23204_v27 = vld [vmem:[%s27350_s14 + $0x420] ss:$16 sps:$4 sm:$0xff]   ;;  %v23207_v28 = vld [vmem:[%s27350_s14 + $0x428] ss:$16 sps:$4 sm:$0xff]  }
  0xe2   : > { %v381_v9 = vcombine.high %v27520_v26, %v27520_v26 }
  0xe4   : > { %16480 = vmatpush1.bf16.msra.mxu0 %v23120_v29  ;;  %18161 = vmatpush1.bf16.msra.mxu1 %v23123_v30  ;;  %v23212_v29 = vld [vmem:[%s27350_s14 + $0x444] ss:$16 sps:$4 sm:$0xff]   ;;  %v23215_v30 = vld [vmem:[%s27350_s14 + $0x44c] ss:$16 sps:$4 sm:$0xff]  }
  0xe5   : > { %16481 = vmatprep.subr.bf16.mxu0 %v23128_v31  ;;  %18162 = vmatprep.subr.bf16.mxu1 %v23131_v32  ;;  %v782_v31 = vpack.c.bf16 %v381_v9, %v381_v9  ;;  %v23210_v32 = vld [vmem:[%s27350_s14 + $0x440] ss:$16 sps:$4 sm:$0xff]   ;;  %v23291_v9 = vld [vmem:[%s27350_s14 + $0x5e8] ss:$16 sps:$4 sm:$0xff]  }
  0xe8   : > { %16482 = vmatpush1.bf16.msra.mxu0 %v23126_v33  ;;  %18163 = vmatpush1.bf16.msra.mxu1 %v23129_v34  ;;  %v23213_v33 = vld [vmem:[%s27350_s14 + $0x448] ss:$16 sps:$4 sm:$0xff]   ;;  %v23218_v34 = vld [vmem:[%s27350_s14 + $0x464] ss:$16 sps:$4 sm:$0xff]  }
  0xe9   : > { %16483 = vmatprep.subr.bf16.mxu0 %v23134_v35  ;;  %18164 = vmatprep.subr.bf16.mxu1 %v23137_v36  ;;  %v23221_v35 = vld [vmem:[%s27350_s14 + $0x46c] ss:$16 sps:$4 sm:$0xff]   ;;  %v23216_v36 = vld [vmem:[%s27350_s14 + $0x460] ss:$16 sps:$4 sm:$0xff]  }
  0xec   : > { %16484 = vmatpush1.bf16.msra.mxu0 %v23132_v37  ;;  %18165 = vmatpush1.bf16.msra.mxu1 %v23135_v38  ;;  %v23219_v37 = vld [vmem:[%s27350_s14 + $0x468] ss:$16 sps:$4 sm:$0xff]   ;;  %v23224_v38 = vld [vmem:[%s27350_s14 + $0x484] ss:$16 sps:$4 sm:$0xff]  }
  0xed   : > { %16485 = vmatprep.subr.bf16.mxu0 %v23140_v39  ;;  %18166 = vmatprep.subr.bf16.mxu1 %v23143_v40  ;;  %v23227_v39 = vld [vmem:[%s27350_s14 + $0x48c] ss:$16 sps:$4 sm:$0xff]   ;;  %v23222_v40 = vld [vmem:[%s27350_s14 + $0x480] ss:$16 sps:$4 sm:$0xff]  }
  0xf0   : > { %16486 = vmatpush1.bf16.msra.mxu0 %v23138_v41  ;;  %18167 = vmatpush1.bf16.msra.mxu1 %v23141_v42  ;;  %v23225_v41 = vld [vmem:[%s27350_s14 + $0x488] ss:$16 sps:$4 sm:$0xff]   ;;  %v23230_v42 = vld [vmem:[%s27350_s14 + $0x4a4] ss:$16 sps:$4 sm:$0xff]  }
  0xf1   : > { %16487 = vmatprep.subr.bf16.mxu0 %v23146_v44  ;;  %18168 = vmatprep.subr.bf16.mxu1 %v23149_v45  ;;  %v23233_v44 = vld [vmem:[%s27350_s14 + $0x4ac] ss:$16 sps:$4 sm:$0xff]   ;;  %v23228_v45 = vld [vmem:[%s27350_s14 + $0x4a0] ss:$16 sps:$4 sm:$0xff]  }
  0xf4   : > { %16488 = vmatpush1.bf16.msra.mxu0 %v23144_v46  ;;  %18169 = vmatpush1.bf16.msra.mxu1 %v23147_v47  ;;  %v23231_v46 = vld [vmem:[%s27350_s14 + $0x4a8] ss:$16 sps:$4 sm:$0xff]   ;;  %v23236_v47 = vld [vmem:[%s27350_s14 + $0x4c4] ss:$16 sps:$4 sm:$0xff]  }
  0xf5   : > { %16489 = vmatprep.subr.bf16.mxu0 %v23152_v48  ;;  %18170 = vmatprep.subr.bf16.mxu1 %v23155_v50  ;;  %v23239_v48 = vld [vmem:[%s27350_s14 + $0x4cc] ss:$16 sps:$4 sm:$0xff]   ;;  %v23234_v50 = vld [vmem:[%s27350_s14 + $0x4c0] ss:$16 sps:$4 sm:$0xff]  }
  0xf8   : > { %16490 = vmatpush1.bf16.msra.mxu0 %v23150_v51  ;;  %18171 = vmatpush1.bf16.msra.mxu1 %v23153_v52  ;;  %v23237_v51 = vld [vmem:[%s27350_s14 + $0x4c8] ss:$16 sps:$4 sm:$0xff]   ;;  %v23242_v52 = vld [vmem:[%s27350_s14 + $0x4e4] ss:$16 sps:$4 sm:$0xff]  }
  0xf9   : > { %16491 = vmatprep.subr.bf16.mxu0 %v23158_v53  ;;  %18172 = vmatprep.subr.bf16.mxu1 %v23161_v54  ;;  %v23245_v53 = vld [vmem:[%s27350_s14 + $0x4ec] ss:$16 sps:$4 sm:$0xff]   ;;  %v23240_v54 = vld [vmem:[%s27350_s14 + $0x4e0] ss:$16 sps:$4 sm:$0xff]  }
  0xfc   : > { %16492 = vmatpush1.bf16.msra.mxu0 %v23156_v55  ;;  %18173 = vmatpush1.bf16.msra.mxu1 %v23159_v56  ;;  %v23243_v55 = vld [vmem:[%s27350_s14 + $0x4e8] ss:$16 sps:$4 sm:$0xff]   ;;  %v23248_v56 = vld [vmem:[%s27350_s14 + $0x504] ss:$16 sps:$4 sm:$0xff]  }
  0xfd   : > { %16493 = vmatprep.subr.bf16.mxu0 %v23164_v57  ;;  %18174 = vmatprep.subr.bf16.mxu1 %v23167_v58  ;;  %v23251_v57 = vld [vmem:[%s27350_s14 + $0x50c] ss:$16 sps:$4 sm:$0xff]   ;;  %v23246_v58 = vld [vmem:[%s27350_s14 + $0x500] ss:$16 sps:$4 sm:$0xff]  }
 0x100   : > { %16494 = vmatpush1.bf16.msra.mxu0 %v23162_v59  ;;  %18175 = vmatpush1.bf16.msra.mxu1 %v23165_v60  ;;  %v23249_v59 = vld [vmem:[%s27350_s14 + $0x508] ss:$16 sps:$4 sm:$0xff]   ;;  %v23254_v60 = vld [vmem:[%s27350_s14 + $0x524] ss:$16 sps:$4 sm:$0xff]  }
 0x101   : > { %16495 = vmatprep.subr.bf16.mxu0 %v23170_v61  ;;  %18176 = vmatprep.subr.bf16.mxu1 %v23173_v62  ;;  %v23257_v61 = vld [vmem:[%s27350_s14 + $0x52c] ss:$16 sps:$4 sm:$0xff]   ;;  %v23252_v62 = vld [vmem:[%s27350_s14 + $0x520] ss:$16 sps:$4 sm:$0xff]  }
 0x104   : > { %16496 = vmatpush1.bf16.msra.mxu0 %v23168_v63  ;;  %18177 = vmatpush1.bf16.msra.mxu1 %v23171_v0  ;;  %v23255_v63 = vld [vmem:[%s27350_s14 + $0x528] ss:$16 sps:$4 sm:$0xff]   ;;  %v23260_v0 = vld [vmem:[%s27350_s14 + $0x544] ss:$16 sps:$4 sm:$0xff]  }
 0x105   : > { %16497 = vmatprep.subr.bf16.mxu0 %v23176_v1  ;;  %18178 = vmatprep.subr.bf16.mxu1 %v23179_v2  ;;  %v23263_v1 = vld [vmem:[%s27350_s14 + $0x54c] ss:$16 sps:$4 sm:$0xff]   ;;  %v23258_v2 = vld [vmem:[%s27350_s14 + $0x540] ss:$16 sps:$4 sm:$0xff]  }
 0x108   : > { %16498 = vmatpush1.bf16.msra.mxu0 %v23174_v3  ;;  %18179 = vmatpush1.bf16.msra.mxu1 %v23177_v4  ;;  %v23261_v3 = vld [vmem:[%s27350_s14 + $0x548] ss:$16 sps:$4 sm:$0xff]   ;;  %v23266_v4 = vld [vmem:[%s27350_s14 + $0x564] ss:$16 sps:$4 sm:$0xff]  }
 0x109   : > { %16499 = vmatprep.subr.bf16.mxu0 %v23182_v5  ;;  %18180 = vmatprep.subr.bf16.mxu1 %v23185_v6  ;;  %v23269_v5 = vld [vmem:[%s27350_s14 + $0x56c] ss:$16 sps:$4 sm:$0xff]   ;;  %v23264_v6 = vld [vmem:[%s27350_s14 + $0x560] ss:$16 sps:$4 sm:$0xff]  }
 0x10c   : > { %16500 = vmatpush1.bf16.msra.mxu0 %v23180_v7  ;;  %18181 = vmatpush1.bf16.msra.mxu1 %v23183_v8  ;;  %v23267_v7 = vld [vmem:[%s27350_s14 + $0x568] ss:$16 sps:$4 sm:$0xff]   ;;  %v23272_v8 = vld [vmem:[%s27350_s14 + $0x584] ss:$16 sps:$4 sm:$0xff]  }
 0x10d   : > { %16501 = vmatprep.subr.bf16.mxu0 %v23188_v10  ;;  %18182 = vmatprep.subr.bf16.mxu1 %v23191_v11  ;;  %v23275_v10 = vld [vmem:[%s27350_s14 + $0x58c] ss:$16 sps:$4 sm:$0xff]   ;;  %v23270_v11 = vld [vmem:[%s27350_s14 + $0x580] ss:$16 sps:$4 sm:$0xff]  }
 0x110   : > { %16502 = vmatpush1.bf16.msra.mxu0 %v23186_v12  ;;  %18183 = vmatpush1.bf16.msra.mxu1 %v23189_v13  ;;  %v23273_v12 = vld [vmem:[%s27350_s14 + $0x588] ss:$16 sps:$4 sm:$0xff]   ;;  %v23278_v13 = vld [vmem:[%s27350_s14 + $0x5a4] ss:$16 sps:$4 sm:$0xff]  }
 0x111   : > { %16503 = vmatprep.subr.bf16.mxu0 %v23194_v14  ;;  %18184 = vmatprep.subr.bf16.mxu1 %v23197_v15  ;;  %v23281_v14 = vld [vmem:[%s27350_s14 + $0x5ac] ss:$16 sps:$4 sm:$0xff]   ;;  %v23276_v15 = vld [vmem:[%s27350_s14 + $0x5a0] ss:$16 sps:$4 sm:$0xff]  }
 0x114   : > { %16504 = vmatpush1.bf16.msra.mxu0 %v23192_v16  ;;  %18185 = vmatpush1.bf16.msra.mxu1 %v23195_v17  ;;  %v23279_v16 = vld [vmem:[%s27350_s14 + $0x5a8] ss:$16 sps:$4 sm:$0xff]   ;;  %v23284_v17 = vld [vmem:[%s27350_s14 + $0x5c4] ss:$16 sps:$4 sm:$0xff]  }
 0x115   : > { %16514 = vmatprep.subr.bf16.mxu0 %v23200_v18  ;;  %18195 = vmatprep.subr.bf16.mxu1 %v23203_v19  ;;  %v23287_v18 = vld [vmem:[%s27350_s14 + $0x5cc] ss:$16 sps:$4 sm:$0xff]   ;;  %v366_v19 = vcombine.high %v27514_v23, %v27514_v23  ;;  %v23288_v23 = vld [vmem:[%s27350_s14 + $0x5e0] ss:$16 sps:$4 sm:$0xff]  }
 0x117   : > { %16506 = vmatmul.mubr.bf16.vlgmr.msra.gmra.mrb[0].mxu0 %v779_v21  ;;  %18187 = vmatmul.mubr.bf16.vlgmr.msra.gmra.mrb[0].mxu1 %v779_v21  ;;  %v23285_v21 = vld [vmem:[%s27350_s14 + $0x5c8] ss:$16 sps:$4 sm:$0xff]  }
 0x118   : > { %16515 = vmatpush1.bf16.msra.mxu0 %v23198_v20  ;;  %18196 = vmatpush1.bf16.msra.mxu1 %v23201_v22  ;;  %v23282_v20 = vld [vmem:[%s27350_s14 + $0x5c0] ss:$16 sps:$4 sm:$0xff]   ;;  %v23290_v22 = vld [vmem:[%s27350_s14 + $0x5e4] ss:$16 sps:$4 sm:$0xff]  }
 0x119   : > { %16516 = vmatprep.subr.bf16.mxu0 %v23206_v24  ;;  %18197 = vmatprep.subr.bf16.mxu1 %v23209_v25  ;;  %v23293_v24 = vld [vmem:[%s27350_s14 + $0x5ec] ss:$16 sps:$4 sm:$0xff]   ;;  %v27583_v25 = vrot.slane %v366_v19, %v27416_v49  ;;  %v23369_v19 = vld [vmem:[%s27350_s14 + $0x788] ss:$16 sps:$4 sm:$0xff]  }
 0x11a   : > { %16546 = vmatprep.mubr.bf16.mxu0 %v782_v31  ;;  %18227 = vmatprep.mubr.bf16.mxu1 %v782_v31  ;;  %v23294_v31 = vld [vmem:[%s27350_s14 + $0x600] ss:$16 sps:$4 sm:$0xff]  }
 0x11c   : > { %16517 = vmatpush1.bf16.msra.mxu0 %v23204_v27  ;;  %18198 = vmatpush1.bf16.msra.mxu1 %v23207_v28  ;;  %v23296_v27 = vld [vmem:[%s27350_s14 + $0x604] ss:$16 sps:$4 sm:$0xff]   ;;  %v23299_v28 = vld [vmem:[%s27350_s14 + $0x60c] ss:$16 sps:$4 sm:$0xff]  }
 0x11d   : > { %16518 = vmatprep.subr.bf16.mxu0 %v23212_v29  ;;  %18199 = vmatprep.subr.bf16.mxu1 %v23215_v30  ;;  %v382_v29 = vcombine.high %v27583_v25, %v27583_v25  ;;  %v781_v30 = vpack.c.bf16 %v27520_v26, %v27520_v26  ;;  %v23300_v26 = vld [vmem:[%s27350_s14 + $0x620] ss:$16 sps:$4 sm:$0xff]  }
 0x120   : > { %16519 = vmatpush1.bf16.msra.mxu0 %v23210_v32  ;;  %18200 = vmatpush1.bf16.msra.mxu1 %v23213_v33  ;;  %v23297_v32 = vld [vmem:[%s27350_s14 + $0x608] ss:$16 sps:$4 sm:$0xff]   ;;  %v23302_v33 = vld [vmem:[%s27350_s14 + $0x624] ss:$16 sps:$4 sm:$0xff]  }
 0x121   : > { %16520 = vmatprep.subr.bf16.mxu0 %v23218_v34  ;;  %18201 = vmatprep.subr.bf16.mxu1 %v23221_v35  ;;  %v23305_v34 = vld [vmem:[%s27350_s14 + $0x62c] ss:$16 sps:$4 sm:$0xff]   ;;  %v784_v35 = vpack.c.bf16 %v382_v29, %v382_v29  ;;  %v23381_v29 = vld [vmem:[%s27350_s14 + $0x7c8] ss:$16 sps:$4 sm:$0xff]  }
 0x124   : > { %16521 = vmatpush1.bf16.msra.mxu0 %v23216_v36  ;;  %18202 = vmatpush1.bf16.msra.mxu1 %v23219_v37  ;;  %v23303_v36 = vld [vmem:[%s27350_s14 + $0x628] ss:$16 sps:$4 sm:$0xff]   ;;  %v23308_v37 = vld [vmem:[%s27350_s14 + $0x644] ss:$16 sps:$4 sm:$0xff]  }
 0x125   : > { %16522 = vmatprep.subr.bf16.mxu0 %v23224_v38  ;;  %18203 = vmatprep.subr.bf16.mxu1 %v23227_v39  ;;  %v23311_v38 = vld [vmem:[%s27350_s14 + $0x64c] ss:$16 sps:$4 sm:$0xff]   ;;  %v23306_v39 = vld [vmem:[%s27350_s14 + $0x640] ss:$16 sps:$4 sm:$0xff]  }
 0x128   : > { %16523 = vmatpush1.bf16.msra.mxu0 %v23222_v40  ;;  %18204 = vmatpush1.bf16.msra.mxu1 %v23225_v41  ;;  %v23309_v40 = vld [vmem:[%s27350_s14 + $0x648] ss:$16 sps:$4 sm:$0xff]   ;;  %v23314_v41 = vld [vmem:[%s27350_s14 + $0x664] ss:$16 sps:$4 sm:$0xff]  }
 0x129   : > { %16524 = vmatprep.subr.bf16.mxu0 %v23230_v42  ;;  %18205 = vmatprep.subr.bf16.mxu1 %v23233_v44  ;;  %v23317_v42 = vld [vmem:[%s27350_s14 + $0x66c] ss:$16 sps:$4 sm:$0xff]   ;;  %v23312_v44 = vld [vmem:[%s27350_s14 + $0x660] ss:$16 sps:$4 sm:$0xff]  }
 0x12c   : > { %16525 = vmatpush1.bf16.msra.mxu0 %v23228_v45  ;;  %18206 = vmatpush1.bf16.msra.mxu1 %v23231_v46  ;;  %v23315_v45 = vld [vmem:[%s27350_s14 + $0x668] ss:$16 sps:$4 sm:$0xff]   ;;  %v23320_v46 = vld [vmem:[%s27350_s14 + $0x684] ss:$16 sps:$4 sm:$0xff]  }
 0x12d   : > { %16526 = vmatprep.subr.bf16.mxu0 %v23236_v47  ;;  %18207 = vmatprep.subr.bf16.mxu1 %v23239_v48  ;;  %v23323_v47 = vld [vmem:[%s27350_s14 + $0x68c] ss:$16 sps:$4 sm:$0xff]   ;;  %v23318_v48 = vld [vmem:[%s27350_s14 + $0x680] ss:$16 sps:$4 sm:$0xff]  }
 0x130   : > { %16527 = vmatpush1.bf16.msra.mxu0 %v23234_v50  ;;  %18208 = vmatpush1.bf16.msra.mxu1 %v23237_v51  ;;  %v23321_v50 = vld [vmem:[%s27350_s14 + $0x688] ss:$16 sps:$4 sm:$0xff]   ;;  %v23326_v51 = vld [vmem:[%s27350_s14 + $0x6a4] ss:$16 sps:$4 sm:$0xff]  }
 0x131   : > { %16528 = vmatprep.subr.bf16.mxu0 %v23242_v52  ;;  %18209 = vmatprep.subr.bf16.mxu1 %v23245_v53  ;;  %v23329_v52 = vld [vmem:[%s27350_s14 + $0x6ac] ss:$16 sps:$4 sm:$0xff]   ;;  %v23324_v53 = vld [vmem:[%s27350_s14 + $0x6a0] ss:$16 sps:$4 sm:$0xff]  }
 0x134   : > { %16529 = vmatpush1.bf16.msra.mxu0 %v23240_v54  ;;  %18210 = vmatpush1.bf16.msra.mxu1 %v23243_v55  ;;  %v23327_v54 = vld [vmem:[%s27350_s14 + $0x6a8] ss:$16 sps:$4 sm:$0xff]   ;;  %v23332_v55 = vld [vmem:[%s27350_s14 + $0x6c4] ss:$16 sps:$4 sm:$0xff]  }
 0x135   : > { %16530 = vmatprep.subr.bf16.mxu0 %v23248_v56  ;;  %18211 = vmatprep.subr.bf16.mxu1 %v23251_v57  ;;  %v23335_v56 = vld [vmem:[%s27350_s14 + $0x6cc] ss:$16 sps:$4 sm:$0xff]   ;;  %v23330_v57 = vld [vmem:[%s27350_s14 + $0x6c0] ss:$16 sps:$4 sm:$0xff]  }
 0x138   : > { %16531 = vmatpush1.bf16.msra.mxu0 %v23246_v58  ;;  %18212 = vmatpush1.bf16.msra.mxu1 %v23249_v59  ;;  %v23333_v58 = vld [vmem:[%s27350_s14 + $0x6c8] ss:$16 sps:$4 sm:$0xff]   ;;  %v23338_v59 = vld [vmem:[%s27350_s14 + $0x6e4] ss:$16 sps:$4 sm:$0xff]  }
 0x139   : > { %16532 = vmatprep.subr.bf16.mxu0 %v23254_v60  ;;  %18213 = vmatprep.subr.bf16.mxu1 %v23257_v61  ;;  %v23341_v60 = vld [vmem:[%s27350_s14 + $0x6ec] ss:$16 sps:$4 sm:$0xff]   ;;  %v23336_v61 = vld [vmem:[%s27350_s14 + $0x6e0] ss:$16 sps:$4 sm:$0xff]  }
 0x13c   : > { %16533 = vmatpush1.bf16.msra.mxu0 %v23252_v62  ;;  %18214 = vmatpush1.bf16.msra.mxu1 %v23255_v63  ;;  %v23339_v62 = vld [vmem:[%s27350_s14 + $0x6e8] ss:$16 sps:$4 sm:$0xff]   ;;  %v23344_v63 = vld [vmem:[%s27350_s14 + $0x704] ss:$16 sps:$4 sm:$0xff]  }
 0x13d   : > { %16534 = vmatprep.subr.bf16.mxu0 %v23260_v0  ;;  %18215 = vmatprep.subr.bf16.mxu1 %v23263_v1  ;;  %v23347_v0 = vld [vmem:[%s27350_s14 + $0x70c] ss:$16 sps:$4 sm:$0xff]   ;;  %v23342_v1 = vld [vmem:[%s27350_s14 + $0x700] ss:$16 sps:$4 sm:$0xff]  }
 0x140   : > { %16535 = vmatpush1.bf16.msra.mxu0 %v23258_v2  ;;  %18216 = vmatpush1.bf16.msra.mxu1 %v23261_v3  ;;  %v23345_v2 = vld [vmem:[%s27350_s14 + $0x708] ss:$16 sps:$4 sm:$0xff]   ;;  %v23350_v3 = vld [vmem:[%s27350_s14 + $0x724] ss:$16 sps:$4 sm:$0xff]  }
 0x141   : > { %16536 = vmatprep.subr.bf16.mxu0 %v23266_v4  ;;  %18217 = vmatprep.subr.bf16.mxu1 %v23269_v5  ;;  %v23353_v4 = vld [vmem:[%s27350_s14 + $0x72c] ss:$16 sps:$4 sm:$0xff]   ;;  %v23348_v5 = vld [vmem:[%s27350_s14 + $0x720] ss:$16 sps:$4 sm:$0xff]  }
 0x144   : > { %16537 = vmatpush1.bf16.msra.mxu0 %v23264_v6  ;;  %18218 = vmatpush1.bf16.msra.mxu1 %v23267_v7  ;;  %v23351_v6 = vld [vmem:[%s27350_s14 + $0x728] ss:$16 sps:$4 sm:$0xff]   ;;  %v23356_v7 = vld [vmem:[%s27350_s14 + $0x744] ss:$16 sps:$4 sm:$0xff]  }
 0x145   : > { %16538 = vmatprep.subr.bf16.mxu0 %v23272_v8  ;;  %18219 = vmatprep.subr.bf16.mxu1 %v23275_v10  ;;  %v23359_v8 = vld [vmem:[%s27350_s14 + $0x74c] ss:$16 sps:$4 sm:$0xff]   ;;  %v23354_v10 = vld [vmem:[%s27350_s14 + $0x740] ss:$16 sps:$4 sm:$0xff]  }
 0x148   : > { %16539 = vmatpush1.bf16.msra.mxu0 %v23270_v11  ;;  %18220 = vmatpush1.bf16.msra.mxu1 %v23273_v12  ;;  %v23357_v11 = vld [vmem:[%s27350_s14 + $0x748] ss:$16 sps:$4 sm:$0xff]   ;;  %v23362_v12 = vld [vmem:[%s27350_s14 + $0x764] ss:$16 sps:$4 sm:$0xff]  }
 0x149   : > { %16540 = vmatprep.subr.bf16.mxu0 %v23278_v13  ;;  %18221 = vmatprep.subr.bf16.mxu1 %v23281_v14  ;;  %v23365_v13 = vld [vmem:[%s27350_s14 + $0x76c] ss:$16 sps:$4 sm:$0xff]   ;;  %v23360_v14 = vld [vmem:[%s27350_s14 + $0x760] ss:$16 sps:$4 sm:$0xff]  }
 0x14c   : > { %16541 = vmatpush1.bf16.msra.mxu0 %v23276_v15  ;;  %18222 = vmatpush1.bf16.msra.mxu1 %v23279_v16  ;;  %v23363_v15 = vld [vmem:[%s27350_s14 + $0x768] ss:$16 sps:$4 sm:$0xff]   ;;  %v23368_v16 = vld [vmem:[%s27350_s14 + $0x784] ss:$16 sps:$4 sm:$0xff]  }
 0x14d   : > { %16542 = vmatprep.subr.bf16.mxu0 %v23284_v17  ;;  %18223 = vmatprep.subr.bf16.mxu1 %v23287_v18  ;;  %v23371_v17 = vld [vmem:[%s27350_s14 + $0x78c] ss:$16 sps:$4 sm:$0xff]   ;;  %v23366_v18 = vld [vmem:[%s27350_s14 + $0x780] ss:$16 sps:$4 sm:$0xff]  }
 0x150   : > { %16543 = vmatpush1.bf16.msra.mxu0 %v23282_v20  ;;  %18224 = vmatpush1.bf16.msra.mxu1 %v23285_v21  ;;  %v23374_v20 = vld [vmem:[%s27350_s14 + $0x7a4] ss:$16 sps:$4 sm:$0xff]   ;;  %v23377_v21 = vld [vmem:[%s27350_s14 + $0x7ac] ss:$16 sps:$4 sm:$0xff]  }
 0x151   : > { %16544 = vmatprep.subr.bf16.mxu0 %v23290_v22  ;;  %18225 = vmatprep.subr.bf16.mxu1 %v23293_v24  ;;  %v23372_v22 = vld [vmem:[%s27350_s14 + $0x7a0] ss:$16 sps:$4 sm:$0xff]   ;;  %v23375_v24 = vld [vmem:[%s27350_s14 + $0x7a8] ss:$16 sps:$4 sm:$0xff]  }
 0x154   : > { %16545 = vmatpush1.bf16.msra.mxu0 %v23288_v23  ;;  %18226 = vmatpush1.bf16.msra.mxu1 %v23291_v9  ;;  %v23380_v23 = vld [vmem:[%s27350_s14 + $0x7c4] ss:$16 sps:$4 sm:$0xff]   ;;  %v23383_v9 = vld [vmem:[%s27350_s14 + $0x7cc] ss:$16 sps:$4 sm:$0xff]  }
 0x155   : > { %16555 = vmatprep.subr.bf16.mxu0 %v23296_v27  ;;  %18236 = vmatprep.subr.bf16.mxu1 %v23299_v28  ;;  %v23378_v27 = vld [vmem:[%s27350_s14 + $0x7c0] ss:$16 sps:$4 sm:$0xff]  }
 0x156   : > { %v27650_v28 = vld [vmem:[#allocation2 + $0x10] sm:$0xff] }
 0x157   : > { %16547 = vmatmul.mubr.bf16.vlgmr.msra.gmra.mrb[0].mxu0 %v781_v30  ;;  %18228 = vmatmul.mubr.bf16.vlgmr.msra.gmra.mrb[0].mxu1 %v781_v30  ;;  %v23386_v30 = vld [vmem:[%s27350_s14 + $0x7e4] ss:$16 sps:$4 sm:$0xff]  }
 0x158   : > { %16556 = vmatpush1.bf16.msra.mxu0 %v23294_v31  ;;  %18237 = vmatpush1.bf16.msra.mxu1 %v23297_v32  ;;  %v23389_v31 = vld [vmem:[%s27350_s14 + $0x7ec] ss:$16 sps:$4 sm:$0xff]   ;;  %v27657_v32 = vrot.slane %v27650_v28, %v27416_v49 }
 0x159   : > { %16557 = vmatprep.subr.bf16.mxu0 %v23302_v33  ;;  %18238 = vmatprep.subr.bf16.mxu1 %v23305_v34  ;;  %v23384_v33 = vld [vmem:[%s27350_s14 + $0x7e0] ss:$16 sps:$4 sm:$0xff]   ;;  %v23387_v34 = vld [vmem:[%s27350_s14 + $0x7e8] ss:$16 sps:$4 sm:$0xff]  }
 0x15a   : > { %16587 = vmatprep.mubr.bf16.mxu0 %v784_v35  ;;  %18268 = vmatprep.mubr.bf16.mxu1 %v784_v35  ;;  %v23393_v35 = vld [vmem:[%s27350_s14 + $0x804] ss:$16 sps:$4 sm:$0xff]  }
 0x15c   : > { %16558 = vmatpush1.bf16.msra.mxu0 %v23300_v26  ;;  %18239 = vmatpush1.bf16.msra.mxu1 %v23303_v36  ;;  %v23396_v26 = vld [vmem:[%s27350_s14 + $0x80c] ss:$16 sps:$4 sm:$0xff]   ;;  %v398_v36 = vcombine.high %v27657_v32, %v27657_v32 }
 0x15d   : > { %16559 = vmatprep.subr.bf16.mxu0 %v23308_v37  ;;  %18240 = vmatprep.subr.bf16.mxu1 %v23311_v38  ;;  %v23391_v37 = vld [vmem:[%s27350_s14 + $0x800] ss:$16 sps:$4 sm:$0xff]   ;;  %v783_v38 = vpack.c.bf16 %v27583_v25, %v27583_v25  ;;  %v23405_v25 = vld [vmem:[%s27350_s14 + $0x844] ss:$16 sps:$4 sm:$0xff]  }
 0x160   : > { %16560 = vmatpush1.bf16.msra.mxu0 %v23306_v39  ;;  %18241 = vmatpush1.bf16.msra.mxu1 %v23309_v40  ;;  %v23394_v39 = vld [vmem:[%s27350_s14 + $0x808] ss:$16 sps:$4 sm:$0xff]   ;;  %v23399_v40 = vld [vmem:[%s27350_s14 + $0x824] ss:$16 sps:$4 sm:$0xff]  }
 0x161   : > { %16561 = vmatprep.subr.bf16.mxu0 %v23314_v41  ;;  %18242 = vmatprep.subr.bf16.mxu1 %v23317_v42  ;;  %v23402_v41 = vld [vmem:[%s27350_s14 + $0x82c] ss:$16 sps:$4 sm:$0xff]   ;;  %v786_v42 = vpack.c.bf16 %v398_v36, %v398_v36  ;;  %v23475_v36 = vld [vmem:[%s27350_s14 + $0x9c0] ss:$16 sps:$4 sm:$0xff]  }
 0x164   : > { %16562 = vmatpush1.bf16.msra.mxu0 %v23312_v44  ;;  %18243 = vmatpush1.bf16.msra.mxu1 %v23315_v45  ;;  %v23397_v44 = vld [vmem:[%s27350_s14 + $0x820] ss:$16 sps:$4 sm:$0xff]   ;;  %v23400_v45 = vld [vmem:[%s27350_s14 + $0x828] ss:$16 sps:$4 sm:$0xff]  }
 0x165   : > { %16563 = vmatprep.subr.bf16.mxu0 %v23320_v46  ;;  %18244 = vmatprep.subr.bf16.mxu1 %v23323_v47  ;;  %v23408_v46 = vld [vmem:[%s27350_s14 + $0x84c] ss:$16 sps:$4 sm:$0xff]   ;;  %v23403_v47 = vld [vmem:[%s27350_s14 + $0x840] ss:$16 sps:$4 sm:$0xff]  }
 0x168   : > { %16564 = vmatpush1.bf16.msra.mxu0 %v23318_v48  ;;  %18245 = vmatpush1.bf16.msra.mxu1 %v23321_v50  ;;  %v23406_v48 = vld [vmem:[%s27350_s14 + $0x848] ss:$16 sps:$4 sm:$0xff]   ;;  %v23411_v50 = vld [vmem:[%s27350_s14 + $0x864] ss:$16 sps:$4 sm:$0xff]  }
 0x169   : > { %16565 = vmatprep.subr.bf16.mxu0 %v23326_v51  ;;  %18246 = vmatprep.subr.bf16.mxu1 %v23329_v52  ;;  %v23414_v51 = vld [vmem:[%s27350_s14 + $0x86c] ss:$16 sps:$4 sm:$0xff]   ;;  %v23409_v52 = vld [vmem:[%s27350_s14 + $0x860] ss:$16 sps:$4 sm:$0xff]  }
 0x16c   : > { %16566 = vmatpush1.bf16.msra.mxu0 %v23324_v53  ;;  %18247 = vmatpush1.bf16.msra.mxu1 %v23327_v54  ;;  %v23412_v53 = vld [vmem:[%s27350_s14 + $0x868] ss:$16 sps:$4 sm:$0xff]   ;;  %v23417_v54 = vld [vmem:[%s27350_s14 + $0x884] ss:$16 sps:$4 sm:$0xff]  }
 0x16d   : > { %16567 = vmatprep.subr.bf16.mxu0 %v23332_v55  ;;  %18248 = vmatprep.subr.bf16.mxu1 %v23335_v56  ;;  %v23420_v55 = vld [vmem:[%s27350_s14 + $0x88c] ss:$16 sps:$4 sm:$0xff]   ;;  %v23415_v56 = vld [vmem:[%s27350_s14 + $0x880] ss:$16 sps:$4 sm:$0xff]  }
 0x170   : > { %16568 = vmatpush1.bf16.msra.mxu0 %v23330_v57  ;;  %18249 = vmatpush1.bf16.msra.mxu1 %v23333_v58  ;;  %v23418_v57 = vld [vmem:[%s27350_s14 + $0x888] ss:$16 sps:$4 sm:$0xff]   ;;  %v23423_v58 = vld [vmem:[%s27350_s14 + $0x8a4] ss:$16 sps:$4 sm:$0xff]  }
 0x171   : > { %16569 = vmatprep.subr.bf16.mxu0 %v23338_v59  ;;  %18250 = vmatprep.subr.bf16.mxu1 %v23341_v60  ;;  %v23426_v59 = vld [vmem:[%s27350_s14 + $0x8ac] ss:$16 sps:$4 sm:$0xff]   ;;  %v23421_v60 = vld [vmem:[%s27350_s14 + $0x8a0] ss:$16 sps:$4 sm:$0xff]  }
 0x174   : > { %16570 = vmatpush1.bf16.msra.mxu0 %v23336_v61  ;;  %18251 = vmatpush1.bf16.msra.mxu1 %v23339_v62  ;;  %v23424_v61 = vld [vmem:[%s27350_s14 + $0x8a8] ss:$16 sps:$4 sm:$0xff]   ;;  %v23429_v62 = vld [vmem:[%s27350_s14 + $0x8c4] ss:$16 sps:$4 sm:$0xff]  }
 0x175   : > { %16571 = vmatprep.subr.bf16.mxu0 %v23344_v63  ;;  %18252 = vmatprep.subr.bf16.mxu1 %v23347_v0  ;;  %v23432_v63 = vld [vmem:[%s27350_s14 + $0x8cc] ss:$16 sps:$4 sm:$0xff]   ;;  %v23427_v0 = vld [vmem:[%s27350_s14 + $0x8c0] ss:$16 sps:$4 sm:$0xff]  }
 0x178   : > { %16572 = vmatpush1.bf16.msra.mxu0 %v23342_v1  ;;  %18253 = vmatpush1.bf16.msra.mxu1 %v23345_v2  ;;  %v23430_v1 = vld [vmem:[%s27350_s14 + $0x8c8] ss:$16 sps:$4 sm:$0xff]   ;;  %v23435_v2 = vld [vmem:[%s27350_s14 + $0x8e4] ss:$16 sps:$4 sm:$0xff]  }
 0x179   : > { %16573 = vmatprep.subr.bf16.mxu0 %v23350_v3  ;;  %18254 = vmatprep.subr.bf16.mxu1 %v23353_v4  ;;  %v23438_v3 = vld [vmem:[%s27350_s14 + $0x8ec] ss:$16 sps:$4 sm:$0xff]   ;;  %v23433_v4 = vld [vmem:[%s27350_s14 + $0x8e0] ss:$16 sps:$4 sm:$0xff]  }
 0x17c   : > { %16574 = vmatpush1.bf16.msra.mxu0 %v23348_v5  ;;  %18255 = vmatpush1.bf16.msra.mxu1 %v23351_v6  ;;  %v23436_v5 = vld [vmem:[%s27350_s14 + $0x8e8] ss:$16 sps:$4 sm:$0xff]   ;;  %v23441_v6 = vld [vmem:[%s27350_s14 + $0x904] ss:$16 sps:$4 sm:$0xff]  }
 0x17d   : > { %16575 = vmatprep.subr.bf16.mxu0 %v23356_v7  ;;  %18256 = vmatprep.subr.bf16.mxu1 %v23359_v8  ;;  %v23444_v7 = vld [vmem:[%s27350_s14 + $0x90c] ss:$16 sps:$4 sm:$0xff]   ;;  %v23439_v8 = vld [vmem:[%s27350_s14 + $0x900] ss:$16 sps:$4 sm:$0xff]  }
 0x180   : > { %16576 = vmatpush1.bf16.msra.mxu0 %v23354_v10  ;;  %18257 = vmatpush1.bf16.msra.mxu1 %v23357_v11  ;;  %v23442_v10 = vld [vmem:[%s27350_s14 + $0x908] ss:$16 sps:$4 sm:$0xff]   ;;  %v23447_v11 = vld [vmem:[%s27350_s14 + $0x924] ss:$16 sps:$4 sm:$0xff]  }
 0x181   : > { %16577 = vmatprep.subr.bf16.mxu0 %v23362_v12  ;;  %18258 = vmatprep.subr.bf16.mxu1 %v23365_v13  ;;  %v23450_v12 = vld [vmem:[%s27350_s14 + $0x92c] ss:$16 sps:$4 sm:$0xff]   ;;  %v23445_v13 = vld [vmem:[%s27350_s14 + $0x920] ss:$16 sps:$4 sm:$0xff]  }
 0x184   : > { %16578 = vmatpush1.bf16.msra.mxu0 %v23360_v14  ;;  %18259 = vmatpush1.bf16.msra.mxu1 %v23363_v15  ;;  %v23448_v14 = vld [vmem:[%s27350_s14 + $0x928] ss:$16 sps:$4 sm:$0xff]   ;;  %v23453_v15 = vld [vmem:[%s27350_s14 + $0x944] ss:$16 sps:$4 sm:$0xff]  }
 0x185   : > { %16579 = vmatprep.subr.bf16.mxu0 %v23368_v16  ;;  %18260 = vmatprep.subr.bf16.mxu1 %v23371_v17  ;;  %v23456_v16 = vld [vmem:[%s27350_s14 + $0x94c] ss:$16 sps:$4 sm:$0xff]   ;;  %v23451_v17 = vld [vmem:[%s27350_s14 + $0x940] ss:$16 sps:$4 sm:$0xff]  }
 0x188   : > { %16580 = vmatpush1.bf16.msra.mxu0 %v23366_v18  ;;  %18261 = vmatpush1.bf16.msra.mxu1 %v23369_v19  ;;  %v23454_v18 = vld [vmem:[%s27350_s14 + $0x948] ss:$16 sps:$4 sm:$0xff]   ;;  %v23459_v19 = vld [vmem:[%s27350_s14 + $0x964] ss:$16 sps:$4 sm:$0xff]  }
 0x189   : > { %16581 = vmatprep.subr.bf16.mxu0 %v23374_v20  ;;  %18262 = vmatprep.subr.bf16.mxu1 %v23377_v21  ;;  %v23462_v20 = vld [vmem:[%s27350_s14 + $0x96c] ss:$16 sps:$4 sm:$0xff]   ;;  %v23457_v21 = vld [vmem:[%s27350_s14 + $0x960] ss:$16 sps:$4 sm:$0xff]  }
 0x18c   : > { %16582 = vmatpush1.bf16.msra.mxu0 %v23372_v22  ;;  %18263 = vmatpush1.bf16.msra.mxu1 %v23375_v24  ;;  %v23460_v22 = vld [vmem:[%s27350_s14 + $0x968] ss:$16 sps:$4 sm:$0xff]   ;;  %v23465_v24 = vld [vmem:[%s27350_s14 + $0x984] ss:$16 sps:$4 sm:$0xff]  }
 0x18d   : > { %16583 = vmatprep.subr.bf16.mxu0 %v23380_v23  ;;  %18264 = vmatprep.subr.bf16.mxu1 %v23383_v9  ;;  %v23468_v23 = vld [vmem:[%s27350_s14 + $0x98c] ss:$16 sps:$4 sm:$0xff]   ;;  %v23463_v9 = vld [vmem:[%s27350_s14 + $0x980] ss:$16 sps:$4 sm:$0xff]  }
 0x190   : > { %16584 = vmatpush1.bf16.msra.mxu0 %v23378_v27  ;;  %18265 = vmatpush1.bf16.msra.mxu1 %v23381_v29  ;;  %v23466_v27 = vld [vmem:[%s27350_s14 + $0x988] ss:$16 sps:$4 sm:$0xff]   ;;  %v23471_v29 = vld [vmem:[%s27350_s14 + $0x9a4] ss:$16 sps:$4 sm:$0xff]  }
 0x191   : > { %16585 = vmatprep.subr.bf16.mxu0 %v23386_v30  ;;  %18266 = vmatprep.subr.bf16.mxu1 %v23389_v31  ;;  %v23474_v30 = vld [vmem:[%s27350_s14 + $0x9ac] ss:$16 sps:$4 sm:$0xff]   ;;  %v23469_v31 = vld [vmem:[%s27350_s14 + $0x9a0] ss:$16 sps:$4 sm:$0xff]  }
 0x194   : > { %16586 = vmatpush1.bf16.msra.mxu0 %v23384_v33  ;;  %18267 = vmatpush1.bf16.msra.mxu1 %v23387_v34  ;;  %v23472_v33 = vld [vmem:[%s27350_s14 + $0x9a8] ss:$16 sps:$4 sm:$0xff]   ;;  %v23477_v34 = vld [vmem:[%s27350_s14 + $0x9c4] ss:$16 sps:$4 sm:$0xff]  }
 0x195   : > { %16596 = vmatprep.subr.bf16.mxu0 %v23393_v35  ;;  %18277 = vmatprep.subr.bf16.mxu1 %v23396_v26  ;;  %v23480_v35 = vld [vmem:[%s27350_s14 + $0x9cc] ss:$16 sps:$4 sm:$0xff]   ;;  %v383_v26 = vcombine.high %v27650_v28, %v27650_v28  ;;  %v23481_v28 = vld [vmem:[%s27350_s14 + $0x9e0] ss:$16 sps:$4 sm:$0xff]  }
 0x197   : > { %16588 = vmatmul.mubr.bf16.vlgmr.msra.gmra.mrb[0].mxu0 %v783_v38  ;;  %18269 = vmatmul.mubr.bf16.vlgmr.msra.gmra.mrb[0].mxu1 %v783_v38  ;;  %v23483_v38 = vld [vmem:[%s27350_s14 + $0x9e4] ss:$16 sps:$4 sm:$0xff]  }
 0x198   : > { %16597 = vmatpush1.bf16.msra.mxu0 %v23391_v37  ;;  %18278 = vmatpush1.bf16.msra.mxu1 %v23394_v39  ;;  %v23478_v37 = vld [vmem:[%s27350_s14 + $0x9c8] ss:$16 sps:$4 sm:$0xff]   ;;  %v23486_v39 = vld [vmem:[%s27350_s14 + $0x9ec] ss:$16 sps:$4 sm:$0xff]  }
 0x199   : > { %16598 = vmatprep.subr.bf16.mxu0 %v23399_v40  ;;  %18279 = vmatprep.subr.bf16.mxu1 %v23402_v41  ;;  %v27730_v40 = vrot.slane %v383_v26, %v27416_v49  ;;  %v23484_v41 = vld [vmem:[%s27350_s14 + $0x9e8] ss:$16 sps:$4 sm:$0xff]  }
 0x19a   : > { %16628 = vmatprep.mubr.bf16.mxu0 %v786_v42  ;;  %18309 = vmatprep.mubr.bf16.mxu1 %v786_v42  ;;  %v23489_v42 = vld [vmem:[%s27350_s14 + $0xa04] ss:$16 sps:$4 sm:$0xff]   ;;  %v23562_v26 = vld [vmem:[%s27350_s14 + $0xb88] ss:$16 sps:$4 sm:$0xff]  }
 0x19c   : > { %16599 = vmatpush1.bf16.msra.mxu0 %v23397_v44  ;;  %18280 = vmatpush1.bf16.msra.mxu1 %v23400_v45  ;;  %v23492_v44 = vld [vmem:[%s27350_s14 + $0xa0c] ss:$16 sps:$4 sm:$0xff]   ;;  %v399_v45 = vcombine.high %v27730_v40, %v27730_v40 }
 0x19d   : > { %16600 = vmatprep.subr.bf16.mxu0 %v23405_v25  ;;  %18281 = vmatprep.subr.bf16.mxu1 %v23408_v46  ;;  %v785_v25 = vpack.c.bf16 %v27657_v32, %v27657_v32  ;;  %v23487_v46 = vld [vmem:[%s27350_s14 + $0xa00] ss:$16 sps:$4 sm:$0xff]  }
 0x19e   : > { %v23493_v32 = vld [vmem:[%s27350_s14 + $0xa20] ss:$16 sps:$4 sm:$0xff]  }
 0x1a0   : > { %16601 = vmatpush1.bf16.msra.mxu0 %v23403_v47  ;;  %18282 = vmatpush1.bf16.msra.mxu1 %v23406_v48  ;;  %v23490_v47 = vld [vmem:[%s27350_s14 + $0xa08] ss:$16 sps:$4 sm:$0xff]   ;;  %v23495_v48 = vld [vmem:[%s27350_s14 + $0xa24] ss:$16 sps:$4 sm:$0xff]  }
 0x1a1   : > { %16602 = vmatprep.subr.bf16.mxu0 %v23411_v50  ;;  %18283 = vmatprep.subr.bf16.mxu1 %v23414_v51  ;;  %v23498_v50 = vld [vmem:[%s27350_s14 + $0xa2c] ss:$16 sps:$4 sm:$0xff]   ;;  %v788_v51 = vpack.c.bf16 %v399_v45, %v399_v45  ;;  %v23574_v45 = vld [vmem:[%s27350_s14 + $0xbc8] ss:$16 sps:$4 sm:$0xff]  }
 0x1a4   : > { %16603 = vmatpush1.bf16.msra.mxu0 %v23409_v52  ;;  %18284 = vmatpush1.bf16.msra.mxu1 %v23412_v53  ;;  %v23496_v52 = vld [vmem:[%s27350_s14 + $0xa28] ss:$16 sps:$4 sm:$0xff]   ;;  %v23501_v53 = vld [vmem:[%s27350_s14 + $0xa44] ss:$16 sps:$4 sm:$0xff]  }
 0x1a5   : > { %16604 = vmatprep.subr.bf16.mxu0 %v23417_v54  ;;  %18285 = vmatprep.subr.bf16.mxu1 %v23420_v55  ;;  %v23504_v54 = vld [vmem:[%s27350_s14 + $0xa4c] ss:$16 sps:$4 sm:$0xff]   ;;  %v23499_v55 = vld [vmem:[%s27350_s14 + $0xa40] ss:$16 sps:$4 sm:$0xff]  }
 0x1a8   : > { %16605 = vmatpush1.bf16.msra.mxu0 %v23415_v56  ;;  %18286 = vmatpush1.bf16.msra.mxu1 %v23418_v57  ;;  %v23502_v56 = vld [vmem:[%s27350_s14 + $0xa48] ss:$16 sps:$4 sm:$0xff]   ;;  %v23507_v57 = vld [vmem:[%s27350_s14 + $0xa64] ss:$16 sps:$4 sm:$0xff]  }
 0x1a9   : > { %16606 = vmatprep.subr.bf16.mxu0 %v23423_v58  ;;  %18287 = vmatprep.subr.bf16.mxu1 %v23426_v59  ;;  %v23510_v58 = vld [vmem:[%s27350_s14 + $0xa6c] ss:$16 sps:$4 sm:$0xff]   ;;  %v23505_v59 = vld [vmem:[%s27350_s14 + $0xa60] ss:$16 sps:$4 sm:$0xff]  }
 0x1ac   : > { %16607 = vmatpush1.bf16.msra.mxu0 %v23421_v60  ;;  %18288 = vmatpush1.bf16.msra.mxu1 %v23424_v61  ;;  %v23508_v60 = vld [vmem:[%s27350_s14 + $0xa68] ss:$16 sps:$4 sm:$0xff]   ;;  %v23513_v61 = vld [vmem:[%s27350_s14 + $0xa84] ss:$16 sps:$4 sm:$0xff]  }
 0x1ad   : > { %16608 = vmatprep.subr.bf16.mxu0 %v23429_v62  ;;  %18289 = vmatprep.subr.bf16.mxu1 %v23432_v63  ;;  %v23516_v62 = vld [vmem:[%s27350_s14 + $0xa8c] ss:$16 sps:$4 sm:$0xff]   ;;  %v23511_v63 = vld [vmem:[%s27350_s14 + $0xa80] ss:$16 sps:$4 sm:$0xff]  }
 0x1b0   : > { %16609 = vmatpush1.bf16.msra.mxu0 %v23427_v0  ;;  %18290 = vmatpush1.bf16.msra.mxu1 %v23430_v1  ;;  %v23514_v0 = vld [vmem:[%s27350_s14 + $0xa88] ss:$16 sps:$4 sm:$0xff]   ;;  %v23519_v1 = vld [vmem:[%s27350_s14 + $0xaa4] ss:$16 sps:$4 sm:$0xff]  }
 0x1b1   : > { %16610 = vmatprep.subr.bf16.mxu0 %v23435_v2  ;;  %18291 = vmatprep.subr.bf16.mxu1 %v23438_v3  ;;  %v23522_v2 = vld [vmem:[%s27350_s14 + $0xaac] ss:$16 sps:$4 sm:$0xff]   ;;  %v23517_v3 = vld [vmem:[%s27350_s14 + $0xaa0] ss:$16 sps:$4 sm:$0xff]  }
 0x1b4   : > { %16611 = vmatpush1.bf16.msra.mxu0 %v23433_v4  ;;  %18292 = vmatpush1.bf16.msra.mxu1 %v23436_v5  ;;  %v23520_v4 = vld [vmem:[%s27350_s14 + $0xaa8] ss:$16 sps:$4 sm:$0xff]   ;;  %v23525_v5 = vld [vmem:[%s27350_s14 + $0xac4] ss:$16 sps:$4 sm:$0xff]  }
 0x1b5   : > { %16612 = vmatprep.subr.bf16.mxu0 %v23441_v6  ;;  %18293 = vmatprep.subr.bf16.mxu1 %v23444_v7  ;;  %v23528_v6 = vld [vmem:[%s27350_s14 + $0xacc] ss:$16 sps:$4 sm:$0xff]   ;;  %v23523_v7 = vld [vmem:[%s27350_s14 + $0xac0] ss:$16 sps:$4 sm:$0xff]  }
 0x1b8   : > { %16613 = vmatpush1.bf16.msra.mxu0 %v23439_v8  ;;  %18294 = vmatpush1.bf16.msra.mxu1 %v23442_v10  ;;  %v23526_v8 = vld [vmem:[%s27350_s14 + $0xac8] ss:$16 sps:$4 sm:$0xff]   ;;  %v23531_v10 = vld [vmem:[%s27350_s14 + $0xae4] ss:$16 sps:$4 sm:$0xff]  }
 0x1b9   : > { %16614 = vmatprep.subr.bf16.mxu0 %v23447_v11  ;;  %18295 = vmatprep.subr.bf16.mxu1 %v23450_v12  ;;  %v23534_v11 = vld [vmem:[%s27350_s14 + $0xaec] ss:$16 sps:$4 sm:$0xff]   ;;  %v23529_v12 = vld [vmem:[%s27350_s14 + $0xae0] ss:$16 sps:$4 sm:$0xff]  }
 0x1bc   : > { %16615 = vmatpush1.bf16.msra.mxu0 %v23445_v13  ;;  %18296 = vmatpush1.bf16.msra.mxu1 %v23448_v14  ;;  %v23532_v13 = vld [vmem:[%s27350_s14 + $0xae8] ss:$16 sps:$4 sm:$0xff]   ;;  %v23537_v14 = vld [vmem:[%s27350_s14 + $0xb04] ss:$16 sps:$4 sm:$0xff]  }
 0x1bd   : > { %16616 = vmatprep.subr.bf16.mxu0 %v23453_v15  ;;  %18297 = vmatprep.subr.bf16.mxu1 %v23456_v16  ;;  %v23540_v15 = vld [vmem:[%s27350_s14 + $0xb0c] ss:$16 sps:$4 sm:$0xff]   ;;  %v23535_v16 = vld [vmem:[%s27350_s14 + $0xb00] ss:$16 sps:$4 sm:$0xff]  }
 0x1c0   : > { %16617 = vmatpush1.bf16.msra.mxu0 %v23451_v17  ;;  %18298 = vmatpush1.bf16.msra.mxu1 %v23454_v18  ;;  %v23538_v17 = vld [vmem:[%s27350_s14 + $0xb08] ss:$16 sps:$4 sm:$0xff]   ;;  %v23543_v18 = vld [vmem:[%s27350_s14 + $0xb24] ss:$16 sps:$4 sm:$0xff]  }
 0x1c1   : > { %16618 = vmatprep.subr.bf16.mxu0 %v23459_v19  ;;  %18299 = vmatprep.subr.bf16.mxu1 %v23462_v20  ;;  %v23546_v19 = vld [vmem:[%s27350_s14 + $0xb2c] ss:$16 sps:$4 sm:$0xff]   ;;  %v23541_v20 = vld [vmem:[%s27350_s14 + $0xb20] ss:$16 sps:$4 sm:$0xff]  }
 0x1c4   : > { %16619 = vmatpush1.bf16.msra.mxu0 %v23457_v21  ;;  %18300 = vmatpush1.bf16.msra.mxu1 %v23460_v22  ;;  %v23544_v21 = vld [vmem:[%s27350_s14 + $0xb28] ss:$16 sps:$4 sm:$0xff]   ;;  %v23549_v22 = vld [vmem:[%s27350_s14 + $0xb44] ss:$16 sps:$4 sm:$0xff]  }
 0x1c5   : > { %16620 = vmatprep.subr.bf16.mxu0 %v23465_v24  ;;  %18301 = vmatprep.subr.bf16.mxu1 %v23468_v23  ;;  %v23552_v24 = vld [vmem:[%s27350_s14 + $0xb4c] ss:$16 sps:$4 sm:$0xff]   ;;  %v23547_v23 = vld [vmem:[%s27350_s14 + $0xb40] ss:$16 sps:$4 sm:$0xff]  }
 0x1c8   : > { %16621 = vmatpush1.bf16.msra.mxu0 %v23463_v9  ;;  %18302 = vmatpush1.bf16.msra.mxu1 %v23466_v27  ;;  %v23550_v9 = vld [vmem:[%s27350_s14 + $0xb48] ss:$16 sps:$4 sm:$0xff]   ;;  %v23555_v27 = vld [vmem:[%s27350_s14 + $0xb64] ss:$16 sps:$4 sm:$0xff]  }
 0x1c9   : > { %16622 = vmatprep.subr.bf16.mxu0 %v23471_v29  ;;  %18303 = vmatprep.subr.bf16.mxu1 %v23474_v30  ;;  %v23558_v29 = vld [vmem:[%s27350_s14 + $0xb6c] ss:$16 sps:$4 sm:$0xff]   ;;  %v23553_v30 = vld [vmem:[%s27350_s14 + $0xb60] ss:$16 sps:$4 sm:$0xff]  }
 0x1cc   : > { %16623 = vmatpush1.bf16.msra.mxu0 %v23469_v31  ;;  %18304 = vmatpush1.bf16.msra.mxu1 %v23472_v33  ;;  %v23556_v31 = vld [vmem:[%s27350_s14 + $0xb68] ss:$16 sps:$4 sm:$0xff]   ;;  %v23561_v33 = vld [vmem:[%s27350_s14 + $0xb84] ss:$16 sps:$4 sm:$0xff]  }
 0x1cd   : > { %16624 = vmatprep.subr.bf16.mxu0 %v23477_v34  ;;  %18305 = vmatprep.subr.bf16.mxu1 %v23480_v35  ;;  %v23564_v34 = vld [vmem:[%s27350_s14 + $0xb8c] ss:$16 sps:$4 sm:$0xff]   ;;  %v23559_v35 = vld [vmem:[%s27350_s14 + $0xb80] ss:$16 sps:$4 sm:$0xff]  }
 0x1d0   : > { %16625 = vmatpush1.bf16.msra.mxu0 %v23475_v36  ;;  %18306 = vmatpush1.bf16.msra.mxu1 %v23478_v37  ;;  %v23567_v36 = vld [vmem:[%s27350_s14 + $0xba4] ss:$16 sps:$4 sm:$0xff]   ;;  %v23570_v37 = vld [vmem:[%s27350_s14 + $0xbac] ss:$16 sps:$4 sm:$0xff]  }
 0x1d1   : > { %16626 = vmatprep.subr.bf16.mxu0 %v23483_v38  ;;  %18307 = vmatprep.subr.bf16.mxu1 %v23486_v39  ;;  %v23565_v38 = vld [vmem:[%s27350_s14 + $0xba0] ss:$16 sps:$4 sm:$0xff]   ;;  %v23568_v39 = vld [vmem:[%s27350_s14 + $0xba8] ss:$16 sps:$4 sm:$0xff]  }
 0x1d4   : > { %16627 = vmatpush1.bf16.msra.mxu0 %v23481_v28  ;;  %18308 = vmatpush1.bf16.msra.mxu1 %v23484_v41  ;;  %v23573_v28 = vld [vmem:[%s27350_s14 + $0xbc4] ss:$16 sps:$4 sm:$0xff]   ;;  %v23576_v41 = vld [vmem:[%s27350_s14 + $0xbcc] ss:$16 sps:$4 sm:$0xff]  }
 0x1d5   : > { %16637 = vmatprep.subr.bf16.mxu0 %v23489_v42  ;;  %18318 = vmatprep.subr.bf16.mxu1 %v23492_v44  ;;  %v27796_v42 = vld [vmem:[#allocation2 + $0x18] sm:$0xff]  ;;  %v23571_v44 = vld [vmem:[%s27350_s14 + $0xbc0] ss:$16 sps:$4 sm:$0xff]  }
 0x1d7   : > { %16629 = vmatmul.mubr.bf16.vlgmr.msra.gmra.mrb[0].mxu0 %v785_v25  ;;  %18310 = vmatmul.mubr.bf16.vlgmr.msra.gmra.mrb[0].mxu1 %v785_v25  ;;  %v23579_v25 = vld [vmem:[%s27350_s14 + $0xbe4] ss:$16 sps:$4 sm:$0xff]  }
 0x1d8   : > { %16638 = vmatpush1.bf16.msra.mxu0 %v23487_v46  ;;  %18319 = vmatpush1.bf16.msra.mxu1 %v23490_v47  ;;  %v23582_v46 = vld [vmem:[%s27350_s14 + $0xbec] ss:$16 sps:$4 sm:$0xff]   ;;  %v27804_v47 = vrot.slane %v27796_v42, %v27416_v49 }
 0x1d9   : > { %16639 = vmatprep.subr.bf16.mxu0 %v23495_v48  ;;  %18320 = vmatprep.subr.bf16.mxu1 %v23498_v50  ;;  %v23577_v48 = vld [vmem:[%s27350_s14 + $0xbe0] ss:$16 sps:$4 sm:$0xff]   ;;  %v23580_v50 = vld [vmem:[%s27350_s14 + $0xbe8] ss:$16 sps:$4 sm:$0xff]  }
 0x1da   : > { %16669 = vmatprep.mubr.bf16.mxu0 %v788_v51  ;;  %18350 = vmatprep.mubr.bf16.mxu1 %v788_v51  ;;  %v23586_v51 = vld [vmem:[%s27350_s14 + $0xc04] ss:$16 sps:$4 sm:$0xff]  }
 0x1dc   : > { %16640 = vmatpush1.bf16.msra.mxu0 %v23493_v32  ;;  %18321 = vmatpush1.bf16.msra.mxu1 %v23496_v52  ;;  %v23589_v32 = vld [vmem:[%s27350_s14 + $0xc0c] ss:$16 sps:$4 sm:$0xff]   ;;  %v415_v52 = vcombine.high %v27804_v47, %v27804_v47 }
 0x1dd   : > { %16641 = vmatprep.subr.bf16.mxu0 %v23501_v53  ;;  %18322 = vmatprep.subr.bf16.mxu1 %v23504_v54  ;;  %v787_v53 = vpack.c.bf16 %v27730_v40, %v27730_v40  ;;  %v23584_v54 = vld [vmem:[%s27350_s14 + $0xc00] ss:$16 sps:$4 sm:$0xff]  }
 0x1de   : > { %v23590_v40 = vld [vmem:[%s27350_s14 + $0xc20] ss:$16 sps:$4 sm:$0xff]  }
 0x1e0   : > { %16642 = vmatpush1.bf16.msra.mxu0 %v23499_v55  ;;  %18323 = vmatpush1.bf16.msra.mxu1 %v23502_v56  ;;  %v23587_v55 = vld [vmem:[%s27350_s14 + $0xc08] ss:$16 sps:$4 sm:$0xff]   ;;  %v23592_v56 = vld [vmem:[%s27350_s14 + $0xc24] ss:$16 sps:$4 sm:$0xff]  }
 0x1e1   : > { %16643 = vmatprep.subr.bf16.mxu0 %v23507_v57  ;;  %18324 = vmatprep.subr.bf16.mxu1 %v23510_v58  ;;  %v23595_v57 = vld [vmem:[%s27350_s14 + $0xc2c] ss:$16 sps:$4 sm:$0xff]   ;;  %v790_v58 = vpack.c.bf16 %v415_v52, %v415_v52  ;;  %v23668_v52 = vld [vmem:[%s27350_s14 + $0xdc0] ss:$16 sps:$4 sm:$0xff]  }
 0x1e4   : > { %16644 = vmatpush1.bf16.msra.mxu0 %v23505_v59  ;;  %18325 = vmatpush1.bf16.msra.mxu1 %v23508_v60  ;;  %v23593_v59 = vld [vmem:[%s27350_s14 + $0xc28] ss:$16 sps:$4 sm:$0xff]   ;;  %v23598_v60 = vld [vmem:[%s27350_s14 + $0xc44] ss:$16 sps:$4 sm:$0xff]  }
 0x1e5   : > { %16645 = vmatprep.subr.bf16.mxu0 %v23513_v61  ;;  %18326 = vmatprep.subr.bf16.mxu1 %v23516_v62  ;;  %v23601_v61 = vld [vmem:[%s27350_s14 + $0xc4c] ss:$16 sps:$4 sm:$0xff]   ;;  %v23596_v62 = vld [vmem:[%s27350_s14 + $0xc40] ss:$16 sps:$4 sm:$0xff]  }
 0x1e8   : > { %16646 = vmatpush1.bf16.msra.mxu0 %v23511_v63  ;;  %18327 = vmatpush1.bf16.msra.mxu1 %v23514_v0  ;;  %v23599_v63 = vld [vmem:[%s27350_s14 + $0xc48] ss:$16 sps:$4 sm:$0xff]   ;;  %v23604_v0 = vld [vmem:[%s27350_s14 + $0xc64] ss:$16 sps:$4 sm:$0xff]  }
 0x1e9   : > { %16647 = vmatprep.subr.bf16.mxu0 %v23519_v1  ;;  %18328 = vmatprep.subr.bf16.mxu1 %v23522_v2  ;;  %v23607_v1 = vld [vmem:[%s27350_s14 + $0xc6c] ss:$16 sps:$4 sm:$0xff]   ;;  %v23602_v2 = vld [vmem:[%s27350_s14 + $0xc60] ss:$16 sps:$4 sm:$0xff]  }
 0x1ec   : > { %16648 = vmatpush1.bf16.msra.mxu0 %v23517_v3  ;;  %18329 = vmatpush1.bf16.msra.mxu1 %v23520_v4  ;;  %v23605_v3 = vld [vmem:[%s27350_s14 + $0xc68] ss:$16 sps:$4 sm:$0xff]   ;;  %v23610_v4 = vld [vmem:[%s27350_s14 + $0xc84] ss:$16 sps:$4 sm:$0xff]  }
 0x1ed   : > { %16649 = vmatprep.subr.bf16.mxu0 %v23525_v5  ;;  %18330 = vmatprep.subr.bf16.mxu1 %v23528_v6  ;;  %v23613_v5 = vld [vmem:[%s27350_s14 + $0xc8c] ss:$16 sps:$4 sm:$0xff]   ;;  %v23608_v6 = vld [vmem:[%s27350_s14 + $0xc80] ss:$16 sps:$4 sm:$0xff]  }
 0x1f0   : > { %16650 = vmatpush1.bf16.msra.mxu0 %v23523_v7  ;;  %18331 = vmatpush1.bf16.msra.mxu1 %v23526_v8  ;;  %v23611_v7 = vld [vmem:[%s27350_s14 + $0xc88] ss:$16 sps:$4 sm:$0xff]   ;;  %v23616_v8 = vld [vmem:[%s27350_s14 + $0xca4] ss:$16 sps:$4 sm:$0xff]  }
 0x1f1   : > { %16651 = vmatprep.subr.bf16.mxu0 %v23531_v10  ;;  %18332 = vmatprep.subr.bf16.mxu1 %v23534_v11  ;;  %v23619_v10 = vld [vmem:[%s27350_s14 + $0xcac] ss:$16 sps:$4 sm:$0xff]   ;;  %v23614_v11 = vld [vmem:[%s27350_s14 + $0xca0] ss:$16 sps:$4 sm:$0xff]  }
 0x1f4   : > { %16652 = vmatpush1.bf16.msra.mxu0 %v23529_v12  ;;  %18333 = vmatpush1.bf16.msra.mxu1 %v23532_v13  ;;  %v23617_v12 = vld [vmem:[%s27350_s14 + $0xca8] ss:$16 sps:$4 sm:$0xff]   ;;  %v23622_v13 = vld [vmem:[%s27350_s14 + $0xcc4] ss:$16 sps:$4 sm:$0xff]  }
 0x1f5   : > { %16653 = vmatprep.subr.bf16.mxu0 %v23537_v14  ;;  %18334 = vmatprep.subr.bf16.mxu1 %v23540_v15  ;;  %v23625_v14 = vld [vmem:[%s27350_s14 + $0xccc] ss:$16 sps:$4 sm:$0xff]   ;;  %v23620_v15 = vld [vmem:[%s27350_s14 + $0xcc0] ss:$16 sps:$4 sm:$0xff]  }
 0x1f8   : > { %16654 = vmatpush1.bf16.msra.mxu0 %v23535_v16  ;;  %18335 = vmatpush1.bf16.msra.mxu1 %v23538_v17  ;;  %v23623_v16 = vld [vmem:[%s27350_s14 + $0xcc8] ss:$16 sps:$4 sm:$0xff]   ;;  %v23628_v17 = vld [vmem:[%s27350_s14 + $0xce4] ss:$16 sps:$4 sm:$0xff]  }
 0x1f9   : > { %16655 = vmatprep.subr.bf16.mxu0 %v23543_v18  ;;  %18336 = vmatprep.subr.bf16.mxu1 %v23546_v19  ;;  %v23631_v18 = vld [vmem:[%s27350_s14 + $0xcec] ss:$16 sps:$4 sm:$0xff]   ;;  %v23626_v19 = vld [vmem:[%s27350_s14 + $0xce0] ss:$16 sps:$4 sm:$0xff]  }
 0x1fc   : > { %16656 = vmatpush1.bf16.msra.mxu0 %v23541_v20  ;;  %18337 = vmatpush1.bf16.msra.mxu1 %v23544_v21  ;;  %v23629_v20 = vld [vmem:[%s27350_s14 + $0xce8] ss:$16 sps:$4 sm:$0xff]   ;;  %v23634_v21 = vld [vmem:[%s27350_s14 + $0xd04] ss:$16 sps:$4 sm:$0xff]  }
 0x1fd   : > { %16657 = vmatprep.subr.bf16.mxu0 %v23549_v22  ;;  %18338 = vmatprep.subr.bf16.mxu1 %v23552_v24  ;;  %v23637_v22 = vld [vmem:[%s27350_s14 + $0xd0c] ss:$16 sps:$4 sm:$0xff]   ;;  %v23632_v24 = vld [vmem:[%s27350_s14 + $0xd00] ss:$16 sps:$4 sm:$0xff]  }
 0x200   : > { %16658 = vmatpush1.bf16.msra.mxu0 %v23547_v23  ;;  %18339 = vmatpush1.bf16.msra.mxu1 %v23550_v9  ;;  %v23635_v23 = vld [vmem:[%s27350_s14 + $0xd08] ss:$16 sps:$4 sm:$0xff]   ;;  %v23640_v9 = vld [vmem:[%s27350_s14 + $0xd24] ss:$16 sps:$4 sm:$0xff]  }
 0x201   : > { %16659 = vmatprep.subr.bf16.mxu0 %v23555_v27  ;;  %18340 = vmatprep.subr.bf16.mxu1 %v23558_v29  ;;  %v23643_v27 = vld [vmem:[%s27350_s14 + $0xd2c] ss:$16 sps:$4 sm:$0xff]   ;;  %v23638_v29 = vld [vmem:[%s27350_s14 + $0xd20] ss:$16 sps:$4 sm:$0xff]  }
 0x204   : > { %16660 = vmatpush1.bf16.msra.mxu0 %v23553_v30  ;;  %18341 = vmatpush1.bf16.msra.mxu1 %v23556_v31  ;;  %v23641_v30 = vld [vmem:[%s27350_s14 + $0xd28] ss:$16 sps:$4 sm:$0xff]   ;;  %v23646_v31 = vld [vmem:[%s27350_s14 + $0xd44] ss:$16 sps:$4 sm:$0xff]  }
 0x205   : > { %16661 = vmatprep.subr.bf16.mxu0 %v23561_v33  ;;  %18342 = vmatprep.subr.bf16.mxu1 %v23564_v34  ;;  %v23649_v33 = vld [vmem:[%s27350_s14 + $0xd4c] ss:$16 sps:$4 sm:$0xff]   ;;  %v23644_v34 = vld [vmem:[%s27350_s14 + $0xd40] ss:$16 sps:$4 sm:$0xff]  }
 0x208   : > { %16662 = vmatpush1.bf16.msra.mxu0 %v23559_v35  ;;  %18343 = vmatpush1.bf16.msra.mxu1 %v23562_v26  ;;  %v23647_v35 = vld [vmem:[%s27350_s14 + $0xd48] ss:$16 sps:$4 sm:$0xff]   ;;  %v23652_v26 = vld [vmem:[%s27350_s14 + $0xd64] ss:$16 sps:$4 sm:$0xff]  }
 0x209   : > { %16663 = vmatprep.subr.bf16.mxu0 %v23567_v36  ;;  %18344 = vmatprep.subr.bf16.mxu1 %v23570_v37  ;;  %v23655_v36 = vld [vmem:[%s27350_s14 + $0xd6c] ss:$16 sps:$4 sm:$0xff]   ;;  %v23650_v37 = vld [vmem:[%s27350_s14 + $0xd60] ss:$16 sps:$4 sm:$0xff]  }
 0x20c   : > { %16664 = vmatpush1.bf16.msra.mxu0 %v23565_v38  ;;  %18345 = vmatpush1.bf16.msra.mxu1 %v23568_v39  ;;  %v23653_v38 = vld [vmem:[%s27350_s14 + $0xd68] ss:$16 sps:$4 sm:$0xff]   ;;  %v23658_v39 = vld [vmem:[%s27350_s14 + $0xd84] ss:$16 sps:$4 sm:$0xff]  }
 0x20d   : > { %16665 = vmatprep.subr.bf16.mxu0 %v23573_v28  ;;  %18346 = vmatprep.subr.bf16.mxu1 %v23576_v41  ;;  %v23661_v28 = vld [vmem:[%s27350_s14 + $0xd8c] ss:$16 sps:$4 sm:$0xff]   ;;  %v23656_v41 = vld [vmem:[%s27350_s14 + $0xd80] ss:$16 sps:$4 sm:$0xff]  }
 0x210   : > { %16666 = vmatpush1.bf16.msra.mxu0 %v23571_v44  ;;  %18347 = vmatpush1.bf16.msra.mxu1 %v23574_v45  ;;  %v23659_v44 = vld [vmem:[%s27350_s14 + $0xd88] ss:$16 sps:$4 sm:$0xff]   ;;  %v23664_v45 = vld [vmem:[%s27350_s14 + $0xda4] ss:$16 sps:$4 sm:$0xff]  }
 0x211   : > { %16667 = vmatprep.subr.bf16.mxu0 %v23579_v25  ;;  %18348 = vmatprep.subr.bf16.mxu1 %v23582_v46  ;;  %v23667_v25 = vld [vmem:[%s27350_s14 + $0xdac] ss:$16 sps:$4 sm:$0xff]   ;;  %v23662_v46 = vld [vmem:[%s27350_s14 + $0xda0] ss:$16 sps:$4 sm:$0xff]  }
 0x214   : > { %16668 = vmatpush1.bf16.msra.mxu0 %v23577_v48  ;;  %18349 = vmatpush1.bf16.msra.mxu1 %v23580_v50  ;;  %v23665_v48 = vld [vmem:[%s27350_s14 + $0xda8] ss:$16 sps:$4 sm:$0xff]   ;;  %v23670_v50 = vld [vmem:[%s27350_s14 + $0xdc4] ss:$16 sps:$4 sm:$0xff]  }
 0x215   : > { %16678 = vmatprep.subr.bf16.mxu0 %v23586_v51  ;;  %18359 = vmatprep.subr.bf16.mxu1 %v23589_v32  ;;  %v23673_v51 = vld [vmem:[%s27350_s14 + $0xdcc] ss:$16 sps:$4 sm:$0xff]   ;;  %v400_v32 = vcombine.high %v27796_v42, %v27796_v42  ;;  %v23674_v42 = vld [vmem:[%s27350_s14 + $0xde0] ss:$16 sps:$4 sm:$0xff]  }
 0x217   : > { %16670 = vmatmul.mubr.bf16.vlgmr.msra.gmra.mrb[0].mxu0 %v787_v53  ;;  %18351 = vmatmul.mubr.bf16.vlgmr.msra.gmra.mrb[0].mxu1 %v787_v53  ;;  %v23671_v53 = vld [vmem:[%s27350_s14 + $0xdc8] ss:$16 sps:$4 sm:$0xff]  }
 0x218   : > { %16679 = vmatpush1.bf16.msra.mxu0 %v23584_v54  ;;  %18360 = vmatpush1.bf16.msra.mxu1 %v23587_v55  ;;  %v23676_v54 = vld [vmem:[%s27350_s14 + $0xde4] ss:$16 sps:$4 sm:$0xff]   ;;  %v23679_v55 = vld [vmem:[%s27350_s14 + $0xdec] ss:$16 sps:$4 sm:$0xff]  }
 0x219   : > { %16680 = vmatprep.subr.bf16.mxu0 %v23592_v56  ;;  %18361 = vmatprep.subr.bf16.mxu1 %v23595_v57  ;;  %v27877_v56 = vrot.slane %v400_v32, %v27416_v49  ;;  %v23677_v57 = vld [vmem:[%s27350_s14 + $0xde8] ss:$16 sps:$4 sm:$0xff]  }
 0x21a   : > { %16710 = vmatprep.mubr.bf16.mxu0 %v790_v58  ;;  %18391 = vmatprep.mubr.bf16.mxu1 %v790_v58  ;;  %v23682_v58 = vld [vmem:[%s27350_s14 + $0xe04] ss:$16 sps:$4 sm:$0xff]   ;;  %v23755_v32 = vld [vmem:[%s27350_s14 + $0xf88] ss:$16 sps:$4 sm:$0xff]  }
 0x21c   : > { %16681 = vmatpush1.bf16.msra.mxu0 %v23590_v40  ;;  %18362 = vmatpush1.bf16.msra.mxu1 %v23593_v59  ;;  %v23685_v40 = vld [vmem:[%s27350_s14 + $0xe0c] ss:$16 sps:$4 sm:$0xff]   ;;  %v416_v59 = vcombine.high %v27877_v56, %v27877_v56 }
 0x21d   : > { %16682 = vmatprep.subr.bf16.mxu0 %v23598_v60  ;;  %18363 = vmatprep.subr.bf16.mxu1 %v23601_v61  ;;  %v789_v60 = vpack.c.bf16 %v27804_v47, %v27804_v47  ;;  %v23680_v61 = vld [vmem:[%s27350_s14 + $0xe00] ss:$16 sps:$4 sm:$0xff]  }
 0x21e   : > { %v23686_v47 = vld [vmem:[%s27350_s14 + $0xe20] ss:$16 sps:$4 sm:$0xff]  }
 0x220   : > { %16683 = vmatpush1.bf16.msra.mxu0 %v23596_v62  ;;  %18364 = vmatpush1.bf16.msra.mxu1 %v23599_v63  ;;  %v23683_v62 = vld [vmem:[%s27350_s14 + $0xe08] ss:$16 sps:$4 sm:$0xff]   ;;  %v23688_v63 = vld [vmem:[%s27350_s14 + $0xe24] ss:$16 sps:$4 sm:$0xff]  }
 0x221   : > { %16684 = vmatprep.subr.bf16.mxu0 %v23604_v0  ;;  %18365 = vmatprep.subr.bf16.mxu1 %v23607_v1  ;;  %v23691_v0 = vld [vmem:[%s27350_s14 + $0xe2c] ss:$16 sps:$4 sm:$0xff]   ;;  %v792_v1 = vpack.c.bf16 %v416_v59, %v416_v59  ;;  %v23767_v59 = vld [vmem:[%s27350_s14 + $0xfc8] ss:$16 sps:$4 sm:$0xff]  }
 0x224   : > { %16685 = vmatpush1.bf16.msra.mxu0 %v23602_v2  ;;  %18366 = vmatpush1.bf16.msra.mxu1 %v23605_v3  ;;  %v23689_v2 = vld [vmem:[%s27350_s14 + $0xe28] ss:$16 sps:$4 sm:$0xff]   ;;  %v23694_v3 = vld [vmem:[%s27350_s14 + $0xe44] ss:$16 sps:$4 sm:$0xff]  }
 0x225   : > { %16686 = vmatprep.subr.bf16.mxu0 %v23610_v4  ;;  %18367 = vmatprep.subr.bf16.mxu1 %v23613_v5  ;;  %v23697_v4 = vld [vmem:[%s27350_s14 + $0xe4c] ss:$16 sps:$4 sm:$0xff]   ;;  %v23692_v5 = vld [vmem:[%s27350_s14 + $0xe40] ss:$16 sps:$4 sm:$0xff]  }
 0x228   : > { %16687 = vmatpush1.bf16.msra.mxu0 %v23608_v6  ;;  %18368 = vmatpush1.bf16.msra.mxu1 %v23611_v7  ;;  %v23695_v6 = vld [vmem:[%s27350_s14 + $0xe48] ss:$16 sps:$4 sm:$0xff]   ;;  %v23700_v7 = vld [vmem:[%s27350_s14 + $0xe64] ss:$16 sps:$4 sm:$0xff]  }
 0x229   : > { %16688 = vmatprep.subr.bf16.mxu0 %v23616_v8  ;;  %18369 = vmatprep.subr.bf16.mxu1 %v23619_v10  ;;  %v23703_v8 = vld [vmem:[%s27350_s14 + $0xe6c] ss:$16 sps:$4 sm:$0xff]   ;;  %v23698_v10 = vld [vmem:[%s27350_s14 + $0xe60] ss:$16 sps:$4 sm:$0xff]  }
 0x22c   : > { %16689 = vmatpush1.bf16.msra.mxu0 %v23614_v11  ;;  %18370 = vmatpush1.bf16.msra.mxu1 %v23617_v12  ;;  %v23701_v11 = vld [vmem:[%s27350_s14 + $0xe68] ss:$16 sps:$4 sm:$0xff]   ;;  %v23706_v12 = vld [vmem:[%s27350_s14 + $0xe84] ss:$16 sps:$4 sm:$0xff]  }
 0x22d   : > { %16690 = vmatprep.subr.bf16.mxu0 %v23622_v13  ;;  %18371 = vmatprep.subr.bf16.mxu1 %v23625_v14  ;;  %v23709_v13 = vld [vmem:[%s27350_s14 + $0xe8c] ss:$16 sps:$4 sm:$0xff]   ;;  %v23704_v14 = vld [vmem:[%s27350_s14 + $0xe80] ss:$16 sps:$4 sm:$0xff]  }
 0x230   : > { %16691 = vmatpush1.bf16.msra.mxu0 %v23620_v15  ;;  %18372 = vmatpush1.bf16.msra.mxu1 %v23623_v16  ;;  %v23707_v15 = vld [vmem:[%s27350_s14 + $0xe88] ss:$16 sps:$4 sm:$0xff]   ;;  %v23712_v16 = vld [vmem:[%s27350_s14 + $0xea4] ss:$16 sps:$4 sm:$0xff]  }
 0x231   : > { %16692 = vmatprep.subr.bf16.mxu0 %v23628_v17  ;;  %18373 = vmatprep.subr.bf16.mxu1 %v23631_v18  ;;  %v23715_v17 = vld [vmem:[%s27350_s14 + $0xeac] ss:$16 sps:$4 sm:$0xff]   ;;  %v23710_v18 = vld [vmem:[%s27350_s14 + $0xea0] ss:$16 sps:$4 sm:$0xff]  }
 0x234   : > { %16693 = vmatpush1.bf16.msra.mxu0 %v23626_v19  ;;  %18374 = vmatpush1.bf16.msra.mxu1 %v23629_v20  ;;  %v23713_v19 = vld [vmem:[%s27350_s14 + $0xea8] ss:$16 sps:$4 sm:$0xff]   ;;  %v23718_v20 = vld [vmem:[%s27350_s14 + $0xec4] ss:$16 sps:$4 sm:$0xff]  }
 0x235   : > { %16694 = vmatprep.subr.bf16.mxu0 %v23634_v21  ;;  %18375 = vmatprep.subr.bf16.mxu1 %v23637_v22  ;;  %v23721_v21 = vld [vmem:[%s27350_s14 + $0xecc] ss:$16 sps:$4 sm:$0xff]   ;;  %v23716_v22 = vld [vmem:[%s27350_s14 + $0xec0] ss:$16 sps:$4 sm:$0xff]  }
 0x238   : > { %16695 = vmatpush1.bf16.msra.mxu0 %v23632_v24  ;;  %18376 = vmatpush1.bf16.msra.mxu1 %v23635_v23  ;;  %v23719_v24 = vld [vmem:[%s27350_s14 + $0xec8] ss:$16 sps:$4 sm:$0xff]   ;;  %v23724_v23 = vld [vmem:[%s27350_s14 + $0xee4] ss:$16 sps:$4 sm:$0xff]  }
 0x239   : > { %16696 = vmatprep.subr.bf16.mxu0 %v23640_v9  ;;  %18377 = vmatprep.subr.bf16.mxu1 %v23643_v27  ;;  %v23727_v9 = vld [vmem:[%s27350_s14 + $0xeec] ss:$16 sps:$4 sm:$0xff]   ;;  %v23722_v27 = vld [vmem:[%s27350_s14 + $0xee0] ss:$16 sps:$4 sm:$0xff]  }
 0x23c   : > { %16697 = vmatpush1.bf16.msra.mxu0 %v23638_v29  ;;  %18378 = vmatpush1.bf16.msra.mxu1 %v23641_v30  ;;  %v23725_v29 = vld [vmem:[%s27350_s14 + $0xee8] ss:$16 sps:$4 sm:$0xff]   ;;  %v23730_v30 = vld [vmem:[%s27350_s14 + $0xf04] ss:$16 sps:$4 sm:$0xff]  }
 0x23d   : > { %16698 = vmatprep.subr.bf16.mxu0 %v23646_v31  ;;  %18379 = vmatprep.subr.bf16.mxu1 %v23649_v33  ;;  %v23733_v31 = vld [vmem:[%s27350_s14 + $0xf0c] ss:$16 sps:$4 sm:$0xff]   ;;  %v23728_v33 = vld [vmem:[%s27350_s14 + $0xf00] ss:$16 sps:$4 sm:$0xff]  }
 0x240   : > { %16699 = vmatpush1.bf16.msra.mxu0 %v23644_v34  ;;  %18380 = vmatpush1.bf16.msra.mxu1 %v23647_v35  ;;  %v23731_v34 = vld [vmem:[%s27350_s14 + $0xf08] ss:$16 sps:$4 sm:$0xff]   ;;  %v23736_v35 = vld [vmem:[%s27350_s14 + $0xf24] ss:$16 sps:$4 sm:$0xff]  }
 0x241   : > { %16700 = vmatprep.subr.bf16.mxu0 %v23652_v26  ;;  %18381 = vmatprep.subr.bf16.mxu1 %v23655_v36  ;;  %v23739_v26 = vld [vmem:[%s27350_s14 + $0xf2c] ss:$16 sps:$4 sm:$0xff]   ;;  %v23734_v36 = vld [vmem:[%s27350_s14 + $0xf20] ss:$16 sps:$4 sm:$0xff]  }
 0x244   : > { %16701 = vmatpush1.bf16.msra.mxu0 %v23650_v37  ;;  %18382 = vmatpush1.bf16.msra.mxu1 %v23653_v38  ;;  %v23737_v37 = vld [vmem:[%s27350_s14 + $0xf28] ss:$16 sps:$4 sm:$0xff]   ;;  %v23742_v38 = vld [vmem:[%s27350_s14 + $0xf44] ss:$16 sps:$4 sm:$0xff]  }
 0x245   : > { %16702 = vmatprep.subr.bf16.mxu0 %v23658_v39  ;;  %18383 = vmatprep.subr.bf16.mxu1 %v23661_v28  ;;  %v23745_v39 = vld [vmem:[%s27350_s14 + $0xf4c] ss:$16 sps:$4 sm:$0xff]   ;;  %v23740_v28 = vld [vmem:[%s27350_s14 + $0xf40] ss:$16 sps:$4 sm:$0xff]  }
 0x248   : > { %16703 = vmatpush1.bf16.msra.mxu0 %v23656_v41  ;;  %18384 = vmatpush1.bf16.msra.mxu1 %v23659_v44  ;;  %v23743_v41 = vld [vmem:[%s27350_s14 + $0xf48] ss:$16 sps:$4 sm:$0xff]   ;;  %v23748_v44 = vld [vmem:[%s27350_s14 + $0xf64] ss:$16 sps:$4 sm:$0xff]  }
 0x249   : > { %16704 = vmatprep.subr.bf16.mxu0 %v23664_v45  ;;  %18385 = vmatprep.subr.bf16.mxu1 %v23667_v25  ;;  %v23751_v45 = vld [vmem:[%s27350_s14 + $0xf6c] ss:$16 sps:$4 sm:$0xff]   ;;  %v23746_v25 = vld [vmem:[%s27350_s14 + $0xf60] ss:$16 sps:$4 sm:$0xff]  }
 0x24c   : > { %16705 = vmatpush1.bf16.msra.mxu0 %v23662_v46  ;;  %18386 = vmatpush1.bf16.msra.mxu1 %v23665_v48  ;;  %v23749_v46 = vld [vmem:[%s27350_s14 + $0xf68] ss:$16 sps:$4 sm:$0xff]   ;;  %v23754_v48 = vld [vmem:[%s27350_s14 + $0xf84] ss:$16 sps:$4 sm:$0xff]  }
 0x24d   : > { %16706 = vmatprep.subr.bf16.mxu0 %v23670_v50  ;;  %18387 = vmatprep.subr.bf16.mxu1 %v23673_v51  ;;  %v23757_v50 = vld [vmem:[%s27350_s14 + $0xf8c] ss:$16 sps:$4 sm:$0xff]   ;;  %v23752_v51 = vld [vmem:[%s27350_s14 + $0xf80] ss:$16 sps:$4 sm:$0xff]  }
 0x250   : > { %16707 = vmatpush1.bf16.msra.mxu0 %v23668_v52  ;;  %18388 = vmatpush1.bf16.msra.mxu1 %v23671_v53  ;;  %v23760_v52 = vld [vmem:[%s27350_s14 + $0xfa4] ss:$16 sps:$4 sm:$0xff]   ;;  %v23763_v53 = vld [vmem:[%s27350_s14 + $0xfac] ss:$16 sps:$4 sm:$0xff]  }
 0x251   : > { %16708 = vmatprep.subr.bf16.mxu0 %v23676_v54  ;;  %18389 = vmatprep.subr.bf16.mxu1 %v23679_v55  ;;  %v23758_v54 = vld [vmem:[%s27350_s14 + $0xfa0] ss:$16 sps:$4 sm:$0xff]   ;;  %v23761_v55 = vld [vmem:[%s27350_s14 + $0xfa8] ss:$16 sps:$4 sm:$0xff]  }
 0x254   : > { %16709 = vmatpush1.bf16.msra.mxu0 %v23674_v42  ;;  %18390 = vmatpush1.bf16.msra.mxu1 %v23677_v57  ;;  %v23766_v42 = vld [vmem:[%s27350_s14 + $0xfc4] ss:$16 sps:$4 sm:$0xff]   ;;  %v23769_v57 = vld [vmem:[%s27350_s14 + $0xfcc] ss:$16 sps:$4 sm:$0xff]  }
 0x255   : > { %16719 = vmatprep.subr.bf16.mxu0 %v23682_v58  ;;  %18400 = vmatprep.subr.bf16.mxu1 %v23685_v40  ;;  %v27943_v58 = vld [vmem:[#allocation2 + $0x20] sm:$0xff] }
 0x256   : > { %v23764_v40 = vld [vmem:[%s27350_s14 + $0xfc0] ss:$16 sps:$4 sm:$0xff]  }
 0x257   : > { %16711 = vmatmul.mubr.bf16.vlgmr.msra.gmra.mrb[0].mxu0 %v789_v60  ;;  %18392 = vmatmul.mubr.bf16.vlgmr.msra.gmra.mrb[0].mxu1 %v789_v60  ;;  %v23772_v60 = vld [vmem:[%s27350_s14 + $0xfe4] ss:$16 sps:$4 sm:$0xff]  }
 0x258   : > { %16720 = vmatpush1.bf16.msra.mxu0 %v23680_v61  ;;  %18401 = vmatpush1.bf16.msra.mxu1 %v23683_v62  ;;  %v23775_v61 = vld [vmem:[%s27350_s14 + $0xfec] ss:$16 sps:$4 sm:$0xff]   ;;  %v27951_v62 = vrot.slane %v27943_v58, %v27416_v49 }
 0x259   : > { %16721 = vmatprep.subr.bf16.mxu0 %v23688_v63  ;;  %18402 = vmatprep.subr.bf16.mxu1 %v23691_v0  ;;  %v23770_v63 = vld [vmem:[%s27350_s14 + $0xfe0] ss:$16 sps:$4 sm:$0xff]   ;;  %v23773_v0 = vld [vmem:[%s27350_s14 + $0xfe8] ss:$16 sps:$4 sm:$0xff]  }
 0x25a   : > { %16751 = vmatprep.mubr.bf16.mxu0 %v792_v1  ;;  %18432 = vmatprep.mubr.bf16.mxu1 %v792_v1  ;;  %v23779_v1 = vld [vmem:[%s27350_s14 + $0x1004] ss:$16 sps:$4 sm:$0xff]  }
 0x25c   : > { %16722 = vmatpush1.bf16.msra.mxu0 %v23686_v47  ;;  %18403 = vmatpush1.bf16.msra.mxu1 %v23689_v2  ;;  %v23782_v47 = vld [vmem:[%s27350_s14 + $0x100c] ss:$16 sps:$4 sm:$0xff]   ;;  %v432_v2 = vcombine.high %v27951_v62, %v27951_v62 }
 0x25d   : > { %16723 = vmatprep.subr.bf16.mxu0 %v23694_v3  ;;  %18404 = vmatprep.subr.bf16.mxu1 %v23697_v4  ;;  %v791_v3 = vpack.c.bf16 %v27877_v56, %v27877_v56  ;;  %v23777_v4 = vld [vmem:[%s27350_s14 + $0x1000] ss:$16 sps:$4 sm:$0xff]  }
 0x25e   : > { %v23783_v56 = vld [vmem:[%s27350_s14 + $0x1020] ss:$16 sps:$4 sm:$0xff]  }
 0x260   : > { %16724 = vmatpush1.bf16.msra.mxu0 %v23692_v5  ;;  %18405 = vmatpush1.bf16.msra.mxu1 %v23695_v6  ;;  %v23780_v5 = vld [vmem:[%s27350_s14 + $0x1008] ss:$16 sps:$4 sm:$0xff]   ;;  %v23785_v6 = vld [vmem:[%s27350_s14 + $0x1024] ss:$16 sps:$4 sm:$0xff]  }
 0x261   : > { %16725 = vmatprep.subr.bf16.mxu0 %v23700_v7  ;;  %18406 = vmatprep.subr.bf16.mxu1 %v23703_v8  ;;  %v23788_v7 = vld [vmem:[%s27350_s14 + $0x102c] ss:$16 sps:$4 sm:$0xff]   ;;  %v794_v8 = vpack.c.bf16 %v432_v2, %v432_v2  ;;  %v23861_v2 = vld [vmem:[%s27350_s14 + $0x11c0] ss:$16 sps:$4 sm:$0xff]  }
 0x264   : > { %16726 = vmatpush1.bf16.msra.mxu0 %v23698_v10  ;;  %18407 = vmatpush1.bf16.msra.mxu1 %v23701_v11  ;;  %v23786_v10 = vld [vmem:[%s27350_s14 + $0x1028] ss:$16 sps:$4 sm:$0xff]   ;;  %v23791_v11 = vld [vmem:[%s27350_s14 + $0x1044] ss:$16 sps:$4 sm:$0xff]  }
 0x265   : > { %16727 = vmatprep.subr.bf16.mxu0 %v23706_v12  ;;  %18408 = vmatprep.subr.bf16.mxu1 %v23709_v13  ;;  %v23794_v12 = vld [vmem:[%s27350_s14 + $0x104c] ss:$16 sps:$4 sm:$0xff]   ;;  %v23789_v13 = vld [vmem:[%s27350_s14 + $0x1040] ss:$16 sps:$4 sm:$0xff]  }
 0x268   : > { %16728 = vmatpush1.bf16.msra.mxu0 %v23704_v14  ;;  %18409 = vmatpush1.bf16.msra.mxu1 %v23707_v15  ;;  %v23792_v14 = vld [vmem:[%s27350_s14 + $0x1048] ss:$16 sps:$4 sm:$0xff]   ;;  %v23797_v15 = vld [vmem:[%s27350_s14 + $0x1064] ss:$16 sps:$4 sm:$0xff]  }
 0x269   : > { %16729 = vmatprep.subr.bf16.mxu0 %v23712_v16  ;;  %18410 = vmatprep.subr.bf16.mxu1 %v23715_v17  ;;  %v23800_v16 = vld [vmem:[%s27350_s14 + $0x106c] ss:$16 sps:$4 sm:$0xff]   ;;  %v23795_v17 = vld [vmem:[%s27350_s14 + $0x1060] ss:$16 sps:$4 sm:$0xff]  }
 0x26c   : > { %16730 = vmatpush1.bf16.msra.mxu0 %v23710_v18  ;;  %18411 = vmatpush1.bf16.msra.mxu1 %v23713_v19  ;;  %v23798_v18 = vld [vmem:[%s27350_s14 + $0x1068] ss:$16 sps:$4 sm:$0xff]   ;;  %v23803_v19 = vld [vmem:[%s27350_s14 + $0x1084] ss:$16 sps:$4 sm:$0xff]  }
 0x26d   : > { %16731 = vmatprep.subr.bf16.mxu0 %v23718_v20  ;;  %18412 = vmatprep.subr.bf16.mxu1 %v23721_v21  ;;  %v23806_v20 = vld [vmem:[%s27350_s14 + $0x108c] ss:$16 sps:$4 sm:$0xff]   ;;  %v23801_v21 = vld [vmem:[%s27350_s14 + $0x1080] ss:$16 sps:$4 sm:$0xff]  }
 0x270   : > { %16732 = vmatpush1.bf16.msra.mxu0 %v23716_v22  ;;  %18413 = vmatpush1.bf16.msra.mxu1 %v23719_v24  ;;  %v23804_v22 = vld [vmem:[%s27350_s14 + $0x1088] ss:$16 sps:$4 sm:$0xff]   ;;  %v23809_v24 = vld [vmem:[%s27350_s14 + $0x10a4] ss:$16 sps:$4 sm:$0xff]  }
 0x271   : > { %16733 = vmatprep.subr.bf16.mxu0 %v23724_v23  ;;  %18414 = vmatprep.subr.bf16.mxu1 %v23727_v9  ;;  %v23812_v23 = vld [vmem:[%s27350_s14 + $0x10ac] ss:$16 sps:$4 sm:$0xff]   ;;  %v23807_v9 = vld [vmem:[%s27350_s14 + $0x10a0] ss:$16 sps:$4 sm:$0xff]  }
 0x274   : > { %16734 = vmatpush1.bf16.msra.mxu0 %v23722_v27  ;;  %18415 = vmatpush1.bf16.msra.mxu1 %v23725_v29  ;;  %v23810_v27 = vld [vmem:[%s27350_s14 + $0x10a8] ss:$16 sps:$4 sm:$0xff]   ;;  %v23815_v29 = vld [vmem:[%s27350_s14 + $0x10c4] ss:$16 sps:$4 sm:$0xff]  }
 0x275   : > { %16735 = vmatprep.subr.bf16.mxu0 %v23730_v30  ;;  %18416 = vmatprep.subr.bf16.mxu1 %v23733_v31  ;;  %v23818_v30 = vld [vmem:[%s27350_s14 + $0x10cc] ss:$16 sps:$4 sm:$0xff]   ;;  %v23813_v31 = vld [vmem:[%s27350_s14 + $0x10c0] ss:$16 sps:$4 sm:$0xff]  }
 0x278   : > { %16736 = vmatpush1.bf16.msra.mxu0 %v23728_v33  ;;  %18417 = vmatpush1.bf16.msra.mxu1 %v23731_v34  ;;  %v23816_v33 = vld [vmem:[%s27350_s14 + $0x10c8] ss:$16 sps:$4 sm:$0xff]   ;;  %v23821_v34 = vld [vmem:[%s27350_s14 + $0x10e4] ss:$16 sps:$4 sm:$0xff]  }
 0x279   : > { %16737 = vmatprep.subr.bf16.mxu0 %v23736_v35  ;;  %18418 = vmatprep.subr.bf16.mxu1 %v23739_v26  ;;  %v23824_v35 = vld [vmem:[%s27350_s14 + $0x10ec] ss:$16 sps:$4 sm:$0xff]   ;;  %v23819_v26 = vld [vmem:[%s27350_s14 + $0x10e0] ss:$16 sps:$4 sm:$0xff]  }
 0x27c   : > { %16738 = vmatpush1.bf16.msra.mxu0 %v23734_v36  ;;  %18419 = vmatpush1.bf16.msra.mxu1 %v23737_v37  ;;  %v23822_v36 = vld [vmem:[%s27350_s14 + $0x10e8] ss:$16 sps:$4 sm:$0xff]   ;;  %v23827_v37 = vld [vmem:[%s27350_s14 + $0x1104] ss:$16 sps:$4 sm:$0xff]  }
 0x27d   : > { %16739 = vmatprep.subr.bf16.mxu0 %v23742_v38  ;;  %18420 = vmatprep.subr.bf16.mxu1 %v23745_v39  ;;  %v23830_v38 = vld [vmem:[%s27350_s14 + $0x110c] ss:$16 sps:$4 sm:$0xff]   ;;  %v23825_v39 = vld [vmem:[%s27350_s14 + $0x1100] ss:$16 sps:$4 sm:$0xff]  }
 0x280   : > { %16740 = vmatpush1.bf16.msra.mxu0 %v23740_v28  ;;  %18421 = vmatpush1.bf16.msra.mxu1 %v23743_v41  ;;  %v23828_v28 = vld [vmem:[%s27350_s14 + $0x1108] ss:$16 sps:$4 sm:$0xff]   ;;  %v23833_v41 = vld [vmem:[%s27350_s14 + $0x1124] ss:$16 sps:$4 sm:$0xff]  }
 0x281   : > { %16741 = vmatprep.subr.bf16.mxu0 %v23748_v44  ;;  %18422 = vmatprep.subr.bf16.mxu1 %v23751_v45  ;;  %v23836_v44 = vld [vmem:[%s27350_s14 + $0x112c] ss:$16 sps:$4 sm:$0xff]   ;;  %v23831_v45 = vld [vmem:[%s27350_s14 + $0x1120] ss:$16 sps:$4 sm:$0xff]  }
 0x284   : > { %16742 = vmatpush1.bf16.msra.mxu0 %v23746_v25  ;;  %18423 = vmatpush1.bf16.msra.mxu1 %v23749_v46  ;;  %v23834_v25 = vld [vmem:[%s27350_s14 + $0x1128] ss:$16 sps:$4 sm:$0xff]   ;;  %v23839_v46 = vld [vmem:[%s27350_s14 + $0x1144] ss:$16 sps:$4 sm:$0xff]  }
 0x285   : > { %16743 = vmatprep.subr.bf16.mxu0 %v23754_v48  ;;  %18424 = vmatprep.subr.bf16.mxu1 %v23757_v50  ;;  %v23842_v48 = vld [vmem:[%s27350_s14 + $0x114c] ss:$16 sps:$4 sm:$0xff]   ;;  %v23837_v50 = vld [vmem:[%s27350_s14 + $0x1140] ss:$16 sps:$4 sm:$0xff]  }
 0x288   : > { %16744 = vmatpush1.bf16.msra.mxu0 %v23752_v51  ;;  %18425 = vmatpush1.bf16.msra.mxu1 %v23755_v32  ;;  %v23840_v51 = vld [vmem:[%s27350_s14 + $0x1148] ss:$16 sps:$4 sm:$0xff]   ;;  %v23845_v32 = vld [vmem:[%s27350_s14 + $0x1164] ss:$16 sps:$4 sm:$0xff]  }
 0x289   : > { %16745 = vmatprep.subr.bf16.mxu0 %v23760_v52  ;;  %18426 = vmatprep.subr.bf16.mxu1 %v23763_v53  ;;  %v23848_v52 = vld [vmem:[%s27350_s14 + $0x116c] ss:$16 sps:$4 sm:$0xff]   ;;  %v23843_v53 = vld [vmem:[%s27350_s14 + $0x1160] ss:$16 sps:$4 sm:$0xff]  }
 0x28c   : > { %16746 = vmatpush1.bf16.msra.mxu0 %v23758_v54  ;;  %18427 = vmatpush1.bf16.msra.mxu1 %v23761_v55  ;;  %v23846_v54 = vld [vmem:[%s27350_s14 + $0x1168] ss:$16 sps:$4 sm:$0xff]   ;;  %v23851_v55 = vld [vmem:[%s27350_s14 + $0x1184] ss:$16 sps:$4 sm:$0xff]  }
 0x28d   : > { %16747 = vmatprep.subr.bf16.mxu0 %v23766_v42  ;;  %18428 = vmatprep.subr.bf16.mxu1 %v23769_v57  ;;  %v23854_v42 = vld [vmem:[%s27350_s14 + $0x118c] ss:$16 sps:$4 sm:$0xff]   ;;  %v23849_v57 = vld [vmem:[%s27350_s14 + $0x1180] ss:$16 sps:$4 sm:$0xff]  }
 0x290   : > { %16748 = vmatpush1.bf16.msra.mxu0 %v23764_v40  ;;  %18429 = vmatpush1.bf16.msra.mxu1 %v23767_v59  ;;  %v23852_v40 = vld [vmem:[%s27350_s14 + $0x1188] ss:$16 sps:$4 sm:$0xff]   ;;  %v23857_v59 = vld [vmem:[%s27350_s14 + $0x11a4] ss:$16 sps:$4 sm:$0xff]  }
 0x291   : > { %16749 = vmatprep.subr.bf16.mxu0 %v23772_v60  ;;  %18430 = vmatprep.subr.bf16.mxu1 %v23775_v61  ;;  %v23860_v60 = vld [vmem:[%s27350_s14 + $0x11ac] ss:$16 sps:$4 sm:$0xff]   ;;  %v23855_v61 = vld [vmem:[%s27350_s14 + $0x11a0] ss:$16 sps:$4 sm:$0xff]  }
 0x294   : > { %16750 = vmatpush1.bf16.msra.mxu0 %v23770_v63  ;;  %18431 = vmatpush1.bf16.msra.mxu1 %v23773_v0  ;;  %v23858_v63 = vld [vmem:[%s27350_s14 + $0x11a8] ss:$16 sps:$4 sm:$0xff]   ;;  %v23863_v0 = vld [vmem:[%s27350_s14 + $0x11c4] ss:$16 sps:$4 sm:$0xff]  }
 0x295   : > { %16760 = vmatprep.subr.bf16.mxu0 %v23779_v1  ;;  %18441 = vmatprep.subr.bf16.mxu1 %v23782_v47  ;;  %v23866_v1 = vld [vmem:[%s27350_s14 + $0x11cc] ss:$16 sps:$4 sm:$0xff]   ;;  %v417_v47 = vcombine.high %v27943_v58, %v27943_v58  ;;  %v23867_v58 = vld [vmem:[%s27350_s14 + $0x11e0] ss:$16 sps:$4 sm:$0xff]  }
 0x297   : > { %16752 = vmatmul.mubr.bf16.vlgmr.msra.gmra.mrb[0].mxu0 %v791_v3  ;;  %18433 = vmatmul.mubr.bf16.vlgmr.msra.gmra.mrb[0].mxu1 %v791_v3  ;;  %v23864_v3 = vld [vmem:[%s27350_s14 + $0x11c8] ss:$16 sps:$4 sm:$0xff]  }
 0x298   : > { %16761 = vmatpush1.bf16.msra.mxu0 %v23777_v4  ;;  %18442 = vmatpush1.bf16.msra.mxu1 %v23780_v5  ;;  %v23869_v4 = vld [vmem:[%s27350_s14 + $0x11e4] ss:$16 sps:$4 sm:$0xff]   ;;  %v23872_v5 = vld [vmem:[%s27350_s14 + $0x11ec] ss:$16 sps:$4 sm:$0xff]  }
 0x299   : > { %16762 = vmatprep.subr.bf16.mxu0 %v23785_v6  ;;  %18443 = vmatprep.subr.bf16.mxu1 %v23788_v7  ;;  %v28024_v6 = vrot.slane %v417_v47, %v27416_v49  ;;  %v23870_v7 = vld [vmem:[%s27350_s14 + $0x11e8] ss:$16 sps:$4 sm:$0xff]  }
 0x29a   : > { %16792 = vmatprep.mubr.bf16.mxu0 %v794_v8  ;;  %18473 = vmatprep.mubr.bf16.mxu1 %v794_v8  ;;  %v23875_v8 = vld [vmem:[%s27350_s14 + $0x1204] ss:$16 sps:$4 sm:$0xff]   ;;  %v23948_v47 = vld [vmem:[%s27350_s14 + $0x1388] ss:$16 sps:$4 sm:$0xff]  }
 0x29c   : > { %16763 = vmatpush1.bf16.msra.mxu0 %v23783_v56  ;;  %18444 = vmatpush1.bf16.msra.mxu1 %v23786_v10  ;;  %v23878_v56 = vld [vmem:[%s27350_s14 + $0x120c] ss:$16 sps:$4 sm:$0xff]   ;;  %v433_v10 = vcombine.high %v28024_v6, %v28024_v6 }
 0x29d   : > { %16764 = vmatprep.subr.bf16.mxu0 %v23791_v11  ;;  %18445 = vmatprep.subr.bf16.mxu1 %v23794_v12  ;;  %v793_v11 = vpack.c.bf16 %v27951_v62, %v27951_v62  ;;  %v23873_v12 = vld [vmem:[%s27350_s14 + $0x1200] ss:$16 sps:$4 sm:$0xff]  }
 0x29e   : > { %v23879_v62 = vld [vmem:[%s27350_s14 + $0x1220] ss:$16 sps:$4 sm:$0xff]  }
 0x2a0   : > { %16765 = vmatpush1.bf16.msra.mxu0 %v23789_v13  ;;  %18446 = vmatpush1.bf16.msra.mxu1 %v23792_v14  ;;  %v23876_v13 = vld [vmem:[%s27350_s14 + $0x1208] ss:$16 sps:$4 sm:$0xff]   ;;  %v23881_v14 = vld [vmem:[%s27350_s14 + $0x1224] ss:$16 sps:$4 sm:$0xff]  }
 0x2a1   : > { %16766 = vmatprep.subr.bf16.mxu0 %v23797_v15  ;;  %18447 = vmatprep.subr.bf16.mxu1 %v23800_v16  ;;  %v23884_v15 = vld [vmem:[%s27350_s14 + $0x122c] ss:$16 sps:$4 sm:$0xff]   ;;  %v796_v16 = vpack.c.bf16 %v433_v10, %v433_v10  ;;  %v23960_v10 = vld [vmem:[%s27350_s14 + $0x13c8] ss:$16 sps:$4 sm:$0xff]  }
 0x2a4   : > { %16767 = vmatpush1.bf16.msra.mxu0 %v23795_v17  ;;  %18448 = vmatpush1.bf16.msra.mxu1 %v23798_v18  ;;  %v23882_v17 = vld [vmem:[%s27350_s14 + $0x1228] ss:$16 sps:$4 sm:$0xff]   ;;  %v23887_v18 = vld [vmem:[%s27350_s14 + $0x1244] ss:$16 sps:$4 sm:$0xff]  }
 0x2a5   : > { %16768 = vmatprep.subr.bf16.mxu0 %v23803_v19  ;;  %18449 = vmatprep.subr.bf16.mxu1 %v23806_v20  ;;  %v23890_v19 = vld [vmem:[%s27350_s14 + $0x124c] ss:$16 sps:$4 sm:$0xff]   ;;  %v23885_v20 = vld [vmem:[%s27350_s14 + $0x1240] ss:$16 sps:$4 sm:$0xff]  }
 0x2a8   : > { %16769 = vmatpush1.bf16.msra.mxu0 %v23801_v21  ;;  %18450 = vmatpush1.bf16.msra.mxu1 %v23804_v22  ;;  %v23888_v21 = vld [vmem:[%s27350_s14 + $0x1248] ss:$16 sps:$4 sm:$0xff]   ;;  %v23893_v22 = vld [vmem:[%s27350_s14 + $0x1264] ss:$16 sps:$4 sm:$0xff]  }
 0x2a9   : > { %16770 = vmatprep.subr.bf16.mxu0 %v23809_v24  ;;  %18451 = vmatprep.subr.bf16.mxu1 %v23812_v23  ;;  %v23896_v24 = vld [vmem:[%s27350_s14 + $0x126c] ss:$16 sps:$4 sm:$0xff]   ;;  %v23891_v23 = vld [vmem:[%s27350_s14 + $0x1260] ss:$16 sps:$4 sm:$0xff]  }
 0x2ac   : > { %16771 = vmatpush1.bf16.msra.mxu0 %v23807_v9  ;;  %18452 = vmatpush1.bf16.msra.mxu1 %v23810_v27  ;;  %v23894_v9 = vld [vmem:[%s27350_s14 + $0x1268] ss:$16 sps:$4 sm:$0xff]   ;;  %v23899_v27 = vld [vmem:[%s27350_s14 + $0x1284] ss:$16 sps:$4 sm:$0xff]  }
 0x2ad   : > { %16772 = vmatprep.subr.bf16.mxu0 %v23815_v29  ;;  %18453 = vmatprep.subr.bf16.mxu1 %v23818_v30  ;;  %v23902_v29 = vld [vmem:[%s27350_s14 + $0x128c] ss:$16 sps:$4 sm:$0xff]   ;;  %v23897_v30 = vld [vmem:[%s27350_s14 + $0x1280] ss:$16 sps:$4 sm:$0xff]  }
 0x2b0   : > { %16773 = vmatpush1.bf16.msra.mxu0 %v23813_v31  ;;  %18454 = vmatpush1.bf16.msra.mxu1 %v23816_v33  ;;  %v23900_v31 = vld [vmem:[%s27350_s14 + $0x1288] ss:$16 sps:$4 sm:$0xff]   ;;  %v23905_v33 = vld [vmem:[%s27350_s14 + $0x12a4] ss:$16 sps:$4 sm:$0xff]  }
 0x2b1   : > { %16774 = vmatprep.subr.bf16.mxu0 %v23821_v34  ;;  %18455 = vmatprep.subr.bf16.mxu1 %v23824_v35  ;;  %v23908_v34 = vld [vmem:[%s27350_s14 + $0x12ac] ss:$16 sps:$4 sm:$0xff]   ;;  %v23903_v35 = vld [vmem:[%s27350_s14 + $0x12a0] ss:$16 sps:$4 sm:$0xff]  }
 0x2b4   : > { %16775 = vmatpush1.bf16.msra.mxu0 %v23819_v26  ;;  %18456 = vmatpush1.bf16.msra.mxu1 %v23822_v36  ;;  %v23906_v26 = vld [vmem:[%s27350_s14 + $0x12a8] ss:$16 sps:$4 sm:$0xff]   ;;  %v23911_v36 = vld [vmem:[%s27350_s14 + $0x12c4] ss:$16 sps:$4 sm:$0xff]  }
 0x2b5   : > { %16776 = vmatprep.subr.bf16.mxu0 %v23827_v37  ;;  %18457 = vmatprep.subr.bf16.mxu1 %v23830_v38  ;;  %v23914_v37 = vld [vmem:[%s27350_s14 + $0x12cc] ss:$16 sps:$4 sm:$0xff]   ;;  %v23909_v38 = vld [vmem:[%s27350_s14 + $0x12c0] ss:$16 sps:$4 sm:$0xff]  }
 0x2b8   : > { %16777 = vmatpush1.bf16.msra.mxu0 %v23825_v39  ;;  %18458 = vmatpush1.bf16.msra.mxu1 %v23828_v28  ;;  %v23912_v39 = vld [vmem:[%s27350_s14 + $0x12c8] ss:$16 sps:$4 sm:$0xff]   ;;  %v23917_v28 = vld [vmem:[%s27350_s14 + $0x12e4] ss:$16 sps:$4 sm:$0xff]  }
 0x2b9   : > { %16778 = vmatprep.subr.bf16.mxu0 %v23833_v41  ;;  %18459 = vmatprep.subr.bf16.mxu1 %v23836_v44  ;;  %v23920_v41 = vld [vmem:[%s27350_s14 + $0x12ec] ss:$16 sps:$4 sm:$0xff]   ;;  %v23915_v44 = vld [vmem:[%s27350_s14 + $0x12e0] ss:$16 sps:$4 sm:$0xff]  }
 0x2bc   : > { %16779 = vmatpush1.bf16.msra.mxu0 %v23831_v45  ;;  %18460 = vmatpush1.bf16.msra.mxu1 %v23834_v25  ;;  %v23918_v45 = vld [vmem:[%s27350_s14 + $0x12e8] ss:$16 sps:$4 sm:$0xff]   ;;  %v23923_v25 = vld [vmem:[%s27350_s14 + $0x1304] ss:$16 sps:$4 sm:$0xff]  }
 0x2bd   : > { %16780 = vmatprep.subr.bf16.mxu0 %v23839_v46  ;;  %18461 = vmatprep.subr.bf16.mxu1 %v23842_v48  ;;  %v23926_v46 = vld [vmem:[%s27350_s14 + $0x130c] ss:$16 sps:$4 sm:$0xff]   ;;  %v23921_v48 = vld [vmem:[%s27350_s14 + $0x1300] ss:$16 sps:$4 sm:$0xff]  }
 0x2c0   : > { %16781 = vmatpush1.bf16.msra.mxu0 %v23837_v50  ;;  %18462 = vmatpush1.bf16.msra.mxu1 %v23840_v51  ;;  %v23924_v50 = vld [vmem:[%s27350_s14 + $0x1308] ss:$16 sps:$4 sm:$0xff]   ;;  %v23929_v51 = vld [vmem:[%s27350_s14 + $0x1324] ss:$16 sps:$4 sm:$0xff]  }
 0x2c1   : > { %16782 = vmatprep.subr.bf16.mxu0 %v23845_v32  ;;  %18463 = vmatprep.subr.bf16.mxu1 %v23848_v52  ;;  %v23932_v32 = vld [vmem:[%s27350_s14 + $0x132c] ss:$16 sps:$4 sm:$0xff]   ;;  %v23927_v52 = vld [vmem:[%s27350_s14 + $0x1320] ss:$16 sps:$4 sm:$0xff]  }
 0x2c4   : > { %16783 = vmatpush1.bf16.msra.mxu0 %v23843_v53  ;;  %18464 = vmatpush1.bf16.msra.mxu1 %v23846_v54  ;;  %v23930_v53 = vld [vmem:[%s27350_s14 + $0x1328] ss:$16 sps:$4 sm:$0xff]   ;;  %v23935_v54 = vld [vmem:[%s27350_s14 + $0x1344] ss:$16 sps:$4 sm:$0xff]  }
 0x2c5   : > { %16784 = vmatprep.subr.bf16.mxu0 %v23851_v55  ;;  %18465 = vmatprep.subr.bf16.mxu1 %v23854_v42  ;;  %v23938_v55 = vld [vmem:[%s27350_s14 + $0x134c] ss:$16 sps:$4 sm:$0xff]   ;;  %v23933_v42 = vld [vmem:[%s27350_s14 + $0x1340] ss:$16 sps:$4 sm:$0xff]  }
 0x2c8   : > { %16785 = vmatpush1.bf16.msra.mxu0 %v23849_v57  ;;  %18466 = vmatpush1.bf16.msra.mxu1 %v23852_v40  ;;  %v23936_v57 = vld [vmem:[%s27350_s14 + $0x1348] ss:$16 sps:$4 sm:$0xff]   ;;  %v23941_v40 = vld [vmem:[%s27350_s14 + $0x1364] ss:$16 sps:$4 sm:$0xff]  }
 0x2c9   : > { %16786 = vmatprep.subr.bf16.mxu0 %v23857_v59  ;;  %18467 = vmatprep.subr.bf16.mxu1 %v23860_v60  ;;  %v23944_v59 = vld [vmem:[%s27350_s14 + $0x136c] ss:$16 sps:$4 sm:$0xff]   ;;  %v23939_v60 = vld [vmem:[%s27350_s14 + $0x1360] ss:$16 sps:$4 sm:$0xff]  }
 0x2cc   : > { %16787 = vmatpush1.bf16.msra.mxu0 %v23855_v61  ;;  %18468 = vmatpush1.bf16.msra.mxu1 %v23858_v63  ;;  %v23942_v61 = vld [vmem:[%s27350_s14 + $0x1368] ss:$16 sps:$4 sm:$0xff]   ;;  %v23947_v63 = vld [vmem:[%s27350_s14 + $0x1384] ss:$16 sps:$4 sm:$0xff]  }
 0x2cd   : > { %16788 = vmatprep.subr.bf16.mxu0 %v23863_v0  ;;  %18469 = vmatprep.subr.bf16.mxu1 %v23866_v1  ;;  %v23950_v0 = vld [vmem:[%s27350_s14 + $0x138c] ss:$16 sps:$4 sm:$0xff]   ;;  %v23945_v1 = vld [vmem:[%s27350_s14 + $0x1380] ss:$16 sps:$4 sm:$0xff]  }
 0x2d0   : > { %16789 = vmatpush1.bf16.msra.mxu0 %v23861_v2  ;;  %18470 = vmatpush1.bf16.msra.mxu1 %v23864_v3  ;;  %v23953_v2 = vld [vmem:[%s27350_s14 + $0x13a4] ss:$16 sps:$4 sm:$0xff]   ;;  %v23956_v3 = vld [vmem:[%s27350_s14 + $0x13ac] ss:$16 sps:$4 sm:$0xff]  }
 0x2d1   : > { %16790 = vmatprep.subr.bf16.mxu0 %v23869_v4  ;;  %18471 = vmatprep.subr.bf16.mxu1 %v23872_v5  ;;  %v23951_v4 = vld [vmem:[%s27350_s14 + $0x13a0] ss:$16 sps:$4 sm:$0xff]   ;;  %v23954_v5 = vld [vmem:[%s27350_s14 + $0x13a8] ss:$16 sps:$4 sm:$0xff]  }
 0x2d4   : > { %16791 = vmatpush1.bf16.msra.mxu0 %v23867_v58  ;;  %18472 = vmatpush1.bf16.msra.mxu1 %v23870_v7  ;;  %v23959_v58 = vld [vmem:[%s27350_s14 + $0x13c4] ss:$16 sps:$4 sm:$0xff]   ;;  %v23962_v7 = vld [vmem:[%s27350_s14 + $0x13cc] ss:$16 sps:$4 sm:$0xff]  }
 0x2d5   : > { %16801 = vmatprep.subr.bf16.mxu0 %v23875_v8  ;;  %18482 = vmatprep.subr.bf16.mxu1 %v23878_v56  ;;  %v28090_v8 = vld [vmem:[#allocation2 + $0x28] sm:$0xff]  ;;  %v23957_v56 = vld [vmem:[%s27350_s14 + $0x13c0] ss:$16 sps:$4 sm:$0xff]  }
 0x2d7   : > { %16793 = vmatmul.mubr.bf16.vlgmr.msra.gmra.mrb[0].mxu0 %v793_v11  ;;  %18474 = vmatmul.mubr.bf16.vlgmr.msra.gmra.mrb[0].mxu1 %v793_v11  ;;  %v23965_v11 = vld [vmem:[%s27350_s14 + $0x13e4] ss:$16 sps:$4 sm:$0xff]  }
 0x2d8   : > { %16802 = vmatpush1.bf16.msra.mxu0 %v23873_v12  ;;  %18483 = vmatpush1.bf16.msra.mxu1 %v23876_v13  ;;  %v23968_v12 = vld [vmem:[%s27350_s14 + $0x13ec] ss:$16 sps:$4 sm:$0xff]   ;;  %v28098_v13 = vrot.slane %v28090_v8, %v27416_v49 }
 0x2d9   : > { %16803 = vmatprep.subr.bf16.mxu0 %v23881_v14  ;;  %18484 = vmatprep.subr.bf16.mxu1 %v23884_v15  ;;  %v23963_v14 = vld [vmem:[%s27350_s14 + $0x13e0] ss:$16 sps:$4 sm:$0xff]   ;;  %v23966_v15 = vld [vmem:[%s27350_s14 + $0x13e8] ss:$16 sps:$4 sm:$0xff]  }
 0x2da   : > { %16833 = vmatprep.mubr.bf16.mxu0 %v796_v16  ;;  %18514 = vmatprep.mubr.bf16.mxu1 %v796_v16  ;;  %v23972_v16 = vld [vmem:[%s27350_s14 + $0x1404] ss:$16 sps:$4 sm:$0xff]  }
 0x2dc   : > { %16804 = vmatpush1.bf16.msra.mxu0 %v23879_v62  ;;  %18485 = vmatpush1.bf16.msra.mxu1 %v23882_v17  ;;  %v23975_v62 = vld [vmem:[%s27350_s14 + $0x140c] ss:$16 sps:$4 sm:$0xff]   ;;  %v449_v17 = vcombine.high %v28098_v13, %v28098_v13 }
 0x2dd   : > { %16805 = vmatprep.subr.bf16.mxu0 %v23887_v18  ;;  %18486 = vmatprep.subr.bf16.mxu1 %v23890_v19  ;;  %v795_v18 = vpack.c.bf16 %v28024_v6, %v28024_v6  ;;  %v23970_v19 = vld [vmem:[%s27350_s14 + $0x1400] ss:$16 sps:$4 sm:$0xff]  }
 0x2de   : > { %v23976_v6 = vld [vmem:[%s27350_s14 + $0x1420] ss:$16 sps:$4 sm:$0xff]  }
 0x2e0   : > { %16806 = vmatpush1.bf16.msra.mxu0 %v23885_v20  ;;  %18487 = vmatpush1.bf16.msra.mxu1 %v23888_v21  ;;  %v23973_v20 = vld [vmem:[%s27350_s14 + $0x1408] ss:$16 sps:$4 sm:$0xff]   ;;  %v23978_v21 = vld [vmem:[%s27350_s14 + $0x1424] ss:$16 sps:$4 sm:$0xff]  }
 0x2e1   : > { %16807 = vmatprep.subr.bf16.mxu0 %v23893_v22  ;;  %18488 = vmatprep.subr.bf16.mxu1 %v23896_v24  ;;  %v23981_v22 = vld [vmem:[%s27350_s14 + $0x142c] ss:$16 sps:$4 sm:$0xff]   ;;  %v798_v24 = vpack.c.bf16 %v449_v17, %v449_v17  ;;  %v24054_v17 = vld [vmem:[%s27350_s14 + $0x15c0] ss:$16 sps:$4 sm:$0xff]  }
 0x2e4   : > { %16808 = vmatpush1.bf16.msra.mxu0 %v23891_v23  ;;  %18489 = vmatpush1.bf16.msra.mxu1 %v23894_v9  ;;  %v23979_v23 = vld [vmem:[%s27350_s14 + $0x1428] ss:$16 sps:$4 sm:$0xff]   ;;  %v23984_v9 = vld [vmem:[%s27350_s14 + $0x1444] ss:$16 sps:$4 sm:$0xff]  }
 0x2e5   : > { %16809 = vmatprep.subr.bf16.mxu0 %v23899_v27  ;;  %18490 = vmatprep.subr.bf16.mxu1 %v23902_v29  ;;  %v23987_v27 = vld [vmem:[%s27350_s14 + $0x144c] ss:$16 sps:$4 sm:$0xff]   ;;  %v23982_v29 = vld [vmem:[%s27350_s14 + $0x1440] ss:$16 sps:$4 sm:$0xff]  }
 0x2e8   : > { %16810 = vmatpush1.bf16.msra.mxu0 %v23897_v30  ;;  %18491 = vmatpush1.bf16.msra.mxu1 %v23900_v31  ;;  %v23985_v30 = vld [vmem:[%s27350_s14 + $0x1448] ss:$16 sps:$4 sm:$0xff]   ;;  %v23990_v31 = vld [vmem:[%s27350_s14 + $0x1464] ss:$16 sps:$4 sm:$0xff]  }
 0x2e9   : > { %16811 = vmatprep.subr.bf16.mxu0 %v23905_v33  ;;  %18492 = vmatprep.subr.bf16.mxu1 %v23908_v34  ;;  %v23993_v33 = vld [vmem:[%s27350_s14 + $0x146c] ss:$16 sps:$4 sm:$0xff]   ;;  %v23988_v34 = vld [vmem:[%s27350_s14 + $0x1460] ss:$16 sps:$4 sm:$0xff]  }
 0x2ec   : > { %16812 = vmatpush1.bf16.msra.mxu0 %v23903_v35  ;;  %18493 = vmatpush1.bf16.msra.mxu1 %v23906_v26  ;;  %v23991_v35 = vld [vmem:[%s27350_s14 + $0x1468] ss:$16 sps:$4 sm:$0xff]   ;;  %v23996_v26 = vld [vmem:[%s27350_s14 + $0x1484] ss:$16 sps:$4 sm:$0xff]  }
 0x2ed   : > { %16813 = vmatprep.subr.bf16.mxu0 %v23911_v36  ;;  %18494 = vmatprep.subr.bf16.mxu1 %v23914_v37  ;;  %v23999_v36 = vld [vmem:[%s27350_s14 + $0x148c] ss:$16 sps:$4 sm:$0xff]   ;;  %v23994_v37 = vld [vmem:[%s27350_s14 + $0x1480] ss:$16 sps:$4 sm:$0xff]  }
 0x2f0   : > { %16814 = vmatpush1.bf16.msra.mxu0 %v23909_v38  ;;  %18495 = vmatpush1.bf16.msra.mxu1 %v23912_v39  ;;  %v23997_v38 = vld [vmem:[%s27350_s14 + $0x1488] ss:$16 sps:$4 sm:$0xff]   ;;  %v24002_v39 = vld [vmem:[%s27350_s14 + $0x14a4] ss:$16 sps:$4 sm:$0xff]  }
 0x2f1   : > { %16815 = vmatprep.subr.bf16.mxu0 %v23917_v28  ;;  %18496 = vmatprep.subr.bf16.mxu1 %v23920_v41  ;;  %v24005_v28 = vld [vmem:[%s27350_s14 + $0x14ac] ss:$16 sps:$4 sm:$0xff]   ;;  %v24000_v41 = vld [vmem:[%s27350_s14 + $0x14a0] ss:$16 sps:$4 sm:$0xff]  }
 0x2f4   : > { %16816 = vmatpush1.bf16.msra.mxu0 %v23915_v44  ;;  %18497 = vmatpush1.bf16.msra.mxu1 %v23918_v45  ;;  %v24003_v44 = vld [vmem:[%s27350_s14 + $0x14a8] ss:$16 sps:$4 sm:$0xff]   ;;  %v24008_v45 = vld [vmem:[%s27350_s14 + $0x14c4] ss:$16 sps:$4 sm:$0xff]  }
 0x2f5   : > { %16817 = vmatprep.subr.bf16.mxu0 %v23923_v25  ;;  %18498 = vmatprep.subr.bf16.mxu1 %v23926_v46  ;;  %v24011_v25 = vld [vmem:[%s27350_s14 + $0x14cc] ss:$16 sps:$4 sm:$0xff]   ;;  %v24006_v46 = vld [vmem:[%s27350_s14 + $0x14c0] ss:$16 sps:$4 sm:$0xff]  }
 0x2f8   : > { %16818 = vmatpush1.bf16.msra.mxu0 %v23921_v48  ;;  %18499 = vmatpush1.bf16.msra.mxu1 %v23924_v50  ;;  %v24009_v48 = vld [vmem:[%s27350_s14 + $0x14c8] ss:$16 sps:$4 sm:$0xff]   ;;  %v24014_v50 = vld [vmem:[%s27350_s14 + $0x14e4] ss:$16 sps:$4 sm:$0xff]  }
 0x2f9   : > { %16819 = vmatprep.subr.bf16.mxu0 %v23929_v51  ;;  %18500 = vmatprep.subr.bf16.mxu1 %v23932_v32  ;;  %v24017_v51 = vld [vmem:[%s27350_s14 + $0x14ec] ss:$16 sps:$4 sm:$0xff]   ;;  %v24012_v32 = vld [vmem:[%s27350_s14 + $0x14e0] ss:$16 sps:$4 sm:$0xff]  }
 0x2fc   : > { %16820 = vmatpush1.bf16.msra.mxu0 %v23927_v52  ;;  %18501 = vmatpush1.bf16.msra.mxu1 %v23930_v53  ;;  %v24015_v52 = vld [vmem:[%s27350_s14 + $0x14e8] ss:$16 sps:$4 sm:$0xff]   ;;  %v24020_v53 = vld [vmem:[%s27350_s14 + $0x1504] ss:$16 sps:$4 sm:$0xff]  }
 0x2fd   : > { %16821 = vmatprep.subr.bf16.mxu0 %v23935_v54  ;;  %18502 = vmatprep.subr.bf16.mxu1 %v23938_v55  ;;  %v24023_v54 = vld [vmem:[%s27350_s14 + $0x150c] ss:$16 sps:$4 sm:$0xff]   ;;  %v24018_v55 = vld [vmem:[%s27350_s14 + $0x1500] ss:$16 sps:$4 sm:$0xff]  }
 0x300   : > { %16822 = vmatpush1.bf16.msra.mxu0 %v23933_v42  ;;  %18503 = vmatpush1.bf16.msra.mxu1 %v23936_v57  ;;  %v24021_v42 = vld [vmem:[%s27350_s14 + $0x1508] ss:$16 sps:$4 sm:$0xff]   ;;  %v24026_v57 = vld [vmem:[%s27350_s14 + $0x1524] ss:$16 sps:$4 sm:$0xff]  }
 0x301   : > { %16823 = vmatprep.subr.bf16.mxu0 %v23941_v40  ;;  %18504 = vmatprep.subr.bf16.mxu1 %v23944_v59  ;;  %v24029_v40 = vld [vmem:[%s27350_s14 + $0x152c] ss:$16 sps:$4 sm:$0xff]   ;;  %v24024_v59 = vld [vmem:[%s27350_s14 + $0x1520] ss:$16 sps:$4 sm:$0xff]  }
 0x304   : > { %16824 = vmatpush1.bf16.msra.mxu0 %v23939_v60  ;;  %18505 = vmatpush1.bf16.msra.mxu1 %v23942_v61  ;;  %v24027_v60 = vld [vmem:[%s27350_s14 + $0x1528] ss:$16 sps:$4 sm:$0xff]   ;;  %v24032_v61 = vld [vmem:[%s27350_s14 + $0x1544] ss:$16 sps:$4 sm:$0xff]  }
 0x305   : > { %16825 = vmatprep.subr.bf16.mxu0 %v23947_v63  ;;  %18506 = vmatprep.subr.bf16.mxu1 %v23950_v0  ;;  %v24035_v63 = vld [vmem:[%s27350_s14 + $0x154c] ss:$16 sps:$4 sm:$0xff]   ;;  %v24030_v0 = vld [vmem:[%s27350_s14 + $0x1540] ss:$16 sps:$4 sm:$0xff]  }
 0x308   : > { %16826 = vmatpush1.bf16.msra.mxu0 %v23945_v1  ;;  %18507 = vmatpush1.bf16.msra.mxu1 %v23948_v47  ;;  %v24033_v1 = vld [vmem:[%s27350_s14 + $0x1548] ss:$16 sps:$4 sm:$0xff]   ;;  %v24038_v47 = vld [vmem:[%s27350_s14 + $0x1564] ss:$16 sps:$4 sm:$0xff]  }
 0x309   : > { %16827 = vmatprep.subr.bf16.mxu0 %v23953_v2  ;;  %18508 = vmatprep.subr.bf16.mxu1 %v23956_v3  ;;  %v24041_v2 = vld [vmem:[%s27350_s14 + $0x156c] ss:$16 sps:$4 sm:$0xff]   ;;  %v24036_v3 = vld [vmem:[%s27350_s14 + $0x1560] ss:$16 sps:$4 sm:$0xff]  }
 0x30c   : > { %16828 = vmatpush1.bf16.msra.mxu0 %v23951_v4  ;;  %18509 = vmatpush1.bf16.msra.mxu1 %v23954_v5  ;;  %v24039_v4 = vld [vmem:[%s27350_s14 + $0x1568] ss:$16 sps:$4 sm:$0xff]   ;;  %v24044_v5 = vld [vmem:[%s27350_s14 + $0x1584] ss:$16 sps:$4 sm:$0xff]  }
 0x30d   : > { %16829 = vmatprep.subr.bf16.mxu0 %v23959_v58  ;;  %18510 = vmatprep.subr.bf16.mxu1 %v23962_v7  ;;  %v24047_v58 = vld [vmem:[%s27350_s14 + $0x158c] ss:$16 sps:$4 sm:$0xff]   ;;  %v24042_v7 = vld [vmem:[%s27350_s14 + $0x1580] ss:$16 sps:$4 sm:$0xff]  }
 0x310   : > { %16830 = vmatpush1.bf16.msra.mxu0 %v23957_v56  ;;  %18511 = vmatpush1.bf16.msra.mxu1 %v23960_v10  ;;  %v24045_v56 = vld [vmem:[%s27350_s14 + $0x1588] ss:$16 sps:$4 sm:$0xff]   ;;  %v24050_v10 = vld [vmem:[%s27350_s14 + $0x15a4] ss:$16 sps:$4 sm:$0xff]  }
 0x311   : > { %16831 = vmatprep.subr.bf16.mxu0 %v23965_v11  ;;  %18512 = vmatprep.subr.bf16.mxu1 %v23968_v12  ;;  %v24053_v11 = vld [vmem:[%s27350_s14 + $0x15ac] ss:$16 sps:$4 sm:$0xff]   ;;  %v24048_v12 = vld [vmem:[%s27350_s14 + $0x15a0] ss:$16 sps:$4 sm:$0xff]  }
 0x314   : > { %16832 = vmatpush1.bf16.msra.mxu0 %v23963_v14  ;;  %18513 = vmatpush1.bf16.msra.mxu1 %v23966_v15  ;;  %v24051_v14 = vld [vmem:[%s27350_s14 + $0x15a8] ss:$16 sps:$4 sm:$0xff]   ;;  %v24056_v15 = vld [vmem:[%s27350_s14 + $0x15c4] ss:$16 sps:$4 sm:$0xff]  }
 0x315   : > { %16842 = vmatprep.subr.bf16.mxu0 %v23972_v16  ;;  %18523 = vmatprep.subr.bf16.mxu1 %v23975_v62  ;;  %v24059_v16 = vld [vmem:[%s27350_s14 + $0x15cc] ss:$16 sps:$4 sm:$0xff]   ;;  %v434_v62 = vcombine.high %v28090_v8, %v28090_v8  ;;  %v24060_v8 = vld [vmem:[%s27350_s14 + $0x15e0] ss:$16 sps:$4 sm:$0xff]  }
 0x317   : > { %16834 = vmatmul.mubr.bf16.vlgmr.msra.gmra.mrb[0].mxu0 %v795_v18  ;;  %18515 = vmatmul.mubr.bf16.vlgmr.msra.gmra.mrb[0].mxu1 %v795_v18  ;;  %v24057_v18 = vld [vmem:[%s27350_s14 + $0x15c8] ss:$16 sps:$4 sm:$0xff]  }
 0x318   : > { %16843 = vmatpush1.bf16.msra.mxu0 %v23970_v19  ;;  %18524 = vmatpush1.bf16.msra.mxu1 %v23973_v20  ;;  %v24062_v19 = vld [vmem:[%s27350_s14 + $0x15e4] ss:$16 sps:$4 sm:$0xff]   ;;  %v24065_v20 = vld [vmem:[%s27350_s14 + $0x15ec] ss:$16 sps:$4 sm:$0xff]  }
 0x319   : > { %16844 = vmatprep.subr.bf16.mxu0 %v23978_v21  ;;  %18525 = vmatprep.subr.bf16.mxu1 %v23981_v22  ;;  %v28171_v21 = vrot.slane %v434_v62, %v27416_v49  ;;  %v24063_v22 = vld [vmem:[%s27350_s14 + $0x15e8] ss:$16 sps:$4 sm:$0xff]  }
 0x31a   : > { %16874 = vmatprep.mubr.bf16.mxu0 %v798_v24  ;;  %18555 = vmatprep.mubr.bf16.mxu1 %v798_v24  ;;  %v24068_v24 = vld [vmem:[%s27350_s14 + $0x1604] ss:$16 sps:$4 sm:$0xff]   ;;  %v24141_v62 = vld [vmem:[%s27350_s14 + $0x1788] ss:$16 sps:$4 sm:$0xff]  }
 0x31c   : > { %16845 = vmatpush1.bf16.msra.mxu0 %v23976_v6  ;;  %18526 = vmatpush1.bf16.msra.mxu1 %v23979_v23  ;;  %v24071_v6 = vld [vmem:[%s27350_s14 + $0x160c] ss:$16 sps:$4 sm:$0xff]   ;;  %v450_v23 = vcombine.high %v28171_v21, %v28171_v21 }
 0x31d   : > { %16846 = vmatprep.subr.bf16.mxu0 %v23984_v9  ;;  %18527 = vmatprep.subr.bf16.mxu1 %v23987_v27  ;;  %v797_v9 = vpack.c.bf16 %v28098_v13, %v28098_v13  ;;  %v24066_v27 = vld [vmem:[%s27350_s14 + $0x1600] ss:$16 sps:$4 sm:$0xff]  }
 0x31e   : > { %v24072_v13 = vld [vmem:[%s27350_s14 + $0x1620] ss:$16 sps:$4 sm:$0xff]  }
 0x320   : > { %16847 = vmatpush1.bf16.msra.mxu0 %v23982_v29  ;;  %18528 = vmatpush1.bf16.msra.mxu1 %v23985_v30  ;;  %v24069_v29 = vld [vmem:[%s27350_s14 + $0x1608] ss:$16 sps:$4 sm:$0xff]   ;;  %v24074_v30 = vld [vmem:[%s27350_s14 + $0x1624] ss:$16 sps:$4 sm:$0xff]  }
 0x321   : > { %16848 = vmatprep.subr.bf16.mxu0 %v23990_v31  ;;  %18529 = vmatprep.subr.bf16.mxu1 %v23993_v33  ;;  %v24077_v31 = vld [vmem:[%s27350_s14 + $0x162c] ss:$16 sps:$4 sm:$0xff]   ;;  %v800_v33 = vpack.c.bf16 %v450_v23, %v450_v23  ;;  %v24153_v23 = vld [vmem:[%s27350_s14 + $0x17c8] ss:$16 sps:$4 sm:$0xff]  }
 0x324   : > { %16849 = vmatpush1.bf16.msra.mxu0 %v23988_v34  ;;  %18530 = vmatpush1.bf16.msra.mxu1 %v23991_v35  ;;  %v24075_v34 = vld [vmem:[%s27350_s14 + $0x1628] ss:$16 sps:$4 sm:$0xff]   ;;  %v24080_v35 = vld [vmem:[%s27350_s14 + $0x1644] ss:$16 sps:$4 sm:$0xff]  }
 0x325   : > { %16850 = vmatprep.subr.bf16.mxu0 %v23996_v26  ;;  %18531 = vmatprep.subr.bf16.mxu1 %v23999_v36  ;;  %v24083_v26 = vld [vmem:[%s27350_s14 + $0x164c] ss:$16 sps:$4 sm:$0xff]   ;;  %v24078_v36 = vld [vmem:[%s27350_s14 + $0x1640] ss:$16 sps:$4 sm:$0xff]  }
 0x328   : > { %16851 = vmatpush1.bf16.msra.mxu0 %v23994_v37  ;;  %18532 = vmatpush1.bf16.msra.mxu1 %v23997_v38  ;;  %v24081_v37 = vld [vmem:[%s27350_s14 + $0x1648] ss:$16 sps:$4 sm:$0xff]   ;;  %v24086_v38 = vld [vmem:[%s27350_s14 + $0x1664] ss:$16 sps:$4 sm:$0xff]  }
 0x329   : > { %16852 = vmatprep.subr.bf16.mxu0 %v24002_v39  ;;  %18533 = vmatprep.subr.bf16.mxu1 %v24005_v28  ;;  %v24089_v39 = vld [vmem:[%s27350_s14 + $0x166c] ss:$16 sps:$4 sm:$0xff]   ;;  %v24084_v28 = vld [vmem:[%s27350_s14 + $0x1660] ss:$16 sps:$4 sm:$0xff]  }
 0x32c   : > { %16853 = vmatpush1.bf16.msra.mxu0 %v24000_v41  ;;  %18534 = vmatpush1.bf16.msra.mxu1 %v24003_v44  ;;  %v24087_v41 = vld [vmem:[%s27350_s14 + $0x1668] ss:$16 sps:$4 sm:$0xff]   ;;  %v24092_v44 = vld [vmem:[%s27350_s14 + $0x1684] ss:$16 sps:$4 sm:$0xff]  }
 0x32d   : > { %16854 = vmatprep.subr.bf16.mxu0 %v24008_v45  ;;  %18535 = vmatprep.subr.bf16.mxu1 %v24011_v25  ;;  %v24095_v45 = vld [vmem:[%s27350_s14 + $0x168c] ss:$16 sps:$4 sm:$0xff]   ;;  %v24090_v25 = vld [vmem:[%s27350_s14 + $0x1680] ss:$16 sps:$4 sm:$0xff]  }
 0x330   : > { %16855 = vmatpush1.bf16.msra.mxu0 %v24006_v46  ;;  %18536 = vmatpush1.bf16.msra.mxu1 %v24009_v48  ;;  %v24093_v46 = vld [vmem:[%s27350_s14 + $0x1688] ss:$16 sps:$4 sm:$0xff]   ;;  %v24098_v48 = vld [vmem:[%s27350_s14 + $0x16a4] ss:$16 sps:$4 sm:$0xff]  }
 0x331   : > { %16856 = vmatprep.subr.bf16.mxu0 %v24014_v50  ;;  %18537 = vmatprep.subr.bf16.mxu1 %v24017_v51  ;;  %v24101_v50 = vld [vmem:[%s27350_s14 + $0x16ac] ss:$16 sps:$4 sm:$0xff]   ;;  %v24096_v51 = vld [vmem:[%s27350_s14 + $0x16a0] ss:$16 sps:$4 sm:$0xff]  }
 0x334   : > { %16857 = vmatpush1.bf16.msra.mxu0 %v24012_v32  ;;  %18538 = vmatpush1.bf16.msra.mxu1 %v24015_v52  ;;  %v24099_v32 = vld [vmem:[%s27350_s14 + $0x16a8] ss:$16 sps:$4 sm:$0xff]   ;;  %v24104_v52 = vld [vmem:[%s27350_s14 + $0x16c4] ss:$16 sps:$4 sm:$0xff]  }
 0x335   : > { %16858 = vmatprep.subr.bf16.mxu0 %v24020_v53  ;;  %18539 = vmatprep.subr.bf16.mxu1 %v24023_v54  ;;  %v24107_v53 = vld [vmem:[%s27350_s14 + $0x16cc] ss:$16 sps:$4 sm:$0xff]   ;;  %v24102_v54 = vld [vmem:[%s27350_s14 + $0x16c0] ss:$16 sps:$4 sm:$0xff]  }
 0x338   : > { %16859 = vmatpush1.bf16.msra.mxu0 %v24018_v55  ;;  %18540 = vmatpush1.bf16.msra.mxu1 %v24021_v42  ;;  %v24105_v55 = vld [vmem:[%s27350_s14 + $0x16c8] ss:$16 sps:$4 sm:$0xff]   ;;  %v24110_v42 = vld [vmem:[%s27350_s14 + $0x16e4] ss:$16 sps:$4 sm:$0xff]  }
 0x339   : > { %16860 = vmatprep.subr.bf16.mxu0 %v24026_v57  ;;  %18541 = vmatprep.subr.bf16.mxu1 %v24029_v40  ;;  %v24113_v57 = vld [vmem:[%s27350_s14 + $0x16ec] ss:$16 sps:$4 sm:$0xff]   ;;  %v24108_v40 = vld [vmem:[%s27350_s14 + $0x16e0] ss:$16 sps:$4 sm:$0xff]  }
 0x33c   : > { %16861 = vmatpush1.bf16.msra.mxu0 %v24024_v59  ;;  %18542 = vmatpush1.bf16.msra.mxu1 %v24027_v60  ;;  %v24111_v59 = vld [vmem:[%s27350_s14 + $0x16e8] ss:$16 sps:$4 sm:$0xff]   ;;  %v24116_v60 = vld [vmem:[%s27350_s14 + $0x1704] ss:$16 sps:$4 sm:$0xff]  }
 0x33d   : > { %16862 = vmatprep.subr.bf16.mxu0 %v24032_v61  ;;  %18543 = vmatprep.subr.bf16.mxu1 %v24035_v63  ;;  %v24119_v61 = vld [vmem:[%s27350_s14 + $0x170c] ss:$16 sps:$4 sm:$0xff]   ;;  %v24114_v63 = vld [vmem:[%s27350_s14 + $0x1700] ss:$16 sps:$4 sm:$0xff]  }
 0x340   : > { %16863 = vmatpush1.bf16.msra.mxu0 %v24030_v0  ;;  %18544 = vmatpush1.bf16.msra.mxu1 %v24033_v1  ;;  %v24117_v0 = vld [vmem:[%s27350_s14 + $0x1708] ss:$16 sps:$4 sm:$0xff]   ;;  %v24122_v1 = vld [vmem:[%s27350_s14 + $0x1724] ss:$16 sps:$4 sm:$0xff]  }
 0x341   : > { %16864 = vmatprep.subr.bf16.mxu0 %v24038_v47  ;;  %18545 = vmatprep.subr.bf16.mxu1 %v24041_v2  ;;  %v24125_v47 = vld [vmem:[%s27350_s14 + $0x172c] ss:$16 sps:$4 sm:$0xff]   ;;  %v24120_v2 = vld [vmem:[%s27350_s14 + $0x1720] ss:$16 sps:$4 sm:$0xff]  }
 0x344   : > { %16865 = vmatpush1.bf16.msra.mxu0 %v24036_v3  ;;  %18546 = vmatpush1.bf16.msra.mxu1 %v24039_v4  ;;  %v24123_v3 = vld [vmem:[%s27350_s14 + $0x1728] ss:$16 sps:$4 sm:$0xff]   ;;  %v24128_v4 = vld [vmem:[%s27350_s14 + $0x1744] ss:$16 sps:$4 sm:$0xff]  }
 0x345   : > { %16866 = vmatprep.subr.bf16.mxu0 %v24044_v5  ;;  %18547 = vmatprep.subr.bf16.mxu1 %v24047_v58  ;;  %v24131_v5 = vld [vmem:[%s27350_s14 + $0x174c] ss:$16 sps:$4 sm:$0xff]   ;;  %v24126_v58 = vld [vmem:[%s27350_s14 + $0x1740] ss:$16 sps:$4 sm:$0xff]  }
 0x348   : > { %16867 = vmatpush1.bf16.msra.mxu0 %v24042_v7  ;;  %18548 = vmatpush1.bf16.msra.mxu1 %v24045_v56  ;;  %v24129_v7 = vld [vmem:[%s27350_s14 + $0x1748] ss:$16 sps:$4 sm:$0xff]   ;;  %v24134_v56 = vld [vmem:[%s27350_s14 + $0x1764] ss:$16 sps:$4 sm:$0xff]  }
 0x349   : > { %16868 = vmatprep.subr.bf16.mxu0 %v24050_v10  ;;  %18549 = vmatprep.subr.bf16.mxu1 %v24053_v11  ;;  %v24137_v10 = vld [vmem:[%s27350_s14 + $0x176c] ss:$16 sps:$4 sm:$0xff]   ;;  %v24132_v11 = vld [vmem:[%s27350_s14 + $0x1760] ss:$16 sps:$4 sm:$0xff]  }
 0x34c   : > { %16869 = vmatpush1.bf16.msra.mxu0 %v24048_v12  ;;  %18550 = vmatpush1.bf16.msra.mxu1 %v24051_v14  ;;  %v24135_v12 = vld [vmem:[%s27350_s14 + $0x1768] ss:$16 sps:$4 sm:$0xff]   ;;  %v24140_v14 = vld [vmem:[%s27350_s14 + $0x1784] ss:$16 sps:$4 sm:$0xff]  }
 0x34d   : > { %16870 = vmatprep.subr.bf16.mxu0 %v24056_v15  ;;  %18551 = vmatprep.subr.bf16.mxu1 %v24059_v16  ;;  %v24143_v15 = vld [vmem:[%s27350_s14 + $0x178c] ss:$16 sps:$4 sm:$0xff]   ;;  %v24138_v16 = vld [vmem:[%s27350_s14 + $0x1780] ss:$16 sps:$4 sm:$0xff]  }
 0x350   : > { %16871 = vmatpush1.bf16.msra.mxu0 %v24054_v17  ;;  %18552 = vmatpush1.bf16.msra.mxu1 %v24057_v18  ;;  %v24146_v17 = vld [vmem:[%s27350_s14 + $0x17a4] ss:$16 sps:$4 sm:$0xff]   ;;  %v24149_v18 = vld [vmem:[%s27350_s14 + $0x17ac] ss:$16 sps:$4 sm:$0xff]  }
 0x351   : > { %16872 = vmatprep.subr.bf16.mxu0 %v24062_v19  ;;  %18553 = vmatprep.subr.bf16.mxu1 %v24065_v20  ;;  %v24144_v19 = vld [vmem:[%s27350_s14 + $0x17a0] ss:$16 sps:$4 sm:$0xff]   ;;  %v24147_v20 = vld [vmem:[%s27350_s14 + $0x17a8] ss:$16 sps:$4 sm:$0xff]  }
 0x354   : > { %16873 = vmatpush1.bf16.msra.mxu0 %v24060_v8  ;;  %18554 = vmatpush1.bf16.msra.mxu1 %v24063_v22  ;;  %v24152_v8 = vld [vmem:[%s27350_s14 + $0x17c4] ss:$16 sps:$4 sm:$0xff]   ;;  %v24155_v22 = vld [vmem:[%s27350_s14 + $0x17cc] ss:$16 sps:$4 sm:$0xff]  }
 0x355   : > { %16883 = vmatprep.subr.bf16.mxu0 %v24068_v24  ;;  %18564 = vmatprep.subr.bf16.mxu1 %v24071_v6  ;;  %v28237_v24 = vld [vmem:[#allocation2 + $0x30] sm:$0xff] }
 0x356   : > { %v24150_v6 = vld [vmem:[%s27350_s14 + $0x17c0] ss:$16 sps:$4 sm:$0xff]  }
 0x357   : > { %16875 = vmatmul.mubr.bf16.vlgmr.msra.gmra.mrb[0].mxu0 %v797_v9  ;;  %18556 = vmatmul.mubr.bf16.vlgmr.msra.gmra.mrb[0].mxu1 %v797_v9  ;;  %v24158_v9 = vld [vmem:[%s27350_s14 + $0x17e4] ss:$16 sps:$4 sm:$0xff]  }
 0x358   : > { %16884 = vmatpush1.bf16.msra.mxu0 %v24066_v27  ;;  %18565 = vmatpush1.bf16.msra.mxu1 %v24069_v29  ;;  %v24161_v27 = vld [vmem:[%s27350_s14 + $0x17ec] ss:$16 sps:$4 sm:$0xff]   ;;  %v28245_v29 = vrot.slane %v28237_v24, %v27416_v49 }
 0x359   : > { %16885 = vmatprep.subr.bf16.mxu0 %v24074_v30  ;;  %18566 = vmatprep.subr.bf16.mxu1 %v24077_v31  ;;  %v24156_v30 = vld [vmem:[%s27350_s14 + $0x17e0] ss:$16 sps:$4 sm:$0xff]   ;;  %v24159_v31 = vld [vmem:[%s27350_s14 + $0x17e8] ss:$16 sps:$4 sm:$0xff]  }
 0x35a   : > { %16915 = vmatprep.mubr.bf16.mxu0 %v800_v33  ;;  %18596 = vmatprep.mubr.bf16.mxu1 %v800_v33  ;;  %v24165_v33 = vld [vmem:[%s27350_s14 + $0x1804] ss:$16 sps:$4 sm:$0xff]  }
 0x35c   : > { %16886 = vmatpush1.bf16.msra.mxu0 %v24072_v13  ;;  %18567 = vmatpush1.bf16.msra.mxu1 %v24075_v34  ;;  %v24168_v13 = vld [vmem:[%s27350_s14 + $0x180c] ss:$16 sps:$4 sm:$0xff]   ;;  %v466_v34 = vcombine.high %v28245_v29, %v28245_v29 }
 0x35d   : > { %16887 = vmatprep.subr.bf16.mxu0 %v24080_v35  ;;  %18568 = vmatprep.subr.bf16.mxu1 %v24083_v26  ;;  %v799_v35 = vpack.c.bf16 %v28171_v21, %v28171_v21  ;;  %v24163_v26 = vld [vmem:[%s27350_s14 + $0x1800] ss:$16 sps:$4 sm:$0xff]  }
 0x35e   : > { %v24169_v21 = vld [vmem:[%s27350_s14 + $0x1820] ss:$16 sps:$4 sm:$0xff]  }
 0x360   : > { %16888 = vmatpush1.bf16.msra.mxu0 %v24078_v36  ;;  %18569 = vmatpush1.bf16.msra.mxu1 %v24081_v37  ;;  %v24166_v36 = vld [vmem:[%s27350_s14 + $0x1808] ss:$16 sps:$4 sm:$0xff]   ;;  %v24171_v37 = vld [vmem:[%s27350_s14 + $0x1824] ss:$16 sps:$4 sm:$0xff]  }
 0x361   : > { %16889 = vmatprep.subr.bf16.mxu0 %v24086_v38  ;;  %18570 = vmatprep.subr.bf16.mxu1 %v24089_v39  ;;  %v24174_v38 = vld [vmem:[%s27350_s14 + $0x182c] ss:$16 sps:$4 sm:$0xff]   ;;  %v802_v39 = vpack.c.bf16 %v466_v34, %v466_v34  ;;  %v24247_v34 = vld [vmem:[%s27350_s14 + $0x19c0] ss:$16 sps:$4 sm:$0xff]  }
 0x364   : > { %16890 = vmatpush1.bf16.msra.mxu0 %v24084_v28  ;;  %18571 = vmatpush1.bf16.msra.mxu1 %v24087_v41  ;;  %v24172_v28 = vld [vmem:[%s27350_s14 + $0x1828] ss:$16 sps:$4 sm:$0xff]   ;;  %v24177_v41 = vld [vmem:[%s27350_s14 + $0x1844] ss:$16 sps:$4 sm:$0xff]  }
 0x365   : > { %16891 = vmatprep.subr.bf16.mxu0 %v24092_v44  ;;  %18572 = vmatprep.subr.bf16.mxu1 %v24095_v45  ;;  %v24180_v44 = vld [vmem:[%s27350_s14 + $0x184c] ss:$16 sps:$4 sm:$0xff]   ;;  %v24175_v45 = vld [vmem:[%s27350_s14 + $0x1840] ss:$16 sps:$4 sm:$0xff]  }
 0x368   : > { %16892 = vmatpush1.bf16.msra.mxu0 %v24090_v25  ;;  %18573 = vmatpush1.bf16.msra.mxu1 %v24093_v46  ;;  %v24178_v25 = vld [vmem:[%s27350_s14 + $0x1848] ss:$16 sps:$4 sm:$0xff]   ;;  %v24183_v46 = vld [vmem:[%s27350_s14 + $0x1864] ss:$16 sps:$4 sm:$0xff]  }
 0x369   : > { %16893 = vmatprep.subr.bf16.mxu0 %v24098_v48  ;;  %18574 = vmatprep.subr.bf16.mxu1 %v24101_v50  ;;  %v24186_v48 = vld [vmem:[%s27350_s14 + $0x186c] ss:$16 sps:$4 sm:$0xff]   ;;  %v24181_v50 = vld [vmem:[%s27350_s14 + $0x1860] ss:$16 sps:$4 sm:$0xff]  }
 0x36c   : > { %16894 = vmatpush1.bf16.msra.mxu0 %v24096_v51  ;;  %18575 = vmatpush1.bf16.msra.mxu1 %v24099_v32  ;;  %v24184_v51 = vld [vmem:[%s27350_s14 + $0x1868] ss:$16 sps:$4 sm:$0xff]   ;;  %v24189_v32 = vld [vmem:[%s27350_s14 + $0x1884] ss:$16 sps:$4 sm:$0xff]  }
 0x36d   : > { %16895 = vmatprep.subr.bf16.mxu0 %v24104_v52  ;;  %18576 = vmatprep.subr.bf16.mxu1 %v24107_v53  ;;  %v24192_v52 = vld [vmem:[%s27350_s14 + $0x188c] ss:$16 sps:$4 sm:$0xff]   ;;  %v24187_v53 = vld [vmem:[%s27350_s14 + $0x1880] ss:$16 sps:$4 sm:$0xff]  }
 0x370   : > { %16896 = vmatpush1.bf16.msra.mxu0 %v24102_v54  ;;  %18577 = vmatpush1.bf16.msra.mxu1 %v24105_v55  ;;  %v24190_v54 = vld [vmem:[%s27350_s14 + $0x1888] ss:$16 sps:$4 sm:$0xff]   ;;  %v24195_v55 = vld [vmem:[%s27350_s14 + $0x18a4] ss:$16 sps:$4 sm:$0xff]  }
 0x371   : > { %16897 = vmatprep.subr.bf16.mxu0 %v24110_v42  ;;  %18578 = vmatprep.subr.bf16.mxu1 %v24113_v57  ;;  %v24198_v42 = vld [vmem:[%s27350_s14 + $0x18ac] ss:$16 sps:$4 sm:$0xff]   ;;  %v24193_v57 = vld [vmem:[%s27350_s14 + $0x18a0] ss:$16 sps:$4 sm:$0xff]  }
 0x374   : > { %16898 = vmatpush1.bf16.msra.mxu0 %v24108_v40  ;;  %18579 = vmatpush1.bf16.msra.mxu1 %v24111_v59  ;;  %v24196_v40 = vld [vmem:[%s27350_s14 + $0x18a8] ss:$16 sps:$4 sm:$0xff]   ;;  %v24201_v59 = vld [vmem:[%s27350_s14 + $0x18c4] ss:$16 sps:$4 sm:$0xff]  }
 0x375   : > { %16899 = vmatprep.subr.bf16.mxu0 %v24116_v60  ;;  %18580 = vmatprep.subr.bf16.mxu1 %v24119_v61  ;;  %v24204_v60 = vld [vmem:[%s27350_s14 + $0x18cc] ss:$16 sps:$4 sm:$0xff]   ;;  %v24199_v61 = vld [vmem:[%s27350_s14 + $0x18c0] ss:$16 sps:$4 sm:$0xff]  }
 0x378   : > { %16900 = vmatpush1.bf16.msra.mxu0 %v24114_v63  ;;  %18581 = vmatpush1.bf16.msra.mxu1 %v24117_v0  ;;  %v24202_v63 = vld [vmem:[%s27350_s14 + $0x18c8] ss:$16 sps:$4 sm:$0xff]   ;;  %v24207_v0 = vld [vmem:[%s27350_s14 + $0x18e4] ss:$16 sps:$4 sm:$0xff]  }
 0x379   : > { %16901 = vmatprep.subr.bf16.mxu0 %v24122_v1  ;;  %18582 = vmatprep.subr.bf16.mxu1 %v24125_v47  ;;  %v24210_v1 = vld [vmem:[%s27350_s14 + $0x18ec] ss:$16 sps:$4 sm:$0xff]   ;;  %v24205_v47 = vld [vmem:[%s27350_s14 + $0x18e0] ss:$16 sps:$4 sm:$0xff]  }
 0x37c   : > { %16902 = vmatpush1.bf16.msra.mxu0 %v24120_v2  ;;  %18583 = vmatpush1.bf16.msra.mxu1 %v24123_v3  ;;  %v24208_v2 = vld [vmem:[%s27350_s14 + $0x18e8] ss:$16 sps:$4 sm:$0xff]   ;;  %v24213_v3 = vld [vmem:[%s27350_s14 + $0x1904] ss:$16 sps:$4 sm:$0xff]  }
 0x37d   : > { %16903 = vmatprep.subr.bf16.mxu0 %v24128_v4  ;;  %18584 = vmatprep.subr.bf16.mxu1 %v24131_v5  ;;  %v24216_v4 = vld [vmem:[%s27350_s14 + $0x190c] ss:$16 sps:$4 sm:$0xff]   ;;  %v24211_v5 = vld [vmem:[%s27350_s14 + $0x1900] ss:$16 sps:$4 sm:$0xff]  }
 0x380   : > { %16904 = vmatpush1.bf16.msra.mxu0 %v24126_v58  ;;  %18585 = vmatpush1.bf16.msra.mxu1 %v24129_v7  ;;  %v24214_v58 = vld [vmem:[%s27350_s14 + $0x1908] ss:$16 sps:$4 sm:$0xff]   ;;  %v24219_v7 = vld [vmem:[%s27350_s14 + $0x1924] ss:$16 sps:$4 sm:$0xff]  }
 0x381   : > { %16905 = vmatprep.subr.bf16.mxu0 %v24134_v56  ;;  %18586 = vmatprep.subr.bf16.mxu1 %v24137_v10  ;;  %v24222_v56 = vld [vmem:[%s27350_s14 + $0x192c] ss:$16 sps:$4 sm:$0xff]   ;;  %v24217_v10 = vld [vmem:[%s27350_s14 + $0x1920] ss:$16 sps:$4 sm:$0xff]  }
 0x384   : > { %16906 = vmatpush1.bf16.msra.mxu0 %v24132_v11  ;;  %18587 = vmatpush1.bf16.msra.mxu1 %v24135_v12  ;;  %v24220_v11 = vld [vmem:[%s27350_s14 + $0x1928] ss:$16 sps:$4 sm:$0xff]   ;;  %v24225_v12 = vld [vmem:[%s27350_s14 + $0x1944] ss:$16 sps:$4 sm:$0xff]  }
 0x385   : > { %16907 = vmatprep.subr.bf16.mxu0 %v24140_v14  ;;  %18588 = vmatprep.subr.bf16.mxu1 %v24143_v15  ;;  %v24228_v14 = vld [vmem:[%s27350_s14 + $0x194c] ss:$16 sps:$4 sm:$0xff]   ;;  %v24223_v15 = vld [vmem:[%s27350_s14 + $0x1940] ss:$16 sps:$4 sm:$0xff]  }
 0x388   : > { %16908 = vmatpush1.bf16.msra.mxu0 %v24138_v16  ;;  %18589 = vmatpush1.bf16.msra.mxu1 %v24141_v62  ;;  %v24226_v16 = vld [vmem:[%s27350_s14 + $0x1948] ss:$16 sps:$4 sm:$0xff]   ;;  %v24231_v62 = vld [vmem:[%s27350_s14 + $0x1964] ss:$16 sps:$4 sm:$0xff]  }
 0x389   : > { %16909 = vmatprep.subr.bf16.mxu0 %v24146_v17  ;;  %18590 = vmatprep.subr.bf16.mxu1 %v24149_v18  ;;  %v24234_v17 = vld [vmem:[%s27350_s14 + $0x196c] ss:$16 sps:$4 sm:$0xff]   ;;  %v24229_v18 = vld [vmem:[%s27350_s14 + $0x1960] ss:$16 sps:$4 sm:$0xff]  }
 0x38c   : > { %16910 = vmatpush1.bf16.msra.mxu0 %v24144_v19  ;;  %18591 = vmatpush1.bf16.msra.mxu1 %v24147_v20  ;;  %v24232_v19 = vld [vmem:[%s27350_s14 + $0x1968] ss:$16 sps:$4 sm:$0xff]   ;;  %v24237_v20 = vld [vmem:[%s27350_s14 + $0x1984] ss:$16 sps:$4 sm:$0xff]  }
 0x38d   : > { %16911 = vmatprep.subr.bf16.mxu0 %v24152_v8  ;;  %18592 = vmatprep.subr.bf16.mxu1 %v24155_v22  ;;  %v24240_v8 = vld [vmem:[%s27350_s14 + $0x198c] ss:$16 sps:$4 sm:$0xff]   ;;  %v24235_v22 = vld [vmem:[%s27350_s14 + $0x1980] ss:$16 sps:$4 sm:$0xff]  }
 0x390   : > { %16912 = vmatpush1.bf16.msra.mxu0 %v24150_v6  ;;  %18593 = vmatpush1.bf16.msra.mxu1 %v24153_v23  ;;  %v24238_v6 = vld [vmem:[%s27350_s14 + $0x1988] ss:$16 sps:$4 sm:$0xff]   ;;  %v24243_v23 = vld [vmem:[%s27350_s14 + $0x19a4] ss:$16 sps:$4 sm:$0xff]  }
 0x391   : > { %16913 = vmatprep.subr.bf16.mxu0 %v24158_v9  ;;  %18594 = vmatprep.subr.bf16.mxu1 %v24161_v27  ;;  %v24246_v9 = vld [vmem:[%s27350_s14 + $0x19ac] ss:$16 sps:$4 sm:$0xff]   ;;  %v24241_v27 = vld [vmem:[%s27350_s14 + $0x19a0] ss:$16 sps:$4 sm:$0xff]  }
 0x394   : > { %16914 = vmatpush1.bf16.msra.mxu0 %v24156_v30  ;;  %18595 = vmatpush1.bf16.msra.mxu1 %v24159_v31  ;;  %v24244_v30 = vld [vmem:[%s27350_s14 + $0x19a8] ss:$16 sps:$4 sm:$0xff]   ;;  %v24249_v31 = vld [vmem:[%s27350_s14 + $0x19c4] ss:$16 sps:$4 sm:$0xff]  }
 0x395   : > { %16924 = vmatprep.subr.bf16.mxu0 %v24165_v33  ;;  %18605 = vmatprep.subr.bf16.mxu1 %v24168_v13  ;;  %v24252_v33 = vld [vmem:[%s27350_s14 + $0x19cc] ss:$16 sps:$4 sm:$0xff]   ;;  %v451_v13 = vcombine.high %v28237_v24, %v28237_v24  ;;  %v24253_v24 = vld [vmem:[%s27350_s14 + $0x19e0] ss:$16 sps:$4 sm:$0xff]  }
 0x397   : > { %16916 = vmatmul.mubr.bf16.vlgmr.msra.gmra.mrb[0].mxu0 %v799_v35  ;;  %18597 = vmatmul.mubr.bf16.vlgmr.msra.gmra.mrb[0].mxu1 %v799_v35  ;;  %v24250_v35 = vld [vmem:[%s27350_s14 + $0x19c8] ss:$16 sps:$4 sm:$0xff]  }
 0x398   : > { %16925 = vmatpush1.bf16.msra.mxu0 %v24163_v26  ;;  %18606 = vmatpush1.bf16.msra.mxu1 %v24166_v36  ;;  %v24255_v26 = vld [vmem:[%s27350_s14 + $0x19e4] ss:$16 sps:$4 sm:$0xff]   ;;  %v24258_v36 = vld [vmem:[%s27350_s14 + $0x19ec] ss:$16 sps:$4 sm:$0xff]  }
 0x399   : > { %16926 = vmatprep.subr.bf16.mxu0 %v24171_v37  ;;  %18607 = vmatprep.subr.bf16.mxu1 %v24174_v38  ;;  %v28318_v37 = vrot.slane %v451_v13, %v27416_v49  ;;  %v24256_v38 = vld [vmem:[%s27350_s14 + $0x19e8] ss:$16 sps:$4 sm:$0xff]  }
 0x39a   : > { %16956 = vmatprep.mubr.bf16.mxu0 %v802_v39  ;;  %18637 = vmatprep.mubr.bf16.mxu1 %v802_v39  ;;  %v24261_v39 = vld [vmem:[%s27350_s14 + $0x1a04] ss:$16 sps:$4 sm:$0xff]   ;;  %v24334_v13 = vld [vmem:[%s27350_s14 + $0x1b88] ss:$16 sps:$4 sm:$0xff]  }
 0x39c   : > { %16927 = vmatpush1.bf16.msra.mxu0 %v24169_v21  ;;  %18608 = vmatpush1.bf16.msra.mxu1 %v24172_v28  ;;  %v24264_v21 = vld [vmem:[%s27350_s14 + $0x1a0c] ss:$16 sps:$4 sm:$0xff]   ;;  %v467_v28 = vcombine.high %v28318_v37, %v28318_v37 }
 0x39d   : > { %16928 = vmatprep.subr.bf16.mxu0 %v24177_v41  ;;  %18609 = vmatprep.subr.bf16.mxu1 %v24180_v44  ;;  %v801_v41 = vpack.c.bf16 %v28245_v29, %v28245_v29  ;;  %v24259_v44 = vld [vmem:[%s27350_s14 + $0x1a00] ss:$16 sps:$4 sm:$0xff]  }
 0x39e   : > { %v24265_v29 = vld [vmem:[%s27350_s14 + $0x1a20] ss:$16 sps:$4 sm:$0xff]  }
 0x3a0   : > { %16929 = vmatpush1.bf16.msra.mxu0 %v24175_v45  ;;  %18610 = vmatpush1.bf16.msra.mxu1 %v24178_v25  ;;  %v24262_v45 = vld [vmem:[%s27350_s14 + $0x1a08] ss:$16 sps:$4 sm:$0xff]   ;;  %v24267_v25 = vld [vmem:[%s27350_s14 + $0x1a24] ss:$16 sps:$4 sm:$0xff]  }
 0x3a1   : > { %16930 = vmatprep.subr.bf16.mxu0 %v24183_v46  ;;  %18611 = vmatprep.subr.bf16.mxu1 %v24186_v48  ;;  %v24270_v46 = vld [vmem:[%s27350_s14 + $0x1a2c] ss:$16 sps:$4 sm:$0xff]   ;;  %v804_v48 = vpack.c.bf16 %v467_v28, %v467_v28  ;;  %v24346_v28 = vld [vmem:[%s27350_s14 + $0x1bc8] ss:$16 sps:$4 sm:$0xff]  }
 0x3a4   : > { %16931 = vmatpush1.bf16.msra.mxu0 %v24181_v50  ;;  %18612 = vmatpush1.bf16.msra.mxu1 %v24184_v51  ;;  %v24268_v50 = vld [vmem:[%s27350_s14 + $0x1a28] ss:$16 sps:$4 sm:$0xff]   ;;  %v24273_v51 = vld [vmem:[%s27350_s14 + $0x1a44] ss:$16 sps:$4 sm:$0xff]  }
 0x3a5   : > { %16932 = vmatprep.subr.bf16.mxu0 %v24189_v32  ;;  %18613 = vmatprep.subr.bf16.mxu1 %v24192_v52  ;;  %v24276_v32 = vld [vmem:[%s27350_s14 + $0x1a4c] ss:$16 sps:$4 sm:$0xff]   ;;  %v24271_v52 = vld [vmem:[%s27350_s14 + $0x1a40] ss:$16 sps:$4 sm:$0xff]  }
 0x3a8   : > { %16933 = vmatpush1.bf16.msra.mxu0 %v24187_v53  ;;  %18614 = vmatpush1.bf16.msra.mxu1 %v24190_v54  ;;  %v24274_v53 = vld [vmem:[%s27350_s14 + $0x1a48] ss:$16 sps:$4 sm:$0xff]   ;;  %v24279_v54 = vld [vmem:[%s27350_s14 + $0x1a64] ss:$16 sps:$4 sm:$0xff]  }
 0x3a9   : > { %16934 = vmatprep.subr.bf16.mxu0 %v24195_v55  ;;  %18615 = vmatprep.subr.bf16.mxu1 %v24198_v42  ;;  %v24282_v55 = vld [vmem:[%s27350_s14 + $0x1a6c] ss:$16 sps:$4 sm:$0xff]   ;;  %v24277_v42 = vld [vmem:[%s27350_s14 + $0x1a60] ss:$16 sps:$4 sm:$0xff]  }
 0x3ac   : > { %16935 = vmatpush1.bf16.msra.mxu0 %v24193_v57  ;;  %18616 = vmatpush1.bf16.msra.mxu1 %v24196_v40  ;;  %v24280_v57 = vld [vmem:[%s27350_s14 + $0x1a68] ss:$16 sps:$4 sm:$0xff]   ;;  %v24285_v40 = vld [vmem:[%s27350_s14 + $0x1a84] ss:$16 sps:$4 sm:$0xff]  }
 0x3ad   : > { %16936 = vmatprep.subr.bf16.mxu0 %v24201_v59  ;;  %18617 = vmatprep.subr.bf16.mxu1 %v24204_v60  ;;  %v24288_v59 = vld [vmem:[%s27350_s14 + $0x1a8c] ss:$16 sps:$4 sm:$0xff]   ;;  %v24283_v60 = vld [vmem:[%s27350_s14 + $0x1a80] ss:$16 sps:$4 sm:$0xff]  }
 0x3b0   : > { %16937 = vmatpush1.bf16.msra.mxu0 %v24199_v61  ;;  %18618 = vmatpush1.bf16.msra.mxu1 %v24202_v63  ;;  %v24286_v61 = vld [vmem:[%s27350_s14 + $0x1a88] ss:$16 sps:$4 sm:$0xff]   ;;  %v24291_v63 = vld [vmem:[%s27350_s14 + $0x1aa4] ss:$16 sps:$4 sm:$0xff]  }
 0x3b1   : > { %16938 = vmatprep.subr.bf16.mxu0 %v24207_v0  ;;  %18619 = vmatprep.subr.bf16.mxu1 %v24210_v1  ;;  %v24294_v0 = vld [vmem:[%s27350_s14 + $0x1aac] ss:$16 sps:$4 sm:$0xff]   ;;  %v24289_v1 = vld [vmem:[%s27350_s14 + $0x1aa0] ss:$16 sps:$4 sm:$0xff]  }
 0x3b4   : > { %16939 = vmatpush1.bf16.msra.mxu0 %v24205_v47  ;;  %18620 = vmatpush1.bf16.msra.mxu1 %v24208_v2  ;;  %v24292_v47 = vld [vmem:[%s27350_s14 + $0x1aa8] ss:$16 sps:$4 sm:$0xff]   ;;  %v24297_v2 = vld [vmem:[%s27350_s14 + $0x1ac4] ss:$16 sps:$4 sm:$0xff]  }
 0x3b5   : > { %16940 = vmatprep.subr.bf16.mxu0 %v24213_v3  ;;  %18621 = vmatprep.subr.bf16.mxu1 %v24216_v4  ;;  %v24300_v3 = vld [vmem:[%s27350_s14 + $0x1acc] ss:$16 sps:$4 sm:$0xff]   ;;  %v24295_v4 = vld [vmem:[%s27350_s14 + $0x1ac0] ss:$16 sps:$4 sm:$0xff]  }
 0x3b8   : > { %16941 = vmatpush1.bf16.msra.mxu0 %v24211_v5  ;;  %18622 = vmatpush1.bf16.msra.mxu1 %v24214_v58  ;;  %v24298_v5 = vld [vmem:[%s27350_s14 + $0x1ac8] ss:$16 sps:$4 sm:$0xff]   ;;  %v24303_v58 = vld [vmem:[%s27350_s14 + $0x1ae4] ss:$16 sps:$4 sm:$0xff]  }
 0x3b9   : > { %16942 = vmatprep.subr.bf16.mxu0 %v24219_v7  ;;  %18623 = vmatprep.subr.bf16.mxu1 %v24222_v56  ;;  %v24306_v7 = vld [vmem:[%s27350_s14 + $0x1aec] ss:$16 sps:$4 sm:$0xff]   ;;  %v24301_v56 = vld [vmem:[%s27350_s14 + $0x1ae0] ss:$16 sps:$4 sm:$0xff]  }
 0x3bc   : > { %16943 = vmatpush1.bf16.msra.mxu0 %v24217_v10  ;;  %18624 = vmatpush1.bf16.msra.mxu1 %v24220_v11  ;;  %v24304_v10 = vld [vmem:[%s27350_s14 + $0x1ae8] ss:$16 sps:$4 sm:$0xff]   ;;  %v24309_v11 = vld [vmem:[%s27350_s14 + $0x1b04] ss:$16 sps:$4 sm:$0xff]  }
 0x3bd   : > { %16944 = vmatprep.subr.bf16.mxu0 %v24225_v12  ;;  %18625 = vmatprep.subr.bf16.mxu1 %v24228_v14  ;;  %v24312_v12 = vld [vmem:[%s27350_s14 + $0x1b0c] ss:$16 sps:$4 sm:$0xff]   ;;  %v24307_v14 = vld [vmem:[%s27350_s14 + $0x1b00] ss:$16 sps:$4 sm:$0xff]  }
 0x3c0   : > { %16945 = vmatpush1.bf16.msra.mxu0 %v24223_v15  ;;  %18626 = vmatpush1.bf16.msra.mxu1 %v24226_v16  ;;  %v24310_v15 = vld [vmem:[%s27350_s14 + $0x1b08] ss:$16 sps:$4 sm:$0xff]   ;;  %v24315_v16 = vld [vmem:[%s27350_s14 + $0x1b24] ss:$16 sps:$4 sm:$0xff]  }
 0x3c1   : > { %16946 = vmatprep.subr.bf16.mxu0 %v24231_v62  ;;  %18627 = vmatprep.subr.bf16.mxu1 %v24234_v17  ;;  %v24318_v62 = vld [vmem:[%s27350_s14 + $0x1b2c] ss:$16 sps:$4 sm:$0xff]   ;;  %v24313_v17 = vld [vmem:[%s27350_s14 + $0x1b20] ss:$16 sps:$4 sm:$0xff]  }
 0x3c4   : > { %16947 = vmatpush1.bf16.msra.mxu0 %v24229_v18  ;;  %18628 = vmatpush1.bf16.msra.mxu1 %v24232_v19  ;;  %v24316_v18 = vld [vmem:[%s27350_s14 + $0x1b28] ss:$16 sps:$4 sm:$0xff]   ;;  %v24321_v19 = vld [vmem:[%s27350_s14 + $0x1b44] ss:$16 sps:$4 sm:$0xff]  }
 0x3c5   : > { %16948 = vmatprep.subr.bf16.mxu0 %v24237_v20  ;;  %18629 = vmatprep.subr.bf16.mxu1 %v24240_v8  ;;  %v24324_v20 = vld [vmem:[%s27350_s14 + $0x1b4c] ss:$16 sps:$4 sm:$0xff]   ;;  %v24319_v8 = vld [vmem:[%s27350_s14 + $0x1b40] ss:$16 sps:$4 sm:$0xff]  }
 0x3c8   : > { %16949 = vmatpush1.bf16.msra.mxu0 %v24235_v22  ;;  %18630 = vmatpush1.bf16.msra.mxu1 %v24238_v6  ;;  %v24322_v22 = vld [vmem:[%s27350_s14 + $0x1b48] ss:$16 sps:$4 sm:$0xff]   ;;  %v24327_v6 = vld [vmem:[%s27350_s14 + $0x1b64] ss:$16 sps:$4 sm:$0xff]  }
 0x3c9   : > { %16950 = vmatprep.subr.bf16.mxu0 %v24243_v23  ;;  %18631 = vmatprep.subr.bf16.mxu1 %v24246_v9  ;;  %v24330_v23 = vld [vmem:[%s27350_s14 + $0x1b6c] ss:$16 sps:$4 sm:$0xff]   ;;  %v24325_v9 = vld [vmem:[%s27350_s14 + $0x1b60] ss:$16 sps:$4 sm:$0xff]  }
 0x3cc   : > { %16951 = vmatpush1.bf16.msra.mxu0 %v24241_v27  ;;  %18632 = vmatpush1.bf16.msra.mxu1 %v24244_v30  ;;  %v24328_v27 = vld [vmem:[%s27350_s14 + $0x1b68] ss:$16 sps:$4 sm:$0xff]   ;;  %v24333_v30 = vld [vmem:[%s27350_s14 + $0x1b84] ss:$16 sps:$4 sm:$0xff]  }
 0x3cd   : > { %16952 = vmatprep.subr.bf16.mxu0 %v24249_v31  ;;  %18633 = vmatprep.subr.bf16.mxu1 %v24252_v33  ;;  %v24336_v31 = vld [vmem:[%s27350_s14 + $0x1b8c] ss:$16 sps:$4 sm:$0xff]   ;;  %v24331_v33 = vld [vmem:[%s27350_s14 + $0x1b80] ss:$16 sps:$4 sm:$0xff]  }
 0x3d0   : > { %16953 = vmatpush1.bf16.msra.mxu0 %v24247_v34  ;;  %18634 = vmatpush1.bf16.msra.mxu1 %v24250_v35  ;;  %v24339_v34 = vld [vmem:[%s27350_s14 + $0x1ba4] ss:$16 sps:$4 sm:$0xff]   ;;  %v24342_v35 = vld [vmem:[%s27350_s14 + $0x1bac] ss:$16 sps:$4 sm:$0xff]  }
 0x3d1   : > { %16954 = vmatprep.subr.bf16.mxu0 %v24255_v26  ;;  %18635 = vmatprep.subr.bf16.mxu1 %v24258_v36  ;;  %v24337_v26 = vld [vmem:[%s27350_s14 + $0x1ba0] ss:$16 sps:$4 sm:$0xff]   ;;  %v24340_v36 = vld [vmem:[%s27350_s14 + $0x1ba8] ss:$16 sps:$4 sm:$0xff]  }
 0x3d4   : > { %16955 = vmatpush1.bf16.msra.mxu0 %v24253_v24  ;;  %18636 = vmatpush1.bf16.msra.mxu1 %v24256_v38  ;;  %v24345_v24 = vld [vmem:[%s27350_s14 + $0x1bc4] ss:$16 sps:$4 sm:$0xff]   ;;  %v24348_v38 = vld [vmem:[%s27350_s14 + $0x1bcc] ss:$16 sps:$4 sm:$0xff]  }
 0x3d5   : > { %16965 = vmatprep.subr.bf16.mxu0 %v24261_v39  ;;  %18646 = vmatprep.subr.bf16.mxu1 %v24264_v21  ;;  %v28384_v39 = vld [vmem:[#allocation2 + $0x38] sm:$0xff]  ;;  %v24343_v21 = vld [vmem:[%s27350_s14 + $0x1bc0] ss:$16 sps:$4 sm:$0xff]  }
 0x3d7   : > { %16957 = vmatmul.mubr.bf16.vlgmr.msra.gmra.mrb[0].mxu0 %v801_v41  ;;  %18638 = vmatmul.mubr.bf16.vlgmr.msra.gmra.mrb[0].mxu1 %v801_v41  ;;  %v24351_v41 = vld [vmem:[%s27350_s14 + $0x1be4] ss:$16 sps:$4 sm:$0xff]  }
 0x3d8   : > { %16966 = vmatpush1.bf16.msra.mxu0 %v24259_v44  ;;  %18647 = vmatpush1.bf16.msra.mxu1 %v24262_v45  ;;  %v24354_v44 = vld [vmem:[%s27350_s14 + $0x1bec] ss:$16 sps:$4 sm:$0xff]   ;;  %v28392_v45 = vrot.slane %v28384_v39, %v27416_v49 }
 0x3d9   : > { %16967 = vmatprep.subr.bf16.mxu0 %v24267_v25  ;;  %18648 = vmatprep.subr.bf16.mxu1 %v24270_v46  ;;  %v24349_v25 = vld [vmem:[%s27350_s14 + $0x1be0] ss:$16 sps:$4 sm:$0xff]   ;;  %v24352_v46 = vld [vmem:[%s27350_s14 + $0x1be8] ss:$16 sps:$4 sm:$0xff]  }
 0x3da   : > { %16997 = vmatprep.mubr.bf16.mxu0 %v804_v48  ;;  %18678 = vmatprep.mubr.bf16.mxu1 %v804_v48  ;;  %v24358_v48 = vld [vmem:[%s27350_s14 + $0x1c04] ss:$16 sps:$4 sm:$0xff]  }
 0x3dc   : > { %16968 = vmatpush1.bf16.msra.mxu0 %v24265_v29  ;;  %18649 = vmatpush1.bf16.msra.mxu1 %v24268_v50  ;;  %v24361_v29 = vld [vmem:[%s27350_s14 + $0x1c0c] ss:$16 sps:$4 sm:$0xff]   ;;  %v483_v50 = vcombine.high %v28392_v45, %v28392_v45 }
 0x3dd   : > { %16969 = vmatprep.subr.bf16.mxu0 %v24273_v51  ;;  %18650 = vmatprep.subr.bf16.mxu1 %v24276_v32  ;;  %v803_v51 = vpack.c.bf16 %v28318_v37, %v28318_v37  ;;  %v24356_v32 = vld [vmem:[%s27350_s14 + $0x1c00] ss:$16 sps:$4 sm:$0xff]  }
 0x3de   : > { %v24362_v37 = vld [vmem:[%s27350_s14 + $0x1c20] ss:$16 sps:$4 sm:$0xff]  }
 0x3e0   : > { %16970 = vmatpush1.bf16.msra.mxu0 %v24271_v52  ;;  %18651 = vmatpush1.bf16.msra.mxu1 %v24274_v53  ;;  %v24359_v52 = vld [vmem:[%s27350_s14 + $0x1c08] ss:$16 sps:$4 sm:$0xff]   ;;  %v24364_v53 = vld [vmem:[%s27350_s14 + $0x1c24] ss:$16 sps:$4 sm:$0xff]  }
 0x3e1   : > { %16971 = vmatprep.subr.bf16.mxu0 %v24279_v54  ;;  %18652 = vmatprep.subr.bf16.mxu1 %v24282_v55  ;;  %v24367_v54 = vld [vmem:[%s27350_s14 + $0x1c2c] ss:$16 sps:$4 sm:$0xff]   ;;  %v806_v55 = vpack.c.bf16 %v483_v50, %v483_v50  ;;  %v24440_v50 = vld [vmem:[%s27350_s14 + $0x1dc0] ss:$16 sps:$4 sm:$0xff]  }
 0x3e4   : > { %16972 = vmatpush1.bf16.msra.mxu0 %v24277_v42  ;;  %18653 = vmatpush1.bf16.msra.mxu1 %v24280_v57  ;;  %v24365_v42 = vld [vmem:[%s27350_s14 + $0x1c28] ss:$16 sps:$4 sm:$0xff]   ;;  %v24370_v57 = vld [vmem:[%s27350_s14 + $0x1c44] ss:$16 sps:$4 sm:$0xff]  }
 0x3e5   : > { %16973 = vmatprep.subr.bf16.mxu0 %v24285_v40  ;;  %18654 = vmatprep.subr.bf16.mxu1 %v24288_v59  ;;  %v24373_v40 = vld [vmem:[%s27350_s14 + $0x1c4c] ss:$16 sps:$4 sm:$0xff]   ;;  %v24368_v59 = vld [vmem:[%s27350_s14 + $0x1c40] ss:$16 sps:$4 sm:$0xff]  }
 0x3e8   : > { %16974 = vmatpush1.bf16.msra.mxu0 %v24283_v60  ;;  %18655 = vmatpush1.bf16.msra.mxu1 %v24286_v61  ;;  %v24371_v60 = vld [vmem:[%s27350_s14 + $0x1c48] ss:$16 sps:$4 sm:$0xff]   ;;  %v24376_v61 = vld [vmem:[%s27350_s14 + $0x1c64] ss:$16 sps:$4 sm:$0xff]  }
 0x3e9   : > { %16975 = vmatprep.subr.bf16.mxu0 %v24291_v63  ;;  %18656 = vmatprep.subr.bf16.mxu1 %v24294_v0  ;;  %v24379_v63 = vld [vmem:[%s27350_s14 + $0x1c6c] ss:$16 sps:$4 sm:$0xff]   ;;  %v24374_v0 = vld [vmem:[%s27350_s14 + $0x1c60] ss:$16 sps:$4 sm:$0xff]  }
 0x3ec   : > { %16976 = vmatpush1.bf16.msra.mxu0 %v24289_v1  ;;  %18657 = vmatpush1.bf16.msra.mxu1 %v24292_v47  ;;  %v24377_v1 = vld [vmem:[%s27350_s14 + $0x1c68] ss:$16 sps:$4 sm:$0xff]   ;;  %v24382_v47 = vld [vmem:[%s27350_s14 + $0x1c84] ss:$16 sps:$4 sm:$0xff]  }
 0x3ed   : > { %16977 = vmatprep.subr.bf16.mxu0 %v24297_v2  ;;  %18658 = vmatprep.subr.bf16.mxu1 %v24300_v3  ;;  %v24385_v2 = vld [vmem:[%s27350_s14 + $0x1c8c] ss:$16 sps:$4 sm:$0xff]   ;;  %v24380_v3 = vld [vmem:[%s27350_s14 + $0x1c80] ss:$16 sps:$4 sm:$0xff]  }
 0x3f0   : > { %16978 = vmatpush1.bf16.msra.mxu0 %v24295_v4  ;;  %18659 = vmatpush1.bf16.msra.mxu1 %v24298_v5  ;;  %v24383_v4 = vld [vmem:[%s27350_s14 + $0x1c88] ss:$16 sps:$4 sm:$0xff]   ;;  %v24388_v5 = vld [vmem:[%s27350_s14 + $0x1ca4] ss:$16 sps:$4 sm:$0xff]  }
 0x3f1   : > { %16979 = vmatprep.subr.bf16.mxu0 %v24303_v58  ;;  %18660 = vmatprep.subr.bf16.mxu1 %v24306_v7  ;;  %v24391_v58 = vld [vmem:[%s27350_s14 + $0x1cac] ss:$16 sps:$4 sm:$0xff]   ;;  %v24386_v7 = vld [vmem:[%s27350_s14 + $0x1ca0] ss:$16 sps:$4 sm:$0xff]  }
 0x3f4   : > { %16980 = vmatpush1.bf16.msra.mxu0 %v24301_v56  ;;  %18661 = vmatpush1.bf16.msra.mxu1 %v24304_v10  ;;  %v24389_v56 = vld [vmem:[%s27350_s14 + $0x1ca8] ss:$16 sps:$4 sm:$0xff]   ;;  %v24394_v10 = vld [vmem:[%s27350_s14 + $0x1cc4] ss:$16 sps:$4 sm:$0xff]  }
 0x3f5   : > { %16981 = vmatprep.subr.bf16.mxu0 %v24309_v11  ;;  %18662 = vmatprep.subr.bf16.mxu1 %v24312_v12  ;;  %v24397_v11 = vld [vmem:[%s27350_s14 + $0x1ccc] ss:$16 sps:$4 sm:$0xff]   ;;  %v24392_v12 = vld [vmem:[%s27350_s14 + $0x1cc0] ss:$16 sps:$4 sm:$0xff]  }
 0x3f8   : > { %16982 = vmatpush1.bf16.msra.mxu0 %v24307_v14  ;;  %18663 = vmatpush1.bf16.msra.mxu1 %v24310_v15  ;;  %v24395_v14 = vld [vmem:[%s27350_s14 + $0x1cc8] ss:$16 sps:$4 sm:$0xff]   ;;  %v24400_v15 = vld [vmem:[%s27350_s14 + $0x1ce4] ss:$16 sps:$4 sm:$0xff]  }
 0x3f9   : > { %16983 = vmatprep.subr.bf16.mxu0 %v24315_v16  ;;  %18664 = vmatprep.subr.bf16.mxu1 %v24318_v62  ;;  %v24403_v16 = vld [vmem:[%s27350_s14 + $0x1cec] ss:$16 sps:$4 sm:$0xff]   ;;  %v24398_v62 = vld [vmem:[%s27350_s14 + $0x1ce0] ss:$16 sps:$4 sm:$0xff]  }
 0x3fc   : > { %16984 = vmatpush1.bf16.msra.mxu0 %v24313_v17  ;;  %18665 = vmatpush1.bf16.msra.mxu1 %v24316_v18  ;;  %v24401_v17 = vld [vmem:[%s27350_s14 + $0x1ce8] ss:$16 sps:$4 sm:$0xff]   ;;  %v24406_v18 = vld [vmem:[%s27350_s14 + $0x1d04] ss:$16 sps:$4 sm:$0xff]  }
 0x3fd   : > { %16985 = vmatprep.subr.bf16.mxu0 %v24321_v19  ;;  %18666 = vmatprep.subr.bf16.mxu1 %v24324_v20  ;;  %v24409_v19 = vld [vmem:[%s27350_s14 + $0x1d0c] ss:$16 sps:$4 sm:$0xff]   ;;  %v24404_v20 = vld [vmem:[%s27350_s14 + $0x1d00] ss:$16 sps:$4 sm:$0xff]  }
 0x400   : > { %16986 = vmatpush1.bf16.msra.mxu0 %v24319_v8  ;;  %18667 = vmatpush1.bf16.msra.mxu1 %v24322_v22  ;;  %v24407_v8 = vld [vmem:[%s27350_s14 + $0x1d08] ss:$16 sps:$4 sm:$0xff]   ;;  %v24412_v22 = vld [vmem:[%s27350_s14 + $0x1d24] ss:$16 sps:$4 sm:$0xff]  }
 0x401   : > { %16987 = vmatprep.subr.bf16.mxu0 %v24327_v6  ;;  %18668 = vmatprep.subr.bf16.mxu1 %v24330_v23  ;;  %v24415_v6 = vld [vmem:[%s27350_s14 + $0x1d2c] ss:$16 sps:$4 sm:$0xff]   ;;  %v24410_v23 = vld [vmem:[%s27350_s14 + $0x1d20] ss:$16 sps:$4 sm:$0xff]  }
 0x404   : > { %16988 = vmatpush1.bf16.msra.mxu0 %v24325_v9  ;;  %18669 = vmatpush1.bf16.msra.mxu1 %v24328_v27  ;;  %v24413_v9 = vld [vmem:[%s27350_s14 + $0x1d28] ss:$16 sps:$4 sm:$0xff]   ;;  %v24418_v27 = vld [vmem:[%s27350_s14 + $0x1d44] ss:$16 sps:$4 sm:$0xff]  }
 0x405   : > { %16989 = vmatprep.subr.bf16.mxu0 %v24333_v30  ;;  %18670 = vmatprep.subr.bf16.mxu1 %v24336_v31  ;;  %v24421_v30 = vld [vmem:[%s27350_s14 + $0x1d4c] ss:$16 sps:$4 sm:$0xff]   ;;  %v24416_v31 = vld [vmem:[%s27350_s14 + $0x1d40] ss:$16 sps:$4 sm:$0xff]  }
 0x408   : > { %16990 = vmatpush1.bf16.msra.mxu0 %v24331_v33  ;;  %18671 = vmatpush1.bf16.msra.mxu1 %v24334_v13  ;;  %v24419_v33 = vld [vmem:[%s27350_s14 + $0x1d48] ss:$16 sps:$4 sm:$0xff]   ;;  %v24424_v13 = vld [vmem:[%s27350_s14 + $0x1d64] ss:$16 sps:$4 sm:$0xff]  }
 0x409   : > { %16991 = vmatprep.subr.bf16.mxu0 %v24339_v34  ;;  %18672 = vmatprep.subr.bf16.mxu1 %v24342_v35  ;;  %v24427_v34 = vld [vmem:[%s27350_s14 + $0x1d6c] ss:$16 sps:$4 sm:$0xff]   ;;  %v24422_v35 = vld [vmem:[%s27350_s14 + $0x1d60] ss:$16 sps:$4 sm:$0xff]  }
 0x40c   : > { %16992 = vmatpush1.bf16.msra.mxu0 %v24337_v26  ;;  %18673 = vmatpush1.bf16.msra.mxu1 %v24340_v36  ;;  %v24425_v26 = vld [vmem:[%s27350_s14 + $0x1d68] ss:$16 sps:$4 sm:$0xff]   ;;  %v24430_v36 = vld [vmem:[%s27350_s14 + $0x1d84] ss:$16 sps:$4 sm:$0xff]  }
 0x40d   : > { %16993 = vmatprep.subr.bf16.mxu0 %v24345_v24  ;;  %18674 = vmatprep.subr.bf16.mxu1 %v24348_v38  ;;  %v24433_v24 = vld [vmem:[%s27350_s14 + $0x1d8c] ss:$16 sps:$4 sm:$0xff]   ;;  %v24428_v38 = vld [vmem:[%s27350_s14 + $0x1d80] ss:$16 sps:$4 sm:$0xff]  }
 0x410   : > { %16994 = vmatpush1.bf16.msra.mxu0 %v24343_v21  ;;  %18675 = vmatpush1.bf16.msra.mxu1 %v24346_v28  ;;  %v24431_v21 = vld [vmem:[%s27350_s14 + $0x1d88] ss:$16 sps:$4 sm:$0xff]   ;;  %v24436_v28 = vld [vmem:[%s27350_s14 + $0x1da4] ss:$16 sps:$4 sm:$0xff]  }
 0x411   : > { %16995 = vmatprep.subr.bf16.mxu0 %v24351_v41  ;;  %18676 = vmatprep.subr.bf16.mxu1 %v24354_v44  ;;  %v24439_v41 = vld [vmem:[%s27350_s14 + $0x1dac] ss:$16 sps:$4 sm:$0xff]   ;;  %v24434_v44 = vld [vmem:[%s27350_s14 + $0x1da0] ss:$16 sps:$4 sm:$0xff]  }
 0x414   : > { %16996 = vmatpush1.bf16.msra.mxu0 %v24349_v25  ;;  %18677 = vmatpush1.bf16.msra.mxu1 %v24352_v46  ;;  %v24437_v25 = vld [vmem:[%s27350_s14 + $0x1da8] ss:$16 sps:$4 sm:$0xff]   ;;  %v24442_v46 = vld [vmem:[%s27350_s14 + $0x1dc4] ss:$16 sps:$4 sm:$0xff]  }
 0x415   : > { %17006 = vmatprep.subr.bf16.mxu0 %v24358_v48  ;;  %18687 = vmatprep.subr.bf16.mxu1 %v24361_v29  ;;  %v24445_v48 = vld [vmem:[%s27350_s14 + $0x1dcc] ss:$16 sps:$4 sm:$0xff]   ;;  %v468_v29 = vcombine.high %v28384_v39, %v28384_v39  ;;  %v24446_v39 = vld [vmem:[%s27350_s14 + $0x1de0] ss:$16 sps:$4 sm:$0xff]  }
 0x417   : > { %16998 = vmatmul.mubr.bf16.vlgmr.msra.gmra.mrb[0].mxu0 %v803_v51  ;;  %18679 = vmatmul.mubr.bf16.vlgmr.msra.gmra.mrb[0].mxu1 %v803_v51  ;;  %v24443_v51 = vld [vmem:[%s27350_s14 + $0x1dc8] ss:$16 sps:$4 sm:$0xff]  }
 0x418   : > { %17007 = vmatpush1.bf16.msra.mxu0 %v24356_v32  ;;  %18688 = vmatpush1.bf16.msra.mxu1 %v24359_v52  ;;  %v24448_v32 = vld [vmem:[%s27350_s14 + $0x1de4] ss:$16 sps:$4 sm:$0xff]   ;;  %v24451_v52 = vld [vmem:[%s27350_s14 + $0x1dec] ss:$16 sps:$4 sm:$0xff]  }
 0x419   : > { %17008 = vmatprep.subr.bf16.mxu0 %v24364_v53  ;;  %18689 = vmatprep.subr.bf16.mxu1 %v24367_v54  ;;  %v28465_v53 = vrot.slane %v468_v29, %v27416_v49  ;;  %v24449_v54 = vld [vmem:[%s27350_s14 + $0x1de8] ss:$16 sps:$4 sm:$0xff]  }
 0x41a   : > { %17038 = vmatprep.mubr.bf16.mxu0 %v806_v55  ;;  %18719 = vmatprep.mubr.bf16.mxu1 %v806_v55  ;;  %v24454_v55 = vld [vmem:[%s27350_s14 + $0x1e04] ss:$16 sps:$4 sm:$0xff]   ;;  %v24527_v29 = vld [vmem:[%s27350_s14 + $0x1f88] ss:$16 sps:$4 sm:$0xff]  }
 0x41c   : > { %17009 = vmatpush1.bf16.msra.mxu0 %v24362_v37  ;;  %18690 = vmatpush1.bf16.msra.mxu1 %v24365_v42  ;;  %v24457_v37 = vld [vmem:[%s27350_s14 + $0x1e0c] ss:$16 sps:$4 sm:$0xff]   ;;  %v484_v42 = vcombine.high %v28465_v53, %v28465_v53 }
 0x41d   : > { %17010 = vmatprep.subr.bf16.mxu0 %v24370_v57  ;;  %18691 = vmatprep.subr.bf16.mxu1 %v24373_v40  ;;  %v805_v57 = vpack.c.bf16 %v28392_v45, %v28392_v45  ;;  %v24452_v40 = vld [vmem:[%s27350_s14 + $0x1e00] ss:$16 sps:$4 sm:$0xff]  }
 0x41e   : > { %v24458_v45 = vld [vmem:[%s27350_s14 + $0x1e20] ss:$16 sps:$4 sm:$0xff]  }
 0x420   : > { %17011 = vmatpush1.bf16.msra.mxu0 %v24368_v59  ;;  %18692 = vmatpush1.bf16.msra.mxu1 %v24371_v60  ;;  %v24455_v59 = vld [vmem:[%s27350_s14 + $0x1e08] ss:$16 sps:$4 sm:$0xff]   ;;  %v24460_v60 = vld [vmem:[%s27350_s14 + $0x1e24] ss:$16 sps:$4 sm:$0xff]  }
 0x421   : > { %17012 = vmatprep.subr.bf16.mxu0 %v24376_v61  ;;  %18693 = vmatprep.subr.bf16.mxu1 %v24379_v63  ;;  %v24463_v61 = vld [vmem:[%s27350_s14 + $0x1e2c] ss:$16 sps:$4 sm:$0xff]   ;;  %v808_v63 = vpack.c.bf16 %v484_v42, %v484_v42  ;;  %v24539_v42 = vld [vmem:[%s27350_s14 + $0x1fc8] ss:$16 sps:$4 sm:$0xff]  }
 0x424   : > { %17013 = vmatpush1.bf16.msra.mxu0 %v24374_v0  ;;  %18694 = vmatpush1.bf16.msra.mxu1 %v24377_v1  ;;  %v24461_v0 = vld [vmem:[%s27350_s14 + $0x1e28] ss:$16 sps:$4 sm:$0xff]   ;;  %v24466_v1 = vld [vmem:[%s27350_s14 + $0x1e44] ss:$16 sps:$4 sm:$0xff]  }
 0x425   : > { %17014 = vmatprep.subr.bf16.mxu0 %v24382_v47  ;;  %18695 = vmatprep.subr.bf16.mxu1 %v24385_v2  ;;  %v24469_v47 = vld [vmem:[%s27350_s14 + $0x1e4c] ss:$16 sps:$4 sm:$0xff]   ;;  %v24464_v2 = vld [vmem:[%s27350_s14 + $0x1e40] ss:$16 sps:$4 sm:$0xff]  }
 0x428   : > { %17015 = vmatpush1.bf16.msra.mxu0 %v24380_v3  ;;  %18696 = vmatpush1.bf16.msra.mxu1 %v24383_v4  ;;  %v24467_v3 = vld [vmem:[%s27350_s14 + $0x1e48] ss:$16 sps:$4 sm:$0xff]   ;;  %v24472_v4 = vld [vmem:[%s27350_s14 + $0x1e64] ss:$16 sps:$4 sm:$0xff]  }
 0x429   : > { %17016 = vmatprep.subr.bf16.mxu0 %v24388_v5  ;;  %18697 = vmatprep.subr.bf16.mxu1 %v24391_v58  ;;  %v24475_v5 = vld [vmem:[%s27350_s14 + $0x1e6c] ss:$16 sps:$4 sm:$0xff]   ;;  %v24470_v58 = vld [vmem:[%s27350_s14 + $0x1e60] ss:$16 sps:$4 sm:$0xff]  }
 0x42c   : > { %17017 = vmatpush1.bf16.msra.mxu0 %v24386_v7  ;;  %18698 = vmatpush1.bf16.msra.mxu1 %v24389_v56  ;;  %v24473_v7 = vld [vmem:[%s27350_s14 + $0x1e68] ss:$16 sps:$4 sm:$0xff]   ;;  %v24478_v56 = vld [vmem:[%s27350_s14 + $0x1e84] ss:$16 sps:$4 sm:$0xff]  }
 0x42d   : > { %17018 = vmatprep.subr.bf16.mxu0 %v24394_v10  ;;  %18699 = vmatprep.subr.bf16.mxu1 %v24397_v11  ;;  %v24481_v10 = vld [vmem:[%s27350_s14 + $0x1e8c] ss:$16 sps:$4 sm:$0xff]   ;;  %v24476_v11 = vld [vmem:[%s27350_s14 + $0x1e80] ss:$16 sps:$4 sm:$0xff]  }
 0x430   : > { %17019 = vmatpush1.bf16.msra.mxu0 %v24392_v12  ;;  %18700 = vmatpush1.bf16.msra.mxu1 %v24395_v14  ;;  %v24479_v12 = vld [vmem:[%s27350_s14 + $0x1e88] ss:$16 sps:$4 sm:$0xff]   ;;  %v24484_v14 = vld [vmem:[%s27350_s14 + $0x1ea4] ss:$16 sps:$4 sm:$0xff]  }
 0x431   : > { %17020 = vmatprep.subr.bf16.mxu0 %v24400_v15  ;;  %18701 = vmatprep.subr.bf16.mxu1 %v24403_v16  ;;  %v24487_v15 = vld [vmem:[%s27350_s14 + $0x1eac] ss:$16 sps:$4 sm:$0xff]   ;;  %v24482_v16 = vld [vmem:[%s27350_s14 + $0x1ea0] ss:$16 sps:$4 sm:$0xff]  }
 0x434   : > { %17021 = vmatpush1.bf16.msra.mxu0 %v24398_v62  ;;  %18702 = vmatpush1.bf16.msra.mxu1 %v24401_v17  ;;  %v24485_v62 = vld [vmem:[%s27350_s14 + $0x1ea8] ss:$16 sps:$4 sm:$0xff]   ;;  %v24490_v17 = vld [vmem:[%s27350_s14 + $0x1ec4] ss:$16 sps:$4 sm:$0xff]  }
 0x435   : > { %17022 = vmatprep.subr.bf16.mxu0 %v24406_v18  ;;  %18703 = vmatprep.subr.bf16.mxu1 %v24409_v19  ;;  %v24493_v18 = vld [vmem:[%s27350_s14 + $0x1ecc] ss:$16 sps:$4 sm:$0xff]   ;;  %v24488_v19 = vld [vmem:[%s27350_s14 + $0x1ec0] ss:$16 sps:$4 sm:$0xff]  }
 0x438   : > { %17023 = vmatpush1.bf16.msra.mxu0 %v24404_v20  ;;  %18704 = vmatpush1.bf16.msra.mxu1 %v24407_v8  ;;  %v24491_v20 = vld [vmem:[%s27350_s14 + $0x1ec8] ss:$16 sps:$4 sm:$0xff]   ;;  %v24496_v8 = vld [vmem:[%s27350_s14 + $0x1ee4] ss:$16 sps:$4 sm:$0xff]  }
 0x439   : > { %17024 = vmatprep.subr.bf16.mxu0 %v24412_v22  ;;  %18705 = vmatprep.subr.bf16.mxu1 %v24415_v6  ;;  %v24499_v22 = vld [vmem:[%s27350_s14 + $0x1eec] ss:$16 sps:$4 sm:$0xff]   ;;  %v24494_v6 = vld [vmem:[%s27350_s14 + $0x1ee0] ss:$16 sps:$4 sm:$0xff]  }
 0x43c   : > { %17025 = vmatpush1.bf16.msra.mxu0 %v24410_v23  ;;  %18706 = vmatpush1.bf16.msra.mxu1 %v24413_v9  ;;  %v24497_v23 = vld [vmem:[%s27350_s14 + $0x1ee8] ss:$16 sps:$4 sm:$0xff]   ;;  %v24502_v9 = vld [vmem:[%s27350_s14 + $0x1f04] ss:$16 sps:$4 sm:$0xff]  }
 0x43d   : > { %17026 = vmatprep.subr.bf16.mxu0 %v24418_v27  ;;  %18707 = vmatprep.subr.bf16.mxu1 %v24421_v30  ;;  %v24505_v27 = vld [vmem:[%s27350_s14 + $0x1f0c] ss:$16 sps:$4 sm:$0xff]   ;;  %v24500_v30 = vld [vmem:[%s27350_s14 + $0x1f00] ss:$16 sps:$4 sm:$0xff]  }
 0x440   : > { %17027 = vmatpush1.bf16.msra.mxu0 %v24416_v31  ;;  %18708 = vmatpush1.bf16.msra.mxu1 %v24419_v33  ;;  %v24503_v31 = vld [vmem:[%s27350_s14 + $0x1f08] ss:$16 sps:$4 sm:$0xff]   ;;  %v24508_v33 = vld [vmem:[%s27350_s14 + $0x1f24] ss:$16 sps:$4 sm:$0xff]  }
 0x441   : > { %17028 = vmatprep.subr.bf16.mxu0 %v24424_v13  ;;  %18709 = vmatprep.subr.bf16.mxu1 %v24427_v34  ;;  %v24511_v13 = vld [vmem:[%s27350_s14 + $0x1f2c] ss:$16 sps:$4 sm:$0xff]   ;;  %v24506_v34 = vld [vmem:[%s27350_s14 + $0x1f20] ss:$16 sps:$4 sm:$0xff]  }
 0x444   : > { %17029 = vmatpush1.bf16.msra.mxu0 %v24422_v35  ;;  %18710 = vmatpush1.bf16.msra.mxu1 %v24425_v26  ;;  %v24509_v35 = vld [vmem:[%s27350_s14 + $0x1f28] ss:$16 sps:$4 sm:$0xff]   ;;  %v24514_v26 = vld [vmem:[%s27350_s14 + $0x1f44] ss:$16 sps:$4 sm:$0xff]  }
 0x445   : > { %17030 = vmatprep.subr.bf16.mxu0 %v24430_v36  ;;  %18711 = vmatprep.subr.bf16.mxu1 %v24433_v24  ;;  %v24517_v36 = vld [vmem:[%s27350_s14 + $0x1f4c] ss:$16 sps:$4 sm:$0xff]   ;;  %v24512_v24 = vld [vmem:[%s27350_s14 + $0x1f40] ss:$16 sps:$4 sm:$0xff]  }
 0x448   : > { %17031 = vmatpush1.bf16.msra.mxu0 %v24428_v38  ;;  %18712 = vmatpush1.bf16.msra.mxu1 %v24431_v21  ;;  %v24515_v38 = vld [vmem:[%s27350_s14 + $0x1f48] ss:$16 sps:$4 sm:$0xff]   ;;  %v24520_v21 = vld [vmem:[%s27350_s14 + $0x1f64] ss:$16 sps:$4 sm:$0xff]  }
 0x449   : > { %17032 = vmatprep.subr.bf16.mxu0 %v24436_v28  ;;  %18713 = vmatprep.subr.bf16.mxu1 %v24439_v41  ;;  %v24523_v28 = vld [vmem:[%s27350_s14 + $0x1f6c] ss:$16 sps:$4 sm:$0xff]   ;;  %v24518_v41 = vld [vmem:[%s27350_s14 + $0x1f60] ss:$16 sps:$4 sm:$0xff]  }
 0x44c   : > { %17033 = vmatpush1.bf16.msra.mxu0 %v24434_v44  ;;  %18714 = vmatpush1.bf16.msra.mxu1 %v24437_v25  ;;  %v24521_v44 = vld [vmem:[%s27350_s14 + $0x1f68] ss:$16 sps:$4 sm:$0xff]   ;;  %v24526_v25 = vld [vmem:[%s27350_s14 + $0x1f84] ss:$16 sps:$4 sm:$0xff]  }
 0x44d   : > { %17034 = vmatprep.subr.bf16.mxu0 %v24442_v46  ;;  %18715 = vmatprep.subr.bf16.mxu1 %v24445_v48  ;;  %v24529_v46 = vld [vmem:[%s27350_s14 + $0x1f8c] ss:$16 sps:$4 sm:$0xff]   ;;  %v24524_v48 = vld [vmem:[%s27350_s14 + $0x1f80] ss:$16 sps:$4 sm:$0xff]  }
 0x450   : > { %17035 = vmatpush1.bf16.msra.mxu0 %v24440_v50  ;;  %18716 = vmatpush1.bf16.msra.mxu1 %v24443_v51  ;;  %v24532_v50 = vld [vmem:[%s27350_s14 + $0x1fa4] ss:$16 sps:$4 sm:$0xff]   ;;  %v24535_v51 = vld [vmem:[%s27350_s14 + $0x1fac] ss:$16 sps:$4 sm:$0xff]  }
 0x451   : > { %17036 = vmatprep.subr.bf16.mxu0 %v24448_v32  ;;  %18717 = vmatprep.subr.bf16.mxu1 %v24451_v52  ;;  %v24530_v32 = vld [vmem:[%s27350_s14 + $0x1fa0] ss:$16 sps:$4 sm:$0xff]   ;;  %v24533_v52 = vld [vmem:[%s27350_s14 + $0x1fa8] ss:$16 sps:$4 sm:$0xff]  }
 0x454   : > { %17037 = vmatpush1.bf16.msra.mxu0 %v24446_v39  ;;  %18718 = vmatpush1.bf16.msra.mxu1 %v24449_v54  ;;  %v24538_v39 = vld [vmem:[%s27350_s14 + $0x1fc4] ss:$16 sps:$4 sm:$0xff]   ;;  %v24541_v54 = vld [vmem:[%s27350_s14 + $0x1fcc] ss:$16 sps:$4 sm:$0xff]  }
 0x455   : > { %17047 = vmatprep.subr.bf16.mxu0 %v24454_v55  ;;  %18728 = vmatprep.subr.bf16.mxu1 %v24457_v37  ;;  %v28531_v55 = vld [vmem:[#allocation2 + $0x40] sm:$0xff] }
 0x456   : > { %v24536_v37 = vld [vmem:[%s27350_s14 + $0x1fc0] ss:$16 sps:$4 sm:$0xff]  }
 0x457   : > { %17039 = vmatmul.mubr.bf16.vlgmr.msra.gmra.mrb[0].mxu0 %v805_v57  ;;  %18720 = vmatmul.mubr.bf16.vlgmr.msra.gmra.mrb[0].mxu1 %v805_v57  ;;  %v24544_v57 = vld [vmem:[%s27350_s14 + $0x1fe4] ss:$16 sps:$4 sm:$0xff]  }
 0x458   : > { %17048 = vmatpush1.bf16.msra.mxu0 %v24452_v40  ;;  %18729 = vmatpush1.bf16.msra.mxu1 %v24455_v59  ;;  %v24547_v40 = vld [vmem:[%s27350_s14 + $0x1fec] ss:$16 sps:$4 sm:$0xff]   ;;  %v28539_v59 = vrot.slane %v28531_v55, %v27416_v49 }
 0x459   : > { %17049 = vmatprep.subr.bf16.mxu0 %v24460_v60  ;;  %18730 = vmatprep.subr.bf16.mxu1 %v24463_v61  ;;  %v24542_v60 = vld [vmem:[%s27350_s14 + $0x1fe0] ss:$16 sps:$4 sm:$0xff]   ;;  %v24545_v61 = vld [vmem:[%s27350_s14 + $0x1fe8] ss:$16 sps:$4 sm:$0xff]  }
 0x45a   : > { %17079 = vmatprep.mubr.bf16.mxu0 %v808_v63  ;;  %18760 = vmatprep.mubr.bf16.mxu1 %v808_v63  ;;  %v24551_v63 = vld [vmem:[%s27350_s14 + $0x2004] ss:$16 sps:$4 sm:$0xff]  }
 0x45c   : > { %17050 = vmatpush1.bf16.msra.mxu0 %v24458_v45  ;;  %18731 = vmatpush1.bf16.msra.mxu1 %v24461_v0  ;;  %v24554_v45 = vld [vmem:[%s27350_s14 + $0x200c] ss:$16 sps:$4 sm:$0xff]   ;;  %v500_v0 = vcombine.high %v28539_v59, %v28539_v59 }
 0x45d   : > { %17051 = vmatprep.subr.bf16.mxu0 %v24466_v1  ;;  %18732 = vmatprep.subr.bf16.mxu1 %v24469_v47  ;;  %v807_v1 = vpack.c.bf16 %v28465_v53, %v28465_v53  ;;  %v24549_v47 = vld [vmem:[%s27350_s14 + $0x2000] ss:$16 sps:$4 sm:$0xff]  }
 0x45e   : > { %v24555_v53 = vld [vmem:[%s27350_s14 + $0x2020] ss:$16 sps:$4 sm:$0xff]  }
 0x460   : > { %17052 = vmatpush1.bf16.msra.mxu0 %v24464_v2  ;;  %18733 = vmatpush1.bf16.msra.mxu1 %v24467_v3  ;;  %v24552_v2 = vld [vmem:[%s27350_s14 + $0x2008] ss:$16 sps:$4 sm:$0xff]   ;;  %v24557_v3 = vld [vmem:[%s27350_s14 + $0x2024] ss:$16 sps:$4 sm:$0xff]  }
 0x461   : > { %17053 = vmatprep.subr.bf16.mxu0 %v24472_v4  ;;  %18734 = vmatprep.subr.bf16.mxu1 %v24475_v5  ;;  %v24560_v4 = vld [vmem:[%s27350_s14 + $0x202c] ss:$16 sps:$4 sm:$0xff]   ;;  %v810_v5 = vpack.c.bf16 %v500_v0, %v500_v0  ;;  %v24633_v0 = vld [vmem:[%s27350_s14 + $0x21c0] ss:$16 sps:$4 sm:$0xff]  }
 0x464   : > { %17054 = vmatpush1.bf16.msra.mxu0 %v24470_v58  ;;  %18735 = vmatpush1.bf16.msra.mxu1 %v24473_v7  ;;  %v24558_v58 = vld [vmem:[%s27350_s14 + $0x2028] ss:$16 sps:$4 sm:$0xff]   ;;  %v24563_v7 = vld [vmem:[%s27350_s14 + $0x2044] ss:$16 sps:$4 sm:$0xff]  }
 0x465   : > { %17055 = vmatprep.subr.bf16.mxu0 %v24478_v56  ;;  %18736 = vmatprep.subr.bf16.mxu1 %v24481_v10  ;;  %v24566_v56 = vld [vmem:[%s27350_s14 + $0x204c] ss:$16 sps:$4 sm:$0xff]   ;;  %v24561_v10 = vld [vmem:[%s27350_s14 + $0x2040] ss:$16 sps:$4 sm:$0xff]  }
 0x468   : > { %17056 = vmatpush1.bf16.msra.mxu0 %v24476_v11  ;;  %18737 = vmatpush1.bf16.msra.mxu1 %v24479_v12  ;;  %v24564_v11 = vld [vmem:[%s27350_s14 + $0x2048] ss:$16 sps:$4 sm:$0xff]   ;;  %v24569_v12 = vld [vmem:[%s27350_s14 + $0x2064] ss:$16 sps:$4 sm:$0xff]  }
 0x469   : > { %17057 = vmatprep.subr.bf16.mxu0 %v24484_v14  ;;  %18738 = vmatprep.subr.bf16.mxu1 %v24487_v15  ;;  %v24572_v14 = vld [vmem:[%s27350_s14 + $0x206c] ss:$16 sps:$4 sm:$0xff]   ;;  %v24567_v15 = vld [vmem:[%s27350_s14 + $0x2060] ss:$16 sps:$4 sm:$0xff]  }
 0x46c   : > { %17058 = vmatpush1.bf16.msra.mxu0 %v24482_v16  ;;  %18739 = vmatpush1.bf16.msra.mxu1 %v24485_v62  ;;  %v24570_v16 = vld [vmem:[%s27350_s14 + $0x2068] ss:$16 sps:$4 sm:$0xff]   ;;  %v24575_v62 = vld [vmem:[%s27350_s14 + $0x2084] ss:$16 sps:$4 sm:$0xff]  }
 0x46d   : > { %17059 = vmatprep.subr.bf16.mxu0 %v24490_v17  ;;  %18740 = vmatprep.subr.bf16.mxu1 %v24493_v18  ;;  %v24578_v17 = vld [vmem:[%s27350_s14 + $0x208c] ss:$16 sps:$4 sm:$0xff]   ;;  %v24573_v18 = vld [vmem:[%s27350_s14 + $0x2080] ss:$16 sps:$4 sm:$0xff]  }
 0x470   : > { %17060 = vmatpush1.bf16.msra.mxu0 %v24488_v19  ;;  %18741 = vmatpush1.bf16.msra.mxu1 %v24491_v20  ;;  %v24576_v19 = vld [vmem:[%s27350_s14 + $0x2088] ss:$16 sps:$4 sm:$0xff]   ;;  %v24581_v20 = vld [vmem:[%s27350_s14 + $0x20a4] ss:$16 sps:$4 sm:$0xff]  }
 0x471   : > { %17061 = vmatprep.subr.bf16.mxu0 %v24496_v8  ;;  %18742 = vmatprep.subr.bf16.mxu1 %v24499_v22  ;;  %v24584_v8 = vld [vmem:[%s27350_s14 + $0x20ac] ss:$16 sps:$4 sm:$0xff]   ;;  %v24579_v22 = vld [vmem:[%s27350_s14 + $0x20a0] ss:$16 sps:$4 sm:$0xff]  }
 0x474   : > { %17062 = vmatpush1.bf16.msra.mxu0 %v24494_v6  ;;  %18743 = vmatpush1.bf16.msra.mxu1 %v24497_v23  ;;  %v24582_v6 = vld [vmem:[%s27350_s14 + $0x20a8] ss:$16 sps:$4 sm:$0xff]   ;;  %v24587_v23 = vld [vmem:[%s27350_s14 + $0x20c4] ss:$16 sps:$4 sm:$0xff]  }
 0x475   : > { %17063 = vmatprep.subr.bf16.mxu0 %v24502_v9  ;;  %18744 = vmatprep.subr.bf16.mxu1 %v24505_v27  ;;  %v24590_v9 = vld [vmem:[%s27350_s14 + $0x20cc] ss:$16 sps:$4 sm:$0xff]   ;;  %v24585_v27 = vld [vmem:[%s27350_s14 + $0x20c0] ss:$16 sps:$4 sm:$0xff]  }
 0x478   : > { %17064 = vmatpush1.bf16.msra.mxu0 %v24500_v30  ;;  %18745 = vmatpush1.bf16.msra.mxu1 %v24503_v31  ;;  %v24588_v30 = vld [vmem:[%s27350_s14 + $0x20c8] ss:$16 sps:$4 sm:$0xff]   ;;  %v24593_v31 = vld [vmem:[%s27350_s14 + $0x20e4] ss:$16 sps:$4 sm:$0xff]  }
 0x479   : > { %17065 = vmatprep.subr.bf16.mxu0 %v24508_v33  ;;  %18746 = vmatprep.subr.bf16.mxu1 %v24511_v13  ;;  %v24596_v33 = vld [vmem:[%s27350_s14 + $0x20ec] ss:$16 sps:$4 sm:$0xff]   ;;  %v24591_v13 = vld [vmem:[%s27350_s14 + $0x20e0] ss:$16 sps:$4 sm:$0xff]  }
 0x47c   : > { %17066 = vmatpush1.bf16.msra.mxu0 %v24506_v34  ;;  %18747 = vmatpush1.bf16.msra.mxu1 %v24509_v35  ;;  %v24594_v34 = vld [vmem:[%s27350_s14 + $0x20e8] ss:$16 sps:$4 sm:$0xff]   ;;  %v24599_v35 = vld [vmem:[%s27350_s14 + $0x2104] ss:$16 sps:$4 sm:$0xff]  }
 0x47d   : > { %17067 = vmatprep.subr.bf16.mxu0 %v24514_v26  ;;  %18748 = vmatprep.subr.bf16.mxu1 %v24517_v36  ;;  %v24602_v26 = vld [vmem:[%s27350_s14 + $0x210c] ss:$16 sps:$4 sm:$0xff]   ;;  %v24597_v36 = vld [vmem:[%s27350_s14 + $0x2100] ss:$16 sps:$4 sm:$0xff]  }
 0x480   : > { %17068 = vmatpush1.bf16.msra.mxu0 %v24512_v24  ;;  %18749 = vmatpush1.bf16.msra.mxu1 %v24515_v38  ;;  %v24600_v24 = vld [vmem:[%s27350_s14 + $0x2108] ss:$16 sps:$4 sm:$0xff]   ;;  %v24605_v38 = vld [vmem:[%s27350_s14 + $0x2124] ss:$16 sps:$4 sm:$0xff]  }
 0x481   : > { %17069 = vmatprep.subr.bf16.mxu0 %v24520_v21  ;;  %18750 = vmatprep.subr.bf16.mxu1 %v24523_v28  ;;  %v24608_v21 = vld [vmem:[%s27350_s14 + $0x212c] ss:$16 sps:$4 sm:$0xff]   ;;  %v24603_v28 = vld [vmem:[%s27350_s14 + $0x2120] ss:$16 sps:$4 sm:$0xff]  }
 0x484   : > { %17070 = vmatpush1.bf16.msra.mxu0 %v24518_v41  ;;  %18751 = vmatpush1.bf16.msra.mxu1 %v24521_v44  ;;  %v24606_v41 = vld [vmem:[%s27350_s14 + $0x2128] ss:$16 sps:$4 sm:$0xff]   ;;  %v24611_v44 = vld [vmem:[%s27350_s14 + $0x2144] ss:$16 sps:$4 sm:$0xff]  }
 0x485   : > { %17071 = vmatprep.subr.bf16.mxu0 %v24526_v25  ;;  %18752 = vmatprep.subr.bf16.mxu1 %v24529_v46  ;;  %v24614_v25 = vld [vmem:[%s27350_s14 + $0x214c] ss:$16 sps:$4 sm:$0xff]   ;;  %v24609_v46 = vld [vmem:[%s27350_s14 + $0x2140] ss:$16 sps:$4 sm:$0xff]  }
 0x488   : > { %17072 = vmatpush1.bf16.msra.mxu0 %v24524_v48  ;;  %18753 = vmatpush1.bf16.msra.mxu1 %v24527_v29  ;;  %v24612_v48 = vld [vmem:[%s27350_s14 + $0x2148] ss:$16 sps:$4 sm:$0xff]   ;;  %v24617_v29 = vld [vmem:[%s27350_s14 + $0x2164] ss:$16 sps:$4 sm:$0xff]  }
 0x489   : > { %17073 = vmatprep.subr.bf16.mxu0 %v24532_v50  ;;  %18754 = vmatprep.subr.bf16.mxu1 %v24535_v51  ;;  %v24620_v50 = vld [vmem:[%s27350_s14 + $0x216c] ss:$16 sps:$4 sm:$0xff]   ;;  %v24615_v51 = vld [vmem:[%s27350_s14 + $0x2160] ss:$16 sps:$4 sm:$0xff]  }
 0x48c   : > { %17074 = vmatpush1.bf16.msra.mxu0 %v24530_v32  ;;  %18755 = vmatpush1.bf16.msra.mxu1 %v24533_v52  ;;  %v24618_v32 = vld [vmem:[%s27350_s14 + $0x2168] ss:$16 sps:$4 sm:$0xff]   ;;  %v24623_v52 = vld [vmem:[%s27350_s14 + $0x2184] ss:$16 sps:$4 sm:$0xff]  }
 0x48d   : > { %17075 = vmatprep.subr.bf16.mxu0 %v24538_v39  ;;  %18756 = vmatprep.subr.bf16.mxu1 %v24541_v54  ;;  %v24626_v39 = vld [vmem:[%s27350_s14 + $0x218c] ss:$16 sps:$4 sm:$0xff]   ;;  %v24621_v54 = vld [vmem:[%s27350_s14 + $0x2180] ss:$16 sps:$4 sm:$0xff]  }
 0x490   : > { %17076 = vmatpush1.bf16.msra.mxu0 %v24536_v37  ;;  %18757 = vmatpush1.bf16.msra.mxu1 %v24539_v42  ;;  %v24624_v37 = vld [vmem:[%s27350_s14 + $0x2188] ss:$16 sps:$4 sm:$0xff]   ;;  %v24629_v42 = vld [vmem:[%s27350_s14 + $0x21a4] ss:$16 sps:$4 sm:$0xff]  }
 0x491   : > { %17077 = vmatprep.subr.bf16.mxu0 %v24544_v57  ;;  %18758 = vmatprep.subr.bf16.mxu1 %v24547_v40  ;;  %v24632_v57 = vld [vmem:[%s27350_s14 + $0x21ac] ss:$16 sps:$4 sm:$0xff]   ;;  %v24627_v40 = vld [vmem:[%s27350_s14 + $0x21a0] ss:$16 sps:$4 sm:$0xff]  }
 0x494   : > { %17078 = vmatpush1.bf16.msra.mxu0 %v24542_v60  ;;  %18759 = vmatpush1.bf16.msra.mxu1 %v24545_v61  ;;  %v24630_v60 = vld [vmem:[%s27350_s14 + $0x21a8] ss:$16 sps:$4 sm:$0xff]   ;;  %v24635_v61 = vld [vmem:[%s27350_s14 + $0x21c4] ss:$16 sps:$4 sm:$0xff]  }
 0x495   : > { %17088 = vmatprep.subr.bf16.mxu0 %v24551_v63  ;;  %18769 = vmatprep.subr.bf16.mxu1 %v24554_v45  ;;  %v24638_v63 = vld [vmem:[%s27350_s14 + $0x21cc] ss:$16 sps:$4 sm:$0xff]   ;;  %v485_v45 = vcombine.high %v28531_v55, %v28531_v55  ;;  %v24639_v55 = vld [vmem:[%s27350_s14 + $0x21e0] ss:$16 sps:$4 sm:$0xff]  }
 0x497   : > { %17080 = vmatmul.mubr.bf16.vlgmr.msra.gmra.mrb[0].mxu0 %v807_v1  ;;  %18761 = vmatmul.mubr.bf16.vlgmr.msra.gmra.mrb[0].mxu1 %v807_v1  ;;  %v24636_v1 = vld [vmem:[%s27350_s14 + $0x21c8] ss:$16 sps:$4 sm:$0xff]  }
 0x498   : > { %17089 = vmatpush1.bf16.msra.mxu0 %v24549_v47  ;;  %18770 = vmatpush1.bf16.msra.mxu1 %v24552_v2  ;;  %v24641_v47 = vld [vmem:[%s27350_s14 + $0x21e4] ss:$16 sps:$4 sm:$0xff]   ;;  %v24644_v2 = vld [vmem:[%s27350_s14 + $0x21ec] ss:$16 sps:$4 sm:$0xff]  }
 0x499   : > { %17090 = vmatprep.subr.bf16.mxu0 %v24557_v3  ;;  %18771 = vmatprep.subr.bf16.mxu1 %v24560_v4  ;;  %v28612_v3 = vrot.slane %v485_v45, %v27416_v49  ;;  %v24642_v4 = vld [vmem:[%s27350_s14 + $0x21e8] ss:$16 sps:$4 sm:$0xff]  }
 0x49a   : > { %17120 = vmatprep.mubr.bf16.mxu0 %v810_v5  ;;  %18801 = vmatprep.mubr.bf16.mxu1 %v810_v5  ;;  %v24647_v5 = vld [vmem:[%s27350_s14 + $0x2204] ss:$16 sps:$4 sm:$0xff]   ;;  %v24720_v45 = vld [vmem:[%s27350_s14 + $0x2388] ss:$16 sps:$4 sm:$0xff]  }
 0x49c   : > { %17091 = vmatpush1.bf16.msra.mxu0 %v24555_v53  ;;  %18772 = vmatpush1.bf16.msra.mxu1 %v24558_v58  ;;  %v24650_v53 = vld [vmem:[%s27350_s14 + $0x220c] ss:$16 sps:$4 sm:$0xff]   ;;  %v501_v58 = vcombine.high %v28612_v3, %v28612_v3 }
 0x49d   : > { %17092 = vmatprep.subr.bf16.mxu0 %v24563_v7  ;;  %18773 = vmatprep.subr.bf16.mxu1 %v24566_v56  ;;  %v809_v7 = vpack.c.bf16 %v28539_v59, %v28539_v59  ;;  %v24645_v56 = vld [vmem:[%s27350_s14 + $0x2200] ss:$16 sps:$4 sm:$0xff]  }
 0x49e   : > { %v24651_v59 = vld [vmem:[%s27350_s14 + $0x2220] ss:$16 sps:$4 sm:$0xff]  }
 0x4a0   : > { %17093 = vmatpush1.bf16.msra.mxu0 %v24561_v10  ;;  %18774 = vmatpush1.bf16.msra.mxu1 %v24564_v11  ;;  %v24648_v10 = vld [vmem:[%s27350_s14 + $0x2208] ss:$16 sps:$4 sm:$0xff]   ;;  %v24653_v11 = vld [vmem:[%s27350_s14 + $0x2224] ss:$16 sps:$4 sm:$0xff]  }
 0x4a1   : > { %17094 = vmatprep.subr.bf16.mxu0 %v24569_v12  ;;  %18775 = vmatprep.subr.bf16.mxu1 %v24572_v14  ;;  %v24656_v12 = vld [vmem:[%s27350_s14 + $0x222c] ss:$16 sps:$4 sm:$0xff]   ;;  %v812_v14 = vpack.c.bf16 %v501_v58, %v501_v58  ;;  %v24732_v58 = vld [vmem:[%s27350_s14 + $0x23c8] ss:$16 sps:$4 sm:$0xff]  }
 0x4a4   : > { %17095 = vmatpush1.bf16.msra.mxu0 %v24567_v15  ;;  %18776 = vmatpush1.bf16.msra.mxu1 %v24570_v16  ;;  %v24654_v15 = vld [vmem:[%s27350_s14 + $0x2228] ss:$16 sps:$4 sm:$0xff]   ;;  %v24659_v16 = vld [vmem:[%s27350_s14 + $0x2244] ss:$16 sps:$4 sm:$0xff]  }
 0x4a5   : > { %17096 = vmatprep.subr.bf16.mxu0 %v24575_v62  ;;  %18777 = vmatprep.subr.bf16.mxu1 %v24578_v17  ;;  %v24662_v62 = vld [vmem:[%s27350_s14 + $0x224c] ss:$16 sps:$4 sm:$0xff]   ;;  %v24657_v17 = vld [vmem:[%s27350_s14 + $0x2240] ss:$16 sps:$4 sm:$0xff]  }
 0x4a8   : > { %17097 = vmatpush1.bf16.msra.mxu0 %v24573_v18  ;;  %18778 = vmatpush1.bf16.msra.mxu1 %v24576_v19  ;;  %v24660_v18 = vld [vmem:[%s27350_s14 + $0x2248] ss:$16 sps:$4 sm:$0xff]   ;;  %v24665_v19 = vld [vmem:[%s27350_s14 + $0x2264] ss:$16 sps:$4 sm:$0xff]  }
 0x4a9   : > { %17098 = vmatprep.subr.bf16.mxu0 %v24581_v20  ;;  %18779 = vmatprep.subr.bf16.mxu1 %v24584_v8  ;;  %v24668_v20 = vld [vmem:[%s27350_s14 + $0x226c] ss:$16 sps:$4 sm:$0xff]   ;;  %v24663_v8 = vld [vmem:[%s27350_s14 + $0x2260] ss:$16 sps:$4 sm:$0xff]  }
 0x4ac   : > { %17099 = vmatpush1.bf16.msra.mxu0 %v24579_v22  ;;  %18780 = vmatpush1.bf16.msra.mxu1 %v24582_v6  ;;  %v24666_v22 = vld [vmem:[%s27350_s14 + $0x2268] ss:$16 sps:$4 sm:$0xff]   ;;  %v24671_v6 = vld [vmem:[%s27350_s14 + $0x2284] ss:$16 sps:$4 sm:$0xff]  }
 0x4ad   : > { %17100 = vmatprep.subr.bf16.mxu0 %v24587_v23  ;;  %18781 = vmatprep.subr.bf16.mxu1 %v24590_v9  ;;  %v24674_v23 = vld [vmem:[%s27350_s14 + $0x228c] ss:$16 sps:$4 sm:$0xff]   ;;  %v24669_v9 = vld [vmem:[%s27350_s14 + $0x2280] ss:$16 sps:$4 sm:$0xff]  }
 0x4b0   : > { %17101 = vmatpush1.bf16.msra.mxu0 %v24585_v27  ;;  %18782 = vmatpush1.bf16.msra.mxu1 %v24588_v30  ;;  %v24672_v27 = vld [vmem:[%s27350_s14 + $0x2288] ss:$16 sps:$4 sm:$0xff]   ;;  %v24677_v30 = vld [vmem:[%s27350_s14 + $0x22a4] ss:$16 sps:$4 sm:$0xff]  }
 0x4b1   : > { %17102 = vmatprep.subr.bf16.mxu0 %v24593_v31  ;;  %18783 = vmatprep.subr.bf16.mxu1 %v24596_v33  ;;  %v24680_v31 = vld [vmem:[%s27350_s14 + $0x22ac] ss:$16 sps:$4 sm:$0xff]   ;;  %v24675_v33 = vld [vmem:[%s27350_s14 + $0x22a0] ss:$16 sps:$4 sm:$0xff]  }
 0x4b4   : > { %17103 = vmatpush1.bf16.msra.mxu0 %v24591_v13  ;;  %18784 = vmatpush1.bf16.msra.mxu1 %v24594_v34  ;;  %v24678_v13 = vld [vmem:[%s27350_s14 + $0x22a8] ss:$16 sps:$4 sm:$0xff]   ;;  %v24683_v34 = vld [vmem:[%s27350_s14 + $0x22c4] ss:$16 sps:$4 sm:$0xff]  }
 0x4b5   : > { %17104 = vmatprep.subr.bf16.mxu0 %v24599_v35  ;;  %18785 = vmatprep.subr.bf16.mxu1 %v24602_v26  ;;  %v24686_v35 = vld [vmem:[%s27350_s14 + $0x22cc] ss:$16 sps:$4 sm:$0xff]   ;;  %v24681_v26 = vld [vmem:[%s27350_s14 + $0x22c0] ss:$16 sps:$4 sm:$0xff]  }
 0x4b8   : > { %17105 = vmatpush1.bf16.msra.mxu0 %v24597_v36  ;;  %18786 = vmatpush1.bf16.msra.mxu1 %v24600_v24  ;;  %v24684_v36 = vld [vmem:[%s27350_s14 + $0x22c8] ss:$16 sps:$4 sm:$0xff]   ;;  %v24689_v24 = vld [vmem:[%s27350_s14 + $0x22e4] ss:$16 sps:$4 sm:$0xff]  }
 0x4b9   : > { %17106 = vmatprep.subr.bf16.mxu0 %v24605_v38  ;;  %18787 = vmatprep.subr.bf16.mxu1 %v24608_v21  ;;  %v24692_v38 = vld [vmem:[%s27350_s14 + $0x22ec] ss:$16 sps:$4 sm:$0xff]   ;;  %v24687_v21 = vld [vmem:[%s27350_s14 + $0x22e0] ss:$16 sps:$4 sm:$0xff]  }
 0x4bc   : > { %17107 = vmatpush1.bf16.msra.mxu0 %v24603_v28  ;;  %18788 = vmatpush1.bf16.msra.mxu1 %v24606_v41  ;;  %v24690_v28 = vld [vmem:[%s27350_s14 + $0x22e8] ss:$16 sps:$4 sm:$0xff]   ;;  %v24695_v41 = vld [vmem:[%s27350_s14 + $0x2304] ss:$16 sps:$4 sm:$0xff]  }
 0x4bd   : > { %17108 = vmatprep.subr.bf16.mxu0 %v24611_v44  ;;  %18789 = vmatprep.subr.bf16.mxu1 %v24614_v25  ;;  %v24698_v44 = vld [vmem:[%s27350_s14 + $0x230c] ss:$16 sps:$4 sm:$0xff]   ;;  %v24693_v25 = vld [vmem:[%s27350_s14 + $0x2300] ss:$16 sps:$4 sm:$0xff]  }
 0x4c0   : > { %17109 = vmatpush1.bf16.msra.mxu0 %v24609_v46  ;;  %18790 = vmatpush1.bf16.msra.mxu1 %v24612_v48  ;;  %v24696_v46 = vld [vmem:[%s27350_s14 + $0x2308] ss:$16 sps:$4 sm:$0xff]   ;;  %v24701_v48 = vld [vmem:[%s27350_s14 + $0x2324] ss:$16 sps:$4 sm:$0xff]  }
 0x4c1   : > { %17110 = vmatprep.subr.bf16.mxu0 %v24617_v29  ;;  %18791 = vmatprep.subr.bf16.mxu1 %v24620_v50  ;;  %v24704_v29 = vld [vmem:[%s27350_s14 + $0x232c] ss:$16 sps:$4 sm:$0xff]   ;;  %v24699_v50 = vld [vmem:[%s27350_s14 + $0x2320] ss:$16 sps:$4 sm:$0xff]  }
 0x4c4   : > { %17111 = vmatpush1.bf16.msra.mxu0 %v24615_v51  ;;  %18792 = vmatpush1.bf16.msra.mxu1 %v24618_v32  ;;  %v24702_v51 = vld [vmem:[%s27350_s14 + $0x2328] ss:$16 sps:$4 sm:$0xff]   ;;  %v24707_v32 = vld [vmem:[%s27350_s14 + $0x2344] ss:$16 sps:$4 sm:$0xff]  }
 0x4c5   : > { %17112 = vmatprep.subr.bf16.mxu0 %v24623_v52  ;;  %18793 = vmatprep.subr.bf16.mxu1 %v24626_v39  ;;  %v24710_v52 = vld [vmem:[%s27350_s14 + $0x234c] ss:$16 sps:$4 sm:$0xff]   ;;  %v24705_v39 = vld [vmem:[%s27350_s14 + $0x2340] ss:$16 sps:$4 sm:$0xff]  }
 0x4c8   : > { %17113 = vmatpush1.bf16.msra.mxu0 %v24621_v54  ;;  %18794 = vmatpush1.bf16.msra.mxu1 %v24624_v37  ;;  %v24708_v54 = vld [vmem:[%s27350_s14 + $0x2348] ss:$16 sps:$4 sm:$0xff]   ;;  %v24713_v37 = vld [vmem:[%s27350_s14 + $0x2364] ss:$16 sps:$4 sm:$0xff]  }
 0x4c9   : > { %17114 = vmatprep.subr.bf16.mxu0 %v24629_v42  ;;  %18795 = vmatprep.subr.bf16.mxu1 %v24632_v57  ;;  %v24716_v42 = vld [vmem:[%s27350_s14 + $0x236c] ss:$16 sps:$4 sm:$0xff]   ;;  %v24711_v57 = vld [vmem:[%s27350_s14 + $0x2360] ss:$16 sps:$4 sm:$0xff]  }
 0x4cc   : > { %17115 = vmatpush1.bf16.msra.mxu0 %v24627_v40  ;;  %18796 = vmatpush1.bf16.msra.mxu1 %v24630_v60  ;;  %v24714_v40 = vld [vmem:[%s27350_s14 + $0x2368] ss:$16 sps:$4 sm:$0xff]   ;;  %v24719_v60 = vld [vmem:[%s27350_s14 + $0x2384] ss:$16 sps:$4 sm:$0xff]  }
 0x4cd   : > { %17116 = vmatprep.subr.bf16.mxu0 %v24635_v61  ;;  %18797 = vmatprep.subr.bf16.mxu1 %v24638_v63  ;;  %v24722_v61 = vld [vmem:[%s27350_s14 + $0x238c] ss:$16 sps:$4 sm:$0xff]   ;;  %v24717_v63 = vld [vmem:[%s27350_s14 + $0x2380] ss:$16 sps:$4 sm:$0xff]  }
 0x4d0   : > { %17117 = vmatpush1.bf16.msra.mxu0 %v24633_v0  ;;  %18798 = vmatpush1.bf16.msra.mxu1 %v24636_v1  ;;  %v24725_v0 = vld [vmem:[%s27350_s14 + $0x23a4] ss:$16 sps:$4 sm:$0xff]   ;;  %v24728_v1 = vld [vmem:[%s27350_s14 + $0x23ac] ss:$16 sps:$4 sm:$0xff]  }
 0x4d1   : > { %17118 = vmatprep.subr.bf16.mxu0 %v24641_v47  ;;  %18799 = vmatprep.subr.bf16.mxu1 %v24644_v2  ;;  %v24723_v47 = vld [vmem:[%s27350_s14 + $0x23a0] ss:$16 sps:$4 sm:$0xff]   ;;  %v24726_v2 = vld [vmem:[%s27350_s14 + $0x23a8] ss:$16 sps:$4 sm:$0xff]  }
 0x4d4   : > { %17119 = vmatpush1.bf16.msra.mxu0 %v24639_v55  ;;  %18800 = vmatpush1.bf16.msra.mxu1 %v24642_v4  ;;  %v24731_v55 = vld [vmem:[%s27350_s14 + $0x23c4] ss:$16 sps:$4 sm:$0xff]   ;;  %v24734_v4 = vld [vmem:[%s27350_s14 + $0x23cc] ss:$16 sps:$4 sm:$0xff]  }
 0x4d5   : > { %17129 = vmatprep.subr.bf16.mxu0 %v24647_v5  ;;  %18810 = vmatprep.subr.bf16.mxu1 %v24650_v53  ;;  %v28678_v5 = vld [vmem:[#allocation2 + $0x48] sm:$0xff]  ;;  %v24729_v53 = vld [vmem:[%s27350_s14 + $0x23c0] ss:$16 sps:$4 sm:$0xff]  }
 0x4d7   : > { %17121 = vmatmul.mubr.bf16.vlgmr.msra.gmra.mrb[0].mxu0 %v809_v7  ;;  %18802 = vmatmul.mubr.bf16.vlgmr.msra.gmra.mrb[0].mxu1 %v809_v7  ;;  %v24737_v7 = vld [vmem:[%s27350_s14 + $0x23e4] ss:$16 sps:$4 sm:$0xff]  }
 0x4d8   : > { %17130 = vmatpush1.bf16.msra.mxu0 %v24645_v56  ;;  %18811 = vmatpush1.bf16.msra.mxu1 %v24648_v10  ;;  %v24740_v56 = vld [vmem:[%s27350_s14 + $0x23ec] ss:$16 sps:$4 sm:$0xff]   ;;  %v28686_v10 = vrot.slane %v28678_v5, %v27416_v49 }
 0x4d9   : > { %17131 = vmatprep.subr.bf16.mxu0 %v24653_v11  ;;  %18812 = vmatprep.subr.bf16.mxu1 %v24656_v12  ;;  %v24735_v11 = vld [vmem:[%s27350_s14 + $0x23e0] ss:$16 sps:$4 sm:$0xff]   ;;  %v24738_v12 = vld [vmem:[%s27350_s14 + $0x23e8] ss:$16 sps:$4 sm:$0xff]  }
 0x4da   : > { %17161 = vmatprep.mubr.bf16.mxu0 %v812_v14  ;;  %18842 = vmatprep.mubr.bf16.mxu1 %v812_v14  ;;  %v24744_v14 = vld [vmem:[%s27350_s14 + $0x2404] ss:$16 sps:$4 sm:$0xff]  }
 0x4dc   : > { %17132 = vmatpush1.bf16.msra.mxu0 %v24651_v59  ;;  %18813 = vmatpush1.bf16.msra.mxu1 %v24654_v15  ;;  %v24747_v59 = vld [vmem:[%s27350_s14 + $0x240c] ss:$16 sps:$4 sm:$0xff]   ;;  %v517_v15 = vcombine.high %v28686_v10, %v28686_v10 }
 0x4dd   : > { %17133 = vmatprep.subr.bf16.mxu0 %v24659_v16  ;;  %18814 = vmatprep.subr.bf16.mxu1 %v24662_v62  ;;  %v811_v16 = vpack.c.bf16 %v28612_v3, %v28612_v3  ;;  %v24742_v62 = vld [vmem:[%s27350_s14 + $0x2400] ss:$16 sps:$4 sm:$0xff]  }
 0x4de   : > { %v24748_v3 = vld [vmem:[%s27350_s14 + $0x2420] ss:$16 sps:$4 sm:$0xff]  }
 0x4e0   : > { %17134 = vmatpush1.bf16.msra.mxu0 %v24657_v17  ;;  %18815 = vmatpush1.bf16.msra.mxu1 %v24660_v18  ;;  %v24745_v17 = vld [vmem:[%s27350_s14 + $0x2408] ss:$16 sps:$4 sm:$0xff]   ;;  %v24750_v18 = vld [vmem:[%s27350_s14 + $0x2424] ss:$16 sps:$4 sm:$0xff]  }
 0x4e1   : > { %17135 = vmatprep.subr.bf16.mxu0 %v24665_v19  ;;  %18816 = vmatprep.subr.bf16.mxu1 %v24668_v20  ;;  %v24753_v19 = vld [vmem:[%s27350_s14 + $0x242c] ss:$16 sps:$4 sm:$0xff]   ;;  %v814_v20 = vpack.c.bf16 %v517_v15, %v517_v15  ;;  %v24826_v15 = vld [vmem:[%s27350_s14 + $0x25c0] ss:$16 sps:$4 sm:$0xff]  }
 0x4e4   : > { %17136 = vmatpush1.bf16.msra.mxu0 %v24663_v8  ;;  %18817 = vmatpush1.bf16.msra.mxu1 %v24666_v22  ;;  %v24751_v8 = vld [vmem:[%s27350_s14 + $0x2428] ss:$16 sps:$4 sm:$0xff]   ;;  %v24756_v22 = vld [vmem:[%s27350_s14 + $0x2444] ss:$16 sps:$4 sm:$0xff]  }
 0x4e5   : > { %17137 = vmatprep.subr.bf16.mxu0 %v24671_v6  ;;  %18818 = vmatprep.subr.bf16.mxu1 %v24674_v23  ;;  %v24759_v6 = vld [vmem:[%s27350_s14 + $0x244c] ss:$16 sps:$4 sm:$0xff]   ;;  %v24754_v23 = vld [vmem:[%s27350_s14 + $0x2440] ss:$16 sps:$4 sm:$0xff]  }
 0x4e8   : > { %17138 = vmatpush1.bf16.msra.mxu0 %v24669_v9  ;;  %18819 = vmatpush1.bf16.msra.mxu1 %v24672_v27  ;;  %v24757_v9 = vld [vmem:[%s27350_s14 + $0x2448] ss:$16 sps:$4 sm:$0xff]   ;;  %v24762_v27 = vld [vmem:[%s27350_s14 + $0x2464] ss:$16 sps:$4 sm:$0xff]  }
 0x4e9   : > { %17139 = vmatprep.subr.bf16.mxu0 %v24677_v30  ;;  %18820 = vmatprep.subr.bf16.mxu1 %v24680_v31  ;;  %v24765_v30 = vld [vmem:[%s27350_s14 + $0x246c] ss:$16 sps:$4 sm:$0xff]   ;;  %v24760_v31 = vld [vmem:[%s27350_s14 + $0x2460] ss:$16 sps:$4 sm:$0xff]  }
 0x4ec   : > { %17140 = vmatpush1.bf16.msra.mxu0 %v24675_v33  ;;  %18821 = vmatpush1.bf16.msra.mxu1 %v24678_v13  ;;  %v24763_v33 = vld [vmem:[%s27350_s14 + $0x2468] ss:$16 sps:$4 sm:$0xff]   ;;  %v24768_v13 = vld [vmem:[%s27350_s14 + $0x2484] ss:$16 sps:$4 sm:$0xff]  }
 0x4ed   : > { %17141 = vmatprep.subr.bf16.mxu0 %v24683_v34  ;;  %18822 = vmatprep.subr.bf16.mxu1 %v24686_v35  ;;  %v24771_v34 = vld [vmem:[%s27350_s14 + $0x248c] ss:$16 sps:$4 sm:$0xff]   ;;  %v24766_v35 = vld [vmem:[%s27350_s14 + $0x2480] ss:$16 sps:$4 sm:$0xff]  }
 0x4f0   : > { %17142 = vmatpush1.bf16.msra.mxu0 %v24681_v26  ;;  %18823 = vmatpush1.bf16.msra.mxu1 %v24684_v36  ;;  %v24769_v26 = vld [vmem:[%s27350_s14 + $0x2488] ss:$16 sps:$4 sm:$0xff]   ;;  %v24774_v36 = vld [vmem:[%s27350_s14 + $0x24a4] ss:$16 sps:$4 sm:$0xff]  }
 0x4f1   : > { %17143 = vmatprep.subr.bf16.mxu0 %v24689_v24  ;;  %18824 = vmatprep.subr.bf16.mxu1 %v24692_v38  ;;  %v24777_v24 = vld [vmem:[%s27350_s14 + $0x24ac] ss:$16 sps:$4 sm:$0xff]   ;;  %v24772_v38 = vld [vmem:[%s27350_s14 + $0x24a0] ss:$16 sps:$4 sm:$0xff]  }
 0x4f4   : > { %17144 = vmatpush1.bf16.msra.mxu0 %v24687_v21  ;;  %18825 = vmatpush1.bf16.msra.mxu1 %v24690_v28  ;;  %v24775_v21 = vld [vmem:[%s27350_s14 + $0x24a8] ss:$16 sps:$4 sm:$0xff]   ;;  %v24780_v28 = vld [vmem:[%s27350_s14 + $0x24c4] ss:$16 sps:$4 sm:$0xff]  }
 0x4f5   : > { %17145 = vmatprep.subr.bf16.mxu0 %v24695_v41  ;;  %18826 = vmatprep.subr.bf16.mxu1 %v24698_v44  ;;  %v24783_v41 = vld [vmem:[%s27350_s14 + $0x24cc] ss:$16 sps:$4 sm:$0xff]   ;;  %v24778_v44 = vld [vmem:[%s27350_s14 + $0x24c0] ss:$16 sps:$4 sm:$0xff]  }
 0x4f8   : > { %17146 = vmatpush1.bf16.msra.mxu0 %v24693_v25  ;;  %18827 = vmatpush1.bf16.msra.mxu1 %v24696_v46  ;;  %v24781_v25 = vld [vmem:[%s27350_s14 + $0x24c8] ss:$16 sps:$4 sm:$0xff]   ;;  %v24786_v46 = vld [vmem:[%s27350_s14 + $0x24e4] ss:$16 sps:$4 sm:$0xff]  }
 0x4f9   : > { %17147 = vmatprep.subr.bf16.mxu0 %v24701_v48  ;;  %18828 = vmatprep.subr.bf16.mxu1 %v24704_v29  ;;  %v24789_v48 = vld [vmem:[%s27350_s14 + $0x24ec] ss:$16 sps:$4 sm:$0xff]   ;;  %v24784_v29 = vld [vmem:[%s27350_s14 + $0x24e0] ss:$16 sps:$4 sm:$0xff]  }
 0x4fc   : > { %17148 = vmatpush1.bf16.msra.mxu0 %v24699_v50  ;;  %18829 = vmatpush1.bf16.msra.mxu1 %v24702_v51  ;;  %v24787_v50 = vld [vmem:[%s27350_s14 + $0x24e8] ss:$16 sps:$4 sm:$0xff]   ;;  %v24792_v51 = vld [vmem:[%s27350_s14 + $0x2504] ss:$16 sps:$4 sm:$0xff]  }
 0x4fd   : > { %17149 = vmatprep.subr.bf16.mxu0 %v24707_v32  ;;  %18830 = vmatprep.subr.bf16.mxu1 %v24710_v52  ;;  %v24795_v32 = vld [vmem:[%s27350_s14 + $0x250c] ss:$16 sps:$4 sm:$0xff]   ;;  %v24790_v52 = vld [vmem:[%s27350_s14 + $0x2500] ss:$16 sps:$4 sm:$0xff]  }
 0x500   : > { %17150 = vmatpush1.bf16.msra.mxu0 %v24705_v39  ;;  %18831 = vmatpush1.bf16.msra.mxu1 %v24708_v54  ;;  %v24793_v39 = vld [vmem:[%s27350_s14 + $0x2508] ss:$16 sps:$4 sm:$0xff]   ;;  %v24798_v54 = vld [vmem:[%s27350_s14 + $0x2524] ss:$16 sps:$4 sm:$0xff]  }
 0x501   : > { %17151 = vmatprep.subr.bf16.mxu0 %v24713_v37  ;;  %18832 = vmatprep.subr.bf16.mxu1 %v24716_v42  ;;  %v24801_v37 = vld [vmem:[%s27350_s14 + $0x252c] ss:$16 sps:$4 sm:$0xff]   ;;  %v24796_v42 = vld [vmem:[%s27350_s14 + $0x2520] ss:$16 sps:$4 sm:$0xff]  }
 0x504   : > { %17152 = vmatpush1.bf16.msra.mxu0 %v24711_v57  ;;  %18833 = vmatpush1.bf16.msra.mxu1 %v24714_v40  ;;  %v24799_v57 = vld [vmem:[%s27350_s14 + $0x2528] ss:$16 sps:$4 sm:$0xff]   ;;  %v24804_v40 = vld [vmem:[%s27350_s14 + $0x2544] ss:$16 sps:$4 sm:$0xff]  }
 0x505   : > { %17153 = vmatprep.subr.bf16.mxu0 %v24719_v60  ;;  %18834 = vmatprep.subr.bf16.mxu1 %v24722_v61  ;;  %v24807_v60 = vld [vmem:[%s27350_s14 + $0x254c] ss:$16 sps:$4 sm:$0xff]   ;;  %v24802_v61 = vld [vmem:[%s27350_s14 + $0x2540] ss:$16 sps:$4 sm:$0xff]  }
 0x508   : > { %17154 = vmatpush1.bf16.msra.mxu0 %v24717_v63  ;;  %18835 = vmatpush1.bf16.msra.mxu1 %v24720_v45  ;;  %v24805_v63 = vld [vmem:[%s27350_s14 + $0x2548] ss:$16 sps:$4 sm:$0xff]   ;;  %v24810_v45 = vld [vmem:[%s27350_s14 + $0x2564] ss:$16 sps:$4 sm:$0xff]  }
 0x509   : > { %17155 = vmatprep.subr.bf16.mxu0 %v24725_v0  ;;  %18836 = vmatprep.subr.bf16.mxu1 %v24728_v1  ;;  %v24813_v0 = vld [vmem:[%s27350_s14 + $0x256c] ss:$16 sps:$4 sm:$0xff]   ;;  %v24808_v1 = vld [vmem:[%s27350_s14 + $0x2560] ss:$16 sps:$4 sm:$0xff]  }
 0x50c   : > { %17156 = vmatpush1.bf16.msra.mxu0 %v24723_v47  ;;  %18837 = vmatpush1.bf16.msra.mxu1 %v24726_v2  ;;  %v24811_v47 = vld [vmem:[%s27350_s14 + $0x2568] ss:$16 sps:$4 sm:$0xff]   ;;  %v24816_v2 = vld [vmem:[%s27350_s14 + $0x2584] ss:$16 sps:$4 sm:$0xff]  }
 0x50d   : > { %17157 = vmatprep.subr.bf16.mxu0 %v24731_v55  ;;  %18838 = vmatprep.subr.bf16.mxu1 %v24734_v4  ;;  %v24819_v55 = vld [vmem:[%s27350_s14 + $0x258c] ss:$16 sps:$4 sm:$0xff]   ;;  %v24814_v4 = vld [vmem:[%s27350_s14 + $0x2580] ss:$16 sps:$4 sm:$0xff]  }
 0x510   : > { %17158 = vmatpush1.bf16.msra.mxu0 %v24729_v53  ;;  %18839 = vmatpush1.bf16.msra.mxu1 %v24732_v58  ;;  %v24817_v53 = vld [vmem:[%s27350_s14 + $0x2588] ss:$16 sps:$4 sm:$0xff]   ;;  %v24822_v58 = vld [vmem:[%s27350_s14 + $0x25a4] ss:$16 sps:$4 sm:$0xff]  }
 0x511   : > { %17159 = vmatprep.subr.bf16.mxu0 %v24737_v7  ;;  %18840 = vmatprep.subr.bf16.mxu1 %v24740_v56  ;;  %v24825_v7 = vld [vmem:[%s27350_s14 + $0x25ac] ss:$16 sps:$4 sm:$0xff]   ;;  %v24820_v56 = vld [vmem:[%s27350_s14 + $0x25a0] ss:$16 sps:$4 sm:$0xff]  }
 0x514   : > { %17160 = vmatpush1.bf16.msra.mxu0 %v24735_v11  ;;  %18841 = vmatpush1.bf16.msra.mxu1 %v24738_v12  ;;  %v24823_v11 = vld [vmem:[%s27350_s14 + $0x25a8] ss:$16 sps:$4 sm:$0xff]   ;;  %v24828_v12 = vld [vmem:[%s27350_s14 + $0x25c4] ss:$16 sps:$4 sm:$0xff]  }
 0x515   : > { %17170 = vmatprep.subr.bf16.mxu0 %v24744_v14  ;;  %18851 = vmatprep.subr.bf16.mxu1 %v24747_v59  ;;  %v24831_v14 = vld [vmem:[%s27350_s14 + $0x25cc] ss:$16 sps:$4 sm:$0xff]   ;;  %v502_v59 = vcombine.high %v28678_v5, %v28678_v5  ;;  %v24832_v5 = vld [vmem:[%s27350_s14 + $0x25e0] ss:$16 sps:$4 sm:$0xff]  }
 0x517   : > { %17162 = vmatmul.mubr.bf16.vlgmr.msra.gmra.mrb[0].mxu0 %v811_v16  ;;  %18843 = vmatmul.mubr.bf16.vlgmr.msra.gmra.mrb[0].mxu1 %v811_v16  ;;  %v24829_v16 = vld [vmem:[%s27350_s14 + $0x25c8] ss:$16 sps:$4 sm:$0xff]  }
 0x518   : > { %17171 = vmatpush1.bf16.msra.mxu0 %v24742_v62  ;;  %18852 = vmatpush1.bf16.msra.mxu1 %v24745_v17  ;;  %v24834_v62 = vld [vmem:[%s27350_s14 + $0x25e4] ss:$16 sps:$4 sm:$0xff]   ;;  %v24837_v17 = vld [vmem:[%s27350_s14 + $0x25ec] ss:$16 sps:$4 sm:$0xff]  }
 0x519   : > { %17172 = vmatprep.subr.bf16.mxu0 %v24750_v18  ;;  %18853 = vmatprep.subr.bf16.mxu1 %v24753_v19  ;;  %v28759_v18 = vrot.slane %v502_v59, %v27416_v49  ;;  %v24835_v19 = vld [vmem:[%s27350_s14 + $0x25e8] ss:$16 sps:$4 sm:$0xff]  }
 0x51a   : > { %17202 = vmatprep.mubr.bf16.mxu0 %v814_v20  ;;  %18883 = vmatprep.mubr.bf16.mxu1 %v814_v20  ;;  %v24840_v20 = vld [vmem:[%s27350_s14 + $0x2604] ss:$16 sps:$4 sm:$0xff]   ;;  %v24913_v59 = vld [vmem:[%s27350_s14 + $0x2788] ss:$16 sps:$4 sm:$0xff]  }
 0x51c   : > { %17173 = vmatpush1.bf16.msra.mxu0 %v24748_v3  ;;  %18854 = vmatpush1.bf16.msra.mxu1 %v24751_v8  ;;  %v24843_v3 = vld [vmem:[%s27350_s14 + $0x260c] ss:$16 sps:$4 sm:$0xff]   ;;  %v518_v8 = vcombine.high %v28759_v18, %v28759_v18 }
 0x51d   : > { %17174 = vmatprep.subr.bf16.mxu0 %v24756_v22  ;;  %18855 = vmatprep.subr.bf16.mxu1 %v24759_v6  ;;  %v813_v22 = vpack.c.bf16 %v28686_v10, %v28686_v10  ;;  %v24838_v6 = vld [vmem:[%s27350_s14 + $0x2600] ss:$16 sps:$4 sm:$0xff]  }
 0x51e   : > { %v24844_v10 = vld [vmem:[%s27350_s14 + $0x2620] ss:$16 sps:$4 sm:$0xff]  }
 0x520   : > { %17175 = vmatpush1.bf16.msra.mxu0 %v24754_v23  ;;  %18856 = vmatpush1.bf16.msra.mxu1 %v24757_v9  ;;  %v24841_v23 = vld [vmem:[%s27350_s14 + $0x2608] ss:$16 sps:$4 sm:$0xff]   ;;  %v24846_v9 = vld [vmem:[%s27350_s14 + $0x2624] ss:$16 sps:$4 sm:$0xff]  }
 0x521   : > { %17176 = vmatprep.subr.bf16.mxu0 %v24762_v27  ;;  %18857 = vmatprep.subr.bf16.mxu1 %v24765_v30  ;;  %v24849_v27 = vld [vmem:[%s27350_s14 + $0x262c] ss:$16 sps:$4 sm:$0xff]   ;;  %v816_v30 = vpack.c.bf16 %v518_v8, %v518_v8  ;;  %v24925_v8 = vld [vmem:[%s27350_s14 + $0x27c8] ss:$16 sps:$4 sm:$0xff]  }
 0x524   : > { %17177 = vmatpush1.bf16.msra.mxu0 %v24760_v31  ;;  %18858 = vmatpush1.bf16.msra.mxu1 %v24763_v33  ;;  %v24847_v31 = vld [vmem:[%s27350_s14 + $0x2628] ss:$16 sps:$4 sm:$0xff]   ;;  %v24852_v33 = vld [vmem:[%s27350_s14 + $0x2644] ss:$16 sps:$4 sm:$0xff]  }
 0x525   : > { %17178 = vmatprep.subr.bf16.mxu0 %v24768_v13  ;;  %18859 = vmatprep.subr.bf16.mxu1 %v24771_v34  ;;  %v24855_v13 = vld [vmem:[%s27350_s14 + $0x264c] ss:$16 sps:$4 sm:$0xff]   ;;  %v24850_v34 = vld [vmem:[%s27350_s14 + $0x2640] ss:$16 sps:$4 sm:$0xff]  }
 0x528   : > { %17179 = vmatpush1.bf16.msra.mxu0 %v24766_v35  ;;  %18860 = vmatpush1.bf16.msra.mxu1 %v24769_v26  ;;  %v24853_v35 = vld [vmem:[%s27350_s14 + $0x2648] ss:$16 sps:$4 sm:$0xff]   ;;  %v24858_v26 = vld [vmem:[%s27350_s14 + $0x2664] ss:$16 sps:$4 sm:$0xff]  }
 0x529   : > { %17180 = vmatprep.subr.bf16.mxu0 %v24774_v36  ;;  %18861 = vmatprep.subr.bf16.mxu1 %v24777_v24  ;;  %v24861_v36 = vld [vmem:[%s27350_s14 + $0x266c] ss:$16 sps:$4 sm:$0xff]   ;;  %v24856_v24 = vld [vmem:[%s27350_s14 + $0x2660] ss:$16 sps:$4 sm:$0xff]  }
 0x52c   : > { %17181 = vmatpush1.bf16.msra.mxu0 %v24772_v38  ;;  %18862 = vmatpush1.bf16.msra.mxu1 %v24775_v21  ;;  %v24859_v38 = vld [vmem:[%s27350_s14 + $0x2668] ss:$16 sps:$4 sm:$0xff]   ;;  %v24864_v21 = vld [vmem:[%s27350_s14 + $0x2684] ss:$16 sps:$4 sm:$0xff]  }
 0x52d   : > { %17182 = vmatprep.subr.bf16.mxu0 %v24780_v28  ;;  %18863 = vmatprep.subr.bf16.mxu1 %v24783_v41  ;;  %v24867_v28 = vld [vmem:[%s27350_s14 + $0x268c] ss:$16 sps:$4 sm:$0xff]   ;;  %v24862_v41 = vld [vmem:[%s27350_s14 + $0x2680] ss:$16 sps:$4 sm:$0xff]  }
 0x530   : > { %17183 = vmatpush1.bf16.msra.mxu0 %v24778_v44  ;;  %18864 = vmatpush1.bf16.msra.mxu1 %v24781_v25  ;;  %v24865_v44 = vld [vmem:[%s27350_s14 + $0x2688] ss:$16 sps:$4 sm:$0xff]   ;;  %v24870_v25 = vld [vmem:[%s27350_s14 + $0x26a4] ss:$16 sps:$4 sm:$0xff]  }
 0x531   : > { %17184 = vmatprep.subr.bf16.mxu0 %v24786_v46  ;;  %18865 = vmatprep.subr.bf16.mxu1 %v24789_v48  ;;  %v24873_v46 = vld [vmem:[%s27350_s14 + $0x26ac] ss:$16 sps:$4 sm:$0xff]   ;;  %v24868_v48 = vld [vmem:[%s27350_s14 + $0x26a0] ss:$16 sps:$4 sm:$0xff]  }
 0x534   : > { %17185 = vmatpush1.bf16.msra.mxu0 %v24784_v29  ;;  %18866 = vmatpush1.bf16.msra.mxu1 %v24787_v50  ;;  %v24871_v29 = vld [vmem:[%s27350_s14 + $0x26a8] ss:$16 sps:$4 sm:$0xff]   ;;  %v24876_v50 = vld [vmem:[%s27350_s14 + $0x26c4] ss:$16 sps:$4 sm:$0xff]  }
 0x535   : > { %17186 = vmatprep.subr.bf16.mxu0 %v24792_v51  ;;  %18867 = vmatprep.subr.bf16.mxu1 %v24795_v32  ;;  %v24879_v51 = vld [vmem:[%s27350_s14 + $0x26cc] ss:$16 sps:$4 sm:$0xff]   ;;  %v24874_v32 = vld [vmem:[%s27350_s14 + $0x26c0] ss:$16 sps:$4 sm:$0xff]  }
 0x538   : > { %17187 = vmatpush1.bf16.msra.mxu0 %v24790_v52  ;;  %18868 = vmatpush1.bf16.msra.mxu1 %v24793_v39  ;;  %v24877_v52 = vld [vmem:[%s27350_s14 + $0x26c8] ss:$16 sps:$4 sm:$0xff]   ;;  %v24882_v39 = vld [vmem:[%s27350_s14 + $0x26e4] ss:$16 sps:$4 sm:$0xff]  }
 0x539   : > { %17188 = vmatprep.subr.bf16.mxu0 %v24798_v54  ;;  %18869 = vmatprep.subr.bf16.mxu1 %v24801_v37  ;;  %v24885_v54 = vld [vmem:[%s27350_s14 + $0x26ec] ss:$16 sps:$4 sm:$0xff]   ;;  %v24880_v37 = vld [vmem:[%s27350_s14 + $0x26e0] ss:$16 sps:$4 sm:$0xff]  }
 0x53c   : > { %17189 = vmatpush1.bf16.msra.mxu0 %v24796_v42  ;;  %18870 = vmatpush1.bf16.msra.mxu1 %v24799_v57  ;;  %v24883_v42 = vld [vmem:[%s27350_s14 + $0x26e8] ss:$16 sps:$4 sm:$0xff]   ;;  %v24888_v57 = vld [vmem:[%s27350_s14 + $0x2704] ss:$16 sps:$4 sm:$0xff]  }
 0x53d   : > { %17190 = vmatprep.subr.bf16.mxu0 %v24804_v40  ;;  %18871 = vmatprep.subr.bf16.mxu1 %v24807_v60  ;;  %v24891_v40 = vld [vmem:[%s27350_s14 + $0x270c] ss:$16 sps:$4 sm:$0xff]   ;;  %v24886_v60 = vld [vmem:[%s27350_s14 + $0x2700] ss:$16 sps:$4 sm:$0xff]  }
 0x540   : > { %17191 = vmatpush1.bf16.msra.mxu0 %v24802_v61  ;;  %18872 = vmatpush1.bf16.msra.mxu1 %v24805_v63  ;;  %v24889_v61 = vld [vmem:[%s27350_s14 + $0x2708] ss:$16 sps:$4 sm:$0xff]   ;;  %v24894_v63 = vld [vmem:[%s27350_s14 + $0x2724] ss:$16 sps:$4 sm:$0xff]  }
 0x541   : > { %17192 = vmatprep.subr.bf16.mxu0 %v24810_v45  ;;  %18873 = vmatprep.subr.bf16.mxu1 %v24813_v0  ;;  %v24897_v45 = vld [vmem:[%s27350_s14 + $0x272c] ss:$16 sps:$4 sm:$0xff]   ;;  %v24892_v0 = vld [vmem:[%s27350_s14 + $0x2720] ss:$16 sps:$4 sm:$0xff]  }
 0x544   : > { %17193 = vmatpush1.bf16.msra.mxu0 %v24808_v1  ;;  %18874 = vmatpush1.bf16.msra.mxu1 %v24811_v47  ;;  %v24895_v1 = vld [vmem:[%s27350_s14 + $0x2728] ss:$16 sps:$4 sm:$0xff]   ;;  %v24900_v47 = vld [vmem:[%s27350_s14 + $0x2744] ss:$16 sps:$4 sm:$0xff]  }
 0x545   : > { %17194 = vmatprep.subr.bf16.mxu0 %v24816_v2  ;;  %18875 = vmatprep.subr.bf16.mxu1 %v24819_v55  ;;  %v24903_v2 = vld [vmem:[%s27350_s14 + $0x274c] ss:$16 sps:$4 sm:$0xff]   ;;  %v24898_v55 = vld [vmem:[%s27350_s14 + $0x2740] ss:$16 sps:$4 sm:$0xff]  }
 0x548   : > { %17195 = vmatpush1.bf16.msra.mxu0 %v24814_v4  ;;  %18876 = vmatpush1.bf16.msra.mxu1 %v24817_v53  ;;  %v24901_v4 = vld [vmem:[%s27350_s14 + $0x2748] ss:$16 sps:$4 sm:$0xff]   ;;  %v24906_v53 = vld [vmem:[%s27350_s14 + $0x2764] ss:$16 sps:$4 sm:$0xff]  }
 0x549   : > { %17196 = vmatprep.subr.bf16.mxu0 %v24822_v58  ;;  %18877 = vmatprep.subr.bf16.mxu1 %v24825_v7  ;;  %v24909_v58 = vld [vmem:[%s27350_s14 + $0x276c] ss:$16 sps:$4 sm:$0xff]   ;;  %v24904_v7 = vld [vmem:[%s27350_s14 + $0x2760] ss:$16 sps:$4 sm:$0xff]  }
 0x54c   : > { %17197 = vmatpush1.bf16.msra.mxu0 %v24820_v56  ;;  %18878 = vmatpush1.bf16.msra.mxu1 %v24823_v11  ;;  %v24907_v56 = vld [vmem:[%s27350_s14 + $0x2768] ss:$16 sps:$4 sm:$0xff]   ;;  %v24912_v11 = vld [vmem:[%s27350_s14 + $0x2784] ss:$16 sps:$4 sm:$0xff]  }
 0x54d   : > { %17198 = vmatprep.subr.bf16.mxu0 %v24828_v12  ;;  %18879 = vmatprep.subr.bf16.mxu1 %v24831_v14  ;;  %v24915_v12 = vld [vmem:[%s27350_s14 + $0x278c] ss:$16 sps:$4 sm:$0xff]   ;;  %v24910_v14 = vld [vmem:[%s27350_s14 + $0x2780] ss:$16 sps:$4 sm:$0xff]  }
 0x550   : > { %17199 = vmatpush1.bf16.msra.mxu0 %v24826_v15  ;;  %18880 = vmatpush1.bf16.msra.mxu1 %v24829_v16  ;;  %v24918_v15 = vld [vmem:[%s27350_s14 + $0x27a4] ss:$16 sps:$4 sm:$0xff]   ;;  %v24921_v16 = vld [vmem:[%s27350_s14 + $0x27ac] ss:$16 sps:$4 sm:$0xff]  }
 0x551   : > { %17200 = vmatprep.subr.bf16.mxu0 %v24834_v62  ;;  %18881 = vmatprep.subr.bf16.mxu1 %v24837_v17  ;;  %v24916_v62 = vld [vmem:[%s27350_s14 + $0x27a0] ss:$16 sps:$4 sm:$0xff]   ;;  %v24919_v17 = vld [vmem:[%s27350_s14 + $0x27a8] ss:$16 sps:$4 sm:$0xff]  }
 0x554   : > { %17201 = vmatpush1.bf16.msra.mxu0 %v24832_v5  ;;  %18882 = vmatpush1.bf16.msra.mxu1 %v24835_v19  ;;  %v24924_v5 = vld [vmem:[%s27350_s14 + $0x27c4] ss:$16 sps:$4 sm:$0xff]   ;;  %v24927_v19 = vld [vmem:[%s27350_s14 + $0x27cc] ss:$16 sps:$4 sm:$0xff]  }
 0x555   : > { %17211 = vmatprep.subr.bf16.mxu0 %v24840_v20  ;;  %18892 = vmatprep.subr.bf16.mxu1 %v24843_v3  ;;  %v28825_v20 = vld [vmem:[#allocation2 + $0x50] sm:$0xff] }
 0x556   : > { %v24922_v3 = vld [vmem:[%s27350_s14 + $0x27c0] ss:$16 sps:$4 sm:$0xff]  }
 0x557   : > { %17203 = vmatmul.mubr.bf16.vlgmr.msra.gmra.mrb[0].mxu0 %v813_v22  ;;  %18884 = vmatmul.mubr.bf16.vlgmr.msra.gmra.mrb[0].mxu1 %v813_v22  ;;  %v24930_v22 = vld [vmem:[%s27350_s14 + $0x27e4] ss:$16 sps:$4 sm:$0xff]  }
 0x558   : > { %17212 = vmatpush1.bf16.msra.mxu0 %v24838_v6  ;;  %18893 = vmatpush1.bf16.msra.mxu1 %v24841_v23  ;;  %v24933_v6 = vld [vmem:[%s27350_s14 + $0x27ec] ss:$16 sps:$4 sm:$0xff]   ;;  %v28833_v23 = vrot.slane %v28825_v20, %v27416_v49 }
 0x559   : > { %17213 = vmatprep.subr.bf16.mxu0 %v24846_v9  ;;  %18894 = vmatprep.subr.bf16.mxu1 %v24849_v27  ;;  %v24928_v9 = vld [vmem:[%s27350_s14 + $0x27e0] ss:$16 sps:$4 sm:$0xff]   ;;  %v24931_v27 = vld [vmem:[%s27350_s14 + $0x27e8] ss:$16 sps:$4 sm:$0xff]  }
 0x55a   : > { %17243 = vmatprep.mubr.bf16.mxu0 %v816_v30  ;;  %18924 = vmatprep.mubr.bf16.mxu1 %v816_v30  ;;  %v24937_v30 = vld [vmem:[%s27350_s14 + $0x2804] ss:$16 sps:$4 sm:$0xff]  }
 0x55c   : > { %17214 = vmatpush1.bf16.msra.mxu0 %v24844_v10  ;;  %18895 = vmatpush1.bf16.msra.mxu1 %v24847_v31  ;;  %v24940_v10 = vld [vmem:[%s27350_s14 + $0x280c] ss:$16 sps:$4 sm:$0xff]   ;;  %v534_v31 = vcombine.high %v28833_v23, %v28833_v23 }
 0x55d   : > { %17215 = vmatprep.subr.bf16.mxu0 %v24852_v33  ;;  %18896 = vmatprep.subr.bf16.mxu1 %v24855_v13  ;;  %v815_v33 = vpack.c.bf16 %v28759_v18, %v28759_v18  ;;  %v24935_v13 = vld [vmem:[%s27350_s14 + $0x2800] ss:$16 sps:$4 sm:$0xff]  }
 0x55e   : > { %v24941_v18 = vld [vmem:[%s27350_s14 + $0x2820] ss:$16 sps:$4 sm:$0xff]  }
 0x560   : > { %17216 = vmatpush1.bf16.msra.mxu0 %v24850_v34  ;;  %18897 = vmatpush1.bf16.msra.mxu1 %v24853_v35  ;;  %v24938_v34 = vld [vmem:[%s27350_s14 + $0x2808] ss:$16 sps:$4 sm:$0xff]   ;;  %v24943_v35 = vld [vmem:[%s27350_s14 + $0x2824] ss:$16 sps:$4 sm:$0xff]  }
 0x561   : > { %17217 = vmatprep.subr.bf16.mxu0 %v24858_v26  ;;  %18898 = vmatprep.subr.bf16.mxu1 %v24861_v36  ;;  %v24946_v26 = vld [vmem:[%s27350_s14 + $0x282c] ss:$16 sps:$4 sm:$0xff]   ;;  %v818_v36 = vpack.c.bf16 %v534_v31, %v534_v31  ;;  %v25019_v31 = vld [vmem:[%s27350_s14 + $0x29c0] ss:$16 sps:$4 sm:$0xff]  }
 0x564   : > { %17218 = vmatpush1.bf16.msra.mxu0 %v24856_v24  ;;  %18899 = vmatpush1.bf16.msra.mxu1 %v24859_v38  ;;  %v24944_v24 = vld [vmem:[%s27350_s14 + $0x2828] ss:$16 sps:$4 sm:$0xff]   ;;  %v24949_v38 = vld [vmem:[%s27350_s14 + $0x2844] ss:$16 sps:$4 sm:$0xff]  }
 0x565   : > { %17219 = vmatprep.subr.bf16.mxu0 %v24864_v21  ;;  %18900 = vmatprep.subr.bf16.mxu1 %v24867_v28  ;;  %v24952_v21 = vld [vmem:[%s27350_s14 + $0x284c] ss:$16 sps:$4 sm:$0xff]   ;;  %v24947_v28 = vld [vmem:[%s27350_s14 + $0x2840] ss:$16 sps:$4 sm:$0xff]  }
 0x568   : > { %17220 = vmatpush1.bf16.msra.mxu0 %v24862_v41  ;;  %18901 = vmatpush1.bf16.msra.mxu1 %v24865_v44  ;;  %v24950_v41 = vld [vmem:[%s27350_s14 + $0x2848] ss:$16 sps:$4 sm:$0xff]   ;;  %v24955_v44 = vld [vmem:[%s27350_s14 + $0x2864] ss:$16 sps:$4 sm:$0xff]  }
 0x569   : > { %17221 = vmatprep.subr.bf16.mxu0 %v24870_v25  ;;  %18902 = vmatprep.subr.bf16.mxu1 %v24873_v46  ;;  %v24958_v25 = vld [vmem:[%s27350_s14 + $0x286c] ss:$16 sps:$4 sm:$0xff]   ;;  %v24953_v46 = vld [vmem:[%s27350_s14 + $0x2860] ss:$16 sps:$4 sm:$0xff]  }
 0x56c   : > { %17222 = vmatpush1.bf16.msra.mxu0 %v24868_v48  ;;  %18903 = vmatpush1.bf16.msra.mxu1 %v24871_v29  ;;  %v24956_v48 = vld [vmem:[%s27350_s14 + $0x2868] ss:$16 sps:$4 sm:$0xff]   ;;  %v24961_v29 = vld [vmem:[%s27350_s14 + $0x2884] ss:$16 sps:$4 sm:$0xff]  }
 0x56d   : > { %17223 = vmatprep.subr.bf16.mxu0 %v24876_v50  ;;  %18904 = vmatprep.subr.bf16.mxu1 %v24879_v51  ;;  %v24964_v50 = vld [vmem:[%s27350_s14 + $0x288c] ss:$16 sps:$4 sm:$0xff]   ;;  %v24959_v51 = vld [vmem:[%s27350_s14 + $0x2880] ss:$16 sps:$4 sm:$0xff]  }
 0x570   : > { %17224 = vmatpush1.bf16.msra.mxu0 %v24874_v32  ;;  %18905 = vmatpush1.bf16.msra.mxu1 %v24877_v52  ;;  %v24962_v32 = vld [vmem:[%s27350_s14 + $0x2888] ss:$16 sps:$4 sm:$0xff]   ;;  %v24967_v52 = vld [vmem:[%s27350_s14 + $0x28a4] ss:$16 sps:$4 sm:$0xff]  }
 0x571   : > { %17225 = vmatprep.subr.bf16.mxu0 %v24882_v39  ;;  %18906 = vmatprep.subr.bf16.mxu1 %v24885_v54  ;;  %v24970_v39 = vld [vmem:[%s27350_s14 + $0x28ac] ss:$16 sps:$4 sm:$0xff]   ;;  %v24965_v54 = vld [vmem:[%s27350_s14 + $0x28a0] ss:$16 sps:$4 sm:$0xff]  }
 0x574   : > { %17226 = vmatpush1.bf16.msra.mxu0 %v24880_v37  ;;  %18907 = vmatpush1.bf16.msra.mxu1 %v24883_v42  ;;  %v24968_v37 = vld [vmem:[%s27350_s14 + $0x28a8] ss:$16 sps:$4 sm:$0xff]   ;;  %v24973_v42 = vld [vmem:[%s27350_s14 + $0x28c4] ss:$16 sps:$4 sm:$0xff]  }
 0x575   : > { %17227 = vmatprep.subr.bf16.mxu0 %v24888_v57  ;;  %18908 = vmatprep.subr.bf16.mxu1 %v24891_v40  ;;  %v24976_v57 = vld [vmem:[%s27350_s14 + $0x28cc] ss:$16 sps:$4 sm:$0xff]   ;;  %v24971_v40 = vld [vmem:[%s27350_s14 + $0x28c0] ss:$16 sps:$4 sm:$0xff]  }
 0x578   : > { %17228 = vmatpush1.bf16.msra.mxu0 %v24886_v60  ;;  %18909 = vmatpush1.bf16.msra.mxu1 %v24889_v61  ;;  %v24974_v60 = vld [vmem:[%s27350_s14 + $0x28c8] ss:$16 sps:$4 sm:$0xff]   ;;  %v24979_v61 = vld [vmem:[%s27350_s14 + $0x28e4] ss:$16 sps:$4 sm:$0xff]  }
 0x579   : > { %17229 = vmatprep.subr.bf16.mxu0 %v24894_v63  ;;  %18910 = vmatprep.subr.bf16.mxu1 %v24897_v45  ;;  %v24982_v63 = vld [vmem:[%s27350_s14 + $0x28ec] ss:$16 sps:$4 sm:$0xff]   ;;  %v24977_v45 = vld [vmem:[%s27350_s14 + $0x28e0] ss:$16 sps:$4 sm:$0xff]  }
 0x57c   : > { %17230 = vmatpush1.bf16.msra.mxu0 %v24892_v0  ;;  %18911 = vmatpush1.bf16.msra.mxu1 %v24895_v1  ;;  %v24980_v0 = vld [vmem:[%s27350_s14 + $0x28e8] ss:$16 sps:$4 sm:$0xff]   ;;  %v24985_v1 = vld [vmem:[%s27350_s14 + $0x2904] ss:$16 sps:$4 sm:$0xff]  }
 0x57d   : > { %17231 = vmatprep.subr.bf16.mxu0 %v24900_v47  ;;  %18912 = vmatprep.subr.bf16.mxu1 %v24903_v2  ;;  %v24988_v47 = vld [vmem:[%s27350_s14 + $0x290c] ss:$16 sps:$4 sm:$0xff]   ;;  %v24983_v2 = vld [vmem:[%s27350_s14 + $0x2900] ss:$16 sps:$4 sm:$0xff]  }
 0x580   : > { %17232 = vmatpush1.bf16.msra.mxu0 %v24898_v55  ;;  %18913 = vmatpush1.bf16.msra.mxu1 %v24901_v4  ;;  %v24986_v55 = vld [vmem:[%s27350_s14 + $0x2908] ss:$16 sps:$4 sm:$0xff]   ;;  %v24991_v4 = vld [vmem:[%s27350_s14 + $0x2924] ss:$16 sps:$4 sm:$0xff]  }
 0x581   : > { %17233 = vmatprep.subr.bf16.mxu0 %v24906_v53  ;;  %18914 = vmatprep.subr.bf16.mxu1 %v24909_v58  ;;  %v24994_v53 = vld [vmem:[%s27350_s14 + $0x292c] ss:$16 sps:$4 sm:$0xff]   ;;  %v24989_v58 = vld [vmem:[%s27350_s14 + $0x2920] ss:$16 sps:$4 sm:$0xff]  }
 0x584   : > { %17234 = vmatpush1.bf16.msra.mxu0 %v24904_v7  ;;  %18915 = vmatpush1.bf16.msra.mxu1 %v24907_v56  ;;  %v24992_v7 = vld [vmem:[%s27350_s14 + $0x2928] ss:$16 sps:$4 sm:$0xff]   ;;  %v24997_v56 = vld [vmem:[%s27350_s14 + $0x2944] ss:$16 sps:$4 sm:$0xff]  }
 0x585   : > { %17235 = vmatprep.subr.bf16.mxu0 %v24912_v11  ;;  %18916 = vmatprep.subr.bf16.mxu1 %v24915_v12  ;;  %v25000_v11 = vld [vmem:[%s27350_s14 + $0x294c] ss:$16 sps:$4 sm:$0xff]   ;;  %v24995_v12 = vld [vmem:[%s27350_s14 + $0x2940] ss:$16 sps:$4 sm:$0xff]  }
 0x588   : > { %17236 = vmatpush1.bf16.msra.mxu0 %v24910_v14  ;;  %18917 = vmatpush1.bf16.msra.mxu1 %v24913_v59  ;;  %v24998_v14 = vld [vmem:[%s27350_s14 + $0x2948] ss:$16 sps:$4 sm:$0xff]   ;;  %v25003_v59 = vld [vmem:[%s27350_s14 + $0x2964] ss:$16 sps:$4 sm:$0xff]  }
 0x589   : > { %17237 = vmatprep.subr.bf16.mxu0 %v24918_v15  ;;  %18918 = vmatprep.subr.bf16.mxu1 %v24921_v16  ;;  %v25006_v15 = vld [vmem:[%s27350_s14 + $0x296c] ss:$16 sps:$4 sm:$0xff]   ;;  %v25001_v16 = vld [vmem:[%s27350_s14 + $0x2960] ss:$16 sps:$4 sm:$0xff]  }
 0x58c   : > { %17238 = vmatpush1.bf16.msra.mxu0 %v24916_v62  ;;  %18919 = vmatpush1.bf16.msra.mxu1 %v24919_v17  ;;  %v25004_v62 = vld [vmem:[%s27350_s14 + $0x2968] ss:$16 sps:$4 sm:$0xff]   ;;  %v25009_v17 = vld [vmem:[%s27350_s14 + $0x2984] ss:$16 sps:$4 sm:$0xff]  }
 0x58d   : > { %17239 = vmatprep.subr.bf16.mxu0 %v24924_v5  ;;  %18920 = vmatprep.subr.bf16.mxu1 %v24927_v19  ;;  %v25012_v5 = vld [vmem:[%s27350_s14 + $0x298c] ss:$16 sps:$4 sm:$0xff]   ;;  %v25007_v19 = vld [vmem:[%s27350_s14 + $0x2980] ss:$16 sps:$4 sm:$0xff]  }
 0x590   : > { %17240 = vmatpush1.bf16.msra.mxu0 %v24922_v3  ;;  %18921 = vmatpush1.bf16.msra.mxu1 %v24925_v8  ;;  %v25010_v3 = vld [vmem:[%s27350_s14 + $0x2988] ss:$16 sps:$4 sm:$0xff]   ;;  %v25015_v8 = vld [vmem:[%s27350_s14 + $0x29a4] ss:$16 sps:$4 sm:$0xff]  }
 0x591   : > { %17241 = vmatprep.subr.bf16.mxu0 %v24930_v22  ;;  %18922 = vmatprep.subr.bf16.mxu1 %v24933_v6  ;;  %v25018_v22 = vld [vmem:[%s27350_s14 + $0x29ac] ss:$16 sps:$4 sm:$0xff]   ;;  %v25013_v6 = vld [vmem:[%s27350_s14 + $0x29a0] ss:$16 sps:$4 sm:$0xff]  }
 0x594   : > { %17242 = vmatpush1.bf16.msra.mxu0 %v24928_v9  ;;  %18923 = vmatpush1.bf16.msra.mxu1 %v24931_v27  ;;  %v25016_v9 = vld [vmem:[%s27350_s14 + $0x29a8] ss:$16 sps:$4 sm:$0xff]   ;;  %v25021_v27 = vld [vmem:[%s27350_s14 + $0x29c4] ss:$16 sps:$4 sm:$0xff]  }
 0x595   : > { %17252 = vmatprep.subr.bf16.mxu0 %v24937_v30  ;;  %18933 = vmatprep.subr.bf16.mxu1 %v24940_v10  ;;  %v25024_v30 = vld [vmem:[%s27350_s14 + $0x29cc] ss:$16 sps:$4 sm:$0xff]   ;;  %v519_v10 = vcombine.high %v28825_v20, %v28825_v20  ;;  %v25025_v20 = vld [vmem:[%s27350_s14 + $0x29e0] ss:$16 sps:$4 sm:$0xff]  }
 0x597   : > { %17244 = vmatmul.mubr.bf16.vlgmr.msra.gmra.mrb[0].mxu0 %v815_v33  ;;  %18925 = vmatmul.mubr.bf16.vlgmr.msra.gmra.mrb[0].mxu1 %v815_v33  ;;  %v25022_v33 = vld [vmem:[%s27350_s14 + $0x29c8] ss:$16 sps:$4 sm:$0xff]  }
 0x598   : > { %17253 = vmatpush1.bf16.msra.mxu0 %v24935_v13  ;;  %18934 = vmatpush1.bf16.msra.mxu1 %v24938_v34  ;;  %v25027_v13 = vld [vmem:[%s27350_s14 + $0x29e4] ss:$16 sps:$4 sm:$0xff]   ;;  %v25030_v34 = vld [vmem:[%s27350_s14 + $0x29ec] ss:$16 sps:$4 sm:$0xff]  }
 0x599   : > { %17254 = vmatprep.subr.bf16.mxu0 %v24943_v35  ;;  %18935 = vmatprep.subr.bf16.mxu1 %v24946_v26  ;;  %v28906_v35 = vrot.slane %v519_v10, %v27416_v49  ;;  %v25028_v26 = vld [vmem:[%s27350_s14 + $0x29e8] ss:$16 sps:$4 sm:$0xff]  }
 0x59a   : > { %17284 = vmatprep.mubr.bf16.mxu0 %v818_v36  ;;  %18965 = vmatprep.mubr.bf16.mxu1 %v818_v36  ;;  %v25033_v36 = vld [vmem:[%s27350_s14 + $0x2a04] ss:$16 sps:$4 sm:$0xff]   ;;  %v25106_v10 = vld [vmem:[%s27350_s14 + $0x2b88] ss:$16 sps:$4 sm:$0xff]  }
 0x59c   : > { %17255 = vmatpush1.bf16.msra.mxu0 %v24941_v18  ;;  %18936 = vmatpush1.bf16.msra.mxu1 %v24944_v24  ;;  %v25036_v18 = vld [vmem:[%s27350_s14 + $0x2a0c] ss:$16 sps:$4 sm:$0xff]   ;;  %v535_v24 = vcombine.high %v28906_v35, %v28906_v35 }
 0x59d   : > { %17256 = vmatprep.subr.bf16.mxu0 %v24949_v38  ;;  %18937 = vmatprep.subr.bf16.mxu1 %v24952_v21  ;;  %v817_v38 = vpack.c.bf16 %v28833_v23, %v28833_v23  ;;  %v25031_v21 = vld [vmem:[%s27350_s14 + $0x2a00] ss:$16 sps:$4 sm:$0xff]  }
 0x59e   : > { %v25037_v23 = vld [vmem:[%s27350_s14 + $0x2a20] ss:$16 sps:$4 sm:$0xff]  }
 0x5a0   : > { %17257 = vmatpush1.bf16.msra.mxu0 %v24947_v28  ;;  %18938 = vmatpush1.bf16.msra.mxu1 %v24950_v41  ;;  %v25034_v28 = vld [vmem:[%s27350_s14 + $0x2a08] ss:$16 sps:$4 sm:$0xff]   ;;  %v25039_v41 = vld [vmem:[%s27350_s14 + $0x2a24] ss:$16 sps:$4 sm:$0xff]  }
 0x5a1   : > { %17258 = vmatprep.subr.bf16.mxu0 %v24955_v44  ;;  %18939 = vmatprep.subr.bf16.mxu1 %v24958_v25  ;;  %v25042_v44 = vld [vmem:[%s27350_s14 + $0x2a2c] ss:$16 sps:$4 sm:$0xff]   ;;  %v820_v25 = vpack.c.bf16 %v535_v24, %v535_v24  ;;  %v25118_v24 = vld [vmem:[%s27350_s14 + $0x2bc8] ss:$16 sps:$4 sm:$0xff]  }
 0x5a4   : > { %17259 = vmatpush1.bf16.msra.mxu0 %v24953_v46  ;;  %18940 = vmatpush1.bf16.msra.mxu1 %v24956_v48  ;;  %v25040_v46 = vld [vmem:[%s27350_s14 + $0x2a28] ss:$16 sps:$4 sm:$0xff]   ;;  %v25045_v48 = vld [vmem:[%s27350_s14 + $0x2a44] ss:$16 sps:$4 sm:$0xff]  }
 0x5a5   : > { %17260 = vmatprep.subr.bf16.mxu0 %v24961_v29  ;;  %18941 = vmatprep.subr.bf16.mxu1 %v24964_v50  ;;  %v25048_v29 = vld [vmem:[%s27350_s14 + $0x2a4c] ss:$16 sps:$4 sm:$0xff]   ;;  %v25043_v50 = vld [vmem:[%s27350_s14 + $0x2a40] ss:$16 sps:$4 sm:$0xff]  }
 0x5a8   : > { %17261 = vmatpush1.bf16.msra.mxu0 %v24959_v51  ;;  %18942 = vmatpush1.bf16.msra.mxu1 %v24962_v32  ;;  %v25046_v51 = vld [vmem:[%s27350_s14 + $0x2a48] ss:$16 sps:$4 sm:$0xff]   ;;  %v25051_v32 = vld [vmem:[%s27350_s14 + $0x2a64] ss:$16 sps:$4 sm:$0xff]  }
 0x5a9   : > { %17262 = vmatprep.subr.bf16.mxu0 %v24967_v52  ;;  %18943 = vmatprep.subr.bf16.mxu1 %v24970_v39  ;;  %v25054_v52 = vld [vmem:[%s27350_s14 + $0x2a6c] ss:$16 sps:$4 sm:$0xff]   ;;  %v25049_v39 = vld [vmem:[%s27350_s14 + $0x2a60] ss:$16 sps:$4 sm:$0xff]  }
 0x5ac   : > { %17263 = vmatpush1.bf16.msra.mxu0 %v24965_v54  ;;  %18944 = vmatpush1.bf16.msra.mxu1 %v24968_v37  ;;  %v25052_v54 = vld [vmem:[%s27350_s14 + $0x2a68] ss:$16 sps:$4 sm:$0xff]   ;;  %v25057_v37 = vld [vmem:[%s27350_s14 + $0x2a84] ss:$16 sps:$4 sm:$0xff]  }
 0x5ad   : > { %17264 = vmatprep.subr.bf16.mxu0 %v24973_v42  ;;  %18945 = vmatprep.subr.bf16.mxu1 %v24976_v57  ;;  %v25060_v42 = vld [vmem:[%s27350_s14 + $0x2a8c] ss:$16 sps:$4 sm:$0xff]   ;;  %v25055_v57 = vld [vmem:[%s27350_s14 + $0x2a80] ss:$16 sps:$4 sm:$0xff]  }
 0x5b0   : > { %17265 = vmatpush1.bf16.msra.mxu0 %v24971_v40  ;;  %18946 = vmatpush1.bf16.msra.mxu1 %v24974_v60  ;;  %v25058_v40 = vld [vmem:[%s27350_s14 + $0x2a88] ss:$16 sps:$4 sm:$0xff]   ;;  %v25063_v60 = vld [vmem:[%s27350_s14 + $0x2aa4] ss:$16 sps:$4 sm:$0xff]  }
 0x5b1   : > { %17266 = vmatprep.subr.bf16.mxu0 %v24979_v61  ;;  %18947 = vmatprep.subr.bf16.mxu1 %v24982_v63  ;;  %v25066_v61 = vld [vmem:[%s27350_s14 + $0x2aac] ss:$16 sps:$4 sm:$0xff]   ;;  %v25061_v63 = vld [vmem:[%s27350_s14 + $0x2aa0] ss:$16 sps:$4 sm:$0xff]  }
 0x5b4   : > { %17267 = vmatpush1.bf16.msra.mxu0 %v24977_v45  ;;  %18948 = vmatpush1.bf16.msra.mxu1 %v24980_v0  ;;  %v25064_v45 = vld [vmem:[%s27350_s14 + $0x2aa8] ss:$16 sps:$4 sm:$0xff]   ;;  %v25069_v0 = vld [vmem:[%s27350_s14 + $0x2ac4] ss:$16 sps:$4 sm:$0xff]  }
 0x5b5   : > { %17268 = vmatprep.subr.bf16.mxu0 %v24985_v1  ;;  %18949 = vmatprep.subr.bf16.mxu1 %v24988_v47  ;;  %v25072_v1 = vld [vmem:[%s27350_s14 + $0x2acc] ss:$16 sps:$4 sm:$0xff]   ;;  %v25067_v47 = vld [vmem:[%s27350_s14 + $0x2ac0] ss:$16 sps:$4 sm:$0xff]  }
 0x5b8   : > { %17269 = vmatpush1.bf16.msra.mxu0 %v24983_v2  ;;  %18950 = vmatpush1.bf16.msra.mxu1 %v24986_v55  ;;  %v25070_v2 = vld [vmem:[%s27350_s14 + $0x2ac8] ss:$16 sps:$4 sm:$0xff]   ;;  %v25075_v55 = vld [vmem:[%s27350_s14 + $0x2ae4] ss:$16 sps:$4 sm:$0xff]  }
 0x5b9   : > { %17270 = vmatprep.subr.bf16.mxu0 %v24991_v4  ;;  %18951 = vmatprep.subr.bf16.mxu1 %v24994_v53  ;;  %v25078_v4 = vld [vmem:[%s27350_s14 + $0x2aec] ss:$16 sps:$4 sm:$0xff]   ;;  %v25073_v53 = vld [vmem:[%s27350_s14 + $0x2ae0] ss:$16 sps:$4 sm:$0xff]  }
 0x5bc   : > { %17271 = vmatpush1.bf16.msra.mxu0 %v24989_v58  ;;  %18952 = vmatpush1.bf16.msra.mxu1 %v24992_v7  ;;  %v25076_v58 = vld [vmem:[%s27350_s14 + $0x2ae8] ss:$16 sps:$4 sm:$0xff]   ;;  %v25081_v7 = vld [vmem:[%s27350_s14 + $0x2b04] ss:$16 sps:$4 sm:$0xff]  }
 0x5bd   : > { %17272 = vmatprep.subr.bf16.mxu0 %v24997_v56  ;;  %18953 = vmatprep.subr.bf16.mxu1 %v25000_v11  ;;  %v25084_v56 = vld [vmem:[%s27350_s14 + $0x2b0c] ss:$16 sps:$4 sm:$0xff]   ;;  %v25079_v11 = vld [vmem:[%s27350_s14 + $0x2b00] ss:$16 sps:$4 sm:$0xff]  }
 0x5c0   : > { %17273 = vmatpush1.bf16.msra.mxu0 %v24995_v12  ;;  %18954 = vmatpush1.bf16.msra.mxu1 %v24998_v14  ;;  %v25082_v12 = vld [vmem:[%s27350_s14 + $0x2b08] ss:$16 sps:$4 sm:$0xff]   ;;  %v25087_v14 = vld [vmem:[%s27350_s14 + $0x2b24] ss:$16 sps:$4 sm:$0xff]  }
 0x5c1   : > { %17274 = vmatprep.subr.bf16.mxu0 %v25003_v59  ;;  %18955 = vmatprep.subr.bf16.mxu1 %v25006_v15  ;;  %v25090_v59 = vld [vmem:[%s27350_s14 + $0x2b2c] ss:$16 sps:$4 sm:$0xff]   ;;  %v25085_v15 = vld [vmem:[%s27350_s14 + $0x2b20] ss:$16 sps:$4 sm:$0xff]  }
 0x5c4   : > { %17275 = vmatpush1.bf16.msra.mxu0 %v25001_v16  ;;  %18956 = vmatpush1.bf16.msra.mxu1 %v25004_v62  ;;  %v25088_v16 = vld [vmem:[%s27350_s14 + $0x2b28] ss:$16 sps:$4 sm:$0xff]   ;;  %v25093_v62 = vld [vmem:[%s27350_s14 + $0x2b44] ss:$16 sps:$4 sm:$0xff]  }
 0x5c5   : > { %17276 = vmatprep.subr.bf16.mxu0 %v25009_v17  ;;  %18957 = vmatprep.subr.bf16.mxu1 %v25012_v5  ;;  %v25096_v17 = vld [vmem:[%s27350_s14 + $0x2b4c] ss:$16 sps:$4 sm:$0xff]   ;;  %v25091_v5 = vld [vmem:[%s27350_s14 + $0x2b40] ss:$16 sps:$4 sm:$0xff]  }
 0x5c8   : > { %17277 = vmatpush1.bf16.msra.mxu0 %v25007_v19  ;;  %18958 = vmatpush1.bf16.msra.mxu1 %v25010_v3  ;;  %v25094_v19 = vld [vmem:[%s27350_s14 + $0x2b48] ss:$16 sps:$4 sm:$0xff]   ;;  %v25099_v3 = vld [vmem:[%s27350_s14 + $0x2b64] ss:$16 sps:$4 sm:$0xff]  }
 0x5c9   : > { %17278 = vmatprep.subr.bf16.mxu0 %v25015_v8  ;;  %18959 = vmatprep.subr.bf16.mxu1 %v25018_v22  ;;  %v25102_v8 = vld [vmem:[%s27350_s14 + $0x2b6c] ss:$16 sps:$4 sm:$0xff]   ;;  %v25097_v22 = vld [vmem:[%s27350_s14 + $0x2b60] ss:$16 sps:$4 sm:$0xff]  }
 0x5cc   : > { %17279 = vmatpush1.bf16.msra.mxu0 %v25013_v6  ;;  %18960 = vmatpush1.bf16.msra.mxu1 %v25016_v9  ;;  %v25100_v6 = vld [vmem:[%s27350_s14 + $0x2b68] ss:$16 sps:$4 sm:$0xff]   ;;  %v25105_v9 = vld [vmem:[%s27350_s14 + $0x2b84] ss:$16 sps:$4 sm:$0xff]  }
 0x5cd   : > { %17280 = vmatprep.subr.bf16.mxu0 %v25021_v27  ;;  %18961 = vmatprep.subr.bf16.mxu1 %v25024_v30  ;;  %v25108_v27 = vld [vmem:[%s27350_s14 + $0x2b8c] ss:$16 sps:$4 sm:$0xff]   ;;  %v25103_v30 = vld [vmem:[%s27350_s14 + $0x2b80] ss:$16 sps:$4 sm:$0xff]  }
 0x5d0   : > { %17281 = vmatpush1.bf16.msra.mxu0 %v25019_v31  ;;  %18962 = vmatpush1.bf16.msra.mxu1 %v25022_v33  ;;  %v25111_v31 = vld [vmem:[%s27350_s14 + $0x2ba4] ss:$16 sps:$4 sm:$0xff]   ;;  %v25114_v33 = vld [vmem:[%s27350_s14 + $0x2bac] ss:$16 sps:$4 sm:$0xff]  }
 0x5d1   : > { %17282 = vmatprep.subr.bf16.mxu0 %v25027_v13  ;;  %18963 = vmatprep.subr.bf16.mxu1 %v25030_v34  ;;  %v25109_v13 = vld [vmem:[%s27350_s14 + $0x2ba0] ss:$16 sps:$4 sm:$0xff]   ;;  %v25112_v34 = vld [vmem:[%s27350_s14 + $0x2ba8] ss:$16 sps:$4 sm:$0xff]  }
 0x5d4   : > { %17283 = vmatpush1.bf16.msra.mxu0 %v25025_v20  ;;  %18964 = vmatpush1.bf16.msra.mxu1 %v25028_v26  ;;  %v25117_v20 = vld [vmem:[%s27350_s14 + $0x2bc4] ss:$16 sps:$4 sm:$0xff]   ;;  %v25120_v26 = vld [vmem:[%s27350_s14 + $0x2bcc] ss:$16 sps:$4 sm:$0xff]  }
 0x5d5   : > { %17293 = vmatprep.subr.bf16.mxu0 %v25033_v36  ;;  %18974 = vmatprep.subr.bf16.mxu1 %v25036_v18  ;;  %v28972_v36 = vld [vmem:[#allocation2 + $0x58] sm:$0xff]  ;;  %v25115_v18 = vld [vmem:[%s27350_s14 + $0x2bc0] ss:$16 sps:$4 sm:$0xff]  }
 0x5d7   : > { %17285 = vmatmul.mubr.bf16.vlgmr.msra.gmra.mrb[0].mxu0 %v817_v38  ;;  %18966 = vmatmul.mubr.bf16.vlgmr.msra.gmra.mrb[0].mxu1 %v817_v38  ;;  %v25123_v38 = vld [vmem:[%s27350_s14 + $0x2be4] ss:$16 sps:$4 sm:$0xff]  }
 0x5d8   : > { %17294 = vmatpush1.bf16.msra.mxu0 %v25031_v21  ;;  %18975 = vmatpush1.bf16.msra.mxu1 %v25034_v28  ;;  %v25126_v21 = vld [vmem:[%s27350_s14 + $0x2bec] ss:$16 sps:$4 sm:$0xff]   ;;  %v28980_v28 = vrot.slane %v28972_v36, %v27416_v49 }
 0x5d9   : > { %17295 = vmatprep.subr.bf16.mxu0 %v25039_v41  ;;  %18976 = vmatprep.subr.bf16.mxu1 %v25042_v44  ;;  %v25121_v41 = vld [vmem:[%s27350_s14 + $0x2be0] ss:$16 sps:$4 sm:$0xff]   ;;  %v25124_v44 = vld [vmem:[%s27350_s14 + $0x2be8] ss:$16 sps:$4 sm:$0xff]  }
 0x5da   : > { %17325 = vmatprep.mubr.bf16.mxu0 %v820_v25  ;;  %19006 = vmatprep.mubr.bf16.mxu1 %v820_v25  ;;  %v25130_v25 = vld [vmem:[%s27350_s14 + $0x2c04] ss:$16 sps:$4 sm:$0xff]  }
 0x5dc   : > { %17296 = vmatpush1.bf16.msra.mxu0 %v25037_v23  ;;  %18977 = vmatpush1.bf16.msra.mxu1 %v25040_v46  ;;  %v25133_v23 = vld [vmem:[%s27350_s14 + $0x2c0c] ss:$16 sps:$4 sm:$0xff]   ;;  %v551_v46 = vcombine.high %v28980_v28, %v28980_v28 }
 0x5dd   : > { %17297 = vmatprep.subr.bf16.mxu0 %v25045_v48  ;;  %18978 = vmatprep.subr.bf16.mxu1 %v25048_v29  ;;  %v819_v48 = vpack.c.bf16 %v28906_v35, %v28906_v35  ;;  %v25128_v29 = vld [vmem:[%s27350_s14 + $0x2c00] ss:$16 sps:$4 sm:$0xff]  }
 0x5de   : > { %v25134_v35 = vld [vmem:[%s27350_s14 + $0x2c20] ss:$16 sps:$4 sm:$0xff]  }
 0x5e0   : > { %17298 = vmatpush1.bf16.msra.mxu0 %v25043_v50  ;;  %18979 = vmatpush1.bf16.msra.mxu1 %v25046_v51  ;;  %v25131_v50 = vld [vmem:[%s27350_s14 + $0x2c08] ss:$16 sps:$4 sm:$0xff]   ;;  %v25136_v51 = vld [vmem:[%s27350_s14 + $0x2c24] ss:$16 sps:$4 sm:$0xff]  }
 0x5e1   : > { %17299 = vmatprep.subr.bf16.mxu0 %v25051_v32  ;;  %18980 = vmatprep.subr.bf16.mxu1 %v25054_v52  ;;  %v25139_v32 = vld [vmem:[%s27350_s14 + $0x2c2c] ss:$16 sps:$4 sm:$0xff]   ;;  %v822_v52 = vpack.c.bf16 %v551_v46, %v551_v46  ;;  %v25212_v46 = vld [vmem:[%s27350_s14 + $0x2dc0] ss:$16 sps:$4 sm:$0xff]  }
 0x5e4   : > { %17300 = vmatpush1.bf16.msra.mxu0 %v25049_v39  ;;  %18981 = vmatpush1.bf16.msra.mxu1 %v25052_v54  ;;  %v25137_v39 = vld [vmem:[%s27350_s14 + $0x2c28] ss:$16 sps:$4 sm:$0xff]   ;;  %v25142_v54 = vld [vmem:[%s27350_s14 + $0x2c44] ss:$16 sps:$4 sm:$0xff]  }
 0x5e5   : > { %17301 = vmatprep.subr.bf16.mxu0 %v25057_v37  ;;  %18982 = vmatprep.subr.bf16.mxu1 %v25060_v42  ;;  %v25145_v37 = vld [vmem:[%s27350_s14 + $0x2c4c] ss:$16 sps:$4 sm:$0xff]   ;;  %v25140_v42 = vld [vmem:[%s27350_s14 + $0x2c40] ss:$16 sps:$4 sm:$0xff]  }
 0x5e8   : > { %17302 = vmatpush1.bf16.msra.mxu0 %v25055_v57  ;;  %18983 = vmatpush1.bf16.msra.mxu1 %v25058_v40  ;;  %v25143_v57 = vld [vmem:[%s27350_s14 + $0x2c48] ss:$16 sps:$4 sm:$0xff]   ;;  %v25148_v40 = vld [vmem:[%s27350_s14 + $0x2c64] ss:$16 sps:$4 sm:$0xff]  }
 0x5e9   : > { %17303 = vmatprep.subr.bf16.mxu0 %v25063_v60  ;;  %18984 = vmatprep.subr.bf16.mxu1 %v25066_v61  ;;  %v25151_v60 = vld [vmem:[%s27350_s14 + $0x2c6c] ss:$16 sps:$4 sm:$0xff]   ;;  %v25146_v61 = vld [vmem:[%s27350_s14 + $0x2c60] ss:$16 sps:$4 sm:$0xff]  }
 0x5ec   : > { %17304 = vmatpush1.bf16.msra.mxu0 %v25061_v63  ;;  %18985 = vmatpush1.bf16.msra.mxu1 %v25064_v45  ;;  %v25149_v63 = vld [vmem:[%s27350_s14 + $0x2c68] ss:$16 sps:$4 sm:$0xff]   ;;  %v25154_v45 = vld [vmem:[%s27350_s14 + $0x2c84] ss:$16 sps:$4 sm:$0xff]  }
 0x5ed   : > { %17305 = vmatprep.subr.bf16.mxu0 %v25069_v0  ;;  %18986 = vmatprep.subr.bf16.mxu1 %v25072_v1  ;;  %v25157_v0 = vld [vmem:[%s27350_s14 + $0x2c8c] ss:$16 sps:$4 sm:$0xff]   ;;  %v25152_v1 = vld [vmem:[%s27350_s14 + $0x2c80] ss:$16 sps:$4 sm:$0xff]  }
 0x5f0   : > { %17306 = vmatpush1.bf16.msra.mxu0 %v25067_v47  ;;  %18987 = vmatpush1.bf16.msra.mxu1 %v25070_v2  ;;  %v25155_v47 = vld [vmem:[%s27350_s14 + $0x2c88] ss:$16 sps:$4 sm:$0xff]   ;;  %v25160_v2 = vld [vmem:[%s27350_s14 + $0x2ca4] ss:$16 sps:$4 sm:$0xff]  }
 0x5f1   : > { %17307 = vmatprep.subr.bf16.mxu0 %v25075_v55  ;;  %18988 = vmatprep.subr.bf16.mxu1 %v25078_v4  ;;  %v25163_v55 = vld [vmem:[%s27350_s14 + $0x2cac] ss:$16 sps:$4 sm:$0xff]   ;;  %v25158_v4 = vld [vmem:[%s27350_s14 + $0x2ca0] ss:$16 sps:$4 sm:$0xff]  }
 0x5f4   : > { %17308 = vmatpush1.bf16.msra.mxu0 %v25073_v53  ;;  %18989 = vmatpush1.bf16.msra.mxu1 %v25076_v58  ;;  %v25161_v53 = vld [vmem:[%s27350_s14 + $0x2ca8] ss:$16 sps:$4 sm:$0xff]   ;;  %v25166_v58 = vld [vmem:[%s27350_s14 + $0x2cc4] ss:$16 sps:$4 sm:$0xff]  }
 0x5f5   : > { %17309 = vmatprep.subr.bf16.mxu0 %v25081_v7  ;;  %18990 = vmatprep.subr.bf16.mxu1 %v25084_v56  ;;  %v25169_v7 = vld [vmem:[%s27350_s14 + $0x2ccc] ss:$16 sps:$4 sm:$0xff]   ;;  %v25164_v56 = vld [vmem:[%s27350_s14 + $0x2cc0] ss:$16 sps:$4 sm:$0xff]  }
 0x5f8   : > { %17310 = vmatpush1.bf16.msra.mxu0 %v25079_v11  ;;  %18991 = vmatpush1.bf16.msra.mxu1 %v25082_v12  ;;  %v25167_v11 = vld [vmem:[%s27350_s14 + $0x2cc8] ss:$16 sps:$4 sm:$0xff]   ;;  %v25172_v12 = vld [vmem:[%s27350_s14 + $0x2ce4] ss:$16 sps:$4 sm:$0xff]  }
 0x5f9   : > { %17311 = vmatprep.subr.bf16.mxu0 %v25087_v14  ;;  %18992 = vmatprep.subr.bf16.mxu1 %v25090_v59  ;;  %v25175_v14 = vld [vmem:[%s27350_s14 + $0x2cec] ss:$16 sps:$4 sm:$0xff]   ;;  %v25170_v59 = vld [vmem:[%s27350_s14 + $0x2ce0] ss:$16 sps:$4 sm:$0xff]  }
 0x5fc   : > { %17312 = vmatpush1.bf16.msra.mxu0 %v25085_v15  ;;  %18993 = vmatpush1.bf16.msra.mxu1 %v25088_v16  ;;  %v25173_v15 = vld [vmem:[%s27350_s14 + $0x2ce8] ss:$16 sps:$4 sm:$0xff]   ;;  %v25178_v16 = vld [vmem:[%s27350_s14 + $0x2d04] ss:$16 sps:$4 sm:$0xff]  }
 0x5fd   : > { %17313 = vmatprep.subr.bf16.mxu0 %v25093_v62  ;;  %18994 = vmatprep.subr.bf16.mxu1 %v25096_v17  ;;  %v25181_v62 = vld [vmem:[%s27350_s14 + $0x2d0c] ss:$16 sps:$4 sm:$0xff]   ;;  %v25176_v17 = vld [vmem:[%s27350_s14 + $0x2d00] ss:$16 sps:$4 sm:$0xff]  }
 0x600   : > { %17314 = vmatpush1.bf16.msra.mxu0 %v25091_v5  ;;  %18995 = vmatpush1.bf16.msra.mxu1 %v25094_v19  ;;  %v25179_v5 = vld [vmem:[%s27350_s14 + $0x2d08] ss:$16 sps:$4 sm:$0xff]   ;;  %v25184_v19 = vld [vmem:[%s27350_s14 + $0x2d24] ss:$16 sps:$4 sm:$0xff]  }
 0x601   : > { %17315 = vmatprep.subr.bf16.mxu0 %v25099_v3  ;;  %18996 = vmatprep.subr.bf16.mxu1 %v25102_v8  ;;  %v25187_v3 = vld [vmem:[%s27350_s14 + $0x2d2c] ss:$16 sps:$4 sm:$0xff]   ;;  %v25182_v8 = vld [vmem:[%s27350_s14 + $0x2d20] ss:$16 sps:$4 sm:$0xff]  }
 0x604   : > { %17316 = vmatpush1.bf16.msra.mxu0 %v25097_v22  ;;  %18997 = vmatpush1.bf16.msra.mxu1 %v25100_v6  ;;  %v25185_v22 = vld [vmem:[%s27350_s14 + $0x2d28] ss:$16 sps:$4 sm:$0xff]   ;;  %v25190_v6 = vld [vmem:[%s27350_s14 + $0x2d44] ss:$16 sps:$4 sm:$0xff]  }
 0x605   : > { %17317 = vmatprep.subr.bf16.mxu0 %v25105_v9  ;;  %18998 = vmatprep.subr.bf16.mxu1 %v25108_v27  ;;  %v25193_v9 = vld [vmem:[%s27350_s14 + $0x2d4c] ss:$16 sps:$4 sm:$0xff]   ;;  %v25188_v27 = vld [vmem:[%s27350_s14 + $0x2d40] ss:$16 sps:$4 sm:$0xff]  }
 0x608   : > { %17318 = vmatpush1.bf16.msra.mxu0 %v25103_v30  ;;  %18999 = vmatpush1.bf16.msra.mxu1 %v25106_v10  ;;  %v25191_v30 = vld [vmem:[%s27350_s14 + $0x2d48] ss:$16 sps:$4 sm:$0xff]   ;;  %v25196_v10 = vld [vmem:[%s27350_s14 + $0x2d64] ss:$16 sps:$4 sm:$0xff]  }
 0x609   : > { %17319 = vmatprep.subr.bf16.mxu0 %v25111_v31  ;;  %19000 = vmatprep.subr.bf16.mxu1 %v25114_v33  ;;  %v25199_v31 = vld [vmem:[%s27350_s14 + $0x2d6c] ss:$16 sps:$4 sm:$0xff]   ;;  %v25194_v33 = vld [vmem:[%s27350_s14 + $0x2d60] ss:$16 sps:$4 sm:$0xff]  }
 0x60c   : > { %17320 = vmatpush1.bf16.msra.mxu0 %v25109_v13  ;;  %19001 = vmatpush1.bf16.msra.mxu1 %v25112_v34  ;;  %v25197_v13 = vld [vmem:[%s27350_s14 + $0x2d68] ss:$16 sps:$4 sm:$0xff]   ;;  %v25202_v34 = vld [vmem:[%s27350_s14 + $0x2d84] ss:$16 sps:$4 sm:$0xff]  }
 0x60d   : > { %17321 = vmatprep.subr.bf16.mxu0 %v25117_v20  ;;  %19002 = vmatprep.subr.bf16.mxu1 %v25120_v26  ;;  %v25205_v20 = vld [vmem:[%s27350_s14 + $0x2d8c] ss:$16 sps:$4 sm:$0xff]   ;;  %v25200_v26 = vld [vmem:[%s27350_s14 + $0x2d80] ss:$16 sps:$4 sm:$0xff]  }
 0x610   : > { %17322 = vmatpush1.bf16.msra.mxu0 %v25115_v18  ;;  %19003 = vmatpush1.bf16.msra.mxu1 %v25118_v24  ;;  %v25203_v18 = vld [vmem:[%s27350_s14 + $0x2d88] ss:$16 sps:$4 sm:$0xff]   ;;  %v25208_v24 = vld [vmem:[%s27350_s14 + $0x2da4] ss:$16 sps:$4 sm:$0xff]  }
 0x611   : > { %17323 = vmatprep.subr.bf16.mxu0 %v25123_v38  ;;  %19004 = vmatprep.subr.bf16.mxu1 %v25126_v21  ;;  %v25211_v38 = vld [vmem:[%s27350_s14 + $0x2dac] ss:$16 sps:$4 sm:$0xff]   ;;  %v25206_v21 = vld [vmem:[%s27350_s14 + $0x2da0] ss:$16 sps:$4 sm:$0xff]  }
 0x614   : > { %17324 = vmatpush1.bf16.msra.mxu0 %v25121_v41  ;;  %19005 = vmatpush1.bf16.msra.mxu1 %v25124_v44  ;;  %v25209_v41 = vld [vmem:[%s27350_s14 + $0x2da8] ss:$16 sps:$4 sm:$0xff]   ;;  %v25214_v44 = vld [vmem:[%s27350_s14 + $0x2dc4] ss:$16 sps:$4 sm:$0xff]  }
 0x615   : > { %17334 = vmatprep.subr.bf16.mxu0 %v25130_v25  ;;  %19015 = vmatprep.subr.bf16.mxu1 %v25133_v23  ;;  %v25217_v25 = vld [vmem:[%s27350_s14 + $0x2dcc] ss:$16 sps:$4 sm:$0xff]   ;;  %v536_v23 = vcombine.high %v28972_v36, %v28972_v36  ;;  %v25218_v36 = vld [vmem:[%s27350_s14 + $0x2de0] ss:$16 sps:$4 sm:$0xff]  }
 0x617   : > { %17326 = vmatmul.mubr.bf16.vlgmr.msra.gmra.mrb[0].mxu0 %v819_v48  ;;  %19007 = vmatmul.mubr.bf16.vlgmr.msra.gmra.mrb[0].mxu1 %v819_v48  ;;  %v25215_v48 = vld [vmem:[%s27350_s14 + $0x2dc8] ss:$16 sps:$4 sm:$0xff]  }
 0x618   : > { %17335 = vmatpush1.bf16.msra.mxu0 %v25128_v29  ;;  %19016 = vmatpush1.bf16.msra.mxu1 %v25131_v50  ;;  %v25220_v29 = vld [vmem:[%s27350_s14 + $0x2de4] ss:$16 sps:$4 sm:$0xff]   ;;  %v25223_v50 = vld [vmem:[%s27350_s14 + $0x2dec] ss:$16 sps:$4 sm:$0xff]  }
 0x619   : > { %17336 = vmatprep.subr.bf16.mxu0 %v25136_v51  ;;  %19017 = vmatprep.subr.bf16.mxu1 %v25139_v32  ;;  %v29053_v51 = vrot.slane %v536_v23, %v27416_v49  ;;  %v25221_v32 = vld [vmem:[%s27350_s14 + $0x2de8] ss:$16 sps:$4 sm:$0xff]  }
 0x61a   : > { %17366 = vmatprep.mubr.bf16.mxu0 %v822_v52  ;;  %19047 = vmatprep.mubr.bf16.mxu1 %v822_v52  ;;  %v25226_v52 = vld [vmem:[%s27350_s14 + $0x2e04] ss:$16 sps:$4 sm:$0xff]   ;;  %v25299_v23 = vld [vmem:[%s27350_s14 + $0x2f88] ss:$16 sps:$4 sm:$0xff]  }
 0x61c   : > { %17337 = vmatpush1.bf16.msra.mxu0 %v25134_v35  ;;  %19018 = vmatpush1.bf16.msra.mxu1 %v25137_v39  ;;  %v25229_v35 = vld [vmem:[%s27350_s14 + $0x2e0c] ss:$16 sps:$4 sm:$0xff]   ;;  %v552_v39 = vcombine.high %v29053_v51, %v29053_v51 }
 0x61d   : > { %17338 = vmatprep.subr.bf16.mxu0 %v25142_v54  ;;  %19019 = vmatprep.subr.bf16.mxu1 %v25145_v37  ;;  %v821_v54 = vpack.c.bf16 %v28980_v28, %v28980_v28  ;;  %v25224_v37 = vld [vmem:[%s27350_s14 + $0x2e00] ss:$16 sps:$4 sm:$0xff]  }
 0x61e   : > { %v25230_v28 = vld [vmem:[%s27350_s14 + $0x2e20] ss:$16 sps:$4 sm:$0xff]  }
 0x620   : > { %17339 = vmatpush1.bf16.msra.mxu0 %v25140_v42  ;;  %19020 = vmatpush1.bf16.msra.mxu1 %v25143_v57  ;;  %v25227_v42 = vld [vmem:[%s27350_s14 + $0x2e08] ss:$16 sps:$4 sm:$0xff]   ;;  %v25232_v57 = vld [vmem:[%s27350_s14 + $0x2e24] ss:$16 sps:$4 sm:$0xff]  }
 0x621   : > { %17340 = vmatprep.subr.bf16.mxu0 %v25148_v40  ;;  %19021 = vmatprep.subr.bf16.mxu1 %v25151_v60  ;;  %v25235_v40 = vld [vmem:[%s27350_s14 + $0x2e2c] ss:$16 sps:$4 sm:$0xff]   ;;  %v824_v60 = vpack.c.bf16 %v552_v39, %v552_v39  ;;  %v25311_v39 = vld [vmem:[%s27350_s14 + $0x2fc8] ss:$16 sps:$4 sm:$0xff]  }
 0x624   : > { %17341 = vmatpush1.bf16.msra.mxu0 %v25146_v61  ;;  %19022 = vmatpush1.bf16.msra.mxu1 %v25149_v63  ;;  %v25233_v61 = vld [vmem:[%s27350_s14 + $0x2e28] ss:$16 sps:$4 sm:$0xff]   ;;  %v25238_v63 = vld [vmem:[%s27350_s14 + $0x2e44] ss:$16 sps:$4 sm:$0xff]  }
 0x625   : > { %17342 = vmatprep.subr.bf16.mxu0 %v25154_v45  ;;  %19023 = vmatprep.subr.bf16.mxu1 %v25157_v0  ;;  %v25241_v45 = vld [vmem:[%s27350_s14 + $0x2e4c] ss:$16 sps:$4 sm:$0xff]   ;;  %v25236_v0 = vld [vmem:[%s27350_s14 + $0x2e40] ss:$16 sps:$4 sm:$0xff]  }
 0x628   : > { %17343 = vmatpush1.bf16.msra.mxu0 %v25152_v1  ;;  %19024 = vmatpush1.bf16.msra.mxu1 %v25155_v47  ;;  %v25239_v1 = vld [vmem:[%s27350_s14 + $0x2e48] ss:$16 sps:$4 sm:$0xff]   ;;  %v25244_v47 = vld [vmem:[%s27350_s14 + $0x2e64] ss:$16 sps:$4 sm:$0xff]  }
 0x629   : > { %17344 = vmatprep.subr.bf16.mxu0 %v25160_v2  ;;  %19025 = vmatprep.subr.bf16.mxu1 %v25163_v55  ;;  %v25247_v2 = vld [vmem:[%s27350_s14 + $0x2e6c] ss:$16 sps:$4 sm:$0xff]   ;;  %v25242_v55 = vld [vmem:[%s27350_s14 + $0x2e60] ss:$16 sps:$4 sm:$0xff]  }
 0x62c   : > { %17345 = vmatpush1.bf16.msra.mxu0 %v25158_v4  ;;  %19026 = vmatpush1.bf16.msra.mxu1 %v25161_v53  ;;  %v25245_v4 = vld [vmem:[%s27350_s14 + $0x2e68] ss:$16 sps:$4 sm:$0xff]   ;;  %v25250_v53 = vld [vmem:[%s27350_s14 + $0x2e84] ss:$16 sps:$4 sm:$0xff]  }
 0x62d   : > { %17346 = vmatprep.subr.bf16.mxu0 %v25166_v58  ;;  %19027 = vmatprep.subr.bf16.mxu1 %v25169_v7  ;;  %v25253_v58 = vld [vmem:[%s27350_s14 + $0x2e8c] ss:$16 sps:$4 sm:$0xff]   ;;  %v25248_v7 = vld [vmem:[%s27350_s14 + $0x2e80] ss:$16 sps:$4 sm:$0xff]  }
 0x630   : > { %17347 = vmatpush1.bf16.msra.mxu0 %v25164_v56  ;;  %19028 = vmatpush1.bf16.msra.mxu1 %v25167_v11  ;;  %v25251_v56 = vld [vmem:[%s27350_s14 + $0x2e88] ss:$16 sps:$4 sm:$0xff]   ;;  %v25256_v11 = vld [vmem:[%s27350_s14 + $0x2ea4] ss:$16 sps:$4 sm:$0xff]  }
 0x631   : > { %17348 = vmatprep.subr.bf16.mxu0 %v25172_v12  ;;  %19029 = vmatprep.subr.bf16.mxu1 %v25175_v14  ;;  %v25259_v12 = vld [vmem:[%s27350_s14 + $0x2eac] ss:$16 sps:$4 sm:$0xff]   ;;  %v25254_v14 = vld [vmem:[%s27350_s14 + $0x2ea0] ss:$16 sps:$4 sm:$0xff]  }
 0x634   : > { %17349 = vmatpush1.bf16.msra.mxu0 %v25170_v59  ;;  %19030 = vmatpush1.bf16.msra.mxu1 %v25173_v15  ;;  %v25257_v59 = vld [vmem:[%s27350_s14 + $0x2ea8] ss:$16 sps:$4 sm:$0xff]   ;;  %v25262_v15 = vld [vmem:[%s27350_s14 + $0x2ec4] ss:$16 sps:$4 sm:$0xff]  }
 0x635   : > { %17350 = vmatprep.subr.bf16.mxu0 %v25178_v16  ;;  %19031 = vmatprep.subr.bf16.mxu1 %v25181_v62  ;;  %v25265_v16 = vld [vmem:[%s27350_s14 + $0x2ecc] ss:$16 sps:$4 sm:$0xff]   ;;  %v25260_v62 = vld [vmem:[%s27350_s14 + $0x2ec0] ss:$16 sps:$4 sm:$0xff]  }
 0x638   : > { %17351 = vmatpush1.bf16.msra.mxu0 %v25176_v17  ;;  %19032 = vmatpush1.bf16.msra.mxu1 %v25179_v5  ;;  %v25263_v17 = vld [vmem:[%s27350_s14 + $0x2ec8] ss:$16 sps:$4 sm:$0xff]   ;;  %v25268_v5 = vld [vmem:[%s27350_s14 + $0x2ee4] ss:$16 sps:$4 sm:$0xff]  }
 0x639   : > { %17352 = vmatprep.subr.bf16.mxu0 %v25184_v19  ;;  %19033 = vmatprep.subr.bf16.mxu1 %v25187_v3  ;;  %v25271_v19 = vld [vmem:[%s27350_s14 + $0x2eec] ss:$16 sps:$4 sm:$0xff]   ;;  %v25266_v3 = vld [vmem:[%s27350_s14 + $0x2ee0] ss:$16 sps:$4 sm:$0xff]  }
 0x63c   : > { %17353 = vmatpush1.bf16.msra.mxu0 %v25182_v8  ;;  %19034 = vmatpush1.bf16.msra.mxu1 %v25185_v22  ;;  %v25269_v8 = vld [vmem:[%s27350_s14 + $0x2ee8] ss:$16 sps:$4 sm:$0xff]   ;;  %v25274_v22 = vld [vmem:[%s27350_s14 + $0x2f04] ss:$16 sps:$4 sm:$0xff]  }
 0x63d   : > { %17354 = vmatprep.subr.bf16.mxu0 %v25190_v6  ;;  %19035 = vmatprep.subr.bf16.mxu1 %v25193_v9  ;;  %v25277_v6 = vld [vmem:[%s27350_s14 + $0x2f0c] ss:$16 sps:$4 sm:$0xff]   ;;  %v25272_v9 = vld [vmem:[%s27350_s14 + $0x2f00] ss:$16 sps:$4 sm:$0xff]  }
 0x640   : > { %17355 = vmatpush1.bf16.msra.mxu0 %v25188_v27  ;;  %19036 = vmatpush1.bf16.msra.mxu1 %v25191_v30  ;;  %v25275_v27 = vld [vmem:[%s27350_s14 + $0x2f08] ss:$16 sps:$4 sm:$0xff]   ;;  %v25280_v30 = vld [vmem:[%s27350_s14 + $0x2f24] ss:$16 sps:$4 sm:$0xff]  }
 0x641   : > { %17356 = vmatprep.subr.bf16.mxu0 %v25196_v10  ;;  %19037 = vmatprep.subr.bf16.mxu1 %v25199_v31  ;;  %v25283_v10 = vld [vmem:[%s27350_s14 + $0x2f2c] ss:$16 sps:$4 sm:$0xff]   ;;  %v25278_v31 = vld [vmem:[%s27350_s14 + $0x2f20] ss:$16 sps:$4 sm:$0xff]  }
 0x644   : > { %17357 = vmatpush1.bf16.msra.mxu0 %v25194_v33  ;;  %19038 = vmatpush1.bf16.msra.mxu1 %v25197_v13  ;;  %v25281_v33 = vld [vmem:[%s27350_s14 + $0x2f28] ss:$16 sps:$4 sm:$0xff]   ;;  %v25286_v13 = vld [vmem:[%s27350_s14 + $0x2f44] ss:$16 sps:$4 sm:$0xff]  }
 0x645   : > { %17358 = vmatprep.subr.bf16.mxu0 %v25202_v34  ;;  %19039 = vmatprep.subr.bf16.mxu1 %v25205_v20  ;;  %v25289_v34 = vld [vmem:[%s27350_s14 + $0x2f4c] ss:$16 sps:$4 sm:$0xff]   ;;  %v25284_v20 = vld [vmem:[%s27350_s14 + $0x2f40] ss:$16 sps:$4 sm:$0xff]  }
 0x648   : > { %17359 = vmatpush1.bf16.msra.mxu0 %v25200_v26  ;;  %19040 = vmatpush1.bf16.msra.mxu1 %v25203_v18  ;;  %v25287_v26 = vld [vmem:[%s27350_s14 + $0x2f48] ss:$16 sps:$4 sm:$0xff]   ;;  %v25292_v18 = vld [vmem:[%s27350_s14 + $0x2f64] ss:$16 sps:$4 sm:$0xff]  }
 0x649   : > { %17360 = vmatprep.subr.bf16.mxu0 %v25208_v24  ;;  %19041 = vmatprep.subr.bf16.mxu1 %v25211_v38  ;;  %v25295_v24 = vld [vmem:[%s27350_s14 + $0x2f6c] ss:$16 sps:$4 sm:$0xff]   ;;  %v25290_v38 = vld [vmem:[%s27350_s14 + $0x2f60] ss:$16 sps:$4 sm:$0xff]  }
 0x64c   : > { %17361 = vmatpush1.bf16.msra.mxu0 %v25206_v21  ;;  %19042 = vmatpush1.bf16.msra.mxu1 %v25209_v41  ;;  %v25293_v21 = vld [vmem:[%s27350_s14 + $0x2f68] ss:$16 sps:$4 sm:$0xff]   ;;  %v25298_v41 = vld [vmem:[%s27350_s14 + $0x2f84] ss:$16 sps:$4 sm:$0xff]  }
 0x64d   : > { %17362 = vmatprep.subr.bf16.mxu0 %v25214_v44  ;;  %19043 = vmatprep.subr.bf16.mxu1 %v25217_v25  ;;  %v25301_v44 = vld [vmem:[%s27350_s14 + $0x2f8c] ss:$16 sps:$4 sm:$0xff]   ;;  %v25296_v25 = vld [vmem:[%s27350_s14 + $0x2f80] ss:$16 sps:$4 sm:$0xff]  }
 0x650   : > { %17363 = vmatpush1.bf16.msra.mxu0 %v25212_v46  ;;  %19044 = vmatpush1.bf16.msra.mxu1 %v25215_v48  ;;  %v25304_v46 = vld [vmem:[%s27350_s14 + $0x2fa4] ss:$16 sps:$4 sm:$0xff]   ;;  %v25307_v48 = vld [vmem:[%s27350_s14 + $0x2fac] ss:$16 sps:$4 sm:$0xff]  }
 0x651   : > { %17364 = vmatprep.subr.bf16.mxu0 %v25220_v29  ;;  %19045 = vmatprep.subr.bf16.mxu1 %v25223_v50  ;;  %v25302_v29 = vld [vmem:[%s27350_s14 + $0x2fa0] ss:$16 sps:$4 sm:$0xff]   ;;  %v25305_v50 = vld [vmem:[%s27350_s14 + $0x2fa8] ss:$16 sps:$4 sm:$0xff]  }
 0x654   : > { %17365 = vmatpush1.bf16.msra.mxu0 %v25218_v36  ;;  %19046 = vmatpush1.bf16.msra.mxu1 %v25221_v32  ;;  %v25310_v36 = vld [vmem:[%s27350_s14 + $0x2fc4] ss:$16 sps:$4 sm:$0xff]   ;;  %v25313_v32 = vld [vmem:[%s27350_s14 + $0x2fcc] ss:$16 sps:$4 sm:$0xff]  }
 0x655   : > { %17375 = vmatprep.subr.bf16.mxu0 %v25226_v52  ;;  %19056 = vmatprep.subr.bf16.mxu1 %v25229_v35  ;;  %v29119_v52 = vld [vmem:[#allocation2 + $0x60] sm:$0xff] }
 0x656   : > { %v25308_v35 = vld [vmem:[%s27350_s14 + $0x2fc0] ss:$16 sps:$4 sm:$0xff]  }
 0x657   : > { %17367 = vmatmul.mubr.bf16.vlgmr.msra.gmra.mrb[0].mxu0 %v821_v54  ;;  %19048 = vmatmul.mubr.bf16.vlgmr.msra.gmra.mrb[0].mxu1 %v821_v54  ;;  %v25316_v54 = vld [vmem:[%s27350_s14 + $0x2fe4] ss:$16 sps:$4 sm:$0xff]  }
 0x658   : > { %17376 = vmatpush1.bf16.msra.mxu0 %v25224_v37  ;;  %19057 = vmatpush1.bf16.msra.mxu1 %v25227_v42  ;;  %v25319_v37 = vld [vmem:[%s27350_s14 + $0x2fec] ss:$16 sps:$4 sm:$0xff]   ;;  %v29127_v42 = vrot.slane %v29119_v52, %v27416_v49 }
 0x659   : > { %17377 = vmatprep.subr.bf16.mxu0 %v25232_v57  ;;  %19058 = vmatprep.subr.bf16.mxu1 %v25235_v40  ;;  %v25314_v57 = vld [vmem:[%s27350_s14 + $0x2fe0] ss:$16 sps:$4 sm:$0xff]   ;;  %v25317_v40 = vld [vmem:[%s27350_s14 + $0x2fe8] ss:$16 sps:$4 sm:$0xff]  }
 0x65a   : > { %17407 = vmatprep.mubr.bf16.mxu0 %v824_v60  ;;  %19088 = vmatprep.mubr.bf16.mxu1 %v824_v60  ;;  %v25323_v60 = vld [vmem:[%s27350_s14 + $0x3004] ss:$16 sps:$4 sm:$0xff]  }
 0x65c   : > { %17378 = vmatpush1.bf16.msra.mxu0 %v25230_v28  ;;  %19059 = vmatpush1.bf16.msra.mxu1 %v25233_v61  ;;  %v25326_v28 = vld [vmem:[%s27350_s14 + $0x300c] ss:$16 sps:$4 sm:$0xff]   ;;  %v568_v61 = vcombine.high %v29127_v42, %v29127_v42 }
 0x65d   : > { %17379 = vmatprep.subr.bf16.mxu0 %v25238_v63  ;;  %19060 = vmatprep.subr.bf16.mxu1 %v25241_v45  ;;  %v823_v63 = vpack.c.bf16 %v29053_v51, %v29053_v51  ;;  %v25321_v45 = vld [vmem:[%s27350_s14 + $0x3000] ss:$16 sps:$4 sm:$0xff]  }
 0x65e   : > { %v25327_v51 = vld [vmem:[%s27350_s14 + $0x3020] ss:$16 sps:$4 sm:$0xff]  }
 0x660   : > { %17380 = vmatpush1.bf16.msra.mxu0 %v25236_v0  ;;  %19061 = vmatpush1.bf16.msra.mxu1 %v25239_v1  ;;  %v25324_v0 = vld [vmem:[%s27350_s14 + $0x3008] ss:$16 sps:$4 sm:$0xff]   ;;  %v25329_v1 = vld [vmem:[%s27350_s14 + $0x3024] ss:$16 sps:$4 sm:$0xff]  }
 0x661   : > { %17381 = vmatprep.subr.bf16.mxu0 %v25244_v47  ;;  %19062 = vmatprep.subr.bf16.mxu1 %v25247_v2  ;;  %v25332_v47 = vld [vmem:[%s27350_s14 + $0x302c] ss:$16 sps:$4 sm:$0xff]   ;;  %v826_v2 = vpack.c.bf16 %v568_v61, %v568_v61  ;;  %v25405_v61 = vld [vmem:[%s27350_s14 + $0x31c0] ss:$16 sps:$4 sm:$0xff]  }
 0x664   : > { %17382 = vmatpush1.bf16.msra.mxu0 %v25242_v55  ;;  %19063 = vmatpush1.bf16.msra.mxu1 %v25245_v4  ;;  %v25330_v55 = vld [vmem:[%s27350_s14 + $0x3028] ss:$16 sps:$4 sm:$0xff]   ;;  %v25335_v4 = vld [vmem:[%s27350_s14 + $0x3044] ss:$16 sps:$4 sm:$0xff]  }
 0x665   : > { %17383 = vmatprep.subr.bf16.mxu0 %v25250_v53  ;;  %19064 = vmatprep.subr.bf16.mxu1 %v25253_v58  ;;  %v25338_v53 = vld [vmem:[%s27350_s14 + $0x304c] ss:$16 sps:$4 sm:$0xff]   ;;  %v25333_v58 = vld [vmem:[%s27350_s14 + $0x3040] ss:$16 sps:$4 sm:$0xff]  }
 0x668   : > { %17384 = vmatpush1.bf16.msra.mxu0 %v25248_v7  ;;  %19065 = vmatpush1.bf16.msra.mxu1 %v25251_v56  ;;  %v25336_v7 = vld [vmem:[%s27350_s14 + $0x3048] ss:$16 sps:$4 sm:$0xff]   ;;  %v25341_v56 = vld [vmem:[%s27350_s14 + $0x3064] ss:$16 sps:$4 sm:$0xff]  }
 0x669   : > { %17385 = vmatprep.subr.bf16.mxu0 %v25256_v11  ;;  %19066 = vmatprep.subr.bf16.mxu1 %v25259_v12  ;;  %v25344_v11 = vld [vmem:[%s27350_s14 + $0x306c] ss:$16 sps:$4 sm:$0xff]   ;;  %v25339_v12 = vld [vmem:[%s27350_s14 + $0x3060] ss:$16 sps:$4 sm:$0xff]  }
 0x66c   : > { %17386 = vmatpush1.bf16.msra.mxu0 %v25254_v14  ;;  %19067 = vmatpush1.bf16.msra.mxu1 %v25257_v59  ;;  %v25342_v14 = vld [vmem:[%s27350_s14 + $0x3068] ss:$16 sps:$4 sm:$0xff]   ;;  %v25347_v59 = vld [vmem:[%s27350_s14 + $0x3084] ss:$16 sps:$4 sm:$0xff]  }
 0x66d   : > { %17387 = vmatprep.subr.bf16.mxu0 %v25262_v15  ;;  %19068 = vmatprep.subr.bf16.mxu1 %v25265_v16  ;;  %v25350_v15 = vld [vmem:[%s27350_s14 + $0x308c] ss:$16 sps:$4 sm:$0xff]   ;;  %v25345_v16 = vld [vmem:[%s27350_s14 + $0x3080] ss:$16 sps:$4 sm:$0xff]  }
 0x670   : > { %17388 = vmatpush1.bf16.msra.mxu0 %v25260_v62  ;;  %19069 = vmatpush1.bf16.msra.mxu1 %v25263_v17  ;;  %v25348_v62 = vld [vmem:[%s27350_s14 + $0x3088] ss:$16 sps:$4 sm:$0xff]   ;;  %v25353_v17 = vld [vmem:[%s27350_s14 + $0x30a4] ss:$16 sps:$4 sm:$0xff]  }
 0x671   : > { %17389 = vmatprep.subr.bf16.mxu0 %v25268_v5  ;;  %19070 = vmatprep.subr.bf16.mxu1 %v25271_v19  ;;  %v25356_v5 = vld [vmem:[%s27350_s14 + $0x30ac] ss:$16 sps:$4 sm:$0xff]   ;;  %v25351_v19 = vld [vmem:[%s27350_s14 + $0x30a0] ss:$16 sps:$4 sm:$0xff]  }
 0x674   : > { %17390 = vmatpush1.bf16.msra.mxu0 %v25266_v3  ;;  %19071 = vmatpush1.bf16.msra.mxu1 %v25269_v8  ;;  %v25354_v3 = vld [vmem:[%s27350_s14 + $0x30a8] ss:$16 sps:$4 sm:$0xff]   ;;  %v25359_v8 = vld [vmem:[%s27350_s14 + $0x30c4] ss:$16 sps:$4 sm:$0xff]  }
 0x675   : > { %17391 = vmatprep.subr.bf16.mxu0 %v25274_v22  ;;  %19072 = vmatprep.subr.bf16.mxu1 %v25277_v6  ;;  %v25362_v22 = vld [vmem:[%s27350_s14 + $0x30cc] ss:$16 sps:$4 sm:$0xff]   ;;  %v25357_v6 = vld [vmem:[%s27350_s14 + $0x30c0] ss:$16 sps:$4 sm:$0xff]  }
 0x678   : > { %17392 = vmatpush1.bf16.msra.mxu0 %v25272_v9  ;;  %19073 = vmatpush1.bf16.msra.mxu1 %v25275_v27  ;;  %v25360_v9 = vld [vmem:[%s27350_s14 + $0x30c8] ss:$16 sps:$4 sm:$0xff]   ;;  %v25365_v27 = vld [vmem:[%s27350_s14 + $0x30e4] ss:$16 sps:$4 sm:$0xff]  }
 0x679   : > { %17393 = vmatprep.subr.bf16.mxu0 %v25280_v30  ;;  %19074 = vmatprep.subr.bf16.mxu1 %v25283_v10  ;;  %v25368_v30 = vld [vmem:[%s27350_s14 + $0x30ec] ss:$16 sps:$4 sm:$0xff]   ;;  %v25363_v10 = vld [vmem:[%s27350_s14 + $0x30e0] ss:$16 sps:$4 sm:$0xff]  }
 0x67c   : > { %17394 = vmatpush1.bf16.msra.mxu0 %v25278_v31  ;;  %19075 = vmatpush1.bf16.msra.mxu1 %v25281_v33  ;;  %v25366_v31 = vld [vmem:[%s27350_s14 + $0x30e8] ss:$16 sps:$4 sm:$0xff]   ;;  %v25371_v33 = vld [vmem:[%s27350_s14 + $0x3104] ss:$16 sps:$4 sm:$0xff]  }
 0x67d   : > { %17395 = vmatprep.subr.bf16.mxu0 %v25286_v13  ;;  %19076 = vmatprep.subr.bf16.mxu1 %v25289_v34  ;;  %v25374_v13 = vld [vmem:[%s27350_s14 + $0x310c] ss:$16 sps:$4 sm:$0xff]   ;;  %v25369_v34 = vld [vmem:[%s27350_s14 + $0x3100] ss:$16 sps:$4 sm:$0xff]  }
 0x680   : > { %17396 = vmatpush1.bf16.msra.mxu0 %v25284_v20  ;;  %19077 = vmatpush1.bf16.msra.mxu1 %v25287_v26  ;;  %v25372_v20 = vld [vmem:[%s27350_s14 + $0x3108] ss:$16 sps:$4 sm:$0xff]   ;;  %v25377_v26 = vld [vmem:[%s27350_s14 + $0x3124] ss:$16 sps:$4 sm:$0xff]  }
 0x681   : > { %17397 = vmatprep.subr.bf16.mxu0 %v25292_v18  ;;  %19078 = vmatprep.subr.bf16.mxu1 %v25295_v24  ;;  %v25380_v18 = vld [vmem:[%s27350_s14 + $0x312c] ss:$16 sps:$4 sm:$0xff]   ;;  %v25375_v24 = vld [vmem:[%s27350_s14 + $0x3120] ss:$16 sps:$4 sm:$0xff]  }
 0x684   : > { %17398 = vmatpush1.bf16.msra.mxu0 %v25290_v38  ;;  %19079 = vmatpush1.bf16.msra.mxu1 %v25293_v21  ;;  %v25378_v38 = vld [vmem:[%s27350_s14 + $0x3128] ss:$16 sps:$4 sm:$0xff]   ;;  %v25383_v21 = vld [vmem:[%s27350_s14 + $0x3144] ss:$16 sps:$4 sm:$0xff]  }
 0x685   : > { %17399 = vmatprep.subr.bf16.mxu0 %v25298_v41  ;;  %19080 = vmatprep.subr.bf16.mxu1 %v25301_v44  ;;  %v25386_v41 = vld [vmem:[%s27350_s14 + $0x314c] ss:$16 sps:$4 sm:$0xff]   ;;  %v25381_v44 = vld [vmem:[%s27350_s14 + $0x3140] ss:$16 sps:$4 sm:$0xff]  }
 0x688   : > { %17400 = vmatpush1.bf16.msra.mxu0 %v25296_v25  ;;  %19081 = vmatpush1.bf16.msra.mxu1 %v25299_v23  ;;  %v25384_v25 = vld [vmem:[%s27350_s14 + $0x3148] ss:$16 sps:$4 sm:$0xff]   ;;  %v25389_v23 = vld [vmem:[%s27350_s14 + $0x3164] ss:$16 sps:$4 sm:$0xff]  }
 0x689   : > { %17401 = vmatprep.subr.bf16.mxu0 %v25304_v46  ;;  %19082 = vmatprep.subr.bf16.mxu1 %v25307_v48  ;;  %v25392_v46 = vld [vmem:[%s27350_s14 + $0x316c] ss:$16 sps:$4 sm:$0xff]   ;;  %v25387_v48 = vld [vmem:[%s27350_s14 + $0x3160] ss:$16 sps:$4 sm:$0xff]  }
 0x68c   : > { %17402 = vmatpush1.bf16.msra.mxu0 %v25302_v29  ;;  %19083 = vmatpush1.bf16.msra.mxu1 %v25305_v50  ;;  %v25390_v29 = vld [vmem:[%s27350_s14 + $0x3168] ss:$16 sps:$4 sm:$0xff]   ;;  %v25395_v50 = vld [vmem:[%s27350_s14 + $0x3184] ss:$16 sps:$4 sm:$0xff]  }
 0x68d   : > { %17403 = vmatprep.subr.bf16.mxu0 %v25310_v36  ;;  %19084 = vmatprep.subr.bf16.mxu1 %v25313_v32  ;;  %v25398_v36 = vld [vmem:[%s27350_s14 + $0x318c] ss:$16 sps:$4 sm:$0xff]   ;;  %v25393_v32 = vld [vmem:[%s27350_s14 + $0x3180] ss:$16 sps:$4 sm:$0xff]  }
 0x690   : > { %17404 = vmatpush1.bf16.msra.mxu0 %v25308_v35  ;;  %19085 = vmatpush1.bf16.msra.mxu1 %v25311_v39  ;;  %v25396_v35 = vld [vmem:[%s27350_s14 + $0x3188] ss:$16 sps:$4 sm:$0xff]   ;;  %v25401_v39 = vld [vmem:[%s27350_s14 + $0x31a4] ss:$16 sps:$4 sm:$0xff]  }
 0x691   : > { %17405 = vmatprep.subr.bf16.mxu0 %v25316_v54  ;;  %19086 = vmatprep.subr.bf16.mxu1 %v25319_v37  ;;  %v25404_v54 = vld [vmem:[%s27350_s14 + $0x31ac] ss:$16 sps:$4 sm:$0xff]   ;;  %v25399_v37 = vld [vmem:[%s27350_s14 + $0x31a0] ss:$16 sps:$4 sm:$0xff]  }
 0x694   : > { %17406 = vmatpush1.bf16.msra.mxu0 %v25314_v57  ;;  %19087 = vmatpush1.bf16.msra.mxu1 %v25317_v40  ;;  %v25402_v57 = vld [vmem:[%s27350_s14 + $0x31a8] ss:$16 sps:$4 sm:$0xff]   ;;  %v25407_v40 = vld [vmem:[%s27350_s14 + $0x31c4] ss:$16 sps:$4 sm:$0xff]  }
 0x695   : > { %17416 = vmatprep.subr.bf16.mxu0 %v25323_v60  ;;  %19097 = vmatprep.subr.bf16.mxu1 %v25326_v28  ;;  %v25410_v60 = vld [vmem:[%s27350_s14 + $0x31cc] ss:$16 sps:$4 sm:$0xff]   ;;  %v553_v28 = vcombine.high %v29119_v52, %v29119_v52  ;;  %v25411_v52 = vld [vmem:[%s27350_s14 + $0x31e0] ss:$16 sps:$4 sm:$0xff]  }
 0x697   : > { %17408 = vmatmul.mubr.bf16.vlgmr.msra.gmra.mrb[0].mxu0 %v823_v63  ;;  %19089 = vmatmul.mubr.bf16.vlgmr.msra.gmra.mrb[0].mxu1 %v823_v63  ;;  %v25408_v63 = vld [vmem:[%s27350_s14 + $0x31c8] ss:$16 sps:$4 sm:$0xff]  }
 0x698   : > { %17417 = vmatpush1.bf16.msra.mxu0 %v25321_v45  ;;  %19098 = vmatpush1.bf16.msra.mxu1 %v25324_v0  ;;  %v25413_v45 = vld [vmem:[%s27350_s14 + $0x31e4] ss:$16 sps:$4 sm:$0xff]   ;;  %v25416_v0 = vld [vmem:[%s27350_s14 + $0x31ec] ss:$16 sps:$4 sm:$0xff]  }
 0x699   : > { %17418 = vmatprep.subr.bf16.mxu0 %v25329_v1  ;;  %19099 = vmatprep.subr.bf16.mxu1 %v25332_v47  ;;  %v29200_v1 = vrot.slane %v553_v28, %v27416_v49  ;;  %v25414_v47 = vld [vmem:[%s27350_s14 + $0x31e8] ss:$16 sps:$4 sm:$0xff]  }
 0x69a   : > { %17448 = vmatprep.mubr.bf16.mxu0 %v826_v2  ;;  %19129 = vmatprep.mubr.bf16.mxu1 %v826_v2  ;;  %v25419_v2 = vld [vmem:[%s27350_s14 + $0x3204] ss:$16 sps:$4 sm:$0xff]   ;;  %v25492_v28 = vld [vmem:[%s27350_s14 + $0x3388] ss:$16 sps:$4 sm:$0xff]  }
 0x69c   : > { %17419 = vmatpush1.bf16.msra.mxu0 %v25327_v51  ;;  %19100 = vmatpush1.bf16.msra.mxu1 %v25330_v55  ;;  %v25422_v51 = vld [vmem:[%s27350_s14 + $0x320c] ss:$16 sps:$4 sm:$0xff]   ;;  %v569_v55 = vcombine.high %v29200_v1, %v29200_v1 }
 0x69d   : > { %17420 = vmatprep.subr.bf16.mxu0 %v25335_v4  ;;  %19101 = vmatprep.subr.bf16.mxu1 %v25338_v53  ;;  %v825_v4 = vpack.c.bf16 %v29127_v42, %v29127_v42  ;;  %v25417_v53 = vld [vmem:[%s27350_s14 + $0x3200] ss:$16 sps:$4 sm:$0xff]  }
 0x69e   : > { %v25423_v42 = vld [vmem:[%s27350_s14 + $0x3220] ss:$16 sps:$4 sm:$0xff]  }
 0x6a0   : > { %17421 = vmatpush1.bf16.msra.mxu0 %v25333_v58  ;;  %19102 = vmatpush1.bf16.msra.mxu1 %v25336_v7  ;;  %v25420_v58 = vld [vmem:[%s27350_s14 + $0x3208] ss:$16 sps:$4 sm:$0xff]   ;;  %v25425_v7 = vld [vmem:[%s27350_s14 + $0x3224] ss:$16 sps:$4 sm:$0xff]  }
 0x6a1   : > { %17422 = vmatprep.subr.bf16.mxu0 %v25341_v56  ;;  %19103 = vmatprep.subr.bf16.mxu1 %v25344_v11  ;;  %v25428_v56 = vld [vmem:[%s27350_s14 + $0x322c] ss:$16 sps:$4 sm:$0xff]   ;;  %v828_v11 = vpack.c.bf16 %v569_v55, %v569_v55  ;;  %v25504_v55 = vld [vmem:[%s27350_s14 + $0x33c8] ss:$16 sps:$4 sm:$0xff]  }
 0x6a4   : > { %17423 = vmatpush1.bf16.msra.mxu0 %v25339_v12  ;;  %19104 = vmatpush1.bf16.msra.mxu1 %v25342_v14  ;;  %v25426_v12 = vld [vmem:[%s27350_s14 + $0x3228] ss:$16 sps:$4 sm:$0xff]   ;;  %v25431_v14 = vld [vmem:[%s27350_s14 + $0x3244] ss:$16 sps:$4 sm:$0xff]  }
 0x6a5   : > { %17424 = vmatprep.subr.bf16.mxu0 %v25347_v59  ;;  %19105 = vmatprep.subr.bf16.mxu1 %v25350_v15  ;;  %v25434_v59 = vld [vmem:[%s27350_s14 + $0x324c] ss:$16 sps:$4 sm:$0xff]   ;;  %v25429_v15 = vld [vmem:[%s27350_s14 + $0x3240] ss:$16 sps:$4 sm:$0xff]  }
 0x6a8   : > { %17425 = vmatpush1.bf16.msra.mxu0 %v25345_v16  ;;  %19106 = vmatpush1.bf16.msra.mxu1 %v25348_v62  ;;  %v25432_v16 = vld [vmem:[%s27350_s14 + $0x3248] ss:$16 sps:$4 sm:$0xff]   ;;  %v25437_v62 = vld [vmem:[%s27350_s14 + $0x3264] ss:$16 sps:$4 sm:$0xff]  }
 0x6a9   : > { %17426 = vmatprep.subr.bf16.mxu0 %v25353_v17  ;;  %19107 = vmatprep.subr.bf16.mxu1 %v25356_v5  ;;  %v25440_v17 = vld [vmem:[%s27350_s14 + $0x326c] ss:$16 sps:$4 sm:$0xff]   ;;  %v25435_v5 = vld [vmem:[%s27350_s14 + $0x3260] ss:$16 sps:$4 sm:$0xff]  }
 0x6ac   : > { %17427 = vmatpush1.bf16.msra.mxu0 %v25351_v19  ;;  %19108 = vmatpush1.bf16.msra.mxu1 %v25354_v3  ;;  %v25438_v19 = vld [vmem:[%s27350_s14 + $0x3268] ss:$16 sps:$4 sm:$0xff]   ;;  %v25443_v3 = vld [vmem:[%s27350_s14 + $0x3284] ss:$16 sps:$4 sm:$0xff]  }
 0x6ad   : > { %17428 = vmatprep.subr.bf16.mxu0 %v25359_v8  ;;  %19109 = vmatprep.subr.bf16.mxu1 %v25362_v22  ;;  %v25446_v8 = vld [vmem:[%s27350_s14 + $0x328c] ss:$16 sps:$4 sm:$0xff]   ;;  %v25441_v22 = vld [vmem:[%s27350_s14 + $0x3280] ss:$16 sps:$4 sm:$0xff]  }
 0x6b0   : > { %17429 = vmatpush1.bf16.msra.mxu0 %v25357_v6  ;;  %19110 = vmatpush1.bf16.msra.mxu1 %v25360_v9  ;;  %v25444_v6 = vld [vmem:[%s27350_s14 + $0x3288] ss:$16 sps:$4 sm:$0xff]   ;;  %v25449_v9 = vld [vmem:[%s27350_s14 + $0x32a4] ss:$16 sps:$4 sm:$0xff]  }
 0x6b1   : > { %17430 = vmatprep.subr.bf16.mxu0 %v25365_v27  ;;  %19111 = vmatprep.subr.bf16.mxu1 %v25368_v30  ;;  %v25452_v27 = vld [vmem:[%s27350_s14 + $0x32ac] ss:$16 sps:$4 sm:$0xff]   ;;  %v25447_v30 = vld [vmem:[%s27350_s14 + $0x32a0] ss:$16 sps:$4 sm:$0xff]  }
 0x6b4   : > { %17431 = vmatpush1.bf16.msra.mxu0 %v25363_v10  ;;  %19112 = vmatpush1.bf16.msra.mxu1 %v25366_v31  ;;  %v25450_v10 = vld [vmem:[%s27350_s14 + $0x32a8] ss:$16 sps:$4 sm:$0xff]   ;;  %v25455_v31 = vld [vmem:[%s27350_s14 + $0x32c4] ss:$16 sps:$4 sm:$0xff]  }
 0x6b5   : > { %17432 = vmatprep.subr.bf16.mxu0 %v25371_v33  ;;  %19113 = vmatprep.subr.bf16.mxu1 %v25374_v13  ;;  %v25458_v33 = vld [vmem:[%s27350_s14 + $0x32cc] ss:$16 sps:$4 sm:$0xff]   ;;  %v25453_v13 = vld [vmem:[%s27350_s14 + $0x32c0] ss:$16 sps:$4 sm:$0xff]  }
 0x6b8   : > { %17433 = vmatpush1.bf16.msra.mxu0 %v25369_v34  ;;  %19114 = vmatpush1.bf16.msra.mxu1 %v25372_v20  ;;  %v25456_v34 = vld [vmem:[%s27350_s14 + $0x32c8] ss:$16 sps:$4 sm:$0xff]   ;;  %v25461_v20 = vld [vmem:[%s27350_s14 + $0x32e4] ss:$16 sps:$4 sm:$0xff]  }
 0x6b9   : > { %17434 = vmatprep.subr.bf16.mxu0 %v25377_v26  ;;  %19115 = vmatprep.subr.bf16.mxu1 %v25380_v18  ;;  %v25464_v26 = vld [vmem:[%s27350_s14 + $0x32ec] ss:$16 sps:$4 sm:$0xff]   ;;  %v25459_v18 = vld [vmem:[%s27350_s14 + $0x32e0] ss:$16 sps:$4 sm:$0xff]  }
 0x6bc   : > { %17435 = vmatpush1.bf16.msra.mxu0 %v25375_v24  ;;  %19116 = vmatpush1.bf16.msra.mxu1 %v25378_v38  ;;  %v25462_v24 = vld [vmem:[%s27350_s14 + $0x32e8] ss:$16 sps:$4 sm:$0xff]   ;;  %v25467_v38 = vld [vmem:[%s27350_s14 + $0x3304] ss:$16 sps:$4 sm:$0xff]  }
 0x6bd   : > { %17436 = vmatprep.subr.bf16.mxu0 %v25383_v21  ;;  %19117 = vmatprep.subr.bf16.mxu1 %v25386_v41  ;;  %v25470_v21 = vld [vmem:[%s27350_s14 + $0x330c] ss:$16 sps:$4 sm:$0xff]   ;;  %v25465_v41 = vld [vmem:[%s27350_s14 + $0x3300] ss:$16 sps:$4 sm:$0xff]  }
 0x6c0   : > { %17437 = vmatpush1.bf16.msra.mxu0 %v25381_v44  ;;  %19118 = vmatpush1.bf16.msra.mxu1 %v25384_v25  ;;  %v25468_v44 = vld [vmem:[%s27350_s14 + $0x3308] ss:$16 sps:$4 sm:$0xff]   ;;  %v25473_v25 = vld [vmem:[%s27350_s14 + $0x3324] ss:$16 sps:$4 sm:$0xff]  }
 0x6c1   : > { %17438 = vmatprep.subr.bf16.mxu0 %v25389_v23  ;;  %19119 = vmatprep.subr.bf16.mxu1 %v25392_v46  ;;  %v25476_v23 = vld [vmem:[%s27350_s14 + $0x332c] ss:$16 sps:$4 sm:$0xff]   ;;  %v25471_v46 = vld [vmem:[%s27350_s14 + $0x3320] ss:$16 sps:$4 sm:$0xff]  }
 0x6c4   : > { %17439 = vmatpush1.bf16.msra.mxu0 %v25387_v48  ;;  %19120 = vmatpush1.bf16.msra.mxu1 %v25390_v29  ;;  %v25474_v48 = vld [vmem:[%s27350_s14 + $0x3328] ss:$16 sps:$4 sm:$0xff]   ;;  %v25479_v29 = vld [vmem:[%s27350_s14 + $0x3344] ss:$16 sps:$4 sm:$0xff]  }
 0x6c5   : > { %17440 = vmatprep.subr.bf16.mxu0 %v25395_v50  ;;  %19121 = vmatprep.subr.bf16.mxu1 %v25398_v36  ;;  %v25482_v50 = vld [vmem:[%s27350_s14 + $0x334c] ss:$16 sps:$4 sm:$0xff]   ;;  %v25477_v36 = vld [vmem:[%s27350_s14 + $0x3340] ss:$16 sps:$4 sm:$0xff]  }
 0x6c8   : > { %17441 = vmatpush1.bf16.msra.mxu0 %v25393_v32  ;;  %19122 = vmatpush1.bf16.msra.mxu1 %v25396_v35  ;;  %v25480_v32 = vld [vmem:[%s27350_s14 + $0x3348] ss:$16 sps:$4 sm:$0xff]   ;;  %v25485_v35 = vld [vmem:[%s27350_s14 + $0x3364] ss:$16 sps:$4 sm:$0xff]  }
 0x6c9   : > { %17442 = vmatprep.subr.bf16.mxu0 %v25401_v39  ;;  %19123 = vmatprep.subr.bf16.mxu1 %v25404_v54  ;;  %v25488_v39 = vld [vmem:[%s27350_s14 + $0x336c] ss:$16 sps:$4 sm:$0xff]   ;;  %v25483_v54 = vld [vmem:[%s27350_s14 + $0x3360] ss:$16 sps:$4 sm:$0xff]  }
 0x6cc   : > { %17443 = vmatpush1.bf16.msra.mxu0 %v25399_v37  ;;  %19124 = vmatpush1.bf16.msra.mxu1 %v25402_v57  ;;  %v25486_v37 = vld [vmem:[%s27350_s14 + $0x3368] ss:$16 sps:$4 sm:$0xff]   ;;  %v25491_v57 = vld [vmem:[%s27350_s14 + $0x3384] ss:$16 sps:$4 sm:$0xff]  }
 0x6cd   : > { %17444 = vmatprep.subr.bf16.mxu0 %v25407_v40  ;;  %19125 = vmatprep.subr.bf16.mxu1 %v25410_v60  ;;  %v25494_v40 = vld [vmem:[%s27350_s14 + $0x338c] ss:$16 sps:$4 sm:$0xff]   ;;  %v25489_v60 = vld [vmem:[%s27350_s14 + $0x3380] ss:$16 sps:$4 sm:$0xff]  }
 0x6d0   : > { %17445 = vmatpush1.bf16.msra.mxu0 %v25405_v61  ;;  %19126 = vmatpush1.bf16.msra.mxu1 %v25408_v63  ;;  %v25497_v61 = vld [vmem:[%s27350_s14 + $0x33a4] ss:$16 sps:$4 sm:$0xff]   ;;  %v25500_v63 = vld [vmem:[%s27350_s14 + $0x33ac] ss:$16 sps:$4 sm:$0xff]  }
 0x6d1   : > { %17446 = vmatprep.subr.bf16.mxu0 %v25413_v45  ;;  %19127 = vmatprep.subr.bf16.mxu1 %v25416_v0  ;;  %v25495_v45 = vld [vmem:[%s27350_s14 + $0x33a0] ss:$16 sps:$4 sm:$0xff]   ;;  %v25498_v0 = vld [vmem:[%s27350_s14 + $0x33a8] ss:$16 sps:$4 sm:$0xff]  }
 0x6d4   : > { %17447 = vmatpush1.bf16.msra.mxu0 %v25411_v52  ;;  %19128 = vmatpush1.bf16.msra.mxu1 %v25414_v47  ;;  %v25503_v52 = vld [vmem:[%s27350_s14 + $0x33c4] ss:$16 sps:$4 sm:$0xff]   ;;  %v25506_v47 = vld [vmem:[%s27350_s14 + $0x33cc] ss:$16 sps:$4 sm:$0xff]  }
 0x6d5   : > { %17457 = vmatprep.subr.bf16.mxu0 %v25419_v2  ;;  %19138 = vmatprep.subr.bf16.mxu1 %v25422_v51  ;;  %v29266_v2 = vld [vmem:[#allocation2 + $0x68] sm:$0xff]  ;;  %v25501_v51 = vld [vmem:[%s27350_s14 + $0x33c0] ss:$16 sps:$4 sm:$0xff]  }
 0x6d7   : > { %17449 = vmatmul.mubr.bf16.vlgmr.msra.gmra.mrb[0].mxu0 %v825_v4  ;;  %19130 = vmatmul.mubr.bf16.vlgmr.msra.gmra.mrb[0].mxu1 %v825_v4  ;;  %v25509_v4 = vld [vmem:[%s27350_s14 + $0x33e4] ss:$16 sps:$4 sm:$0xff]  }
 0x6d8   : > { %17458 = vmatpush1.bf16.msra.mxu0 %v25417_v53  ;;  %19139 = vmatpush1.bf16.msra.mxu1 %v25420_v58  ;;  %v25512_v53 = vld [vmem:[%s27350_s14 + $0x33ec] ss:$16 sps:$4 sm:$0xff]   ;;  %v29274_v58 = vrot.slane %v29266_v2, %v27416_v49 }
 0x6d9   : > { %17459 = vmatprep.subr.bf16.mxu0 %v25425_v7  ;;  %19140 = vmatprep.subr.bf16.mxu1 %v25428_v56  ;;  %v25507_v7 = vld [vmem:[%s27350_s14 + $0x33e0] ss:$16 sps:$4 sm:$0xff]   ;;  %v25510_v56 = vld [vmem:[%s27350_s14 + $0x33e8] ss:$16 sps:$4 sm:$0xff]  }
 0x6da   : > { %17489 = vmatprep.mubr.bf16.mxu0 %v828_v11  ;;  %19170 = vmatprep.mubr.bf16.mxu1 %v828_v11  ;;  %v25516_v11 = vld [vmem:[%s27350_s14 + $0x3404] ss:$16 sps:$4 sm:$0xff]  }
 0x6dc   : > { %17460 = vmatpush1.bf16.msra.mxu0 %v25423_v42  ;;  %19141 = vmatpush1.bf16.msra.mxu1 %v25426_v12  ;;  %v25519_v42 = vld [vmem:[%s27350_s14 + $0x340c] ss:$16 sps:$4 sm:$0xff]   ;;  %v585_v12 = vcombine.high %v29274_v58, %v29274_v58 }
 0x6dd   : > { %17461 = vmatprep.subr.bf16.mxu0 %v25431_v14  ;;  %19142 = vmatprep.subr.bf16.mxu1 %v25434_v59  ;;  %v827_v14 = vpack.c.bf16 %v29200_v1, %v29200_v1  ;;  %v25514_v59 = vld [vmem:[%s27350_s14 + $0x3400] ss:$16 sps:$4 sm:$0xff]  }
 0x6de   : > { %v25520_v1 = vld [vmem:[%s27350_s14 + $0x3420] ss:$16 sps:$4 sm:$0xff]  }
 0x6e0   : > { %17462 = vmatpush1.bf16.msra.mxu0 %v25429_v15  ;;  %19143 = vmatpush1.bf16.msra.mxu1 %v25432_v16  ;;  %v25517_v15 = vld [vmem:[%s27350_s14 + $0x3408] ss:$16 sps:$4 sm:$0xff]   ;;  %v25522_v16 = vld [vmem:[%s27350_s14 + $0x3424] ss:$16 sps:$4 sm:$0xff]  }
 0x6e1   : > { %17463 = vmatprep.subr.bf16.mxu0 %v25437_v62  ;;  %19144 = vmatprep.subr.bf16.mxu1 %v25440_v17  ;;  %v25525_v62 = vld [vmem:[%s27350_s14 + $0x342c] ss:$16 sps:$4 sm:$0xff]   ;;  %v830_v17 = vpack.c.bf16 %v585_v12, %v585_v12  ;;  %v25598_v12 = vld [vmem:[%s27350_s14 + $0x35c0] ss:$16 sps:$4 sm:$0xff]  }
 0x6e4   : > { %17464 = vmatpush1.bf16.msra.mxu0 %v25435_v5  ;;  %19145 = vmatpush1.bf16.msra.mxu1 %v25438_v19  ;;  %v25523_v5 = vld [vmem:[%s27350_s14 + $0x3428] ss:$16 sps:$4 sm:$0xff]   ;;  %v25528_v19 = vld [vmem:[%s27350_s14 + $0x3444] ss:$16 sps:$4 sm:$0xff]  }
 0x6e5   : > { %17465 = vmatprep.subr.bf16.mxu0 %v25443_v3  ;;  %19146 = vmatprep.subr.bf16.mxu1 %v25446_v8  ;;  %v25531_v3 = vld [vmem:[%s27350_s14 + $0x344c] ss:$16 sps:$4 sm:$0xff]   ;;  %v25526_v8 = vld [vmem:[%s27350_s14 + $0x3440] ss:$16 sps:$4 sm:$0xff]  }
 0x6e8   : > { %17466 = vmatpush1.bf16.msra.mxu0 %v25441_v22  ;;  %19147 = vmatpush1.bf16.msra.mxu1 %v25444_v6  ;;  %v25529_v22 = vld [vmem:[%s27350_s14 + $0x3448] ss:$16 sps:$4 sm:$0xff]   ;;  %v25534_v6 = vld [vmem:[%s27350_s14 + $0x3464] ss:$16 sps:$4 sm:$0xff]  }
 0x6e9   : > { %17467 = vmatprep.subr.bf16.mxu0 %v25449_v9  ;;  %19148 = vmatprep.subr.bf16.mxu1 %v25452_v27  ;;  %v25537_v9 = vld [vmem:[%s27350_s14 + $0x346c] ss:$16 sps:$4 sm:$0xff]   ;;  %v25532_v27 = vld [vmem:[%s27350_s14 + $0x3460] ss:$16 sps:$4 sm:$0xff]  }
 0x6ec   : > { %17468 = vmatpush1.bf16.msra.mxu0 %v25447_v30  ;;  %19149 = vmatpush1.bf16.msra.mxu1 %v25450_v10  ;;  %v25535_v30 = vld [vmem:[%s27350_s14 + $0x3468] ss:$16 sps:$4 sm:$0xff]   ;;  %v25540_v10 = vld [vmem:[%s27350_s14 + $0x3484] ss:$16 sps:$4 sm:$0xff]  }
 0x6ed   : > { %17469 = vmatprep.subr.bf16.mxu0 %v25455_v31  ;;  %19150 = vmatprep.subr.bf16.mxu1 %v25458_v33  ;;  %v25543_v31 = vld [vmem:[%s27350_s14 + $0x348c] ss:$16 sps:$4 sm:$0xff]   ;;  %v25538_v33 = vld [vmem:[%s27350_s14 + $0x3480] ss:$16 sps:$4 sm:$0xff]  }
 0x6f0   : > { %17470 = vmatpush1.bf16.msra.mxu0 %v25453_v13  ;;  %19151 = vmatpush1.bf16.msra.mxu1 %v25456_v34  ;;  %v25541_v13 = vld [vmem:[%s27350_s14 + $0x3488] ss:$16 sps:$4 sm:$0xff]   ;;  %v25546_v34 = vld [vmem:[%s27350_s14 + $0x34a4] ss:$16 sps:$4 sm:$0xff]  }
 0x6f1   : > { %17471 = vmatprep.subr.bf16.mxu0 %v25461_v20  ;;  %19152 = vmatprep.subr.bf16.mxu1 %v25464_v26  ;;  %v25549_v20 = vld [vmem:[%s27350_s14 + $0x34ac] ss:$16 sps:$4 sm:$0xff]   ;;  %v25544_v26 = vld [vmem:[%s27350_s14 + $0x34a0] ss:$16 sps:$4 sm:$0xff]  }
 0x6f4   : > { %17472 = vmatpush1.bf16.msra.mxu0 %v25459_v18  ;;  %19153 = vmatpush1.bf16.msra.mxu1 %v25462_v24  ;;  %v25547_v18 = vld [vmem:[%s27350_s14 + $0x34a8] ss:$16 sps:$4 sm:$0xff]   ;;  %v25552_v24 = vld [vmem:[%s27350_s14 + $0x34c4] ss:$16 sps:$4 sm:$0xff]  }
 0x6f5   : > { %17473 = vmatprep.subr.bf16.mxu0 %v25467_v38  ;;  %19154 = vmatprep.subr.bf16.mxu1 %v25470_v21  ;;  %v25555_v38 = vld [vmem:[%s27350_s14 + $0x34cc] ss:$16 sps:$4 sm:$0xff]   ;;  %v25550_v21 = vld [vmem:[%s27350_s14 + $0x34c0] ss:$16 sps:$4 sm:$0xff]  }
 0x6f8   : > { %17474 = vmatpush1.bf16.msra.mxu0 %v25465_v41  ;;  %19155 = vmatpush1.bf16.msra.mxu1 %v25468_v44  ;;  %v25553_v41 = vld [vmem:[%s27350_s14 + $0x34c8] ss:$16 sps:$4 sm:$0xff]   ;;  %v25558_v44 = vld [vmem:[%s27350_s14 + $0x34e4] ss:$16 sps:$4 sm:$0xff]  }
 0x6f9   : > { %17475 = vmatprep.subr.bf16.mxu0 %v25473_v25  ;;  %19156 = vmatprep.subr.bf16.mxu1 %v25476_v23  ;;  %v25561_v25 = vld [vmem:[%s27350_s14 + $0x34ec] ss:$16 sps:$4 sm:$0xff]   ;;  %v25556_v23 = vld [vmem:[%s27350_s14 + $0x34e0] ss:$16 sps:$4 sm:$0xff]  }
 0x6fc   : > { %17476 = vmatpush1.bf16.msra.mxu0 %v25471_v46  ;;  %19157 = vmatpush1.bf16.msra.mxu1 %v25474_v48  ;;  %v25559_v46 = vld [vmem:[%s27350_s14 + $0x34e8] ss:$16 sps:$4 sm:$0xff]   ;;  %v25564_v48 = vld [vmem:[%s27350_s14 + $0x3504] ss:$16 sps:$4 sm:$0xff]  }
 0x6fd   : > { %17477 = vmatprep.subr.bf16.mxu0 %v25479_v29  ;;  %19158 = vmatprep.subr.bf16.mxu1 %v25482_v50  ;;  %v25567_v29 = vld [vmem:[%s27350_s14 + $0x350c] ss:$16 sps:$4 sm:$0xff]   ;;  %v25562_v50 = vld [vmem:[%s27350_s14 + $0x3500] ss:$16 sps:$4 sm:$0xff]  }
 0x700   : > { %17478 = vmatpush1.bf16.msra.mxu0 %v25477_v36  ;;  %19159 = vmatpush1.bf16.msra.mxu1 %v25480_v32  ;;  %v25565_v36 = vld [vmem:[%s27350_s14 + $0x3508] ss:$16 sps:$4 sm:$0xff]   ;;  %v25570_v32 = vld [vmem:[%s27350_s14 + $0x3524] ss:$16 sps:$4 sm:$0xff]  }
 0x701   : > { %17479 = vmatprep.subr.bf16.mxu0 %v25485_v35  ;;  %19160 = vmatprep.subr.bf16.mxu1 %v25488_v39  ;;  %v25573_v35 = vld [vmem:[%s27350_s14 + $0x352c] ss:$16 sps:$4 sm:$0xff]   ;;  %v25568_v39 = vld [vmem:[%s27350_s14 + $0x3520] ss:$16 sps:$4 sm:$0xff]  }
 0x704   : > { %17480 = vmatpush1.bf16.msra.mxu0 %v25483_v54  ;;  %19161 = vmatpush1.bf16.msra.mxu1 %v25486_v37  ;;  %v25571_v54 = vld [vmem:[%s27350_s14 + $0x3528] ss:$16 sps:$4 sm:$0xff]   ;;  %v25576_v37 = vld [vmem:[%s27350_s14 + $0x3544] ss:$16 sps:$4 sm:$0xff]  }
 0x705   : > { %17481 = vmatprep.subr.bf16.mxu0 %v25491_v57  ;;  %19162 = vmatprep.subr.bf16.mxu1 %v25494_v40  ;;  %v25579_v57 = vld [vmem:[%s27350_s14 + $0x354c] ss:$16 sps:$4 sm:$0xff]   ;;  %v25574_v40 = vld [vmem:[%s27350_s14 + $0x3540] ss:$16 sps:$4 sm:$0xff]  }
 0x708   : > { %17482 = vmatpush1.bf16.msra.mxu0 %v25489_v60  ;;  %19163 = vmatpush1.bf16.msra.mxu1 %v25492_v28  ;;  %v25577_v60 = vld [vmem:[%s27350_s14 + $0x3548] ss:$16 sps:$4 sm:$0xff]   ;;  %v25582_v28 = vld [vmem:[%s27350_s14 + $0x3564] ss:$16 sps:$4 sm:$0xff]  }
 0x709   : > { %17483 = vmatprep.subr.bf16.mxu0 %v25497_v61  ;;  %19164 = vmatprep.subr.bf16.mxu1 %v25500_v63  ;;  %v25585_v61 = vld [vmem:[%s27350_s14 + $0x356c] ss:$16 sps:$4 sm:$0xff]   ;;  %v25580_v63 = vld [vmem:[%s27350_s14 + $0x3560] ss:$16 sps:$4 sm:$0xff]  }
 0x70c   : > { %17484 = vmatpush1.bf16.msra.mxu0 %v25495_v45  ;;  %19165 = vmatpush1.bf16.msra.mxu1 %v25498_v0  ;;  %v25583_v45 = vld [vmem:[%s27350_s14 + $0x3568] ss:$16 sps:$4 sm:$0xff]   ;;  %v25588_v0 = vld [vmem:[%s27350_s14 + $0x3584] ss:$16 sps:$4 sm:$0xff]  }
 0x70d   : > { %17485 = vmatprep.subr.bf16.mxu0 %v25503_v52  ;;  %19166 = vmatprep.subr.bf16.mxu1 %v25506_v47  ;;  %v25591_v52 = vld [vmem:[%s27350_s14 + $0x358c] ss:$16 sps:$4 sm:$0xff]   ;;  %v25586_v47 = vld [vmem:[%s27350_s14 + $0x3580] ss:$16 sps:$4 sm:$0xff]  }
 0x710   : > { %17486 = vmatpush1.bf16.msra.mxu0 %v25501_v51  ;;  %19167 = vmatpush1.bf16.msra.mxu1 %v25504_v55  ;;  %v25589_v51 = vld [vmem:[%s27350_s14 + $0x3588] ss:$16 sps:$4 sm:$0xff]   ;;  %v25594_v55 = vld [vmem:[%s27350_s14 + $0x35a4] ss:$16 sps:$4 sm:$0xff]  }
 0x711   : > { %17487 = vmatprep.subr.bf16.mxu0 %v25509_v4  ;;  %19168 = vmatprep.subr.bf16.mxu1 %v25512_v53  ;;  %v25597_v4 = vld [vmem:[%s27350_s14 + $0x35ac] ss:$16 sps:$4 sm:$0xff]   ;;  %v25592_v53 = vld [vmem:[%s27350_s14 + $0x35a0] ss:$16 sps:$4 sm:$0xff]  }
 0x714   : > { %17488 = vmatpush1.bf16.msra.mxu0 %v25507_v7  ;;  %19169 = vmatpush1.bf16.msra.mxu1 %v25510_v56  ;;  %v25595_v7 = vld [vmem:[%s27350_s14 + $0x35a8] ss:$16 sps:$4 sm:$0xff]   ;;  %v25600_v56 = vld [vmem:[%s27350_s14 + $0x35c4] ss:$16 sps:$4 sm:$0xff]  }
 0x715   : > { %17498 = vmatprep.subr.bf16.mxu0 %v25516_v11  ;;  %19179 = vmatprep.subr.bf16.mxu1 %v25519_v42  ;;  %v25603_v11 = vld [vmem:[%s27350_s14 + $0x35cc] ss:$16 sps:$4 sm:$0xff]   ;;  %v570_v42 = vcombine.high %v29266_v2, %v29266_v2  ;;  %v25604_v2 = vld [vmem:[%s27350_s14 + $0x35e0] ss:$16 sps:$4 sm:$0xff]  }
 0x717   : > { %17490 = vmatmul.mubr.bf16.vlgmr.msra.gmra.mrb[0].mxu0 %v827_v14  ;;  %19171 = vmatmul.mubr.bf16.vlgmr.msra.gmra.mrb[0].mxu1 %v827_v14  ;;  %v25601_v14 = vld [vmem:[%s27350_s14 + $0x35c8] ss:$16 sps:$4 sm:$0xff]  }
 0x718   : > { %17499 = vmatpush1.bf16.msra.mxu0 %v25514_v59  ;;  %19180 = vmatpush1.bf16.msra.mxu1 %v25517_v15  ;;  %v25606_v59 = vld [vmem:[%s27350_s14 + $0x35e4] ss:$16 sps:$4 sm:$0xff]   ;;  %v25609_v15 = vld [vmem:[%s27350_s14 + $0x35ec] ss:$16 sps:$4 sm:$0xff]  }
 0x719   : > { %17500 = vmatprep.subr.bf16.mxu0 %v25522_v16  ;;  %19181 = vmatprep.subr.bf16.mxu1 %v25525_v62  ;;  %v29347_v16 = vrot.slane %v570_v42, %v27416_v49  ;;  %v25607_v62 = vld [vmem:[%s27350_s14 + $0x35e8] ss:$16 sps:$4 sm:$0xff]  }
 0x71a   : > { %17530 = vmatprep.mubr.bf16.mxu0 %v830_v17  ;;  %19211 = vmatprep.mubr.bf16.mxu1 %v830_v17  ;;  %v25612_v17 = vld [vmem:[%s27350_s14 + $0x3604] ss:$16 sps:$4 sm:$0xff]   ;;  %v25685_v42 = vld [vmem:[%s27350_s14 + $0x3788] ss:$16 sps:$4 sm:$0xff]  }
 0x71c   : > { %17501 = vmatpush1.bf16.msra.mxu0 %v25520_v1  ;;  %19182 = vmatpush1.bf16.msra.mxu1 %v25523_v5  ;;  %v25615_v1 = vld [vmem:[%s27350_s14 + $0x360c] ss:$16 sps:$4 sm:$0xff]   ;;  %v586_v5 = vcombine.high %v29347_v16, %v29347_v16 }
 0x71d   : > { %17502 = vmatprep.subr.bf16.mxu0 %v25528_v19  ;;  %19183 = vmatprep.subr.bf16.mxu1 %v25531_v3  ;;  %v829_v19 = vpack.c.bf16 %v29274_v58, %v29274_v58  ;;  %v25610_v3 = vld [vmem:[%s27350_s14 + $0x3600] ss:$16 sps:$4 sm:$0xff]  }
 0x71e   : > { %v25616_v58 = vld [vmem:[%s27350_s14 + $0x3620] ss:$16 sps:$4 sm:$0xff]  }
 0x720   : > { %17503 = vmatpush1.bf16.msra.mxu0 %v25526_v8  ;;  %19184 = vmatpush1.bf16.msra.mxu1 %v25529_v22  ;;  %v25613_v8 = vld [vmem:[%s27350_s14 + $0x3608] ss:$16 sps:$4 sm:$0xff]   ;;  %v25618_v22 = vld [vmem:[%s27350_s14 + $0x3624] ss:$16 sps:$4 sm:$0xff]  }
 0x721   : > { %17504 = vmatprep.subr.bf16.mxu0 %v25534_v6  ;;  %19185 = vmatprep.subr.bf16.mxu1 %v25537_v9  ;;  %v25621_v6 = vld [vmem:[%s27350_s14 + $0x362c] ss:$16 sps:$4 sm:$0xff]   ;;  %v832_v9 = vpack.c.bf16 %v586_v5, %v586_v5  ;;  %v25697_v5 = vld [vmem:[%s27350_s14 + $0x37c8] ss:$16 sps:$4 sm:$0xff]  }
 0x724   : > { %17505 = vmatpush1.bf16.msra.mxu0 %v25532_v27  ;;  %19186 = vmatpush1.bf16.msra.mxu1 %v25535_v30  ;;  %v25619_v27 = vld [vmem:[%s27350_s14 + $0x3628] ss:$16 sps:$4 sm:$0xff]   ;;  %v25624_v30 = vld [vmem:[%s27350_s14 + $0x3644] ss:$16 sps:$4 sm:$0xff]  }
 0x725   : > { %17506 = vmatprep.subr.bf16.mxu0 %v25540_v10  ;;  %19187 = vmatprep.subr.bf16.mxu1 %v25543_v31  ;;  %v25627_v10 = vld [vmem:[%s27350_s14 + $0x364c] ss:$16 sps:$4 sm:$0xff]   ;;  %v25622_v31 = vld [vmem:[%s27350_s14 + $0x3640] ss:$16 sps:$4 sm:$0xff]  }
 0x728   : > { %17507 = vmatpush1.bf16.msra.mxu0 %v25538_v33  ;;  %19188 = vmatpush1.bf16.msra.mxu1 %v25541_v13  ;;  %v25625_v33 = vld [vmem:[%s27350_s14 + $0x3648] ss:$16 sps:$4 sm:$0xff]   ;;  %v25630_v13 = vld [vmem:[%s27350_s14 + $0x3664] ss:$16 sps:$4 sm:$0xff]  }
 0x729   : > { %17508 = vmatprep.subr.bf16.mxu0 %v25546_v34  ;;  %19189 = vmatprep.subr.bf16.mxu1 %v25549_v20  ;;  %v25633_v34 = vld [vmem:[%s27350_s14 + $0x366c] ss:$16 sps:$4 sm:$0xff]   ;;  %v25628_v20 = vld [vmem:[%s27350_s14 + $0x3660] ss:$16 sps:$4 sm:$0xff]  }
 0x72c   : > { %17509 = vmatpush1.bf16.msra.mxu0 %v25544_v26  ;;  %19190 = vmatpush1.bf16.msra.mxu1 %v25547_v18  ;;  %v25631_v26 = vld [vmem:[%s27350_s14 + $0x3668] ss:$16 sps:$4 sm:$0xff]   ;;  %v25636_v18 = vld [vmem:[%s27350_s14 + $0x3684] ss:$16 sps:$4 sm:$0xff]  }
 0x72d   : > { %17510 = vmatprep.subr.bf16.mxu0 %v25552_v24  ;;  %19191 = vmatprep.subr.bf16.mxu1 %v25555_v38  ;;  %v25639_v24 = vld [vmem:[%s27350_s14 + $0x368c] ss:$16 sps:$4 sm:$0xff]   ;;  %v25634_v38 = vld [vmem:[%s27350_s14 + $0x3680] ss:$16 sps:$4 sm:$0xff]  }
 0x730   : > { %17511 = vmatpush1.bf16.msra.mxu0 %v25550_v21  ;;  %19192 = vmatpush1.bf16.msra.mxu1 %v25553_v41  ;;  %v25637_v21 = vld [vmem:[%s27350_s14 + $0x3688] ss:$16 sps:$4 sm:$0xff]   ;;  %v25642_v41 = vld [vmem:[%s27350_s14 + $0x36a4] ss:$16 sps:$4 sm:$0xff]  }
 0x731   : > { %17512 = vmatprep.subr.bf16.mxu0 %v25558_v44  ;;  %19193 = vmatprep.subr.bf16.mxu1 %v25561_v25  ;;  %v25645_v44 = vld [vmem:[%s27350_s14 + $0x36ac] ss:$16 sps:$4 sm:$0xff]   ;;  %v25640_v25 = vld [vmem:[%s27350_s14 + $0x36a0] ss:$16 sps:$4 sm:$0xff]  }
 0x734   : > { %17513 = vmatpush1.bf16.msra.mxu0 %v25556_v23  ;;  %19194 = vmatpush1.bf16.msra.mxu1 %v25559_v46  ;;  %v25643_v23 = vld [vmem:[%s27350_s14 + $0x36a8] ss:$16 sps:$4 sm:$0xff]   ;;  %v25648_v46 = vld [vmem:[%s27350_s14 + $0x36c4] ss:$16 sps:$4 sm:$0xff]  }
 0x735   : > { %17514 = vmatprep.subr.bf16.mxu0 %v25564_v48  ;;  %19195 = vmatprep.subr.bf16.mxu1 %v25567_v29  ;;  %v25651_v48 = vld [vmem:[%s27350_s14 + $0x36cc] ss:$16 sps:$4 sm:$0xff]   ;;  %v25646_v29 = vld [vmem:[%s27350_s14 + $0x36c0] ss:$16 sps:$4 sm:$0xff]  }
 0x738   : > { %17515 = vmatpush1.bf16.msra.mxu0 %v25562_v50  ;;  %19196 = vmatpush1.bf16.msra.mxu1 %v25565_v36  ;;  %v25649_v50 = vld [vmem:[%s27350_s14 + $0x36c8] ss:$16 sps:$4 sm:$0xff]   ;;  %v25654_v36 = vld [vmem:[%s27350_s14 + $0x36e4] ss:$16 sps:$4 sm:$0xff]  }
 0x739   : > { %17516 = vmatprep.subr.bf16.mxu0 %v25570_v32  ;;  %19197 = vmatprep.subr.bf16.mxu1 %v25573_v35  ;;  %v25657_v32 = vld [vmem:[%s27350_s14 + $0x36ec] ss:$16 sps:$4 sm:$0xff]   ;;  %v25652_v35 = vld [vmem:[%s27350_s14 + $0x36e0] ss:$16 sps:$4 sm:$0xff]  }
 0x73c   : > { %17517 = vmatpush1.bf16.msra.mxu0 %v25568_v39  ;;  %19198 = vmatpush1.bf16.msra.mxu1 %v25571_v54  ;;  %v25655_v39 = vld [vmem:[%s27350_s14 + $0x36e8] ss:$16 sps:$4 sm:$0xff]   ;;  %v25660_v54 = vld [vmem:[%s27350_s14 + $0x3704] ss:$16 sps:$4 sm:$0xff]  }
 0x73d   : > { %17518 = vmatprep.subr.bf16.mxu0 %v25576_v37  ;;  %19199 = vmatprep.subr.bf16.mxu1 %v25579_v57  ;;  %v25663_v37 = vld [vmem:[%s27350_s14 + $0x370c] ss:$16 sps:$4 sm:$0xff]   ;;  %v25658_v57 = vld [vmem:[%s27350_s14 + $0x3700] ss:$16 sps:$4 sm:$0xff]  }
 0x740   : > { %17519 = vmatpush1.bf16.msra.mxu0 %v25574_v40  ;;  %19200 = vmatpush1.bf16.msra.mxu1 %v25577_v60  ;;  %v25661_v40 = vld [vmem:[%s27350_s14 + $0x3708] ss:$16 sps:$4 sm:$0xff]   ;;  %v25666_v60 = vld [vmem:[%s27350_s14 + $0x3724] ss:$16 sps:$4 sm:$0xff]  }
 0x741   : > { %17520 = vmatprep.subr.bf16.mxu0 %v25582_v28  ;;  %19201 = vmatprep.subr.bf16.mxu1 %v25585_v61  ;;  %v25669_v28 = vld [vmem:[%s27350_s14 + $0x372c] ss:$16 sps:$4 sm:$0xff]   ;;  %v25664_v61 = vld [vmem:[%s27350_s14 + $0x3720] ss:$16 sps:$4 sm:$0xff]  }
 0x744   : > { %17521 = vmatpush1.bf16.msra.mxu0 %v25580_v63  ;;  %19202 = vmatpush1.bf16.msra.mxu1 %v25583_v45  ;;  %v25667_v63 = vld [vmem:[%s27350_s14 + $0x3728] ss:$16 sps:$4 sm:$0xff]   ;;  %v25672_v45 = vld [vmem:[%s27350_s14 + $0x3744] ss:$16 sps:$4 sm:$0xff]  }
 0x745   : > { %17522 = vmatprep.subr.bf16.mxu0 %v25588_v0  ;;  %19203 = vmatprep.subr.bf16.mxu1 %v25591_v52  ;;  %v25675_v0 = vld [vmem:[%s27350_s14 + $0x374c] ss:$16 sps:$4 sm:$0xff]   ;;  %v25670_v52 = vld [vmem:[%s27350_s14 + $0x3740] ss:$16 sps:$4 sm:$0xff]  }
 0x748   : > { %17523 = vmatpush1.bf16.msra.mxu0 %v25586_v47  ;;  %19204 = vmatpush1.bf16.msra.mxu1 %v25589_v51  ;;  %v25673_v47 = vld [vmem:[%s27350_s14 + $0x3748] ss:$16 sps:$4 sm:$0xff]   ;;  %v25678_v51 = vld [vmem:[%s27350_s14 + $0x3764] ss:$16 sps:$4 sm:$0xff]  }
 0x749   : > { %17524 = vmatprep.subr.bf16.mxu0 %v25594_v55  ;;  %19205 = vmatprep.subr.bf16.mxu1 %v25597_v4  ;;  %v25681_v55 = vld [vmem:[%s27350_s14 + $0x376c] ss:$16 sps:$4 sm:$0xff]   ;;  %v25676_v4 = vld [vmem:[%s27350_s14 + $0x3760] ss:$16 sps:$4 sm:$0xff]  }
 0x74c   : > { %17525 = vmatpush1.bf16.msra.mxu0 %v25592_v53  ;;  %19206 = vmatpush1.bf16.msra.mxu1 %v25595_v7  ;;  %v25679_v53 = vld [vmem:[%s27350_s14 + $0x3768] ss:$16 sps:$4 sm:$0xff]   ;;  %v25684_v7 = vld [vmem:[%s27350_s14 + $0x3784] ss:$16 sps:$4 sm:$0xff]  }
 0x74d   : > { %17526 = vmatprep.subr.bf16.mxu0 %v25600_v56  ;;  %19207 = vmatprep.subr.bf16.mxu1 %v25603_v11  ;;  %v25687_v56 = vld [vmem:[%s27350_s14 + $0x378c] ss:$16 sps:$4 sm:$0xff]   ;;  %v25682_v11 = vld [vmem:[%s27350_s14 + $0x3780] ss:$16 sps:$4 sm:$0xff]  }
 0x750   : > { %17527 = vmatpush1.bf16.msra.mxu0 %v25598_v12  ;;  %19208 = vmatpush1.bf16.msra.mxu1 %v25601_v14  ;;  %v25690_v12 = vld [vmem:[%s27350_s14 + $0x37a4] ss:$16 sps:$4 sm:$0xff]   ;;  %v25693_v14 = vld [vmem:[%s27350_s14 + $0x37ac] ss:$16 sps:$4 sm:$0xff]  }
 0x751   : > { %17528 = vmatprep.subr.bf16.mxu0 %v25606_v59  ;;  %19209 = vmatprep.subr.bf16.mxu1 %v25609_v15  ;;  %v25688_v59 = vld [vmem:[%s27350_s14 + $0x37a0] ss:$16 sps:$4 sm:$0xff]   ;;  %v25691_v15 = vld [vmem:[%s27350_s14 + $0x37a8] ss:$16 sps:$4 sm:$0xff]  }
 0x754   : > { %17529 = vmatpush1.bf16.msra.mxu0 %v25604_v2  ;;  %19210 = vmatpush1.bf16.msra.mxu1 %v25607_v62  ;;  %v25696_v2 = vld [vmem:[%s27350_s14 + $0x37c4] ss:$16 sps:$4 sm:$0xff]   ;;  %v25699_v62 = vld [vmem:[%s27350_s14 + $0x37cc] ss:$16 sps:$4 sm:$0xff]  }
 0x755   : > { %17539 = vmatprep.subr.bf16.mxu0 %v25612_v17  ;;  %19220 = vmatprep.subr.bf16.mxu1 %v25615_v1  ;;  %v29413_v17 = vld [vmem:[#allocation2 + $0x70] sm:$0xff] }
 0x756   : > { %v25694_v1 = vld [vmem:[%s27350_s14 + $0x37c0] ss:$16 sps:$4 sm:$0xff]  }
 0x757   : > { %17531 = vmatmul.mubr.bf16.vlgmr.msra.gmra.mrb[0].mxu0 %v829_v19  ;;  %19212 = vmatmul.mubr.bf16.vlgmr.msra.gmra.mrb[0].mxu1 %v829_v19  ;;  %v25702_v19 = vld [vmem:[%s27350_s14 + $0x37e4] ss:$16 sps:$4 sm:$0xff]  }
 0x758   : > { %17540 = vmatpush1.bf16.msra.mxu0 %v25610_v3  ;;  %19221 = vmatpush1.bf16.msra.mxu1 %v25613_v8  ;;  %v25705_v3 = vld [vmem:[%s27350_s14 + $0x37ec] ss:$16 sps:$4 sm:$0xff]   ;;  %v29421_v8 = vrot.slane %v29413_v17, %v27416_v49 }
 0x759   : > { %17541 = vmatprep.subr.bf16.mxu0 %v25618_v22  ;;  %19222 = vmatprep.subr.bf16.mxu1 %v25621_v6  ;;  %v25700_v22 = vld [vmem:[%s27350_s14 + $0x37e0] ss:$16 sps:$4 sm:$0xff]   ;;  %v25703_v6 = vld [vmem:[%s27350_s14 + $0x37e8] ss:$16 sps:$4 sm:$0xff]  }
 0x75a   : > { %17571 = vmatprep.mubr.bf16.mxu0 %v832_v9  ;;  %19252 = vmatprep.mubr.bf16.mxu1 %v832_v9  ;;  %v25709_v9 = vld [vmem:[%s27350_s14 + $0x3804] ss:$16 sps:$4 sm:$0xff]  }
 0x75c   : > { %17542 = vmatpush1.bf16.msra.mxu0 %v25616_v58  ;;  %19223 = vmatpush1.bf16.msra.mxu1 %v25619_v27  ;;  %v25712_v58 = vld [vmem:[%s27350_s14 + $0x380c] ss:$16 sps:$4 sm:$0xff]   ;;  %v602_v27 = vcombine.high %v29421_v8, %v29421_v8 }
 0x75d   : > { %17543 = vmatprep.subr.bf16.mxu0 %v25624_v30  ;;  %19224 = vmatprep.subr.bf16.mxu1 %v25627_v10  ;;  %v831_v30 = vpack.c.bf16 %v29347_v16, %v29347_v16  ;;  %v25707_v10 = vld [vmem:[%s27350_s14 + $0x3800] ss:$16 sps:$4 sm:$0xff]  }
 0x75e   : > { %v25713_v16 = vld [vmem:[%s27350_s14 + $0x3820] ss:$16 sps:$4 sm:$0xff]  }
 0x760   : > { %17544 = vmatpush1.bf16.msra.mxu0 %v25622_v31  ;;  %19225 = vmatpush1.bf16.msra.mxu1 %v25625_v33  ;;  %v25710_v31 = vld [vmem:[%s27350_s14 + $0x3808] ss:$16 sps:$4 sm:$0xff]   ;;  %v25715_v33 = vld [vmem:[%s27350_s14 + $0x3824] ss:$16 sps:$4 sm:$0xff]  }
 0x761   : > { %17545 = vmatprep.subr.bf16.mxu0 %v25630_v13  ;;  %19226 = vmatprep.subr.bf16.mxu1 %v25633_v34  ;;  %v25718_v13 = vld [vmem:[%s27350_s14 + $0x382c] ss:$16 sps:$4 sm:$0xff]   ;;  %v834_v34 = vpack.c.bf16 %v602_v27, %v602_v27  ;;  %v25791_v27 = vld [vmem:[%s27350_s14 + $0x39c0] ss:$16 sps:$4 sm:$0xff]  }
 0x764   : > { %17546 = vmatpush1.bf16.msra.mxu0 %v25628_v20  ;;  %19227 = vmatpush1.bf16.msra.mxu1 %v25631_v26  ;;  %v25716_v20 = vld [vmem:[%s27350_s14 + $0x3828] ss:$16 sps:$4 sm:$0xff]   ;;  %v25721_v26 = vld [vmem:[%s27350_s14 + $0x3844] ss:$16 sps:$4 sm:$0xff]  }
 0x765   : > { %17547 = vmatprep.subr.bf16.mxu0 %v25636_v18  ;;  %19228 = vmatprep.subr.bf16.mxu1 %v25639_v24  ;;  %v25724_v18 = vld [vmem:[%s27350_s14 + $0x384c] ss:$16 sps:$4 sm:$0xff]   ;;  %v25719_v24 = vld [vmem:[%s27350_s14 + $0x3840] ss:$16 sps:$4 sm:$0xff]  }
 0x768   : > { %17548 = vmatpush1.bf16.msra.mxu0 %v25634_v38  ;;  %19229 = vmatpush1.bf16.msra.mxu1 %v25637_v21  ;;  %v25722_v38 = vld [vmem:[%s27350_s14 + $0x3848] ss:$16 sps:$4 sm:$0xff]   ;;  %v25727_v21 = vld [vmem:[%s27350_s14 + $0x3864] ss:$16 sps:$4 sm:$0xff]  }
 0x769   : > { %17549 = vmatprep.subr.bf16.mxu0 %v25642_v41  ;;  %19230 = vmatprep.subr.bf16.mxu1 %v25645_v44  ;;  %v25730_v41 = vld [vmem:[%s27350_s14 + $0x386c] ss:$16 sps:$4 sm:$0xff]   ;;  %v25725_v44 = vld [vmem:[%s27350_s14 + $0x3860] ss:$16 sps:$4 sm:$0xff]  }
 0x76c   : > { %17550 = vmatpush1.bf16.msra.mxu0 %v25640_v25  ;;  %19231 = vmatpush1.bf16.msra.mxu1 %v25643_v23  ;;  %v25728_v25 = vld [vmem:[%s27350_s14 + $0x3868] ss:$16 sps:$4 sm:$0xff]   ;;  %v25733_v23 = vld [vmem:[%s27350_s14 + $0x3884] ss:$16 sps:$4 sm:$0xff]  }
 0x76d   : > { %17551 = vmatprep.subr.bf16.mxu0 %v25648_v46  ;;  %19232 = vmatprep.subr.bf16.mxu1 %v25651_v48  ;;  %v25736_v46 = vld [vmem:[%s27350_s14 + $0x388c] ss:$16 sps:$4 sm:$0xff]   ;;  %v25731_v48 = vld [vmem:[%s27350_s14 + $0x3880] ss:$16 sps:$4 sm:$0xff]  }
 0x770   : > { %17552 = vmatpush1.bf16.msra.mxu0 %v25646_v29  ;;  %19233 = vmatpush1.bf16.msra.mxu1 %v25649_v50  ;;  %v25734_v29 = vld [vmem:[%s27350_s14 + $0x3888] ss:$16 sps:$4 sm:$0xff]   ;;  %v25739_v50 = vld [vmem:[%s27350_s14 + $0x38a4] ss:$16 sps:$4 sm:$0xff]  }
 0x771   : > { %17553 = vmatprep.subr.bf16.mxu0 %v25654_v36  ;;  %19234 = vmatprep.subr.bf16.mxu1 %v25657_v32  ;;  %v25742_v36 = vld [vmem:[%s27350_s14 + $0x38ac] ss:$16 sps:$4 sm:$0xff]   ;;  %v25737_v32 = vld [vmem:[%s27350_s14 + $0x38a0] ss:$16 sps:$4 sm:$0xff]  }
 0x774   : > { %17554 = vmatpush1.bf16.msra.mxu0 %v25652_v35  ;;  %19235 = vmatpush1.bf16.msra.mxu1 %v25655_v39  ;;  %v25740_v35 = vld [vmem:[%s27350_s14 + $0x38a8] ss:$16 sps:$4 sm:$0xff]   ;;  %v25745_v39 = vld [vmem:[%s27350_s14 + $0x38c4] ss:$16 sps:$4 sm:$0xff]  }
 0x775   : > { %17555 = vmatprep.subr.bf16.mxu0 %v25660_v54  ;;  %19236 = vmatprep.subr.bf16.mxu1 %v25663_v37  ;;  %v25748_v54 = vld [vmem:[%s27350_s14 + $0x38cc] ss:$16 sps:$4 sm:$0xff]   ;;  %v25743_v37 = vld [vmem:[%s27350_s14 + $0x38c0] ss:$16 sps:$4 sm:$0xff]  }
 0x778   : > { %17556 = vmatpush1.bf16.msra.mxu0 %v25658_v57  ;;  %19237 = vmatpush1.bf16.msra.mxu1 %v25661_v40  ;;  %v25746_v57 = vld [vmem:[%s27350_s14 + $0x38c8] ss:$16 sps:$4 sm:$0xff]   ;;  %v25751_v40 = vld [vmem:[%s27350_s14 + $0x38e4] ss:$16 sps:$4 sm:$0xff]  }
 0x779   : > { %17557 = vmatprep.subr.bf16.mxu0 %v25666_v60  ;;  %19238 = vmatprep.subr.bf16.mxu1 %v25669_v28  ;;  %v25754_v60 = vld [vmem:[%s27350_s14 + $0x38ec] ss:$16 sps:$4 sm:$0xff]   ;;  %v25749_v28 = vld [vmem:[%s27350_s14 + $0x38e0] ss:$16 sps:$4 sm:$0xff]  }
 0x77c   : > { %17558 = vmatpush1.bf16.msra.mxu0 %v25664_v61  ;;  %19239 = vmatpush1.bf16.msra.mxu1 %v25667_v63  ;;  %v25752_v61 = vld [vmem:[%s27350_s14 + $0x38e8] ss:$16 sps:$4 sm:$0xff]   ;;  %v25757_v63 = vld [vmem:[%s27350_s14 + $0x3904] ss:$16 sps:$4 sm:$0xff]  }
 0x77d   : > { %17559 = vmatprep.subr.bf16.mxu0 %v25672_v45  ;;  %19240 = vmatprep.subr.bf16.mxu1 %v25675_v0  ;;  %v25760_v45 = vld [vmem:[%s27350_s14 + $0x390c] ss:$16 sps:$4 sm:$0xff]   ;;  %v25755_v0 = vld [vmem:[%s27350_s14 + $0x3900] ss:$16 sps:$4 sm:$0xff]  }
 0x780   : > { %17560 = vmatpush1.bf16.msra.mxu0 %v25670_v52  ;;  %19241 = vmatpush1.bf16.msra.mxu1 %v25673_v47  ;;  %v25758_v52 = vld [vmem:[%s27350_s14 + $0x3908] ss:$16 sps:$4 sm:$0xff]   ;;  %v25763_v47 = vld [vmem:[%s27350_s14 + $0x3924] ss:$16 sps:$4 sm:$0xff]  }
 0x781   : > { %17561 = vmatprep.subr.bf16.mxu0 %v25678_v51  ;;  %19242 = vmatprep.subr.bf16.mxu1 %v25681_v55  ;;  %v25766_v51 = vld [vmem:[%s27350_s14 + $0x392c] ss:$16 sps:$4 sm:$0xff]   ;;  %v25761_v55 = vld [vmem:[%s27350_s14 + $0x3920] ss:$16 sps:$4 sm:$0xff]  }
 0x784   : > { %17562 = vmatpush1.bf16.msra.mxu0 %v25676_v4  ;;  %19243 = vmatpush1.bf16.msra.mxu1 %v25679_v53  ;;  %v25764_v4 = vld [vmem:[%s27350_s14 + $0x3928] ss:$16 sps:$4 sm:$0xff]   ;;  %v25769_v53 = vld [vmem:[%s27350_s14 + $0x3944] ss:$16 sps:$4 sm:$0xff]  }
 0x785   : > { %17563 = vmatprep.subr.bf16.mxu0 %v25684_v7  ;;  %19244 = vmatprep.subr.bf16.mxu1 %v25687_v56  ;;  %v25772_v7 = vld [vmem:[%s27350_s14 + $0x394c] ss:$16 sps:$4 sm:$0xff]   ;;  %v25767_v56 = vld [vmem:[%s27350_s14 + $0x3940] ss:$16 sps:$4 sm:$0xff]  }
 0x788   : > { %17564 = vmatpush1.bf16.msra.mxu0 %v25682_v11  ;;  %19245 = vmatpush1.bf16.msra.mxu1 %v25685_v42  ;;  %v25770_v11 = vld [vmem:[%s27350_s14 + $0x3948] ss:$16 sps:$4 sm:$0xff]   ;;  %v25775_v42 = vld [vmem:[%s27350_s14 + $0x3964] ss:$16 sps:$4 sm:$0xff]  }
 0x789   : > { %17565 = vmatprep.subr.bf16.mxu0 %v25690_v12  ;;  %19246 = vmatprep.subr.bf16.mxu1 %v25693_v14  ;;  %v25778_v12 = vld [vmem:[%s27350_s14 + $0x396c] ss:$16 sps:$4 sm:$0xff]   ;;  %v25773_v14 = vld [vmem:[%s27350_s14 + $0x3960] ss:$16 sps:$4 sm:$0xff]  }
 0x78c   : > { %17566 = vmatpush1.bf16.msra.mxu0 %v25688_v59  ;;  %19247 = vmatpush1.bf16.msra.mxu1 %v25691_v15  ;;  %v25776_v59 = vld [vmem:[%s27350_s14 + $0x3968] ss:$16 sps:$4 sm:$0xff]   ;;  %v25781_v15 = vld [vmem:[%s27350_s14 + $0x3984] ss:$16 sps:$4 sm:$0xff]  }
 0x78d   : > { %17567 = vmatprep.subr.bf16.mxu0 %v25696_v2  ;;  %19248 = vmatprep.subr.bf16.mxu1 %v25699_v62  ;;  %v25784_v2 = vld [vmem:[%s27350_s14 + $0x398c] ss:$16 sps:$4 sm:$0xff]   ;;  %v25779_v62 = vld [vmem:[%s27350_s14 + $0x3980] ss:$16 sps:$4 sm:$0xff]  }
 0x790   : > { %17568 = vmatpush1.bf16.msra.mxu0 %v25694_v1  ;;  %19249 = vmatpush1.bf16.msra.mxu1 %v25697_v5  ;;  %v25782_v1 = vld [vmem:[%s27350_s14 + $0x3988] ss:$16 sps:$4 sm:$0xff]   ;;  %v25787_v5 = vld [vmem:[%s27350_s14 + $0x39a4] ss:$16 sps:$4 sm:$0xff]  }
 0x791   : > { %17569 = vmatprep.subr.bf16.mxu0 %v25702_v19  ;;  %19250 = vmatprep.subr.bf16.mxu1 %v25705_v3  ;;  %v25790_v19 = vld [vmem:[%s27350_s14 + $0x39ac] ss:$16 sps:$4 sm:$0xff]   ;;  %v25785_v3 = vld [vmem:[%s27350_s14 + $0x39a0] ss:$16 sps:$4 sm:$0xff]  }
 0x794   : > { %17570 = vmatpush1.bf16.msra.mxu0 %v25700_v22  ;;  %19251 = vmatpush1.bf16.msra.mxu1 %v25703_v6  ;;  %v25788_v22 = vld [vmem:[%s27350_s14 + $0x39a8] ss:$16 sps:$4 sm:$0xff]   ;;  %v25793_v6 = vld [vmem:[%s27350_s14 + $0x39c4] ss:$16 sps:$4 sm:$0xff]  }
 0x795   : > { %17580 = vmatprep.subr.bf16.mxu0 %v25709_v9  ;;  %19261 = vmatprep.subr.bf16.mxu1 %v25712_v58  ;;  %v25796_v9 = vld [vmem:[%s27350_s14 + $0x39cc] ss:$16 sps:$4 sm:$0xff]   ;;  %v587_v58 = vcombine.high %v29413_v17, %v29413_v17  ;;  %v25797_v17 = vld [vmem:[%s27350_s14 + $0x39e0] ss:$16 sps:$4 sm:$0xff]  }
 0x797   : > { %17572 = vmatmul.mubr.bf16.vlgmr.msra.gmra.mrb[0].mxu0 %v831_v30  ;;  %19253 = vmatmul.mubr.bf16.vlgmr.msra.gmra.mrb[0].mxu1 %v831_v30  ;;  %v25794_v30 = vld [vmem:[%s27350_s14 + $0x39c8] ss:$16 sps:$4 sm:$0xff]  }
 0x798   : > { %17581 = vmatpush1.bf16.msra.mxu0 %v25707_v10  ;;  %19262 = vmatpush1.bf16.msra.mxu1 %v25710_v31  ;;  %v25799_v10 = vld [vmem:[%s27350_s14 + $0x39e4] ss:$16 sps:$4 sm:$0xff]   ;;  %v25802_v31 = vld [vmem:[%s27350_s14 + $0x39ec] ss:$16 sps:$4 sm:$0xff]  }
 0x799   : > { %17582 = vmatprep.subr.bf16.mxu0 %v25715_v33  ;;  %19263 = vmatprep.subr.bf16.mxu1 %v25718_v13  ;;  %v29494_v33 = vrot.slane %v587_v58, %v27416_v49  ;;  %v25800_v13 = vld [vmem:[%s27350_s14 + $0x39e8] ss:$16 sps:$4 sm:$0xff]  }
 0x79a   : > { %17612 = vmatprep.mubr.bf16.mxu0 %v834_v34  ;;  %19293 = vmatprep.mubr.bf16.mxu1 %v834_v34  ;;  %v25805_v34 = vld [vmem:[%s27350_s14 + $0x3a04] ss:$16 sps:$4 sm:$0xff]   ;;  %v25878_v58 = vld [vmem:[%s27350_s14 + $0x3b88] ss:$16 sps:$4 sm:$0xff]  }
 0x79c   : > { %17583 = vmatpush1.bf16.msra.mxu0 %v25713_v16  ;;  %19264 = vmatpush1.bf16.msra.mxu1 %v25716_v20  ;;  %v25808_v16 = vld [vmem:[%s27350_s14 + $0x3a0c] ss:$16 sps:$4 sm:$0xff]   ;;  %v603_v20 = vcombine.high %v29494_v33, %v29494_v33 }
 0x79d   : > { %17584 = vmatprep.subr.bf16.mxu0 %v25721_v26  ;;  %19265 = vmatprep.subr.bf16.mxu1 %v25724_v18  ;;  %v833_v26 = vpack.c.bf16 %v29421_v8, %v29421_v8  ;;  %v25803_v18 = vld [vmem:[%s27350_s14 + $0x3a00] ss:$16 sps:$4 sm:$0xff]  }
 0x79e   : > { %v25809_v8 = vld [vmem:[%s27350_s14 + $0x3a20] ss:$16 sps:$4 sm:$0xff]  }
 0x7a0   : > { %17585 = vmatpush1.bf16.msra.mxu0 %v25719_v24  ;;  %19266 = vmatpush1.bf16.msra.mxu1 %v25722_v38  ;;  %v25806_v24 = vld [vmem:[%s27350_s14 + $0x3a08] ss:$16 sps:$4 sm:$0xff]   ;;  %v25811_v38 = vld [vmem:[%s27350_s14 + $0x3a24] ss:$16 sps:$4 sm:$0xff]  }
 0x7a1   : > { %17586 = vmatprep.subr.bf16.mxu0 %v25727_v21  ;;  %19267 = vmatprep.subr.bf16.mxu1 %v25730_v41  ;;  %v25814_v21 = vld [vmem:[%s27350_s14 + $0x3a2c] ss:$16 sps:$4 sm:$0xff]   ;;  %v836_v41 = vpack.c.bf16 %v603_v20, %v603_v20  ;;  %v25890_v20 = vld [vmem:[%s27350_s14 + $0x3bc8] ss:$16 sps:$4 sm:$0xff]  }
 0x7a4   : > { %17587 = vmatpush1.bf16.msra.mxu0 %v25725_v44  ;;  %19268 = vmatpush1.bf16.msra.mxu1 %v25728_v25  ;;  %v25812_v44 = vld [vmem:[%s27350_s14 + $0x3a28] ss:$16 sps:$4 sm:$0xff]   ;;  %v25817_v25 = vld [vmem:[%s27350_s14 + $0x3a44] ss:$16 sps:$4 sm:$0xff]  }
 0x7a5   : > { %17588 = vmatprep.subr.bf16.mxu0 %v25733_v23  ;;  %19269 = vmatprep.subr.bf16.mxu1 %v25736_v46  ;;  %v25820_v23 = vld [vmem:[%s27350_s14 + $0x3a4c] ss:$16 sps:$4 sm:$0xff]   ;;  %v25815_v46 = vld [vmem:[%s27350_s14 + $0x3a40] ss:$16 sps:$4 sm:$0xff]  }
 0x7a8   : > { %17589 = vmatpush1.bf16.msra.mxu0 %v25731_v48  ;;  %19270 = vmatpush1.bf16.msra.mxu1 %v25734_v29  ;;  %v25818_v48 = vld [vmem:[%s27350_s14 + $0x3a48] ss:$16 sps:$4 sm:$0xff]   ;;  %v25823_v29 = vld [vmem:[%s27350_s14 + $0x3a64] ss:$16 sps:$4 sm:$0xff]  }
 0x7a9   : > { %17590 = vmatprep.subr.bf16.mxu0 %v25739_v50  ;;  %19271 = vmatprep.subr.bf16.mxu1 %v25742_v36  ;;  %v25826_v50 = vld [vmem:[%s27350_s14 + $0x3a6c] ss:$16 sps:$4 sm:$0xff]   ;;  %v25821_v36 = vld [vmem:[%s27350_s14 + $0x3a60] ss:$16 sps:$4 sm:$0xff]  }
 0x7ac   : > { %17591 = vmatpush1.bf16.msra.mxu0 %v25737_v32  ;;  %19272 = vmatpush1.bf16.msra.mxu1 %v25740_v35  ;;  %v25824_v32 = vld [vmem:[%s27350_s14 + $0x3a68] ss:$16 sps:$4 sm:$0xff]   ;;  %v25829_v35 = vld [vmem:[%s27350_s14 + $0x3a84] ss:$16 sps:$4 sm:$0xff]  }
 0x7ad   : > { %17592 = vmatprep.subr.bf16.mxu0 %v25745_v39  ;;  %19273 = vmatprep.subr.bf16.mxu1 %v25748_v54  ;;  %v25832_v39 = vld [vmem:[%s27350_s14 + $0x3a8c] ss:$16 sps:$4 sm:$0xff]   ;;  %v25827_v54 = vld [vmem:[%s27350_s14 + $0x3a80] ss:$16 sps:$4 sm:$0xff]  }
 0x7b0   : > { %17593 = vmatpush1.bf16.msra.mxu0 %v25743_v37  ;;  %19274 = vmatpush1.bf16.msra.mxu1 %v25746_v57  ;;  %v25830_v37 = vld [vmem:[%s27350_s14 + $0x3a88] ss:$16 sps:$4 sm:$0xff]   ;;  %v25835_v57 = vld [vmem:[%s27350_s14 + $0x3aa4] ss:$16 sps:$4 sm:$0xff]  }
 0x7b1   : > { %17594 = vmatprep.subr.bf16.mxu0 %v25751_v40  ;;  %19275 = vmatprep.subr.bf16.mxu1 %v25754_v60  ;;  %v25838_v40 = vld [vmem:[%s27350_s14 + $0x3aac] ss:$16 sps:$4 sm:$0xff]   ;;  %v25833_v60 = vld [vmem:[%s27350_s14 + $0x3aa0] ss:$16 sps:$4 sm:$0xff]  }
 0x7b4   : > { %17595 = vmatpush1.bf16.msra.mxu0 %v25749_v28  ;;  %19276 = vmatpush1.bf16.msra.mxu1 %v25752_v61  ;;  %v25836_v28 = vld [vmem:[%s27350_s14 + $0x3aa8] ss:$16 sps:$4 sm:$0xff]   ;;  %v25841_v61 = vld [vmem:[%s27350_s14 + $0x3ac4] ss:$16 sps:$4 sm:$0xff]  }
 0x7b5   : > { %17596 = vmatprep.subr.bf16.mxu0 %v25757_v63  ;;  %19277 = vmatprep.subr.bf16.mxu1 %v25760_v45  ;;  %v25844_v63 = vld [vmem:[%s27350_s14 + $0x3acc] ss:$16 sps:$4 sm:$0xff]   ;;  %v25839_v45 = vld [vmem:[%s27350_s14 + $0x3ac0] ss:$16 sps:$4 sm:$0xff]  }
 0x7b8   : > { %17597 = vmatpush1.bf16.msra.mxu0 %v25755_v0  ;;  %19278 = vmatpush1.bf16.msra.mxu1 %v25758_v52  ;;  %v25842_v0 = vld [vmem:[%s27350_s14 + $0x3ac8] ss:$16 sps:$4 sm:$0xff]   ;;  %v25847_v52 = vld [vmem:[%s27350_s14 + $0x3ae4] ss:$16 sps:$4 sm:$0xff]  }
 0x7b9   : > { %17598 = vmatprep.subr.bf16.mxu0 %v25763_v47  ;;  %19279 = vmatprep.subr.bf16.mxu1 %v25766_v51  ;;  %v25850_v47 = vld [vmem:[%s27350_s14 + $0x3aec] ss:$16 sps:$4 sm:$0xff]   ;;  %v25845_v51 = vld [vmem:[%s27350_s14 + $0x3ae0] ss:$16 sps:$4 sm:$0xff]  }
 0x7bc   : > { %17599 = vmatpush1.bf16.msra.mxu0 %v25761_v55  ;;  %19280 = vmatpush1.bf16.msra.mxu1 %v25764_v4  ;;  %v25848_v55 = vld [vmem:[%s27350_s14 + $0x3ae8] ss:$16 sps:$4 sm:$0xff]   ;;  %v25853_v4 = vld [vmem:[%s27350_s14 + $0x3b04] ss:$16 sps:$4 sm:$0xff]  }
 0x7bd   : > { %17600 = vmatprep.subr.bf16.mxu0 %v25769_v53  ;;  %19281 = vmatprep.subr.bf16.mxu1 %v25772_v7  ;;  %v25856_v53 = vld [vmem:[%s27350_s14 + $0x3b0c] ss:$16 sps:$4 sm:$0xff]   ;;  %v25851_v7 = vld [vmem:[%s27350_s14 + $0x3b00] ss:$16 sps:$4 sm:$0xff]  }
 0x7c0   : > { %17601 = vmatpush1.bf16.msra.mxu0 %v25767_v56  ;;  %19282 = vmatpush1.bf16.msra.mxu1 %v25770_v11  ;;  %v25854_v56 = vld [vmem:[%s27350_s14 + $0x3b08] ss:$16 sps:$4 sm:$0xff]   ;;  %v25859_v11 = vld [vmem:[%s27350_s14 + $0x3b24] ss:$16 sps:$4 sm:$0xff]  }
 0x7c1   : > { %17602 = vmatprep.subr.bf16.mxu0 %v25775_v42  ;;  %19283 = vmatprep.subr.bf16.mxu1 %v25778_v12  ;;  %v25862_v42 = vld [vmem:[%s27350_s14 + $0x3b2c] ss:$16 sps:$4 sm:$0xff]   ;;  %v25857_v12 = vld [vmem:[%s27350_s14 + $0x3b20] ss:$16 sps:$4 sm:$0xff]  }
 0x7c4   : > { %17603 = vmatpush1.bf16.msra.mxu0 %v25773_v14  ;;  %19284 = vmatpush1.bf16.msra.mxu1 %v25776_v59  ;;  %v25860_v14 = vld [vmem:[%s27350_s14 + $0x3b28] ss:$16 sps:$4 sm:$0xff]   ;;  %v25865_v59 = vld [vmem:[%s27350_s14 + $0x3b44] ss:$16 sps:$4 sm:$0xff]  }
 0x7c5   : > { %17604 = vmatprep.subr.bf16.mxu0 %v25781_v15  ;;  %19285 = vmatprep.subr.bf16.mxu1 %v25784_v2  ;;  %v25868_v15 = vld [vmem:[%s27350_s14 + $0x3b4c] ss:$16 sps:$4 sm:$0xff]   ;;  %v25863_v2 = vld [vmem:[%s27350_s14 + $0x3b40] ss:$16 sps:$4 sm:$0xff]  }
 0x7c8   : > { %17605 = vmatpush1.bf16.msra.mxu0 %v25779_v62  ;;  %19286 = vmatpush1.bf16.msra.mxu1 %v25782_v1  ;;  %v25866_v62 = vld [vmem:[%s27350_s14 + $0x3b48] ss:$16 sps:$4 sm:$0xff]   ;;  %v25871_v1 = vld [vmem:[%s27350_s14 + $0x3b64] ss:$16 sps:$4 sm:$0xff]  }
 0x7c9   : > { %17606 = vmatprep.subr.bf16.mxu0 %v25787_v5  ;;  %19287 = vmatprep.subr.bf16.mxu1 %v25790_v19  ;;  %v25874_v5 = vld [vmem:[%s27350_s14 + $0x3b6c] ss:$16 sps:$4 sm:$0xff]   ;;  %v25869_v19 = vld [vmem:[%s27350_s14 + $0x3b60] ss:$16 sps:$4 sm:$0xff]  }
 0x7cc   : > { %17607 = vmatpush1.bf16.msra.mxu0 %v25785_v3  ;;  %19288 = vmatpush1.bf16.msra.mxu1 %v25788_v22  ;;  %v25872_v3 = vld [vmem:[%s27350_s14 + $0x3b68] ss:$16 sps:$4 sm:$0xff]   ;;  %v25877_v22 = vld [vmem:[%s27350_s14 + $0x3b84] ss:$16 sps:$4 sm:$0xff]  }
 0x7cd   : > { %17608 = vmatprep.subr.bf16.mxu0 %v25793_v6  ;;  %19289 = vmatprep.subr.bf16.mxu1 %v25796_v9  ;;  %v25880_v6 = vld [vmem:[%s27350_s14 + $0x3b8c] ss:$16 sps:$4 sm:$0xff]   ;;  %v25875_v9 = vld [vmem:[%s27350_s14 + $0x3b80] ss:$16 sps:$4 sm:$0xff]  }
 0x7d0   : > { %17609 = vmatpush1.bf16.msra.mxu0 %v25791_v27  ;;  %19290 = vmatpush1.bf16.msra.mxu1 %v25794_v30  ;;  %v25883_v27 = vld [vmem:[%s27350_s14 + $0x3ba4] ss:$16 sps:$4 sm:$0xff]   ;;  %v25886_v30 = vld [vmem:[%s27350_s14 + $0x3bac] ss:$16 sps:$4 sm:$0xff]  }
 0x7d1   : > { %17610 = vmatprep.subr.bf16.mxu0 %v25799_v10  ;;  %19291 = vmatprep.subr.bf16.mxu1 %v25802_v31  ;;  %v25881_v10 = vld [vmem:[%s27350_s14 + $0x3ba0] ss:$16 sps:$4 sm:$0xff]   ;;  %v25884_v31 = vld [vmem:[%s27350_s14 + $0x3ba8] ss:$16 sps:$4 sm:$0xff]  }
 0x7d4   : > { %17611 = vmatpush1.bf16.msra.mxu0 %v25797_v17  ;;  %19292 = vmatpush1.bf16.msra.mxu1 %v25800_v13  ;;  %v25889_v17 = vld [vmem:[%s27350_s14 + $0x3bc4] ss:$16 sps:$4 sm:$0xff]   ;;  %v25892_v13 = vld [vmem:[%s27350_s14 + $0x3bcc] ss:$16 sps:$4 sm:$0xff]  }
 0x7d5   : > { %17621 = vmatprep.subr.bf16.mxu0 %v25805_v34  ;;  %19302 = vmatprep.subr.bf16.mxu1 %v25808_v16  ;;  %v29560_v34 = vld [vmem:[#allocation2 + $0x78] sm:$0xff]  ;;  %v25887_v16 = vld [vmem:[%s27350_s14 + $0x3bc0] ss:$16 sps:$4 sm:$0xff]  }
 0x7d7   : > { %17613 = vmatmul.mubr.bf16.vlgmr.msra.gmra.mrb[0].mxu0 %v833_v26  ;;  %19294 = vmatmul.mubr.bf16.vlgmr.msra.gmra.mrb[0].mxu1 %v833_v26  ;;  %v25895_v26 = vld [vmem:[%s27350_s14 + $0x3be4] ss:$16 sps:$4 sm:$0xff]  }
 0x7d8   : > { %17622 = vmatpush1.bf16.msra.mxu0 %v25803_v18  ;;  %19303 = vmatpush1.bf16.msra.mxu1 %v25806_v24  ;;  %v25898_v18 = vld [vmem:[%s27350_s14 + $0x3bec] ss:$16 sps:$4 sm:$0xff]   ;;  %v29568_v24 = vrot.slane %v29560_v34, %v27416_v49 }
 0x7d9   : > { %17623 = vmatprep.subr.bf16.mxu0 %v25811_v38  ;;  %19304 = vmatprep.subr.bf16.mxu1 %v25814_v21  ;;  %v25893_v38 = vld [vmem:[%s27350_s14 + $0x3be0] ss:$16 sps:$4 sm:$0xff]   ;;  %v25896_v21 = vld [vmem:[%s27350_s14 + $0x3be8] ss:$16 sps:$4 sm:$0xff]  }
 0x7da   : > { %17653 = vmatprep.mubr.bf16.mxu0 %v836_v41  ;;  %19334 = vmatprep.mubr.bf16.mxu1 %v836_v41  ;;  %v25902_v41 = vld [vmem:[%s27350_s14 + $0x3c04] ss:$16 sps:$4 sm:$0xff]  }
 0x7dc   : > { %17624 = vmatpush1.bf16.msra.mxu0 %v25809_v8  ;;  %19305 = vmatpush1.bf16.msra.mxu1 %v25812_v44  ;;  %v25905_v8 = vld [vmem:[%s27350_s14 + $0x3c0c] ss:$16 sps:$4 sm:$0xff]   ;;  %v619_v44 = vcombine.high %v29568_v24, %v29568_v24 }
 0x7dd   : > { %17625 = vmatprep.subr.bf16.mxu0 %v25817_v25  ;;  %19306 = vmatprep.subr.bf16.mxu1 %v25820_v23  ;;  %v835_v25 = vpack.c.bf16 %v29494_v33, %v29494_v33  ;;  %v25900_v23 = vld [vmem:[%s27350_s14 + $0x3c00] ss:$16 sps:$4 sm:$0xff]  }
 0x7de   : > { %v25906_v33 = vld [vmem:[%s27350_s14 + $0x3c20] ss:$16 sps:$4 sm:$0xff]  }
 0x7e0   : > { %17626 = vmatpush1.bf16.msra.mxu0 %v25815_v46  ;;  %19307 = vmatpush1.bf16.msra.mxu1 %v25818_v48  ;;  %v25903_v46 = vld [vmem:[%s27350_s14 + $0x3c08] ss:$16 sps:$4 sm:$0xff]   ;;  %v25908_v48 = vld [vmem:[%s27350_s14 + $0x3c24] ss:$16 sps:$4 sm:$0xff]  }
 0x7e1   : > { %17627 = vmatprep.subr.bf16.mxu0 %v25823_v29  ;;  %19308 = vmatprep.subr.bf16.mxu1 %v25826_v50  ;;  %v25911_v29 = vld [vmem:[%s27350_s14 + $0x3c2c] ss:$16 sps:$4 sm:$0xff]   ;;  %v838_v50 = vpack.c.bf16 %v619_v44, %v619_v44  ;;  %v25984_v44 = vld [vmem:[%s27350_s14 + $0x3dc0] ss:$16 sps:$4 sm:$0xff]  }
 0x7e4   : > { %17628 = vmatpush1.bf16.msra.mxu0 %v25821_v36  ;;  %19309 = vmatpush1.bf16.msra.mxu1 %v25824_v32  ;;  %v25909_v36 = vld [vmem:[%s27350_s14 + $0x3c28] ss:$16 sps:$4 sm:$0xff]   ;;  %v25914_v32 = vld [vmem:[%s27350_s14 + $0x3c44] ss:$16 sps:$4 sm:$0xff]  }
 0x7e5   : > { %17629 = vmatprep.subr.bf16.mxu0 %v25829_v35  ;;  %19310 = vmatprep.subr.bf16.mxu1 %v25832_v39  ;;  %v25917_v35 = vld [vmem:[%s27350_s14 + $0x3c4c] ss:$16 sps:$4 sm:$0xff]   ;;  %v25912_v39 = vld [vmem:[%s27350_s14 + $0x3c40] ss:$16 sps:$4 sm:$0xff]  }
 0x7e8   : > { %17630 = vmatpush1.bf16.msra.mxu0 %v25827_v54  ;;  %19311 = vmatpush1.bf16.msra.mxu1 %v25830_v37  ;;  %v25915_v54 = vld [vmem:[%s27350_s14 + $0x3c48] ss:$16 sps:$4 sm:$0xff]   ;;  %v25920_v37 = vld [vmem:[%s27350_s14 + $0x3c64] ss:$16 sps:$4 sm:$0xff]  }
 0x7e9   : > { %17631 = vmatprep.subr.bf16.mxu0 %v25835_v57  ;;  %19312 = vmatprep.subr.bf16.mxu1 %v25838_v40  ;;  %v25923_v57 = vld [vmem:[%s27350_s14 + $0x3c6c] ss:$16 sps:$4 sm:$0xff]   ;;  %v25918_v40 = vld [vmem:[%s27350_s14 + $0x3c60] ss:$16 sps:$4 sm:$0xff]  }
 0x7ec   : > { %17632 = vmatpush1.bf16.msra.mxu0 %v25833_v60  ;;  %19313 = vmatpush1.bf16.msra.mxu1 %v25836_v28  ;;  %v25921_v60 = vld [vmem:[%s27350_s14 + $0x3c68] ss:$16 sps:$4 sm:$0xff]   ;;  %v25926_v28 = vld [vmem:[%s27350_s14 + $0x3c84] ss:$16 sps:$4 sm:$0xff]  }
 0x7ed   : > { %17633 = vmatprep.subr.bf16.mxu0 %v25841_v61  ;;  %19314 = vmatprep.subr.bf16.mxu1 %v25844_v63  ;;  %v25929_v61 = vld [vmem:[%s27350_s14 + $0x3c8c] ss:$16 sps:$4 sm:$0xff]   ;;  %v25924_v63 = vld [vmem:[%s27350_s14 + $0x3c80] ss:$16 sps:$4 sm:$0xff]  }
 0x7f0   : > { %17634 = vmatpush1.bf16.msra.mxu0 %v25839_v45  ;;  %19315 = vmatpush1.bf16.msra.mxu1 %v25842_v0  ;;  %v25927_v45 = vld [vmem:[%s27350_s14 + $0x3c88] ss:$16 sps:$4 sm:$0xff]   ;;  %v25932_v0 = vld [vmem:[%s27350_s14 + $0x3ca4] ss:$16 sps:$4 sm:$0xff]  }
 0x7f1   : > { %17635 = vmatprep.subr.bf16.mxu0 %v25847_v52  ;;  %19316 = vmatprep.subr.bf16.mxu1 %v25850_v47  ;;  %v25935_v52 = vld [vmem:[%s27350_s14 + $0x3cac] ss:$16 sps:$4 sm:$0xff]   ;;  %v25930_v47 = vld [vmem:[%s27350_s14 + $0x3ca0] ss:$16 sps:$4 sm:$0xff]  }
 0x7f4   : > { %17636 = vmatpush1.bf16.msra.mxu0 %v25845_v51  ;;  %19317 = vmatpush1.bf16.msra.mxu1 %v25848_v55  ;;  %v25933_v51 = vld [vmem:[%s27350_s14 + $0x3ca8] ss:$16 sps:$4 sm:$0xff]   ;;  %v25938_v55 = vld [vmem:[%s27350_s14 + $0x3cc4] ss:$16 sps:$4 sm:$0xff]  }
 0x7f5   : > { %17637 = vmatprep.subr.bf16.mxu0 %v25853_v4  ;;  %19318 = vmatprep.subr.bf16.mxu1 %v25856_v53  ;;  %v25941_v4 = vld [vmem:[%s27350_s14 + $0x3ccc] ss:$16 sps:$4 sm:$0xff]   ;;  %v25936_v53 = vld [vmem:[%s27350_s14 + $0x3cc0] ss:$16 sps:$4 sm:$0xff]  }
 0x7f8   : > { %17638 = vmatpush1.bf16.msra.mxu0 %v25851_v7  ;;  %19319 = vmatpush1.bf16.msra.mxu1 %v25854_v56  ;;  %v25939_v7 = vld [vmem:[%s27350_s14 + $0x3cc8] ss:$16 sps:$4 sm:$0xff]   ;;  %v25944_v56 = vld [vmem:[%s27350_s14 + $0x3ce4] ss:$16 sps:$4 sm:$0xff]  }
 0x7f9   : > { %17639 = vmatprep.subr.bf16.mxu0 %v25859_v11  ;;  %19320 = vmatprep.subr.bf16.mxu1 %v25862_v42  ;;  %v25947_v11 = vld [vmem:[%s27350_s14 + $0x3cec] ss:$16 sps:$4 sm:$0xff]   ;;  %v25942_v42 = vld [vmem:[%s27350_s14 + $0x3ce0] ss:$16 sps:$4 sm:$0xff]  }
 0x7fc   : > { %17640 = vmatpush1.bf16.msra.mxu0 %v25857_v12  ;;  %19321 = vmatpush1.bf16.msra.mxu1 %v25860_v14  ;;  %v25945_v12 = vld [vmem:[%s27350_s14 + $0x3ce8] ss:$16 sps:$4 sm:$0xff]   ;;  %v25950_v14 = vld [vmem:[%s27350_s14 + $0x3d04] ss:$16 sps:$4 sm:$0xff]  }
 0x7fd   : > { %17641 = vmatprep.subr.bf16.mxu0 %v25865_v59  ;;  %19322 = vmatprep.subr.bf16.mxu1 %v25868_v15  ;;  %v25953_v59 = vld [vmem:[%s27350_s14 + $0x3d0c] ss:$16 sps:$4 sm:$0xff]   ;;  %v25948_v15 = vld [vmem:[%s27350_s14 + $0x3d00] ss:$16 sps:$4 sm:$0xff]  }
 0x800   : > { %17642 = vmatpush1.bf16.msra.mxu0 %v25863_v2  ;;  %19323 = vmatpush1.bf16.msra.mxu1 %v25866_v62  ;;  %v25951_v2 = vld [vmem:[%s27350_s14 + $0x3d08] ss:$16 sps:$4 sm:$0xff]   ;;  %v25956_v62 = vld [vmem:[%s27350_s14 + $0x3d24] ss:$16 sps:$4 sm:$0xff]  }
 0x801   : > { %17643 = vmatprep.subr.bf16.mxu0 %v25871_v1  ;;  %19324 = vmatprep.subr.bf16.mxu1 %v25874_v5  ;;  %v25959_v1 = vld [vmem:[%s27350_s14 + $0x3d2c] ss:$16 sps:$4 sm:$0xff]   ;;  %v25954_v5 = vld [vmem:[%s27350_s14 + $0x3d20] ss:$16 sps:$4 sm:$0xff]  }
 0x804   : > { %17644 = vmatpush1.bf16.msra.mxu0 %v25869_v19  ;;  %19325 = vmatpush1.bf16.msra.mxu1 %v25872_v3  ;;  %v25957_v19 = vld [vmem:[%s27350_s14 + $0x3d28] ss:$16 sps:$4 sm:$0xff]   ;;  %v25962_v3 = vld [vmem:[%s27350_s14 + $0x3d44] ss:$16 sps:$4 sm:$0xff]  }
 0x805   : > { %17645 = vmatprep.subr.bf16.mxu0 %v25877_v22  ;;  %19326 = vmatprep.subr.bf16.mxu1 %v25880_v6  ;;  %v25965_v22 = vld [vmem:[%s27350_s14 + $0x3d4c] ss:$16 sps:$4 sm:$0xff]   ;;  %v25960_v6 = vld [vmem:[%s27350_s14 + $0x3d40] ss:$16 sps:$4 sm:$0xff]  }
 0x808   : > { %17646 = vmatpush1.bf16.msra.mxu0 %v25875_v9  ;;  %19327 = vmatpush1.bf16.msra.mxu1 %v25878_v58  ;;  %v25963_v9 = vld [vmem:[%s27350_s14 + $0x3d48] ss:$16 sps:$4 sm:$0xff]   ;;  %v25968_v58 = vld [vmem:[%s27350_s14 + $0x3d64] ss:$16 sps:$4 sm:$0xff]  }
 0x809   : > { %17647 = vmatprep.subr.bf16.mxu0 %v25883_v27  ;;  %19328 = vmatprep.subr.bf16.mxu1 %v25886_v30  ;;  %v25971_v27 = vld [vmem:[%s27350_s14 + $0x3d6c] ss:$16 sps:$4 sm:$0xff]   ;;  %v25966_v30 = vld [vmem:[%s27350_s14 + $0x3d60] ss:$16 sps:$4 sm:$0xff]  }
 0x80c   : > { %17648 = vmatpush1.bf16.msra.mxu0 %v25881_v10  ;;  %19329 = vmatpush1.bf16.msra.mxu1 %v25884_v31  ;;  %v25969_v10 = vld [vmem:[%s27350_s14 + $0x3d68] ss:$16 sps:$4 sm:$0xff]   ;;  %v25974_v31 = vld [vmem:[%s27350_s14 + $0x3d84] ss:$16 sps:$4 sm:$0xff]  }
 0x80d   : > { %17649 = vmatprep.subr.bf16.mxu0 %v25889_v17  ;;  %19330 = vmatprep.subr.bf16.mxu1 %v25892_v13  ;;  %v25977_v17 = vld [vmem:[%s27350_s14 + $0x3d8c] ss:$16 sps:$4 sm:$0xff]   ;;  %v25972_v13 = vld [vmem:[%s27350_s14 + $0x3d80] ss:$16 sps:$4 sm:$0xff]  }
 0x810   : > { %17650 = vmatpush1.bf16.msra.mxu0 %v25887_v16  ;;  %19331 = vmatpush1.bf16.msra.mxu1 %v25890_v20  ;;  %v25975_v16 = vld [vmem:[%s27350_s14 + $0x3d88] ss:$16 sps:$4 sm:$0xff]   ;;  %v25980_v20 = vld [vmem:[%s27350_s14 + $0x3da4] ss:$16 sps:$4 sm:$0xff]  }
 0x811   : > { %17651 = vmatprep.subr.bf16.mxu0 %v25895_v26  ;;  %19332 = vmatprep.subr.bf16.mxu1 %v25898_v18  ;;  %v25983_v26 = vld [vmem:[%s27350_s14 + $0x3dac] ss:$16 sps:$4 sm:$0xff]   ;;  %v25978_v18 = vld [vmem:[%s27350_s14 + $0x3da0] ss:$16 sps:$4 sm:$0xff]  }
 0x814   : > { %17652 = vmatpush1.bf16.msra.mxu0 %v25893_v38  ;;  %19333 = vmatpush1.bf16.msra.mxu1 %v25896_v21  ;;  %v25981_v38 = vld [vmem:[%s27350_s14 + $0x3da8] ss:$16 sps:$4 sm:$0xff]   ;;  %v25986_v21 = vld [vmem:[%s27350_s14 + $0x3dc4] ss:$16 sps:$4 sm:$0xff]  }
 0x815   : > { %17662 = vmatprep.subr.bf16.mxu0 %v25902_v41  ;;  %19343 = vmatprep.subr.bf16.mxu1 %v25905_v8  ;;  %v25989_v41 = vld [vmem:[%s27350_s14 + $0x3dcc] ss:$16 sps:$4 sm:$0xff]   ;;  %v604_v8 = vcombine.high %v29560_v34, %v29560_v34  ;;  %v25990_v34 = vld [vmem:[%s27350_s14 + $0x3de0] ss:$16 sps:$4 sm:$0xff]  }
 0x817   : > { %17654 = vmatmul.mubr.bf16.vlgmr.msra.gmra.mrb[0].mxu0 %v835_v25  ;;  %19335 = vmatmul.mubr.bf16.vlgmr.msra.gmra.mrb[0].mxu1 %v835_v25  ;;  %v25987_v25 = vld [vmem:[%s27350_s14 + $0x3dc8] ss:$16 sps:$4 sm:$0xff]  }
 0x818   : > { %17663 = vmatpush1.bf16.msra.mxu0 %v25900_v23  ;;  %19344 = vmatpush1.bf16.msra.mxu1 %v25903_v46  ;;  %v25992_v23 = vld [vmem:[%s27350_s14 + $0x3de4] ss:$16 sps:$4 sm:$0xff]   ;;  %v25995_v46 = vld [vmem:[%s27350_s14 + $0x3dec] ss:$16 sps:$4 sm:$0xff]  }
 0x819   : > { %17664 = vmatprep.subr.bf16.mxu0 %v25908_v48  ;;  %19345 = vmatprep.subr.bf16.mxu1 %v25911_v29  ;;  %v29641_v48 = vrot.slane %v604_v8, %v27416_v49  ;;  %v25993_v29 = vld [vmem:[%s27350_s14 + $0x3de8] ss:$16 sps:$4 sm:$0xff]  }
 0x81a   : > { %17694 = vmatprep.mubr.bf16.mxu0 %v838_v50  ;;  %19375 = vmatprep.mubr.bf16.mxu1 %v838_v50  ;;  %v25998_v50 = vld [vmem:[%s27350_s14 + $0x3e04] ss:$16 sps:$4 sm:$0xff]   ;;  %v26071_v8 = vld [vmem:[%s27350_s14 + $0x3f88] ss:$16 sps:$4 sm:$0xff]  }
 0x81c   : > { %17665 = vmatpush1.bf16.msra.mxu0 %v25906_v33  ;;  %19346 = vmatpush1.bf16.msra.mxu1 %v25909_v36  ;;  %v26001_v33 = vld [vmem:[%s27350_s14 + $0x3e0c] ss:$16 sps:$4 sm:$0xff]   ;;  %v620_v36 = vcombine.high %v29641_v48, %v29641_v48 }
 0x81d   : > { %17666 = vmatprep.subr.bf16.mxu0 %v25914_v32  ;;  %19347 = vmatprep.subr.bf16.mxu1 %v25917_v35  ;;  %v837_v32 = vpack.c.bf16 %v29568_v24, %v29568_v24  ;;  %v25996_v35 = vld [vmem:[%s27350_s14 + $0x3e00] ss:$16 sps:$4 sm:$0xff]  }
 0x81e   : > { %v26002_v24 = vld [vmem:[%s27350_s14 + $0x3e20] ss:$16 sps:$4 sm:$0xff]  }
 0x820   : > { %17667 = vmatpush1.bf16.msra.mxu0 %v25912_v39  ;;  %19348 = vmatpush1.bf16.msra.mxu1 %v25915_v54  ;;  %v25999_v39 = vld [vmem:[%s27350_s14 + $0x3e08] ss:$16 sps:$4 sm:$0xff]   ;;  %v26004_v54 = vld [vmem:[%s27350_s14 + $0x3e24] ss:$16 sps:$4 sm:$0xff]  }
 0x821   : > { %17668 = vmatprep.subr.bf16.mxu0 %v25920_v37  ;;  %19349 = vmatprep.subr.bf16.mxu1 %v25923_v57  ;;  %v26007_v37 = vld [vmem:[%s27350_s14 + $0x3e2c] ss:$16 sps:$4 sm:$0xff]   ;;  %v840_v57 = vpack.c.bf16 %v620_v36, %v620_v36  ;;  %v26083_v36 = vld [vmem:[%s27350_s14 + $0x3fc8] ss:$16 sps:$4 sm:$0xff]  }
 0x824   : > { %17669 = vmatpush1.bf16.msra.mxu0 %v25918_v40  ;;  %19350 = vmatpush1.bf16.msra.mxu1 %v25921_v60  ;;  %v26005_v40 = vld [vmem:[%s27350_s14 + $0x3e28] ss:$16 sps:$4 sm:$0xff]   ;;  %v26010_v60 = vld [vmem:[%s27350_s14 + $0x3e44] ss:$16 sps:$4 sm:$0xff]  }
 0x825   : > { %17670 = vmatprep.subr.bf16.mxu0 %v25926_v28  ;;  %19351 = vmatprep.subr.bf16.mxu1 %v25929_v61  ;;  %v26013_v28 = vld [vmem:[%s27350_s14 + $0x3e4c] ss:$16 sps:$4 sm:$0xff]   ;;  %v26008_v61 = vld [vmem:[%s27350_s14 + $0x3e40] ss:$16 sps:$4 sm:$0xff]  }
 0x828   : > { %17671 = vmatpush1.bf16.msra.mxu0 %v25924_v63  ;;  %19352 = vmatpush1.bf16.msra.mxu1 %v25927_v45  ;;  %v26011_v63 = vld [vmem:[%s27350_s14 + $0x3e48] ss:$16 sps:$4 sm:$0xff]   ;;  %v26016_v45 = vld [vmem:[%s27350_s14 + $0x3e64] ss:$16 sps:$4 sm:$0xff]  }
 0x829   : > { %17672 = vmatprep.subr.bf16.mxu0 %v25932_v0  ;;  %19353 = vmatprep.subr.bf16.mxu1 %v25935_v52  ;;  %v26019_v0 = vld [vmem:[%s27350_s14 + $0x3e6c] ss:$16 sps:$4 sm:$0xff]   ;;  %v26014_v52 = vld [vmem:[%s27350_s14 + $0x3e60] ss:$16 sps:$4 sm:$0xff]  }
 0x82c   : > { %17673 = vmatpush1.bf16.msra.mxu0 %v25930_v47  ;;  %19354 = vmatpush1.bf16.msra.mxu1 %v25933_v51  ;;  %v26017_v47 = vld [vmem:[%s27350_s14 + $0x3e68] ss:$16 sps:$4 sm:$0xff]   ;;  %v26022_v51 = vld [vmem:[%s27350_s14 + $0x3e84] ss:$16 sps:$4 sm:$0xff]  }
 0x82d   : > { %17674 = vmatprep.subr.bf16.mxu0 %v25938_v55  ;;  %19355 = vmatprep.subr.bf16.mxu1 %v25941_v4  ;;  %v26025_v55 = vld [vmem:[%s27350_s14 + $0x3e8c] ss:$16 sps:$4 sm:$0xff]   ;;  %v26020_v4 = vld [vmem:[%s27350_s14 + $0x3e80] ss:$16 sps:$4 sm:$0xff]  }
 0x830   : > { %17675 = vmatpush1.bf16.msra.mxu0 %v25936_v53  ;;  %19356 = vmatpush1.bf16.msra.mxu1 %v25939_v7  ;;  %v26023_v53 = vld [vmem:[%s27350_s14 + $0x3e88] ss:$16 sps:$4 sm:$0xff]   ;;  %v26028_v7 = vld [vmem:[%s27350_s14 + $0x3ea4] ss:$16 sps:$4 sm:$0xff]  }
 0x831   : > { %17676 = vmatprep.subr.bf16.mxu0 %v25944_v56  ;;  %19357 = vmatprep.subr.bf16.mxu1 %v25947_v11  ;;  %v26031_v56 = vld [vmem:[%s27350_s14 + $0x3eac] ss:$16 sps:$4 sm:$0xff]   ;;  %v26026_v11 = vld [vmem:[%s27350_s14 + $0x3ea0] ss:$16 sps:$4 sm:$0xff]  }
 0x834   : > { %17677 = vmatpush1.bf16.msra.mxu0 %v25942_v42  ;;  %19358 = vmatpush1.bf16.msra.mxu1 %v25945_v12  ;;  %v26029_v42 = vld [vmem:[%s27350_s14 + $0x3ea8] ss:$16 sps:$4 sm:$0xff]   ;;  %v26034_v12 = vld [vmem:[%s27350_s14 + $0x3ec4] ss:$16 sps:$4 sm:$0xff]  }
 0x835   : > { %17678 = vmatprep.subr.bf16.mxu0 %v25950_v14  ;;  %19359 = vmatprep.subr.bf16.mxu1 %v25953_v59  ;;  %v26037_v14 = vld [vmem:[%s27350_s14 + $0x3ecc] ss:$16 sps:$4 sm:$0xff]   ;;  %v26032_v59 = vld [vmem:[%s27350_s14 + $0x3ec0] ss:$16 sps:$4 sm:$0xff]  }
 0x838   : > { %17679 = vmatpush1.bf16.msra.mxu0 %v25948_v15  ;;  %19360 = vmatpush1.bf16.msra.mxu1 %v25951_v2  ;;  %v26035_v15 = vld [vmem:[%s27350_s14 + $0x3ec8] ss:$16 sps:$4 sm:$0xff]   ;;  %v26040_v2 = vld [vmem:[%s27350_s14 + $0x3ee4] ss:$16 sps:$4 sm:$0xff]  }
 0x839   : > { %17680 = vmatprep.subr.bf16.mxu0 %v25956_v62  ;;  %19361 = vmatprep.subr.bf16.mxu1 %v25959_v1  ;;  %v26043_v62 = vld [vmem:[%s27350_s14 + $0x3eec] ss:$16 sps:$4 sm:$0xff]   ;;  %v26038_v1 = vld [vmem:[%s27350_s14 + $0x3ee0] ss:$16 sps:$4 sm:$0xff]  }
 0x83c   : > { %17681 = vmatpush1.bf16.msra.mxu0 %v25954_v5  ;;  %19362 = vmatpush1.bf16.msra.mxu1 %v25957_v19  ;;  %v26041_v5 = vld [vmem:[%s27350_s14 + $0x3ee8] ss:$16 sps:$4 sm:$0xff]   ;;  %v26046_v19 = vld [vmem:[%s27350_s14 + $0x3f04] ss:$16 sps:$4 sm:$0xff]  }
 0x83d   : > { %17682 = vmatprep.subr.bf16.mxu0 %v25962_v3  ;;  %19363 = vmatprep.subr.bf16.mxu1 %v25965_v22  ;;  %v26049_v3 = vld [vmem:[%s27350_s14 + $0x3f0c] ss:$16 sps:$4 sm:$0xff]   ;;  %v26044_v22 = vld [vmem:[%s27350_s14 + $0x3f00] ss:$16 sps:$4 sm:$0xff]  }
 0x840   : > { %17683 = vmatpush1.bf16.msra.mxu0 %v25960_v6  ;;  %19364 = vmatpush1.bf16.msra.mxu1 %v25963_v9  ;;  %v26047_v6 = vld [vmem:[%s27350_s14 + $0x3f08] ss:$16 sps:$4 sm:$0xff]   ;;  %v26052_v9 = vld [vmem:[%s27350_s14 + $0x3f24] ss:$16 sps:$4 sm:$0xff]  }
 0x841   : > { %17684 = vmatprep.subr.bf16.mxu0 %v25968_v58  ;;  %19365 = vmatprep.subr.bf16.mxu1 %v25971_v27  ;;  %v26055_v58 = vld [vmem:[%s27350_s14 + $0x3f2c] ss:$16 sps:$4 sm:$0xff]   ;;  %v26050_v27 = vld [vmem:[%s27350_s14 + $0x3f20] ss:$16 sps:$4 sm:$0xff]  }
 0x844   : > { %17685 = vmatpush1.bf16.msra.mxu0 %v25966_v30  ;;  %19366 = vmatpush1.bf16.msra.mxu1 %v25969_v10  ;;  %v26053_v30 = vld [vmem:[%s27350_s14 + $0x3f28] ss:$16 sps:$4 sm:$0xff]   ;;  %v26058_v10 = vld [vmem:[%s27350_s14 + $0x3f44] ss:$16 sps:$4 sm:$0xff]  }
 0x845   : > { %17686 = vmatprep.subr.bf16.mxu0 %v25974_v31  ;;  %19367 = vmatprep.subr.bf16.mxu1 %v25977_v17  ;;  %v26061_v31 = vld [vmem:[%s27350_s14 + $0x3f4c] ss:$16 sps:$4 sm:$0xff]   ;;  %v26056_v17 = vld [vmem:[%s27350_s14 + $0x3f40] ss:$16 sps:$4 sm:$0xff]  }
 0x848   : > { %17687 = vmatpush1.bf16.msra.mxu0 %v25972_v13  ;;  %19368 = vmatpush1.bf16.msra.mxu1 %v25975_v16  ;;  %v26059_v13 = vld [vmem:[%s27350_s14 + $0x3f48] ss:$16 sps:$4 sm:$0xff]   ;;  %v26064_v16 = vld [vmem:[%s27350_s14 + $0x3f64] ss:$16 sps:$4 sm:$0xff]  }
 0x849   : > { %17688 = vmatprep.subr.bf16.mxu0 %v25980_v20  ;;  %19369 = vmatprep.subr.bf16.mxu1 %v25983_v26  ;;  %v26067_v20 = vld [vmem:[%s27350_s14 + $0x3f6c] ss:$16 sps:$4 sm:$0xff]   ;;  %v26062_v26 = vld [vmem:[%s27350_s14 + $0x3f60] ss:$16 sps:$4 sm:$0xff]  }
 0x84c   : > { %17689 = vmatpush1.bf16.msra.mxu0 %v25978_v18  ;;  %19370 = vmatpush1.bf16.msra.mxu1 %v25981_v38  ;;  %v26065_v18 = vld [vmem:[%s27350_s14 + $0x3f68] ss:$16 sps:$4 sm:$0xff]   ;;  %v26070_v38 = vld [vmem:[%s27350_s14 + $0x3f84] ss:$16 sps:$4 sm:$0xff]  }
 0x84d   : > { %17690 = vmatprep.subr.bf16.mxu0 %v25986_v21  ;;  %19371 = vmatprep.subr.bf16.mxu1 %v25989_v41  ;;  %v26073_v21 = vld [vmem:[%s27350_s14 + $0x3f8c] ss:$16 sps:$4 sm:$0xff]   ;;  %v26068_v41 = vld [vmem:[%s27350_s14 + $0x3f80] ss:$16 sps:$4 sm:$0xff]  }
 0x850   : > { %17691 = vmatpush1.bf16.msra.mxu0 %v25984_v44  ;;  %19372 = vmatpush1.bf16.msra.mxu1 %v25987_v25  ;;  %v26076_v44 = vld [vmem:[%s27350_s14 + $0x3fa4] ss:$16 sps:$4 sm:$0xff]   ;;  %v26079_v25 = vld [vmem:[%s27350_s14 + $0x3fac] ss:$16 sps:$4 sm:$0xff]  }
 0x851   : > { %17692 = vmatprep.subr.bf16.mxu0 %v25992_v23  ;;  %19373 = vmatprep.subr.bf16.mxu1 %v25995_v46  ;;  %v26074_v23 = vld [vmem:[%s27350_s14 + $0x3fa0] ss:$16 sps:$4 sm:$0xff]   ;;  %v26077_v46 = vld [vmem:[%s27350_s14 + $0x3fa8] ss:$16 sps:$4 sm:$0xff]  }
 0x854   : > { %17693 = vmatpush1.bf16.msra.mxu0 %v25990_v34  ;;  %19374 = vmatpush1.bf16.msra.mxu1 %v25993_v29  ;;  %v26082_v34 = vld [vmem:[%s27350_s14 + $0x3fc4] ss:$16 sps:$4 sm:$0xff]   ;;  %v26085_v29 = vld [vmem:[%s27350_s14 + $0x3fcc] ss:$16 sps:$4 sm:$0xff]  }
 0x855   : > { %17703 = vmatprep.subr.bf16.mxu0 %v25998_v50  ;;  %19384 = vmatprep.subr.bf16.mxu1 %v26001_v33  ;;  %v29707_v50 = vld [vmem:[#allocation2 + $0x80] sm:$0xff] }
 0x856   : > { %v26080_v33 = vld [vmem:[%s27350_s14 + $0x3fc0] ss:$16 sps:$4 sm:$0xff]  }
 0x857   : > { %17695 = vmatmul.mubr.bf16.vlgmr.msra.gmra.mrb[0].mxu0 %v837_v32  ;;  %19376 = vmatmul.mubr.bf16.vlgmr.msra.gmra.mrb[0].mxu1 %v837_v32  ;;  %v26088_v32 = vld [vmem:[%s27350_s14 + $0x3fe4] ss:$16 sps:$4 sm:$0xff]  }
 0x858   : > { %17704 = vmatpush1.bf16.msra.mxu0 %v25996_v35  ;;  %19385 = vmatpush1.bf16.msra.mxu1 %v25999_v39  ;;  %v26091_v35 = vld [vmem:[%s27350_s14 + $0x3fec] ss:$16 sps:$4 sm:$0xff]   ;;  %v29715_v39 = vrot.slane %v29707_v50, %v27416_v49 }
 0x859   : > { %17705 = vmatprep.subr.bf16.mxu0 %v26004_v54  ;;  %19386 = vmatprep.subr.bf16.mxu1 %v26007_v37  ;;  %v26086_v54 = vld [vmem:[%s27350_s14 + $0x3fe0] ss:$16 sps:$4 sm:$0xff]   ;;  %v26089_v37 = vld [vmem:[%s27350_s14 + $0x3fe8] ss:$16 sps:$4 sm:$0xff]  }
 0x85a   : > { %17735 = vmatprep.mubr.bf16.mxu0 %v840_v57  ;;  %19416 = vmatprep.mubr.bf16.mxu1 %v840_v57  ;;  %v26095_v57 = vld [vmem:[%s27350_s14 + $0x4004] ss:$16 sps:$4 sm:$0xff]  }
 0x85c   : > { %17706 = vmatpush1.bf16.msra.mxu0 %v26002_v24  ;;  %19387 = vmatpush1.bf16.msra.mxu1 %v26005_v40  ;;  %v26098_v24 = vld [vmem:[%s27350_s14 + $0x400c] ss:$16 sps:$4 sm:$0xff]   ;;  %v636_v40 = vcombine.high %v29715_v39, %v29715_v39 }
 0x85d   : > { %17707 = vmatprep.subr.bf16.mxu0 %v26010_v60  ;;  %19388 = vmatprep.subr.bf16.mxu1 %v26013_v28  ;;  %v839_v60 = vpack.c.bf16 %v29641_v48, %v29641_v48  ;;  %v26093_v28 = vld [vmem:[%s27350_s14 + $0x4000] ss:$16 sps:$4 sm:$0xff]  }
 0x85e   : > { %v26099_v48 = vld [vmem:[%s27350_s14 + $0x4020] ss:$16 sps:$4 sm:$0xff]  }
 0x860   : > { %17708 = vmatpush1.bf16.msra.mxu0 %v26008_v61  ;;  %19389 = vmatpush1.bf16.msra.mxu1 %v26011_v63  ;;  %v26096_v61 = vld [vmem:[%s27350_s14 + $0x4008] ss:$16 sps:$4 sm:$0xff]   ;;  %v26101_v63 = vld [vmem:[%s27350_s14 + $0x4024] ss:$16 sps:$4 sm:$0xff]  }
 0x861   : > { %17709 = vmatprep.subr.bf16.mxu0 %v26016_v45  ;;  %19390 = vmatprep.subr.bf16.mxu1 %v26019_v0  ;;  %v26104_v45 = vld [vmem:[%s27350_s14 + $0x402c] ss:$16 sps:$4 sm:$0xff]   ;;  %v842_v0 = vpack.c.bf16 %v636_v40, %v636_v40  ;;  %v26177_v40 = vld [vmem:[%s27350_s14 + $0x41c0] ss:$16 sps:$4 sm:$0xff]  }
 0x864   : > { %17710 = vmatpush1.bf16.msra.mxu0 %v26014_v52  ;;  %19391 = vmatpush1.bf16.msra.mxu1 %v26017_v47  ;;  %v26102_v52 = vld [vmem:[%s27350_s14 + $0x4028] ss:$16 sps:$4 sm:$0xff]   ;;  %v26107_v47 = vld [vmem:[%s27350_s14 + $0x4044] ss:$16 sps:$4 sm:$0xff]  }
 0x865   : > { %17711 = vmatprep.subr.bf16.mxu0 %v26022_v51  ;;  %19392 = vmatprep.subr.bf16.mxu1 %v26025_v55  ;;  %v26110_v51 = vld [vmem:[%s27350_s14 + $0x404c] ss:$16 sps:$4 sm:$0xff]   ;;  %v26105_v55 = vld [vmem:[%s27350_s14 + $0x4040] ss:$16 sps:$4 sm:$0xff]  }
 0x868   : > { %17712 = vmatpush1.bf16.msra.mxu0 %v26020_v4  ;;  %19393 = vmatpush1.bf16.msra.mxu1 %v26023_v53  ;;  %v26108_v4 = vld [vmem:[%s27350_s14 + $0x4048] ss:$16 sps:$4 sm:$0xff]   ;;  %v26113_v53 = vld [vmem:[%s27350_s14 + $0x4064] ss:$16 sps:$4 sm:$0xff]  }
 0x869   : > { %17713 = vmatprep.subr.bf16.mxu0 %v26028_v7  ;;  %19394 = vmatprep.subr.bf16.mxu1 %v26031_v56  ;;  %v26116_v7 = vld [vmem:[%s27350_s14 + $0x406c] ss:$16 sps:$4 sm:$0xff]   ;;  %v26111_v56 = vld [vmem:[%s27350_s14 + $0x4060] ss:$16 sps:$4 sm:$0xff]  }
 0x86c   : > { %17714 = vmatpush1.bf16.msra.mxu0 %v26026_v11  ;;  %19395 = vmatpush1.bf16.msra.mxu1 %v26029_v42  ;;  %v26114_v11 = vld [vmem:[%s27350_s14 + $0x4068] ss:$16 sps:$4 sm:$0xff]   ;;  %v26119_v42 = vld [vmem:[%s27350_s14 + $0x4084] ss:$16 sps:$4 sm:$0xff]  }
 0x86d   : > { %17715 = vmatprep.subr.bf16.mxu0 %v26034_v12  ;;  %19396 = vmatprep.subr.bf16.mxu1 %v26037_v14  ;;  %v26122_v12 = vld [vmem:[%s27350_s14 + $0x408c] ss:$16 sps:$4 sm:$0xff]   ;;  %v26117_v14 = vld [vmem:[%s27350_s14 + $0x4080] ss:$16 sps:$4 sm:$0xff]  }
 0x870   : > { %17716 = vmatpush1.bf16.msra.mxu0 %v26032_v59  ;;  %19397 = vmatpush1.bf16.msra.mxu1 %v26035_v15  ;;  %v26120_v59 = vld [vmem:[%s27350_s14 + $0x4088] ss:$16 sps:$4 sm:$0xff]   ;;  %v26125_v15 = vld [vmem:[%s27350_s14 + $0x40a4] ss:$16 sps:$4 sm:$0xff]  }
 0x871   : > { %17717 = vmatprep.subr.bf16.mxu0 %v26040_v2  ;;  %19398 = vmatprep.subr.bf16.mxu1 %v26043_v62  ;;  %v26128_v2 = vld [vmem:[%s27350_s14 + $0x40ac] ss:$16 sps:$4 sm:$0xff]   ;;  %v26123_v62 = vld [vmem:[%s27350_s14 + $0x40a0] ss:$16 sps:$4 sm:$0xff]  }
 0x874   : > { %17718 = vmatpush1.bf16.msra.mxu0 %v26038_v1  ;;  %19399 = vmatpush1.bf16.msra.mxu1 %v26041_v5  ;;  %v26126_v1 = vld [vmem:[%s27350_s14 + $0x40a8] ss:$16 sps:$4 sm:$0xff]   ;;  %v26131_v5 = vld [vmem:[%s27350_s14 + $0x40c4] ss:$16 sps:$4 sm:$0xff]  }
 0x875   : > { %17719 = vmatprep.subr.bf16.mxu0 %v26046_v19  ;;  %19400 = vmatprep.subr.bf16.mxu1 %v26049_v3  ;;  %v26134_v19 = vld [vmem:[%s27350_s14 + $0x40cc] ss:$16 sps:$4 sm:$0xff]   ;;  %v26129_v3 = vld [vmem:[%s27350_s14 + $0x40c0] ss:$16 sps:$4 sm:$0xff]  }
 0x878   : > { %17720 = vmatpush1.bf16.msra.mxu0 %v26044_v22  ;;  %19401 = vmatpush1.bf16.msra.mxu1 %v26047_v6  ;;  %v26132_v22 = vld [vmem:[%s27350_s14 + $0x40c8] ss:$16 sps:$4 sm:$0xff]   ;;  %v26137_v6 = vld [vmem:[%s27350_s14 + $0x40e4] ss:$16 sps:$4 sm:$0xff]  }
 0x879   : > { %17721 = vmatprep.subr.bf16.mxu0 %v26052_v9  ;;  %19402 = vmatprep.subr.bf16.mxu1 %v26055_v58  ;;  %v26140_v9 = vld [vmem:[%s27350_s14 + $0x40ec] ss:$16 sps:$4 sm:$0xff]   ;;  %v26135_v58 = vld [vmem:[%s27350_s14 + $0x40e0] ss:$16 sps:$4 sm:$0xff]  }
 0x87c   : > { %17722 = vmatpush1.bf16.msra.mxu0 %v26050_v27  ;;  %19403 = vmatpush1.bf16.msra.mxu1 %v26053_v30  ;;  %v26138_v27 = vld [vmem:[%s27350_s14 + $0x40e8] ss:$16 sps:$4 sm:$0xff]   ;;  %v26143_v30 = vld [vmem:[%s27350_s14 + $0x4104] ss:$16 sps:$4 sm:$0xff]  }
 0x87d   : > { %17723 = vmatprep.subr.bf16.mxu0 %v26058_v10  ;;  %19404 = vmatprep.subr.bf16.mxu1 %v26061_v31  ;;  %v26146_v10 = vld [vmem:[%s27350_s14 + $0x410c] ss:$16 sps:$4 sm:$0xff]   ;;  %v26141_v31 = vld [vmem:[%s27350_s14 + $0x4100] ss:$16 sps:$4 sm:$0xff]  }
 0x880   : > { %17724 = vmatpush1.bf16.msra.mxu0 %v26056_v17  ;;  %19405 = vmatpush1.bf16.msra.mxu1 %v26059_v13  ;;  %v26144_v17 = vld [vmem:[%s27350_s14 + $0x4108] ss:$16 sps:$4 sm:$0xff]   ;;  %v26149_v13 = vld [vmem:[%s27350_s14 + $0x4124] ss:$16 sps:$4 sm:$0xff]  }
 0x881   : > { %17725 = vmatprep.subr.bf16.mxu0 %v26064_v16  ;;  %19406 = vmatprep.subr.bf16.mxu1 %v26067_v20  ;;  %v26152_v16 = vld [vmem:[%s27350_s14 + $0x412c] ss:$16 sps:$4 sm:$0xff]   ;;  %v26147_v20 = vld [vmem:[%s27350_s14 + $0x4120] ss:$16 sps:$4 sm:$0xff]  }
 0x884   : > { %17726 = vmatpush1.bf16.msra.mxu0 %v26062_v26  ;;  %19407 = vmatpush1.bf16.msra.mxu1 %v26065_v18  ;;  %v26150_v26 = vld [vmem:[%s27350_s14 + $0x4128] ss:$16 sps:$4 sm:$0xff]   ;;  %v26155_v18 = vld [vmem:[%s27350_s14 + $0x4144] ss:$16 sps:$4 sm:$0xff]  }
 0x885   : > { %17727 = vmatprep.subr.bf16.mxu0 %v26070_v38  ;;  %19408 = vmatprep.subr.bf16.mxu1 %v26073_v21  ;;  %v26158_v38 = vld [vmem:[%s27350_s14 + $0x414c] ss:$16 sps:$4 sm:$0xff]   ;;  %v26153_v21 = vld [vmem:[%s27350_s14 + $0x4140] ss:$16 sps:$4 sm:$0xff]  }
 0x888   : > { %17728 = vmatpush1.bf16.msra.mxu0 %v26068_v41  ;;  %19409 = vmatpush1.bf16.msra.mxu1 %v26071_v8  ;;  %v26156_v41 = vld [vmem:[%s27350_s14 + $0x4148] ss:$16 sps:$4 sm:$0xff]   ;;  %v26161_v8 = vld [vmem:[%s27350_s14 + $0x4164] ss:$16 sps:$4 sm:$0xff]  }
 0x889   : > { %17729 = vmatprep.subr.bf16.mxu0 %v26076_v44  ;;  %19410 = vmatprep.subr.bf16.mxu1 %v26079_v25  ;;  %v26164_v44 = vld [vmem:[%s27350_s14 + $0x416c] ss:$16 sps:$4 sm:$0xff]   ;;  %v26159_v25 = vld [vmem:[%s27350_s14 + $0x4160] ss:$16 sps:$4 sm:$0xff]  }
 0x88c   : > { %17730 = vmatpush1.bf16.msra.mxu0 %v26074_v23  ;;  %19411 = vmatpush1.bf16.msra.mxu1 %v26077_v46  ;;  %v26162_v23 = vld [vmem:[%s27350_s14 + $0x4168] ss:$16 sps:$4 sm:$0xff]   ;;  %v26167_v46 = vld [vmem:[%s27350_s14 + $0x4184] ss:$16 sps:$4 sm:$0xff]  }
 0x88d   : > { %17731 = vmatprep.subr.bf16.mxu0 %v26082_v34  ;;  %19412 = vmatprep.subr.bf16.mxu1 %v26085_v29  ;;  %v26170_v34 = vld [vmem:[%s27350_s14 + $0x418c] ss:$16 sps:$4 sm:$0xff]   ;;  %v26165_v29 = vld [vmem:[%s27350_s14 + $0x4180] ss:$16 sps:$4 sm:$0xff]  }
 0x890   : > { %17732 = vmatpush1.bf16.msra.mxu0 %v26080_v33  ;;  %19413 = vmatpush1.bf16.msra.mxu1 %v26083_v36  ;;  %v26168_v33 = vld [vmem:[%s27350_s14 + $0x4188] ss:$16 sps:$4 sm:$0xff]   ;;  %v26173_v36 = vld [vmem:[%s27350_s14 + $0x41a4] ss:$16 sps:$4 sm:$0xff]  }
 0x891   : > { %17733 = vmatprep.subr.bf16.mxu0 %v26088_v32  ;;  %19414 = vmatprep.subr.bf16.mxu1 %v26091_v35  ;;  %v26176_v32 = vld [vmem:[%s27350_s14 + $0x41ac] ss:$16 sps:$4 sm:$0xff]   ;;  %v26171_v35 = vld [vmem:[%s27350_s14 + $0x41a0] ss:$16 sps:$4 sm:$0xff]  }
 0x894   : > { %17734 = vmatpush1.bf16.msra.mxu0 %v26086_v54  ;;  %19415 = vmatpush1.bf16.msra.mxu1 %v26089_v37  ;;  %v26174_v54 = vld [vmem:[%s27350_s14 + $0x41a8] ss:$16 sps:$4 sm:$0xff]   ;;  %v26179_v37 = vld [vmem:[%s27350_s14 + $0x41c4] ss:$16 sps:$4 sm:$0xff]  }
 0x895   : > { %17744 = vmatprep.subr.bf16.mxu0 %v26095_v57  ;;  %19425 = vmatprep.subr.bf16.mxu1 %v26098_v24  ;;  %v26182_v57 = vld [vmem:[%s27350_s14 + $0x41cc] ss:$16 sps:$4 sm:$0xff]   ;;  %v621_v24 = vcombine.high %v29707_v50, %v29707_v50  ;;  %v26183_v50 = vld [vmem:[%s27350_s14 + $0x41e0] ss:$16 sps:$4 sm:$0xff]  }
 0x897   : > { %17736 = vmatmul.mubr.bf16.vlgmr.msra.gmra.mrb[0].mxu0 %v839_v60  ;;  %19417 = vmatmul.mubr.bf16.vlgmr.msra.gmra.mrb[0].mxu1 %v839_v60  ;;  %v26180_v60 = vld [vmem:[%s27350_s14 + $0x41c8] ss:$16 sps:$4 sm:$0xff]  }
 0x898   : > { %17745 = vmatpush1.bf16.msra.mxu0 %v26093_v28  ;;  %19426 = vmatpush1.bf16.msra.mxu1 %v26096_v61  ;;  %v26185_v28 = vld [vmem:[%s27350_s14 + $0x41e4] ss:$16 sps:$4 sm:$0xff]   ;;  %v26188_v61 = vld [vmem:[%s27350_s14 + $0x41ec] ss:$16 sps:$4 sm:$0xff]  }
 0x899   : > { %17746 = vmatprep.subr.bf16.mxu0 %v26101_v63  ;;  %19427 = vmatprep.subr.bf16.mxu1 %v26104_v45  ;;  %v29788_v63 = vrot.slane %v621_v24, %v27416_v49  ;;  %v26186_v45 = vld [vmem:[%s27350_s14 + $0x41e8] ss:$16 sps:$4 sm:$0xff]  }
 0x89a   : > { %17776 = vmatprep.mubr.bf16.mxu0 %v842_v0  ;;  %19457 = vmatprep.mubr.bf16.mxu1 %v842_v0  ;;  %v26191_v0 = vld [vmem:[%s27350_s14 + $0x4204] ss:$16 sps:$4 sm:$0xff]   ;;  %v26264_v24 = vld [vmem:[%s27350_s14 + $0x4388] ss:$16 sps:$4 sm:$0xff]  }
 0x89c   : > { %17747 = vmatpush1.bf16.msra.mxu0 %v26099_v48  ;;  %19428 = vmatpush1.bf16.msra.mxu1 %v26102_v52  ;;  %v26194_v48 = vld [vmem:[%s27350_s14 + $0x420c] ss:$16 sps:$4 sm:$0xff]   ;;  %v637_v52 = vcombine.high %v29788_v63, %v29788_v63 }
 0x89d   : > { %17748 = vmatprep.subr.bf16.mxu0 %v26107_v47  ;;  %19429 = vmatprep.subr.bf16.mxu1 %v26110_v51  ;;  %v841_v47 = vpack.c.bf16 %v29715_v39, %v29715_v39  ;;  %v26189_v51 = vld [vmem:[%s27350_s14 + $0x4200] ss:$16 sps:$4 sm:$0xff]  }
 0x89e   : > { %v26195_v39 = vld [vmem:[%s27350_s14 + $0x4220] ss:$16 sps:$4 sm:$0xff]  }
 0x8a0   : > { %17749 = vmatpush1.bf16.msra.mxu0 %v26105_v55  ;;  %19430 = vmatpush1.bf16.msra.mxu1 %v26108_v4  ;;  %v26192_v55 = vld [vmem:[%s27350_s14 + $0x4208] ss:$16 sps:$4 sm:$0xff]   ;;  %v26197_v4 = vld [vmem:[%s27350_s14 + $0x4224] ss:$16 sps:$4 sm:$0xff]  }
 0x8a1   : > { %17750 = vmatprep.subr.bf16.mxu0 %v26113_v53  ;;  %19431 = vmatprep.subr.bf16.mxu1 %v26116_v7  ;;  %v26200_v53 = vld [vmem:[%s27350_s14 + $0x422c] ss:$16 sps:$4 sm:$0xff]   ;;  %v844_v7 = vpack.c.bf16 %v637_v52, %v637_v52  ;;  %v26276_v52 = vld [vmem:[%s27350_s14 + $0x43c8] ss:$16 sps:$4 sm:$0xff]  }
 0x8a4   : > { %17751 = vmatpush1.bf16.msra.mxu0 %v26111_v56  ;;  %19432 = vmatpush1.bf16.msra.mxu1 %v26114_v11  ;;  %v26198_v56 = vld [vmem:[%s27350_s14 + $0x4228] ss:$16 sps:$4 sm:$0xff]   ;;  %v26203_v11 = vld [vmem:[%s27350_s14 + $0x4244] ss:$16 sps:$4 sm:$0xff]  }
 0x8a5   : > { %17752 = vmatprep.subr.bf16.mxu0 %v26119_v42  ;;  %19433 = vmatprep.subr.bf16.mxu1 %v26122_v12  ;;  %v26206_v42 = vld [vmem:[%s27350_s14 + $0x424c] ss:$16 sps:$4 sm:$0xff]   ;;  %v26201_v12 = vld [vmem:[%s27350_s14 + $0x4240] ss:$16 sps:$4 sm:$0xff]  }
 0x8a8   : > { %17753 = vmatpush1.bf16.msra.mxu0 %v26117_v14  ;;  %19434 = vmatpush1.bf16.msra.mxu1 %v26120_v59  ;;  %v26204_v14 = vld [vmem:[%s27350_s14 + $0x4248] ss:$16 sps:$4 sm:$0xff]   ;;  %v26209_v59 = vld [vmem:[%s27350_s14 + $0x4264] ss:$16 sps:$4 sm:$0xff]  }
 0x8a9   : > { %17754 = vmatprep.subr.bf16.mxu0 %v26125_v15  ;;  %19435 = vmatprep.subr.bf16.mxu1 %v26128_v2  ;;  %v26212_v15 = vld [vmem:[%s27350_s14 + $0x426c] ss:$16 sps:$4 sm:$0xff]   ;;  %v26207_v2 = vld [vmem:[%s27350_s14 + $0x4260] ss:$16 sps:$4 sm:$0xff]  }
 0x8ac   : > { %17755 = vmatpush1.bf16.msra.mxu0 %v26123_v62  ;;  %19436 = vmatpush1.bf16.msra.mxu1 %v26126_v1  ;;  %v26210_v62 = vld [vmem:[%s27350_s14 + $0x4268] ss:$16 sps:$4 sm:$0xff]   ;;  %v26215_v1 = vld [vmem:[%s27350_s14 + $0x4284] ss:$16 sps:$4 sm:$0xff]  }
 0x8ad   : > { %17756 = vmatprep.subr.bf16.mxu0 %v26131_v5  ;;  %19437 = vmatprep.subr.bf16.mxu1 %v26134_v19  ;;  %v26218_v5 = vld [vmem:[%s27350_s14 + $0x428c] ss:$16 sps:$4 sm:$0xff]   ;;  %v26213_v19 = vld [vmem:[%s27350_s14 + $0x4280] ss:$16 sps:$4 sm:$0xff]  }
 0x8b0   : > { %17757 = vmatpush1.bf16.msra.mxu0 %v26129_v3  ;;  %19438 = vmatpush1.bf16.msra.mxu1 %v26132_v22  ;;  %v26216_v3 = vld [vmem:[%s27350_s14 + $0x4288] ss:$16 sps:$4 sm:$0xff]   ;;  %v26221_v22 = vld [vmem:[%s27350_s14 + $0x42a4] ss:$16 sps:$4 sm:$0xff]  }
 0x8b1   : > { %17758 = vmatprep.subr.bf16.mxu0 %v26137_v6  ;;  %19439 = vmatprep.subr.bf16.mxu1 %v26140_v9  ;;  %v26224_v6 = vld [vmem:[%s27350_s14 + $0x42ac] ss:$16 sps:$4 sm:$0xff]   ;;  %v26219_v9 = vld [vmem:[%s27350_s14 + $0x42a0] ss:$16 sps:$4 sm:$0xff]  }
 0x8b4   : > { %17759 = vmatpush1.bf16.msra.mxu0 %v26135_v58  ;;  %19440 = vmatpush1.bf16.msra.mxu1 %v26138_v27  ;;  %v26222_v58 = vld [vmem:[%s27350_s14 + $0x42a8] ss:$16 sps:$4 sm:$0xff]   ;;  %v26227_v27 = vld [vmem:[%s27350_s14 + $0x42c4] ss:$16 sps:$4 sm:$0xff]  }
 0x8b5   : > { %17760 = vmatprep.subr.bf16.mxu0 %v26143_v30  ;;  %19441 = vmatprep.subr.bf16.mxu1 %v26146_v10  ;;  %v26230_v30 = vld [vmem:[%s27350_s14 + $0x42cc] ss:$16 sps:$4 sm:$0xff]   ;;  %v26225_v10 = vld [vmem:[%s27350_s14 + $0x42c0] ss:$16 sps:$4 sm:$0xff]  }
 0x8b8   : > { %17761 = vmatpush1.bf16.msra.mxu0 %v26141_v31  ;;  %19442 = vmatpush1.bf16.msra.mxu1 %v26144_v17  ;;  %v26228_v31 = vld [vmem:[%s27350_s14 + $0x42c8] ss:$16 sps:$4 sm:$0xff]   ;;  %v26233_v17 = vld [vmem:[%s27350_s14 + $0x42e4] ss:$16 sps:$4 sm:$0xff]  }
 0x8b9   : > { %17762 = vmatprep.subr.bf16.mxu0 %v26149_v13  ;;  %19443 = vmatprep.subr.bf16.mxu1 %v26152_v16  ;;  %v26236_v13 = vld [vmem:[%s27350_s14 + $0x42ec] ss:$16 sps:$4 sm:$0xff]   ;;  %v26231_v16 = vld [vmem:[%s27350_s14 + $0x42e0] ss:$16 sps:$4 sm:$0xff]  }
 0x8bc   : > { %17763 = vmatpush1.bf16.msra.mxu0 %v26147_v20  ;;  %19444 = vmatpush1.bf16.msra.mxu1 %v26150_v26  ;;  %v26234_v20 = vld [vmem:[%s27350_s14 + $0x42e8] ss:$16 sps:$4 sm:$0xff]   ;;  %v26239_v26 = vld [vmem:[%s27350_s14 + $0x4304] ss:$16 sps:$4 sm:$0xff]  }
 0x8bd   : > { %17764 = vmatprep.subr.bf16.mxu0 %v26155_v18  ;;  %19445 = vmatprep.subr.bf16.mxu1 %v26158_v38  ;;  %v26242_v18 = vld [vmem:[%s27350_s14 + $0x430c] ss:$16 sps:$4 sm:$0xff]   ;;  %v26237_v38 = vld [vmem:[%s27350_s14 + $0x4300] ss:$16 sps:$4 sm:$0xff]  }
 0x8c0   : > { %17765 = vmatpush1.bf16.msra.mxu0 %v26153_v21  ;;  %19446 = vmatpush1.bf16.msra.mxu1 %v26156_v41  ;;  %v26240_v21 = vld [vmem:[%s27350_s14 + $0x4308] ss:$16 sps:$4 sm:$0xff]   ;;  %v26245_v41 = vld [vmem:[%s27350_s14 + $0x4324] ss:$16 sps:$4 sm:$0xff]  }
 0x8c1   : > { %17766 = vmatprep.subr.bf16.mxu0 %v26161_v8  ;;  %19447 = vmatprep.subr.bf16.mxu1 %v26164_v44  ;;  %v26248_v8 = vld [vmem:[%s27350_s14 + $0x432c] ss:$16 sps:$4 sm:$0xff]   ;;  %v26243_v44 = vld [vmem:[%s27350_s14 + $0x4320] ss:$16 sps:$4 sm:$0xff]  }
 0x8c4   : > { %17767 = vmatpush1.bf16.msra.mxu0 %v26159_v25  ;;  %19448 = vmatpush1.bf16.msra.mxu1 %v26162_v23  ;;  %v26246_v25 = vld [vmem:[%s27350_s14 + $0x4328] ss:$16 sps:$4 sm:$0xff]   ;;  %v26251_v23 = vld [vmem:[%s27350_s14 + $0x4344] ss:$16 sps:$4 sm:$0xff]  }
 0x8c5   : > { %17768 = vmatprep.subr.bf16.mxu0 %v26167_v46  ;;  %19449 = vmatprep.subr.bf16.mxu1 %v26170_v34  ;;  %v26254_v46 = vld [vmem:[%s27350_s14 + $0x434c] ss:$16 sps:$4 sm:$0xff]   ;;  %v26249_v34 = vld [vmem:[%s27350_s14 + $0x4340] ss:$16 sps:$4 sm:$0xff]  }
 0x8c8   : > { %17769 = vmatpush1.bf16.msra.mxu0 %v26165_v29  ;;  %19450 = vmatpush1.bf16.msra.mxu1 %v26168_v33  ;;  %v26252_v29 = vld [vmem:[%s27350_s14 + $0x4348] ss:$16 sps:$4 sm:$0xff]   ;;  %v26257_v33 = vld [vmem:[%s27350_s14 + $0x4364] ss:$16 sps:$4 sm:$0xff]  }
 0x8c9   : > { %17770 = vmatprep.subr.bf16.mxu0 %v26173_v36  ;;  %19451 = vmatprep.subr.bf16.mxu1 %v26176_v32  ;;  %v26260_v36 = vld [vmem:[%s27350_s14 + $0x436c] ss:$16 sps:$4 sm:$0xff]   ;;  %v26255_v32 = vld [vmem:[%s27350_s14 + $0x4360] ss:$16 sps:$4 sm:$0xff]  }
 0x8cc   : > { %17771 = vmatpush1.bf16.msra.mxu0 %v26171_v35  ;;  %19452 = vmatpush1.bf16.msra.mxu1 %v26174_v54  ;;  %v26258_v35 = vld [vmem:[%s27350_s14 + $0x4368] ss:$16 sps:$4 sm:$0xff]   ;;  %v26263_v54 = vld [vmem:[%s27350_s14 + $0x4384] ss:$16 sps:$4 sm:$0xff]  }
 0x8cd   : > { %17772 = vmatprep.subr.bf16.mxu0 %v26179_v37  ;;  %19453 = vmatprep.subr.bf16.mxu1 %v26182_v57  ;;  %v26266_v37 = vld [vmem:[%s27350_s14 + $0x438c] ss:$16 sps:$4 sm:$0xff]   ;;  %v26261_v57 = vld [vmem:[%s27350_s14 + $0x4380] ss:$16 sps:$4 sm:$0xff]  }
 0x8d0   : > { %17773 = vmatpush1.bf16.msra.mxu0 %v26177_v40  ;;  %19454 = vmatpush1.bf16.msra.mxu1 %v26180_v60  ;;  %v26269_v40 = vld [vmem:[%s27350_s14 + $0x43a4] ss:$16 sps:$4 sm:$0xff]   ;;  %v26272_v60 = vld [vmem:[%s27350_s14 + $0x43ac] ss:$16 sps:$4 sm:$0xff]  }
 0x8d1   : > { %17774 = vmatprep.subr.bf16.mxu0 %v26185_v28  ;;  %19455 = vmatprep.subr.bf16.mxu1 %v26188_v61  ;;  %v26267_v28 = vld [vmem:[%s27350_s14 + $0x43a0] ss:$16 sps:$4 sm:$0xff]   ;;  %v26270_v61 = vld [vmem:[%s27350_s14 + $0x43a8] ss:$16 sps:$4 sm:$0xff]  }
 0x8d4   : > { %17775 = vmatpush1.bf16.msra.mxu0 %v26183_v50  ;;  %19456 = vmatpush1.bf16.msra.mxu1 %v26186_v45  ;;  %v26275_v50 = vld [vmem:[%s27350_s14 + $0x43c4] ss:$16 sps:$4 sm:$0xff]   ;;  %v26278_v45 = vld [vmem:[%s27350_s14 + $0x43cc] ss:$16 sps:$4 sm:$0xff]  }
 0x8d5   : > { %17785 = vmatprep.subr.bf16.mxu0 %v26191_v0  ;;  %19466 = vmatprep.subr.bf16.mxu1 %v26194_v48  ;;  %v29854_v0 = vld [vmem:[#allocation2 + $0x88] sm:$0xff]  ;;  %v26273_v48 = vld [vmem:[%s27350_s14 + $0x43c0] ss:$16 sps:$4 sm:$0xff]  }
 0x8d7   : > { %17777 = vmatmul.mubr.bf16.vlgmr.msra.gmra.mrb[0].mxu0 %v841_v47  ;;  %19458 = vmatmul.mubr.bf16.vlgmr.msra.gmra.mrb[0].mxu1 %v841_v47  ;;  %v26281_v47 = vld [vmem:[%s27350_s14 + $0x43e4] ss:$16 sps:$4 sm:$0xff]  }
 0x8d8   : > { %17786 = vmatpush1.bf16.msra.mxu0 %v26189_v51  ;;  %19467 = vmatpush1.bf16.msra.mxu1 %v26192_v55  ;;  %v26284_v51 = vld [vmem:[%s27350_s14 + $0x43ec] ss:$16 sps:$4 sm:$0xff]   ;;  %v29862_v55 = vrot.slane %v29854_v0, %v27416_v49 }
 0x8d9   : > { %17787 = vmatprep.subr.bf16.mxu0 %v26197_v4  ;;  %19468 = vmatprep.subr.bf16.mxu1 %v26200_v53  ;;  %v26279_v4 = vld [vmem:[%s27350_s14 + $0x43e0] ss:$16 sps:$4 sm:$0xff]   ;;  %v26282_v53 = vld [vmem:[%s27350_s14 + $0x43e8] ss:$16 sps:$4 sm:$0xff]  }
 0x8da   : > { %17817 = vmatprep.mubr.bf16.mxu0 %v844_v7  ;;  %19498 = vmatprep.mubr.bf16.mxu1 %v844_v7  ;;  %v26288_v7 = vld [vmem:[%s27350_s14 + $0x4404] ss:$16 sps:$4 sm:$0xff]  }
 0x8dc   : > { %17788 = vmatpush1.bf16.msra.mxu0 %v26195_v39  ;;  %19469 = vmatpush1.bf16.msra.mxu1 %v26198_v56  ;;  %v26291_v39 = vld [vmem:[%s27350_s14 + $0x440c] ss:$16 sps:$4 sm:$0xff]   ;;  %v653_v56 = vcombine.high %v29862_v55, %v29862_v55 }
 0x8dd   : > { %17789 = vmatprep.subr.bf16.mxu0 %v26203_v11  ;;  %19470 = vmatprep.subr.bf16.mxu1 %v26206_v42  ;;  %v843_v11 = vpack.c.bf16 %v29788_v63, %v29788_v63  ;;  %v26286_v42 = vld [vmem:[%s27350_s14 + $0x4400] ss:$16 sps:$4 sm:$0xff]  }
 0x8de   : > { %v26292_v63 = vld [vmem:[%s27350_s14 + $0x4420] ss:$16 sps:$4 sm:$0xff]  }
 0x8e0   : > { %17790 = vmatpush1.bf16.msra.mxu0 %v26201_v12  ;;  %19471 = vmatpush1.bf16.msra.mxu1 %v26204_v14  ;;  %v26289_v12 = vld [vmem:[%s27350_s14 + $0x4408] ss:$16 sps:$4 sm:$0xff]   ;;  %v26294_v14 = vld [vmem:[%s27350_s14 + $0x4424] ss:$16 sps:$4 sm:$0xff]  }
 0x8e1   : > { %17791 = vmatprep.subr.bf16.mxu0 %v26209_v59  ;;  %19472 = vmatprep.subr.bf16.mxu1 %v26212_v15  ;;  %v26297_v59 = vld [vmem:[%s27350_s14 + $0x442c] ss:$16 sps:$4 sm:$0xff]   ;;  %v846_v15 = vpack.c.bf16 %v653_v56, %v653_v56  ;;  %v26370_v56 = vld [vmem:[%s27350_s14 + $0x45c0] ss:$16 sps:$4 sm:$0xff]  }
 0x8e4   : > { %17792 = vmatpush1.bf16.msra.mxu0 %v26207_v2  ;;  %19473 = vmatpush1.bf16.msra.mxu1 %v26210_v62  ;;  %v26295_v2 = vld [vmem:[%s27350_s14 + $0x4428] ss:$16 sps:$4 sm:$0xff]   ;;  %v26300_v62 = vld [vmem:[%s27350_s14 + $0x4444] ss:$16 sps:$4 sm:$0xff]  }
 0x8e5   : > { %17793 = vmatprep.subr.bf16.mxu0 %v26215_v1  ;;  %19474 = vmatprep.subr.bf16.mxu1 %v26218_v5  ;;  %v26303_v1 = vld [vmem:[%s27350_s14 + $0x444c] ss:$16 sps:$4 sm:$0xff]   ;;  %v26298_v5 = vld [vmem:[%s27350_s14 + $0x4440] ss:$16 sps:$4 sm:$0xff]  }
 0x8e8   : > { %17794 = vmatpush1.bf16.msra.mxu0 %v26213_v19  ;;  %19475 = vmatpush1.bf16.msra.mxu1 %v26216_v3  ;;  %v26301_v19 = vld [vmem:[%s27350_s14 + $0x4448] ss:$16 sps:$4 sm:$0xff]   ;;  %v26306_v3 = vld [vmem:[%s27350_s14 + $0x4464] ss:$16 sps:$4 sm:$0xff]  }
 0x8e9   : > { %17795 = vmatprep.subr.bf16.mxu0 %v26221_v22  ;;  %19476 = vmatprep.subr.bf16.mxu1 %v26224_v6  ;;  %v26309_v22 = vld [vmem:[%s27350_s14 + $0x446c] ss:$16 sps:$4 sm:$0xff]   ;;  %v26304_v6 = vld [vmem:[%s27350_s14 + $0x4460] ss:$16 sps:$4 sm:$0xff]  }
 0x8ec   : > { %17796 = vmatpush1.bf16.msra.mxu0 %v26219_v9  ;;  %19477 = vmatpush1.bf16.msra.mxu1 %v26222_v58  ;;  %v26307_v9 = vld [vmem:[%s27350_s14 + $0x4468] ss:$16 sps:$4 sm:$0xff]   ;;  %v26312_v58 = vld [vmem:[%s27350_s14 + $0x4484] ss:$16 sps:$4 sm:$0xff]  }
 0x8ed   : > { %17797 = vmatprep.subr.bf16.mxu0 %v26227_v27  ;;  %19478 = vmatprep.subr.bf16.mxu1 %v26230_v30  ;;  %v26315_v27 = vld [vmem:[%s27350_s14 + $0x448c] ss:$16 sps:$4 sm:$0xff]   ;;  %v26310_v30 = vld [vmem:[%s27350_s14 + $0x4480] ss:$16 sps:$4 sm:$0xff]  }
 0x8f0   : > { %17798 = vmatpush1.bf16.msra.mxu0 %v26225_v10  ;;  %19479 = vmatpush1.bf16.msra.mxu1 %v26228_v31  ;;  %v26313_v10 = vld [vmem:[%s27350_s14 + $0x4488] ss:$16 sps:$4 sm:$0xff]   ;;  %v26318_v31 = vld [vmem:[%s27350_s14 + $0x44a4] ss:$16 sps:$4 sm:$0xff]  }
 0x8f1   : > { %17799 = vmatprep.subr.bf16.mxu0 %v26233_v17  ;;  %19480 = vmatprep.subr.bf16.mxu1 %v26236_v13  ;;  %v26321_v17 = vld [vmem:[%s27350_s14 + $0x44ac] ss:$16 sps:$4 sm:$0xff]   ;;  %v26316_v13 = vld [vmem:[%s27350_s14 + $0x44a0] ss:$16 sps:$4 sm:$0xff]  }
 0x8f4   : > { %17800 = vmatpush1.bf16.msra.mxu0 %v26231_v16  ;;  %19481 = vmatpush1.bf16.msra.mxu1 %v26234_v20  ;;  %v26319_v16 = vld [vmem:[%s27350_s14 + $0x44a8] ss:$16 sps:$4 sm:$0xff]   ;;  %v26324_v20 = vld [vmem:[%s27350_s14 + $0x44c4] ss:$16 sps:$4 sm:$0xff]  }
 0x8f5   : > { %17801 = vmatprep.subr.bf16.mxu0 %v26239_v26  ;;  %19482 = vmatprep.subr.bf16.mxu1 %v26242_v18  ;;  %v26327_v26 = vld [vmem:[%s27350_s14 + $0x44cc] ss:$16 sps:$4 sm:$0xff]   ;;  %v26322_v18 = vld [vmem:[%s27350_s14 + $0x44c0] ss:$16 sps:$4 sm:$0xff]  }
 0x8f8   : > { %17802 = vmatpush1.bf16.msra.mxu0 %v26237_v38  ;;  %19483 = vmatpush1.bf16.msra.mxu1 %v26240_v21  ;;  %v26325_v38 = vld [vmem:[%s27350_s14 + $0x44c8] ss:$16 sps:$4 sm:$0xff]   ;;  %v26330_v21 = vld [vmem:[%s27350_s14 + $0x44e4] ss:$16 sps:$4 sm:$0xff]  }
 0x8f9   : > { %17803 = vmatprep.subr.bf16.mxu0 %v26245_v41  ;;  %19484 = vmatprep.subr.bf16.mxu1 %v26248_v8  ;;  %v26333_v41 = vld [vmem:[%s27350_s14 + $0x44ec] ss:$16 sps:$4 sm:$0xff]   ;;  %v26328_v8 = vld [vmem:[%s27350_s14 + $0x44e0] ss:$16 sps:$4 sm:$0xff]  }
 0x8fc   : > { %17804 = vmatpush1.bf16.msra.mxu0 %v26243_v44  ;;  %19485 = vmatpush1.bf16.msra.mxu1 %v26246_v25  ;;  %v26331_v44 = vld [vmem:[%s27350_s14 + $0x44e8] ss:$16 sps:$4 sm:$0xff]   ;;  %v26336_v25 = vld [vmem:[%s27350_s14 + $0x4504] ss:$16 sps:$4 sm:$0xff]  }
 0x8fd   : > { %17805 = vmatprep.subr.bf16.mxu0 %v26251_v23  ;;  %19486 = vmatprep.subr.bf16.mxu1 %v26254_v46  ;;  %v26339_v23 = vld [vmem:[%s27350_s14 + $0x450c] ss:$16 sps:$4 sm:$0xff]   ;;  %v26334_v46 = vld [vmem:[%s27350_s14 + $0x4500] ss:$16 sps:$4 sm:$0xff]  }
 0x900   : > { %17806 = vmatpush1.bf16.msra.mxu0 %v26249_v34  ;;  %19487 = vmatpush1.bf16.msra.mxu1 %v26252_v29  ;;  %v26337_v34 = vld [vmem:[%s27350_s14 + $0x4508] ss:$16 sps:$4 sm:$0xff]   ;;  %v26342_v29 = vld [vmem:[%s27350_s14 + $0x4524] ss:$16 sps:$4 sm:$0xff]  }
 0x901   : > { %17807 = vmatprep.subr.bf16.mxu0 %v26257_v33  ;;  %19488 = vmatprep.subr.bf16.mxu1 %v26260_v36  ;;  %v26345_v33 = vld [vmem:[%s27350_s14 + $0x452c] ss:$16 sps:$4 sm:$0xff]   ;;  %v26340_v36 = vld [vmem:[%s27350_s14 + $0x4520] ss:$16 sps:$4 sm:$0xff]  }
 0x904   : > { %17808 = vmatpush1.bf16.msra.mxu0 %v26255_v32  ;;  %19489 = vmatpush1.bf16.msra.mxu1 %v26258_v35  ;;  %v26343_v32 = vld [vmem:[%s27350_s14 + $0x4528] ss:$16 sps:$4 sm:$0xff]   ;;  %v26348_v35 = vld [vmem:[%s27350_s14 + $0x4544] ss:$16 sps:$4 sm:$0xff]  }
 0x905   : > { %17809 = vmatprep.subr.bf16.mxu0 %v26263_v54  ;;  %19490 = vmatprep.subr.bf16.mxu1 %v26266_v37  ;;  %v26351_v54 = vld [vmem:[%s27350_s14 + $0x454c] ss:$16 sps:$4 sm:$0xff]   ;;  %v26346_v37 = vld [vmem:[%s27350_s14 + $0x4540] ss:$16 sps:$4 sm:$0xff]  }
 0x908   : > { %17810 = vmatpush1.bf16.msra.mxu0 %v26261_v57  ;;  %19491 = vmatpush1.bf16.msra.mxu1 %v26264_v24  ;;  %v26349_v57 = vld [vmem:[%s27350_s14 + $0x4548] ss:$16 sps:$4 sm:$0xff]   ;;  %v26354_v24 = vld [vmem:[%s27350_s14 + $0x4564] ss:$16 sps:$4 sm:$0xff]  }
 0x909   : > { %17811 = vmatprep.subr.bf16.mxu0 %v26269_v40  ;;  %19492 = vmatprep.subr.bf16.mxu1 %v26272_v60  ;;  %v26357_v40 = vld [vmem:[%s27350_s14 + $0x456c] ss:$16 sps:$4 sm:$0xff]   ;;  %v26352_v60 = vld [vmem:[%s27350_s14 + $0x4560] ss:$16 sps:$4 sm:$0xff]  }
 0x90c   : > { %17812 = vmatpush1.bf16.msra.mxu0 %v26267_v28  ;;  %19493 = vmatpush1.bf16.msra.mxu1 %v26270_v61  ;;  %v26355_v28 = vld [vmem:[%s27350_s14 + $0x4568] ss:$16 sps:$4 sm:$0xff]   ;;  %v26360_v61 = vld [vmem:[%s27350_s14 + $0x4584] ss:$16 sps:$4 sm:$0xff]  }
 0x90d   : > { %17813 = vmatprep.subr.bf16.mxu0 %v26275_v50  ;;  %19494 = vmatprep.subr.bf16.mxu1 %v26278_v45  ;;  %v26363_v50 = vld [vmem:[%s27350_s14 + $0x458c] ss:$16 sps:$4 sm:$0xff]   ;;  %v26358_v45 = vld [vmem:[%s27350_s14 + $0x4580] ss:$16 sps:$4 sm:$0xff]  }
 0x910   : > { %17814 = vmatpush1.bf16.msra.mxu0 %v26273_v48  ;;  %19495 = vmatpush1.bf16.msra.mxu1 %v26276_v52  ;;  %v26361_v48 = vld [vmem:[%s27350_s14 + $0x4588] ss:$16 sps:$4 sm:$0xff]   ;;  %v26366_v52 = vld [vmem:[%s27350_s14 + $0x45a4] ss:$16 sps:$4 sm:$0xff]  }
 0x911   : > { %17815 = vmatprep.subr.bf16.mxu0 %v26281_v47  ;;  %19496 = vmatprep.subr.bf16.mxu1 %v26284_v51  ;;  %v26369_v47 = vld [vmem:[%s27350_s14 + $0x45ac] ss:$16 sps:$4 sm:$0xff]   ;;  %v26364_v51 = vld [vmem:[%s27350_s14 + $0x45a0] ss:$16 sps:$4 sm:$0xff]  }
 0x914   : > { %17816 = vmatpush1.bf16.msra.mxu0 %v26279_v4  ;;  %19497 = vmatpush1.bf16.msra.mxu1 %v26282_v53  ;;  %v26367_v4 = vld [vmem:[%s27350_s14 + $0x45a8] ss:$16 sps:$4 sm:$0xff]   ;;  %v26372_v53 = vld [vmem:[%s27350_s14 + $0x45c4] ss:$16 sps:$4 sm:$0xff]  }
 0x915   : > { %17826 = vmatprep.subr.bf16.mxu0 %v26288_v7  ;;  %19507 = vmatprep.subr.bf16.mxu1 %v26291_v39  ;;  %v26375_v7 = vld [vmem:[%s27350_s14 + $0x45cc] ss:$16 sps:$4 sm:$0xff]   ;;  %v638_v39 = vcombine.high %v29854_v0, %v29854_v0  ;;  %v26376_v0 = vld [vmem:[%s27350_s14 + $0x45e0] ss:$16 sps:$4 sm:$0xff]  }
 0x917   : > { %17818 = vmatmul.mubr.bf16.vlgmr.msra.gmra.mrb[0].mxu0 %v843_v11  ;;  %19499 = vmatmul.mubr.bf16.vlgmr.msra.gmra.mrb[0].mxu1 %v843_v11  ;;  %v26373_v11 = vld [vmem:[%s27350_s14 + $0x45c8] ss:$16 sps:$4 sm:$0xff]  }
 0x918   : > { %17827 = vmatpush1.bf16.msra.mxu0 %v26286_v42  ;;  %19508 = vmatpush1.bf16.msra.mxu1 %v26289_v12  ;;  %v26378_v42 = vld [vmem:[%s27350_s14 + $0x45e4] ss:$16 sps:$4 sm:$0xff]   ;;  %v26381_v12 = vld [vmem:[%s27350_s14 + $0x45ec] ss:$16 sps:$4 sm:$0xff]  }
 0x919   : > { %17828 = vmatprep.subr.bf16.mxu0 %v26294_v14  ;;  %19509 = vmatprep.subr.bf16.mxu1 %v26297_v59  ;;  %v29935_v14 = vrot.slane %v638_v39, %v27416_v49  ;;  %v26379_v59 = vld [vmem:[%s27350_s14 + $0x45e8] ss:$16 sps:$4 sm:$0xff]  }
 0x91a   : > { %17858 = vmatprep.mubr.bf16.mxu0 %v846_v15  ;;  %19539 = vmatprep.mubr.bf16.mxu1 %v846_v15  ;;  %v26384_v15 = vld [vmem:[%s27350_s14 + $0x4604] ss:$16 sps:$4 sm:$0xff]   ;;  %v26457_v39 = vld [vmem:[%s27350_s14 + $0x4788] ss:$16 sps:$4 sm:$0xff]  }
 0x91c   : > { %17829 = vmatpush1.bf16.msra.mxu0 %v26292_v63  ;;  %19510 = vmatpush1.bf16.msra.mxu1 %v26295_v2  ;;  %v26387_v63 = vld [vmem:[%s27350_s14 + $0x460c] ss:$16 sps:$4 sm:$0xff]   ;;  %v654_v2 = vcombine.high %v29935_v14, %v29935_v14 }
 0x91d   : > { %17830 = vmatprep.subr.bf16.mxu0 %v26300_v62  ;;  %19511 = vmatprep.subr.bf16.mxu1 %v26303_v1  ;;  %v845_v62 = vpack.c.bf16 %v29862_v55, %v29862_v55  ;;  %v26382_v1 = vld [vmem:[%s27350_s14 + $0x4600] ss:$16 sps:$4 sm:$0xff]  }
 0x91e   : > { %v26388_v55 = vld [vmem:[%s27350_s14 + $0x4620] ss:$16 sps:$4 sm:$0xff]  }
 0x920   : > { %17831 = vmatpush1.bf16.msra.mxu0 %v26298_v5  ;;  %19512 = vmatpush1.bf16.msra.mxu1 %v26301_v19  ;;  %v26385_v5 = vld [vmem:[%s27350_s14 + $0x4608] ss:$16 sps:$4 sm:$0xff]   ;;  %v26390_v19 = vld [vmem:[%s27350_s14 + $0x4624] ss:$16 sps:$4 sm:$0xff]  }
 0x921   : > { %17832 = vmatprep.subr.bf16.mxu0 %v26306_v3  ;;  %19513 = vmatprep.subr.bf16.mxu1 %v26309_v22  ;;  %v26393_v3 = vld [vmem:[%s27350_s14 + $0x462c] ss:$16 sps:$4 sm:$0xff]   ;;  %v848_v22 = vpack.c.bf16 %v654_v2, %v654_v2  ;;  %v26469_v2 = vld [vmem:[%s27350_s14 + $0x47c8] ss:$16 sps:$4 sm:$0xff]  }
 0x924   : > { %17833 = vmatpush1.bf16.msra.mxu0 %v26304_v6  ;;  %19514 = vmatpush1.bf16.msra.mxu1 %v26307_v9  ;;  %v26391_v6 = vld [vmem:[%s27350_s14 + $0x4628] ss:$16 sps:$4 sm:$0xff]   ;;  %v26396_v9 = vld [vmem:[%s27350_s14 + $0x4644] ss:$16 sps:$4 sm:$0xff]  }
 0x925   : > { %17834 = vmatprep.subr.bf16.mxu0 %v26312_v58  ;;  %19515 = vmatprep.subr.bf16.mxu1 %v26315_v27  ;;  %v26399_v58 = vld [vmem:[%s27350_s14 + $0x464c] ss:$16 sps:$4 sm:$0xff]   ;;  %v26394_v27 = vld [vmem:[%s27350_s14 + $0x4640] ss:$16 sps:$4 sm:$0xff]  }
 0x928   : > { %17835 = vmatpush1.bf16.msra.mxu0 %v26310_v30  ;;  %19516 = vmatpush1.bf16.msra.mxu1 %v26313_v10  ;;  %v26397_v30 = vld [vmem:[%s27350_s14 + $0x4648] ss:$16 sps:$4 sm:$0xff]   ;;  %v26402_v10 = vld [vmem:[%s27350_s14 + $0x4664] ss:$16 sps:$4 sm:$0xff]  }
 0x929   : > { %17836 = vmatprep.subr.bf16.mxu0 %v26318_v31  ;;  %19517 = vmatprep.subr.bf16.mxu1 %v26321_v17  ;;  %v26405_v31 = vld [vmem:[%s27350_s14 + $0x466c] ss:$16 sps:$4 sm:$0xff]   ;;  %v26400_v17 = vld [vmem:[%s27350_s14 + $0x4660] ss:$16 sps:$4 sm:$0xff]  }
 0x92c   : > { %17837 = vmatpush1.bf16.msra.mxu0 %v26316_v13  ;;  %19518 = vmatpush1.bf16.msra.mxu1 %v26319_v16  ;;  %v26403_v13 = vld [vmem:[%s27350_s14 + $0x4668] ss:$16 sps:$4 sm:$0xff]   ;;  %v26408_v16 = vld [vmem:[%s27350_s14 + $0x4684] ss:$16 sps:$4 sm:$0xff]  }
 0x92d   : > { %17838 = vmatprep.subr.bf16.mxu0 %v26324_v20  ;;  %19519 = vmatprep.subr.bf16.mxu1 %v26327_v26  ;;  %v26411_v20 = vld [vmem:[%s27350_s14 + $0x468c] ss:$16 sps:$4 sm:$0xff]   ;;  %v26406_v26 = vld [vmem:[%s27350_s14 + $0x4680] ss:$16 sps:$4 sm:$0xff]  }
 0x930   : > { %17839 = vmatpush1.bf16.msra.mxu0 %v26322_v18  ;;  %19520 = vmatpush1.bf16.msra.mxu1 %v26325_v38  ;;  %v26409_v18 = vld [vmem:[%s27350_s14 + $0x4688] ss:$16 sps:$4 sm:$0xff]   ;;  %v26414_v38 = vld [vmem:[%s27350_s14 + $0x46a4] ss:$16 sps:$4 sm:$0xff]  }
 0x931   : > { %17840 = vmatprep.subr.bf16.mxu0 %v26330_v21  ;;  %19521 = vmatprep.subr.bf16.mxu1 %v26333_v41  ;;  %v26417_v21 = vld [vmem:[%s27350_s14 + $0x46ac] ss:$16 sps:$4 sm:$0xff]   ;;  %v26412_v41 = vld [vmem:[%s27350_s14 + $0x46a0] ss:$16 sps:$4 sm:$0xff]  }
 0x934   : > { %17841 = vmatpush1.bf16.msra.mxu0 %v26328_v8  ;;  %19522 = vmatpush1.bf16.msra.mxu1 %v26331_v44  ;;  %v26415_v8 = vld [vmem:[%s27350_s14 + $0x46a8] ss:$16 sps:$4 sm:$0xff]   ;;  %v26420_v44 = vld [vmem:[%s27350_s14 + $0x46c4] ss:$16 sps:$4 sm:$0xff]  }
 0x935   : > { %17842 = vmatprep.subr.bf16.mxu0 %v26336_v25  ;;  %19523 = vmatprep.subr.bf16.mxu1 %v26339_v23  ;;  %v26423_v25 = vld [vmem:[%s27350_s14 + $0x46cc] ss:$16 sps:$4 sm:$0xff]   ;;  %v26418_v23 = vld [vmem:[%s27350_s14 + $0x46c0] ss:$16 sps:$4 sm:$0xff]  }
 0x938   : > { %17843 = vmatpush1.bf16.msra.mxu0 %v26334_v46  ;;  %19524 = vmatpush1.bf16.msra.mxu1 %v26337_v34  ;;  %v26421_v46 = vld [vmem:[%s27350_s14 + $0x46c8] ss:$16 sps:$4 sm:$0xff]   ;;  %v26426_v34 = vld [vmem:[%s27350_s14 + $0x46e4] ss:$16 sps:$4 sm:$0xff]  }
 0x939   : > { %17844 = vmatprep.subr.bf16.mxu0 %v26342_v29  ;;  %19525 = vmatprep.subr.bf16.mxu1 %v26345_v33  ;;  %v26429_v29 = vld [vmem:[%s27350_s14 + $0x46ec] ss:$16 sps:$4 sm:$0xff]   ;;  %v26424_v33 = vld [vmem:[%s27350_s14 + $0x46e0] ss:$16 sps:$4 sm:$0xff]  }
 0x93c   : > { %17845 = vmatpush1.bf16.msra.mxu0 %v26340_v36  ;;  %19526 = vmatpush1.bf16.msra.mxu1 %v26343_v32  ;;  %v26427_v36 = vld [vmem:[%s27350_s14 + $0x46e8] ss:$16 sps:$4 sm:$0xff]   ;;  %v26432_v32 = vld [vmem:[%s27350_s14 + $0x4704] ss:$16 sps:$4 sm:$0xff]  }
 0x93d   : > { %17846 = vmatprep.subr.bf16.mxu0 %v26348_v35  ;;  %19527 = vmatprep.subr.bf16.mxu1 %v26351_v54  ;;  %v26435_v35 = vld [vmem:[%s27350_s14 + $0x470c] ss:$16 sps:$4 sm:$0xff]   ;;  %v26430_v54 = vld [vmem:[%s27350_s14 + $0x4700] ss:$16 sps:$4 sm:$0xff]  }
 0x940   : > { %17847 = vmatpush1.bf16.msra.mxu0 %v26346_v37  ;;  %19528 = vmatpush1.bf16.msra.mxu1 %v26349_v57  ;;  %v26433_v37 = vld [vmem:[%s27350_s14 + $0x4708] ss:$16 sps:$4 sm:$0xff]   ;;  %v26438_v57 = vld [vmem:[%s27350_s14 + $0x4724] ss:$16 sps:$4 sm:$0xff]  }
 0x941   : > { %17848 = vmatprep.subr.bf16.mxu0 %v26354_v24  ;;  %19529 = vmatprep.subr.bf16.mxu1 %v26357_v40  ;;  %v26441_v24 = vld [vmem:[%s27350_s14 + $0x472c] ss:$16 sps:$4 sm:$0xff]   ;;  %v26436_v40 = vld [vmem:[%s27350_s14 + $0x4720] ss:$16 sps:$4 sm:$0xff]  }
 0x944   : > { %17849 = vmatpush1.bf16.msra.mxu0 %v26352_v60  ;;  %19530 = vmatpush1.bf16.msra.mxu1 %v26355_v28  ;;  %v26439_v60 = vld [vmem:[%s27350_s14 + $0x4728] ss:$16 sps:$4 sm:$0xff]   ;;  %v26444_v28 = vld [vmem:[%s27350_s14 + $0x4744] ss:$16 sps:$4 sm:$0xff]  }
 0x945   : > { %17850 = vmatprep.subr.bf16.mxu0 %v26360_v61  ;;  %19531 = vmatprep.subr.bf16.mxu1 %v26363_v50  ;;  %v26447_v61 = vld [vmem:[%s27350_s14 + $0x474c] ss:$16 sps:$4 sm:$0xff]   ;;  %v26442_v50 = vld [vmem:[%s27350_s14 + $0x4740] ss:$16 sps:$4 sm:$0xff]  }
 0x948   : > { %17851 = vmatpush1.bf16.msra.mxu0 %v26358_v45  ;;  %19532 = vmatpush1.bf16.msra.mxu1 %v26361_v48  ;;  %v26445_v45 = vld [vmem:[%s27350_s14 + $0x4748] ss:$16 sps:$4 sm:$0xff]   ;;  %v26450_v48 = vld [vmem:[%s27350_s14 + $0x4764] ss:$16 sps:$4 sm:$0xff]  }
 0x949   : > { %17852 = vmatprep.subr.bf16.mxu0 %v26366_v52  ;;  %19533 = vmatprep.subr.bf16.mxu1 %v26369_v47  ;;  %v26453_v52 = vld [vmem:[%s27350_s14 + $0x476c] ss:$16 sps:$4 sm:$0xff]   ;;  %v26448_v47 = vld [vmem:[%s27350_s14 + $0x4760] ss:$16 sps:$4 sm:$0xff]  }
 0x94c   : > { %17853 = vmatpush1.bf16.msra.mxu0 %v26364_v51  ;;  %19534 = vmatpush1.bf16.msra.mxu1 %v26367_v4  ;;  %v26451_v51 = vld [vmem:[%s27350_s14 + $0x4768] ss:$16 sps:$4 sm:$0xff]   ;;  %v26456_v4 = vld [vmem:[%s27350_s14 + $0x4784] ss:$16 sps:$4 sm:$0xff]  }
 0x94d   : > { %17854 = vmatprep.subr.bf16.mxu0 %v26372_v53  ;;  %19535 = vmatprep.subr.bf16.mxu1 %v26375_v7  ;;  %v26459_v53 = vld [vmem:[%s27350_s14 + $0x478c] ss:$16 sps:$4 sm:$0xff]   ;;  %v26454_v7 = vld [vmem:[%s27350_s14 + $0x4780] ss:$16 sps:$4 sm:$0xff]  }
 0x950   : > { %17855 = vmatpush1.bf16.msra.mxu0 %v26370_v56  ;;  %19536 = vmatpush1.bf16.msra.mxu1 %v26373_v11  ;;  %v26462_v56 = vld [vmem:[%s27350_s14 + $0x47a4] ss:$16 sps:$4 sm:$0xff]   ;;  %v26465_v11 = vld [vmem:[%s27350_s14 + $0x47ac] ss:$16 sps:$4 sm:$0xff]  }
 0x951   : > { %17856 = vmatprep.subr.bf16.mxu0 %v26378_v42  ;;  %19537 = vmatprep.subr.bf16.mxu1 %v26381_v12  ;;  %v26460_v42 = vld [vmem:[%s27350_s14 + $0x47a0] ss:$16 sps:$4 sm:$0xff]   ;;  %v26463_v12 = vld [vmem:[%s27350_s14 + $0x47a8] ss:$16 sps:$4 sm:$0xff]  }
 0x954   : > { %17857 = vmatpush1.bf16.msra.mxu0 %v26376_v0  ;;  %19538 = vmatpush1.bf16.msra.mxu1 %v26379_v59  ;;  %v26468_v0 = vld [vmem:[%s27350_s14 + $0x47c4] ss:$16 sps:$4 sm:$0xff]   ;;  %v26471_v59 = vld [vmem:[%s27350_s14 + $0x47cc] ss:$16 sps:$4 sm:$0xff]  }
 0x955   : > { %17867 = vmatprep.subr.bf16.mxu0 %v26384_v15  ;;  %19548 = vmatprep.subr.bf16.mxu1 %v26387_v63  ;;  %v30001_v15 = vld [vmem:[#allocation2 + $0x90] sm:$0xff] }
 0x956   : > { %v26466_v63 = vld [vmem:[%s27350_s14 + $0x47c0] ss:$16 sps:$4 sm:$0xff]  }
 0x957   : > { %17859 = vmatmul.mubr.bf16.vlgmr.msra.gmra.mrb[0].mxu0 %v845_v62  ;;  %19540 = vmatmul.mubr.bf16.vlgmr.msra.gmra.mrb[0].mxu1 %v845_v62  ;;  %v26474_v62 = vld [vmem:[%s27350_s14 + $0x47e4] ss:$16 sps:$4 sm:$0xff]  }
 0x958   : > { %17868 = vmatpush1.bf16.msra.mxu0 %v26382_v1  ;;  %19549 = vmatpush1.bf16.msra.mxu1 %v26385_v5  ;;  %v26477_v1 = vld [vmem:[%s27350_s14 + $0x47ec] ss:$16 sps:$4 sm:$0xff]   ;;  %v30009_v5 = vrot.slane %v30001_v15, %v27416_v49 }
 0x959   : > { %17869 = vmatprep.subr.bf16.mxu0 %v26390_v19  ;;  %19550 = vmatprep.subr.bf16.mxu1 %v26393_v3  ;;  %v26472_v19 = vld [vmem:[%s27350_s14 + $0x47e0] ss:$16 sps:$4 sm:$0xff]   ;;  %v26475_v3 = vld [vmem:[%s27350_s14 + $0x47e8] ss:$16 sps:$4 sm:$0xff]  }
 0x95a   : > { %17899 = vmatprep.mubr.bf16.mxu0 %v848_v22  ;;  %19580 = vmatprep.mubr.bf16.mxu1 %v848_v22  ;;  %v26481_v22 = vld [vmem:[%s27350_s14 + $0x4804] ss:$16 sps:$4 sm:$0xff]  }
 0x95c   : > { %17870 = vmatpush1.bf16.msra.mxu0 %v26388_v55  ;;  %19551 = vmatpush1.bf16.msra.mxu1 %v26391_v6  ;;  %v26484_v55 = vld [vmem:[%s27350_s14 + $0x480c] ss:$16 sps:$4 sm:$0xff]   ;;  %v670_v6 = vcombine.high %v30009_v5, %v30009_v5 }
 0x95d   : > { %17871 = vmatprep.subr.bf16.mxu0 %v26396_v9  ;;  %19552 = vmatprep.subr.bf16.mxu1 %v26399_v58  ;;  %v847_v9 = vpack.c.bf16 %v29935_v14, %v29935_v14  ;;  %v26479_v58 = vld [vmem:[%s27350_s14 + $0x4800] ss:$16 sps:$4 sm:$0xff]  }
 0x95e   : > { %v26485_v14 = vld [vmem:[%s27350_s14 + $0x4820] ss:$16 sps:$4 sm:$0xff]  }
 0x960   : > { %17872 = vmatpush1.bf16.msra.mxu0 %v26394_v27  ;;  %19553 = vmatpush1.bf16.msra.mxu1 %v26397_v30  ;;  %v26482_v27 = vld [vmem:[%s27350_s14 + $0x4808] ss:$16 sps:$4 sm:$0xff]   ;;  %v26487_v30 = vld [vmem:[%s27350_s14 + $0x4824] ss:$16 sps:$4 sm:$0xff]  }
 0x961   : > { %17873 = vmatprep.subr.bf16.mxu0 %v26402_v10  ;;  %19554 = vmatprep.subr.bf16.mxu1 %v26405_v31  ;;  %v26490_v10 = vld [vmem:[%s27350_s14 + $0x482c] ss:$16 sps:$4 sm:$0xff]   ;;  %v850_v31 = vpack.c.bf16 %v670_v6, %v670_v6  ;;  %v26563_v6 = vld [vmem:[%s27350_s14 + $0x49c0] ss:$16 sps:$4 sm:$0xff]  }
 0x964   : > { %17874 = vmatpush1.bf16.msra.mxu0 %v26400_v17  ;;  %19555 = vmatpush1.bf16.msra.mxu1 %v26403_v13  ;;  %v26488_v17 = vld [vmem:[%s27350_s14 + $0x4828] ss:$16 sps:$4 sm:$0xff]   ;;  %v26493_v13 = vld [vmem:[%s27350_s14 + $0x4844] ss:$16 sps:$4 sm:$0xff]  }
 0x965   : > { %17875 = vmatprep.subr.bf16.mxu0 %v26408_v16  ;;  %19556 = vmatprep.subr.bf16.mxu1 %v26411_v20  ;;  %v26496_v16 = vld [vmem:[%s27350_s14 + $0x484c] ss:$16 sps:$4 sm:$0xff]   ;;  %v26491_v20 = vld [vmem:[%s27350_s14 + $0x4840] ss:$16 sps:$4 sm:$0xff]  }
 0x968   : > { %17876 = vmatpush1.bf16.msra.mxu0 %v26406_v26  ;;  %19557 = vmatpush1.bf16.msra.mxu1 %v26409_v18  ;;  %v26494_v26 = vld [vmem:[%s27350_s14 + $0x4848] ss:$16 sps:$4 sm:$0xff]   ;;  %v26499_v18 = vld [vmem:[%s27350_s14 + $0x4864] ss:$16 sps:$4 sm:$0xff]  }
 0x969   : > { %17877 = vmatprep.subr.bf16.mxu0 %v26414_v38  ;;  %19558 = vmatprep.subr.bf16.mxu1 %v26417_v21  ;;  %v26502_v38 = vld [vmem:[%s27350_s14 + $0x486c] ss:$16 sps:$4 sm:$0xff]   ;;  %v26497_v21 = vld [vmem:[%s27350_s14 + $0x4860] ss:$16 sps:$4 sm:$0xff]  }
 0x96c   : > { %17878 = vmatpush1.bf16.msra.mxu0 %v26412_v41  ;;  %19559 = vmatpush1.bf16.msra.mxu1 %v26415_v8  ;;  %v26500_v41 = vld [vmem:[%s27350_s14 + $0x4868] ss:$16 sps:$4 sm:$0xff]   ;;  %v26505_v8 = vld [vmem:[%s27350_s14 + $0x4884] ss:$16 sps:$4 sm:$0xff]  }
 0x96d   : > { %17879 = vmatprep.subr.bf16.mxu0 %v26420_v44  ;;  %19560 = vmatprep.subr.bf16.mxu1 %v26423_v25  ;;  %v26508_v44 = vld [vmem:[%s27350_s14 + $0x488c] ss:$16 sps:$4 sm:$0xff]   ;;  %v26503_v25 = vld [vmem:[%s27350_s14 + $0x4880] ss:$16 sps:$4 sm:$0xff]  }
 0x970   : > { %17880 = vmatpush1.bf16.msra.mxu0 %v26418_v23  ;;  %19561 = vmatpush1.bf16.msra.mxu1 %v26421_v46  ;;  %v26506_v23 = vld [vmem:[%s27350_s14 + $0x4888] ss:$16 sps:$4 sm:$0xff]   ;;  %v26511_v46 = vld [vmem:[%s27350_s14 + $0x48a4] ss:$16 sps:$4 sm:$0xff]  }
 0x971   : > { %17881 = vmatprep.subr.bf16.mxu0 %v26426_v34  ;;  %19562 = vmatprep.subr.bf16.mxu1 %v26429_v29  ;;  %v26514_v34 = vld [vmem:[%s27350_s14 + $0x48ac] ss:$16 sps:$4 sm:$0xff]   ;;  %v26509_v29 = vld [vmem:[%s27350_s14 + $0x48a0] ss:$16 sps:$4 sm:$0xff]  }
 0x974   : > { %17882 = vmatpush1.bf16.msra.mxu0 %v26424_v33  ;;  %19563 = vmatpush1.bf16.msra.mxu1 %v26427_v36  ;;  %v26512_v33 = vld [vmem:[%s27350_s14 + $0x48a8] ss:$16 sps:$4 sm:$0xff]   ;;  %v26517_v36 = vld [vmem:[%s27350_s14 + $0x48c4] ss:$16 sps:$4 sm:$0xff]  }
 0x975   : > { %17883 = vmatprep.subr.bf16.mxu0 %v26432_v32  ;;  %19564 = vmatprep.subr.bf16.mxu1 %v26435_v35  ;;  %v26520_v32 = vld [vmem:[%s27350_s14 + $0x48cc] ss:$16 sps:$4 sm:$0xff]   ;;  %v26515_v35 = vld [vmem:[%s27350_s14 + $0x48c0] ss:$16 sps:$4 sm:$0xff]  }
 0x978   : > { %17884 = vmatpush1.bf16.msra.mxu0 %v26430_v54  ;;  %19565 = vmatpush1.bf16.msra.mxu1 %v26433_v37  ;;  %v26518_v54 = vld [vmem:[%s27350_s14 + $0x48c8] ss:$16 sps:$4 sm:$0xff]   ;;  %v26523_v37 = vld [vmem:[%s27350_s14 + $0x48e4] ss:$16 sps:$4 sm:$0xff]  }
 0x979   : > { %17885 = vmatprep.subr.bf16.mxu0 %v26438_v57  ;;  %19566 = vmatprep.subr.bf16.mxu1 %v26441_v24  ;;  %v26526_v57 = vld [vmem:[%s27350_s14 + $0x48ec] ss:$16 sps:$4 sm:$0xff]   ;;  %v26521_v24 = vld [vmem:[%s27350_s14 + $0x48e0] ss:$16 sps:$4 sm:$0xff]  }
 0x97c   : > { %17886 = vmatpush1.bf16.msra.mxu0 %v26436_v40  ;;  %19567 = vmatpush1.bf16.msra.mxu1 %v26439_v60  ;;  %v26524_v40 = vld [vmem:[%s27350_s14 + $0x48e8] ss:$16 sps:$4 sm:$0xff]   ;;  %v26529_v60 = vld [vmem:[%s27350_s14 + $0x4904] ss:$16 sps:$4 sm:$0xff]  }
 0x97d   : > { %17887 = vmatprep.subr.bf16.mxu0 %v26444_v28  ;;  %19568 = vmatprep.subr.bf16.mxu1 %v26447_v61  ;;  %v26532_v28 = vld [vmem:[%s27350_s14 + $0x490c] ss:$16 sps:$4 sm:$0xff]   ;;  %v26527_v61 = vld [vmem:[%s27350_s14 + $0x4900] ss:$16 sps:$4 sm:$0xff]  }
 0x980   : > { %17888 = vmatpush1.bf16.msra.mxu0 %v26442_v50  ;;  %19569 = vmatpush1.bf16.msra.mxu1 %v26445_v45  ;;  %v26530_v50 = vld [vmem:[%s27350_s14 + $0x4908] ss:$16 sps:$4 sm:$0xff]   ;;  %v26535_v45 = vld [vmem:[%s27350_s14 + $0x4924] ss:$16 sps:$4 sm:$0xff]  }
 0x981   : > { %17889 = vmatprep.subr.bf16.mxu0 %v26450_v48  ;;  %19570 = vmatprep.subr.bf16.mxu1 %v26453_v52  ;;  %v26538_v48 = vld [vmem:[%s27350_s14 + $0x492c] ss:$16 sps:$4 sm:$0xff]   ;;  %v26533_v52 = vld [vmem:[%s27350_s14 + $0x4920] ss:$16 sps:$4 sm:$0xff]  }
 0x984   : > { %17890 = vmatpush1.bf16.msra.mxu0 %v26448_v47  ;;  %19571 = vmatpush1.bf16.msra.mxu1 %v26451_v51  ;;  %v26536_v47 = vld [vmem:[%s27350_s14 + $0x4928] ss:$16 sps:$4 sm:$0xff]   ;;  %v26541_v51 = vld [vmem:[%s27350_s14 + $0x4944] ss:$16 sps:$4 sm:$0xff]  }
 0x985   : > { %17891 = vmatprep.subr.bf16.mxu0 %v26456_v4  ;;  %19572 = vmatprep.subr.bf16.mxu1 %v26459_v53  ;;  %v26544_v4 = vld [vmem:[%s27350_s14 + $0x494c] ss:$16 sps:$4 sm:$0xff]   ;;  %v26539_v53 = vld [vmem:[%s27350_s14 + $0x4940] ss:$16 sps:$4 sm:$0xff]  }
 0x988   : > { %17892 = vmatpush1.bf16.msra.mxu0 %v26454_v7  ;;  %19573 = vmatpush1.bf16.msra.mxu1 %v26457_v39  ;;  %v26542_v7 = vld [vmem:[%s27350_s14 + $0x4948] ss:$16 sps:$4 sm:$0xff]   ;;  %v26547_v39 = vld [vmem:[%s27350_s14 + $0x4964] ss:$16 sps:$4 sm:$0xff]  }
 0x989   : > { %17893 = vmatprep.subr.bf16.mxu0 %v26462_v56  ;;  %19574 = vmatprep.subr.bf16.mxu1 %v26465_v11  ;;  %v26550_v56 = vld [vmem:[%s27350_s14 + $0x496c] ss:$16 sps:$4 sm:$0xff]   ;;  %v26545_v11 = vld [vmem:[%s27350_s14 + $0x4960] ss:$16 sps:$4 sm:$0xff]  }
 0x98c   : > { %17894 = vmatpush1.bf16.msra.mxu0 %v26460_v42  ;;  %19575 = vmatpush1.bf16.msra.mxu1 %v26463_v12  ;;  %v26548_v42 = vld [vmem:[%s27350_s14 + $0x4968] ss:$16 sps:$4 sm:$0xff]   ;;  %v26553_v12 = vld [vmem:[%s27350_s14 + $0x4984] ss:$16 sps:$4 sm:$0xff]  }
 0x98d   : > { %17895 = vmatprep.subr.bf16.mxu0 %v26468_v0  ;;  %19576 = vmatprep.subr.bf16.mxu1 %v26471_v59  ;;  %v26556_v0 = vld [vmem:[%s27350_s14 + $0x498c] ss:$16 sps:$4 sm:$0xff]   ;;  %v26551_v59 = vld [vmem:[%s27350_s14 + $0x4980] ss:$16 sps:$4 sm:$0xff]  }
 0x990   : > { %17896 = vmatpush1.bf16.msra.mxu0 %v26466_v63  ;;  %19577 = vmatpush1.bf16.msra.mxu1 %v26469_v2  ;;  %v26554_v63 = vld [vmem:[%s27350_s14 + $0x4988] ss:$16 sps:$4 sm:$0xff]   ;;  %v26559_v2 = vld [vmem:[%s27350_s14 + $0x49a4] ss:$16 sps:$4 sm:$0xff]  }
 0x991   : > { %17897 = vmatprep.subr.bf16.mxu0 %v26474_v62  ;;  %19578 = vmatprep.subr.bf16.mxu1 %v26477_v1  ;;  %v26562_v62 = vld [vmem:[%s27350_s14 + $0x49ac] ss:$16 sps:$4 sm:$0xff]   ;;  %v26557_v1 = vld [vmem:[%s27350_s14 + $0x49a0] ss:$16 sps:$4 sm:$0xff]  }
 0x994   : > { %17898 = vmatpush1.bf16.msra.mxu0 %v26472_v19  ;;  %19579 = vmatpush1.bf16.msra.mxu1 %v26475_v3  ;;  %v26560_v19 = vld [vmem:[%s27350_s14 + $0x49a8] ss:$16 sps:$4 sm:$0xff]   ;;  %v26565_v3 = vld [vmem:[%s27350_s14 + $0x49c4] ss:$16 sps:$4 sm:$0xff]  }
 0x995   : > { %17908 = vmatprep.subr.bf16.mxu0 %v26481_v22  ;;  %19589 = vmatprep.subr.bf16.mxu1 %v26484_v55  ;;  %v26568_v22 = vld [vmem:[%s27350_s14 + $0x49cc] ss:$16 sps:$4 sm:$0xff]   ;;  %v655_v55 = vcombine.high %v30001_v15, %v30001_v15  ;;  %v26569_v15 = vld [vmem:[%s27350_s14 + $0x49e0] ss:$16 sps:$4 sm:$0xff]  }
 0x997   : > { %17900 = vmatmul.mubr.bf16.vlgmr.msra.gmra.mrb[0].mxu0 %v847_v9  ;;  %19581 = vmatmul.mubr.bf16.vlgmr.msra.gmra.mrb[0].mxu1 %v847_v9  ;;  %v26566_v9 = vld [vmem:[%s27350_s14 + $0x49c8] ss:$16 sps:$4 sm:$0xff]  }
 0x998   : > { %17909 = vmatpush1.bf16.msra.mxu0 %v26479_v58  ;;  %19590 = vmatpush1.bf16.msra.mxu1 %v26482_v27  ;;  %v26571_v58 = vld [vmem:[%s27350_s14 + $0x49e4] ss:$16 sps:$4 sm:$0xff]   ;;  %v26574_v27 = vld [vmem:[%s27350_s14 + $0x49ec] ss:$16 sps:$4 sm:$0xff]  }
 0x999   : > { %17910 = vmatprep.subr.bf16.mxu0 %v26487_v30  ;;  %19591 = vmatprep.subr.bf16.mxu1 %v26490_v10  ;;  %v30082_v30 = vrot.slane %v655_v55, %v27416_v49  ;;  %v26572_v10 = vld [vmem:[%s27350_s14 + $0x49e8] ss:$16 sps:$4 sm:$0xff]  }
 0x99a   : > { %17940 = vmatprep.mubr.bf16.mxu0 %v850_v31  ;;  %19621 = vmatprep.mubr.bf16.mxu1 %v850_v31  ;;  %v26577_v31 = vld [vmem:[%s27350_s14 + $0x4a04] ss:$16 sps:$4 sm:$0xff]   ;;  %v26650_v55 = vld [vmem:[%s27350_s14 + $0x4b88] ss:$16 sps:$4 sm:$0xff]  }
 0x99c   : > { %17911 = vmatpush1.bf16.msra.mxu0 %v26485_v14  ;;  %19592 = vmatpush1.bf16.msra.mxu1 %v26488_v17  ;;  %v26580_v14 = vld [vmem:[%s27350_s14 + $0x4a0c] ss:$16 sps:$4 sm:$0xff]   ;;  %v671_v17 = vcombine.high %v30082_v30, %v30082_v30 }
 0x99d   : > { %17912 = vmatprep.subr.bf16.mxu0 %v26493_v13  ;;  %19593 = vmatprep.subr.bf16.mxu1 %v26496_v16  ;;  %v849_v13 = vpack.c.bf16 %v30009_v5, %v30009_v5  ;;  %v26575_v16 = vld [vmem:[%s27350_s14 + $0x4a00] ss:$16 sps:$4 sm:$0xff]  }
 0x99e   : > { %v26581_v5 = vld [vmem:[%s27350_s14 + $0x4a20] ss:$16 sps:$4 sm:$0xff]  }
 0x9a0   : > { %17913 = vmatpush1.bf16.msra.mxu0 %v26491_v20  ;;  %19594 = vmatpush1.bf16.msra.mxu1 %v26494_v26  ;;  %v26578_v20 = vld [vmem:[%s27350_s14 + $0x4a08] ss:$16 sps:$4 sm:$0xff]   ;;  %v26583_v26 = vld [vmem:[%s27350_s14 + $0x4a24] ss:$16 sps:$4 sm:$0xff]  }
 0x9a1   : > { %17914 = vmatprep.subr.bf16.mxu0 %v26499_v18  ;;  %19595 = vmatprep.subr.bf16.mxu1 %v26502_v38  ;;  %v26586_v18 = vld [vmem:[%s27350_s14 + $0x4a2c] ss:$16 sps:$4 sm:$0xff]   ;;  %v852_v38 = vpack.c.bf16 %v671_v17, %v671_v17  ;;  %v26662_v17 = vld [vmem:[%s27350_s14 + $0x4bc8] ss:$16 sps:$4 sm:$0xff]  }
 0x9a4   : > { %17915 = vmatpush1.bf16.msra.mxu0 %v26497_v21  ;;  %19596 = vmatpush1.bf16.msra.mxu1 %v26500_v41  ;;  %v26584_v21 = vld [vmem:[%s27350_s14 + $0x4a28] ss:$16 sps:$4 sm:$0xff]   ;;  %v26589_v41 = vld [vmem:[%s27350_s14 + $0x4a44] ss:$16 sps:$4 sm:$0xff]  }
 0x9a5   : > { %17916 = vmatprep.subr.bf16.mxu0 %v26505_v8  ;;  %19597 = vmatprep.subr.bf16.mxu1 %v26508_v44  ;;  %v26592_v8 = vld [vmem:[%s27350_s14 + $0x4a4c] ss:$16 sps:$4 sm:$0xff]   ;;  %v26587_v44 = vld [vmem:[%s27350_s14 + $0x4a40] ss:$16 sps:$4 sm:$0xff]  }
 0x9a8   : > { %17917 = vmatpush1.bf16.msra.mxu0 %v26503_v25  ;;  %19598 = vmatpush1.bf16.msra.mxu1 %v26506_v23  ;;  %v26590_v25 = vld [vmem:[%s27350_s14 + $0x4a48] ss:$16 sps:$4 sm:$0xff]   ;;  %v26595_v23 = vld [vmem:[%s27350_s14 + $0x4a64] ss:$16 sps:$4 sm:$0xff]  }
 0x9a9   : > { %17918 = vmatprep.subr.bf16.mxu0 %v26511_v46  ;;  %19599 = vmatprep.subr.bf16.mxu1 %v26514_v34  ;;  %v26598_v46 = vld [vmem:[%s27350_s14 + $0x4a6c] ss:$16 sps:$4 sm:$0xff]   ;;  %v26593_v34 = vld [vmem:[%s27350_s14 + $0x4a60] ss:$16 sps:$4 sm:$0xff]  }
 0x9ac   : > { %17919 = vmatpush1.bf16.msra.mxu0 %v26509_v29  ;;  %19600 = vmatpush1.bf16.msra.mxu1 %v26512_v33  ;;  %v26596_v29 = vld [vmem:[%s27350_s14 + $0x4a68] ss:$16 sps:$4 sm:$0xff]   ;;  %v26601_v33 = vld [vmem:[%s27350_s14 + $0x4a84] ss:$16 sps:$4 sm:$0xff]  }
 0x9ad   : > { %17920 = vmatprep.subr.bf16.mxu0 %v26517_v36  ;;  %19601 = vmatprep.subr.bf16.mxu1 %v26520_v32  ;;  %v26604_v36 = vld [vmem:[%s27350_s14 + $0x4a8c] ss:$16 sps:$4 sm:$0xff]   ;;  %v26599_v32 = vld [vmem:[%s27350_s14 + $0x4a80] ss:$16 sps:$4 sm:$0xff]  }
 0x9b0   : > { %17921 = vmatpush1.bf16.msra.mxu0 %v26515_v35  ;;  %19602 = vmatpush1.bf16.msra.mxu1 %v26518_v54  ;;  %v26602_v35 = vld [vmem:[%s27350_s14 + $0x4a88] ss:$16 sps:$4 sm:$0xff]   ;;  %v26607_v54 = vld [vmem:[%s27350_s14 + $0x4aa4] ss:$16 sps:$4 sm:$0xff]  }
 0x9b1   : > { %17922 = vmatprep.subr.bf16.mxu0 %v26523_v37  ;;  %19603 = vmatprep.subr.bf16.mxu1 %v26526_v57  ;;  %v26610_v37 = vld [vmem:[%s27350_s14 + $0x4aac] ss:$16 sps:$4 sm:$0xff]   ;;  %v26605_v57 = vld [vmem:[%s27350_s14 + $0x4aa0] ss:$16 sps:$4 sm:$0xff]  }
 0x9b4   : > { %17923 = vmatpush1.bf16.msra.mxu0 %v26521_v24  ;;  %19604 = vmatpush1.bf16.msra.mxu1 %v26524_v40  ;;  %v26608_v24 = vld [vmem:[%s27350_s14 + $0x4aa8] ss:$16 sps:$4 sm:$0xff]   ;;  %v26613_v40 = vld [vmem:[%s27350_s14 + $0x4ac4] ss:$16 sps:$4 sm:$0xff]  }
 0x9b5   : > { %17924 = vmatprep.subr.bf16.mxu0 %v26529_v60  ;;  %19605 = vmatprep.subr.bf16.mxu1 %v26532_v28  ;;  %v26616_v60 = vld [vmem:[%s27350_s14 + $0x4acc] ss:$16 sps:$4 sm:$0xff]   ;;  %v26611_v28 = vld [vmem:[%s27350_s14 + $0x4ac0] ss:$16 sps:$4 sm:$0xff]  }
 0x9b8   : > { %17925 = vmatpush1.bf16.msra.mxu0 %v26527_v61  ;;  %19606 = vmatpush1.bf16.msra.mxu1 %v26530_v50  ;;  %v26614_v61 = vld [vmem:[%s27350_s14 + $0x4ac8] ss:$16 sps:$4 sm:$0xff]   ;;  %v26619_v50 = vld [vmem:[%s27350_s14 + $0x4ae4] ss:$16 sps:$4 sm:$0xff]  }
 0x9b9   : > { %17926 = vmatprep.subr.bf16.mxu0 %v26535_v45  ;;  %19607 = vmatprep.subr.bf16.mxu1 %v26538_v48  ;;  %v26622_v45 = vld [vmem:[%s27350_s14 + $0x4aec] ss:$16 sps:$4 sm:$0xff]   ;;  %v26617_v48 = vld [vmem:[%s27350_s14 + $0x4ae0] ss:$16 sps:$4 sm:$0xff]  }
 0x9bc   : > { %17927 = vmatpush1.bf16.msra.mxu0 %v26533_v52  ;;  %19608 = vmatpush1.bf16.msra.mxu1 %v26536_v47  ;;  %v26620_v52 = vld [vmem:[%s27350_s14 + $0x4ae8] ss:$16 sps:$4 sm:$0xff]   ;;  %v26625_v47 = vld [vmem:[%s27350_s14 + $0x4b04] ss:$16 sps:$4 sm:$0xff]  }
 0x9bd   : > { %17928 = vmatprep.subr.bf16.mxu0 %v26541_v51  ;;  %19609 = vmatprep.subr.bf16.mxu1 %v26544_v4  ;;  %v26628_v51 = vld [vmem:[%s27350_s14 + $0x4b0c] ss:$16 sps:$4 sm:$0xff]   ;;  %v26623_v4 = vld [vmem:[%s27350_s14 + $0x4b00] ss:$16 sps:$4 sm:$0xff]  }
 0x9c0   : > { %17929 = vmatpush1.bf16.msra.mxu0 %v26539_v53  ;;  %19610 = vmatpush1.bf16.msra.mxu1 %v26542_v7  ;;  %v26626_v53 = vld [vmem:[%s27350_s14 + $0x4b08] ss:$16 sps:$4 sm:$0xff]   ;;  %v26631_v7 = vld [vmem:[%s27350_s14 + $0x4b24] ss:$16 sps:$4 sm:$0xff]  }
 0x9c1   : > { %17930 = vmatprep.subr.bf16.mxu0 %v26547_v39  ;;  %19611 = vmatprep.subr.bf16.mxu1 %v26550_v56  ;;  %v26634_v39 = vld [vmem:[%s27350_s14 + $0x4b2c] ss:$16 sps:$4 sm:$0xff]   ;;  %v26629_v56 = vld [vmem:[%s27350_s14 + $0x4b20] ss:$16 sps:$4 sm:$0xff]  }
 0x9c4   : > { %17931 = vmatpush1.bf16.msra.mxu0 %v26545_v11  ;;  %19612 = vmatpush1.bf16.msra.mxu1 %v26548_v42  ;;  %v26632_v11 = vld [vmem:[%s27350_s14 + $0x4b28] ss:$16 sps:$4 sm:$0xff]   ;;  %v26637_v42 = vld [vmem:[%s27350_s14 + $0x4b44] ss:$16 sps:$4 sm:$0xff]  }
 0x9c5   : > { %17932 = vmatprep.subr.bf16.mxu0 %v26553_v12  ;;  %19613 = vmatprep.subr.bf16.mxu1 %v26556_v0  ;;  %v26640_v12 = vld [vmem:[%s27350_s14 + $0x4b4c] ss:$16 sps:$4 sm:$0xff]   ;;  %v26635_v0 = vld [vmem:[%s27350_s14 + $0x4b40] ss:$16 sps:$4 sm:$0xff]  }
 0x9c8   : > { %17933 = vmatpush1.bf16.msra.mxu0 %v26551_v59  ;;  %19614 = vmatpush1.bf16.msra.mxu1 %v26554_v63  ;;  %v26638_v59 = vld [vmem:[%s27350_s14 + $0x4b48] ss:$16 sps:$4 sm:$0xff]   ;;  %v26643_v63 = vld [vmem:[%s27350_s14 + $0x4b64] ss:$16 sps:$4 sm:$0xff]  }
 0x9c9   : > { %17934 = vmatprep.subr.bf16.mxu0 %v26559_v2  ;;  %19615 = vmatprep.subr.bf16.mxu1 %v26562_v62  ;;  %v26646_v2 = vld [vmem:[%s27350_s14 + $0x4b6c] ss:$16 sps:$4 sm:$0xff]   ;;  %v26641_v62 = vld [vmem:[%s27350_s14 + $0x4b60] ss:$16 sps:$4 sm:$0xff]  }
 0x9cc   : > { %17935 = vmatpush1.bf16.msra.mxu0 %v26557_v1  ;;  %19616 = vmatpush1.bf16.msra.mxu1 %v26560_v19  ;;  %v26644_v1 = vld [vmem:[%s27350_s14 + $0x4b68] ss:$16 sps:$4 sm:$0xff]   ;;  %v26649_v19 = vld [vmem:[%s27350_s14 + $0x4b84] ss:$16 sps:$4 sm:$0xff]  }
 0x9cd   : > { %17936 = vmatprep.subr.bf16.mxu0 %v26565_v3  ;;  %19617 = vmatprep.subr.bf16.mxu1 %v26568_v22  ;;  %v26652_v3 = vld [vmem:[%s27350_s14 + $0x4b8c] ss:$16 sps:$4 sm:$0xff]   ;;  %v26647_v22 = vld [vmem:[%s27350_s14 + $0x4b80] ss:$16 sps:$4 sm:$0xff]  }
 0x9d0   : > { %17937 = vmatpush1.bf16.msra.mxu0 %v26563_v6  ;;  %19618 = vmatpush1.bf16.msra.mxu1 %v26566_v9  ;;  %v26655_v6 = vld [vmem:[%s27350_s14 + $0x4ba4] ss:$16 sps:$4 sm:$0xff]   ;;  %v26658_v9 = vld [vmem:[%s27350_s14 + $0x4bac] ss:$16 sps:$4 sm:$0xff]  }
 0x9d1   : > { %17938 = vmatprep.subr.bf16.mxu0 %v26571_v58  ;;  %19619 = vmatprep.subr.bf16.mxu1 %v26574_v27  ;;  %v26653_v58 = vld [vmem:[%s27350_s14 + $0x4ba0] ss:$16 sps:$4 sm:$0xff]   ;;  %v26656_v27 = vld [vmem:[%s27350_s14 + $0x4ba8] ss:$16 sps:$4 sm:$0xff]  }
 0x9d4   : > { %17939 = vmatpush1.bf16.msra.mxu0 %v26569_v15  ;;  %19620 = vmatpush1.bf16.msra.mxu1 %v26572_v10  ;;  %v26661_v15 = vld [vmem:[%s27350_s14 + $0x4bc4] ss:$16 sps:$4 sm:$0xff]   ;;  %v26664_v10 = vld [vmem:[%s27350_s14 + $0x4bcc] ss:$16 sps:$4 sm:$0xff]  }
 0x9d5   : > { %17949 = vmatprep.subr.bf16.mxu0 %v26577_v31  ;;  %19630 = vmatprep.subr.bf16.mxu1 %v26580_v14  ;;  %v30148_v31 = vld [vmem:[#allocation2 + $0x98] sm:$0xff]  ;;  %v26659_v14 = vld [vmem:[%s27350_s14 + $0x4bc0] ss:$16 sps:$4 sm:$0xff]  }
 0x9d7   : > { %17941 = vmatmul.mubr.bf16.vlgmr.msra.gmra.mrb[0].mxu0 %v849_v13  ;;  %19622 = vmatmul.mubr.bf16.vlgmr.msra.gmra.mrb[0].mxu1 %v849_v13  ;;  %v26667_v13 = vld [vmem:[%s27350_s14 + $0x4be4] ss:$16 sps:$4 sm:$0xff]  }
 0x9d8   : > { %17950 = vmatpush1.bf16.msra.mxu0 %v26575_v16  ;;  %19631 = vmatpush1.bf16.msra.mxu1 %v26578_v20  ;;  %v26670_v16 = vld [vmem:[%s27350_s14 + $0x4bec] ss:$16 sps:$4 sm:$0xff]   ;;  %v30156_v20 = vrot.slane %v30148_v31, %v27416_v49 }
 0x9d9   : > { %17951 = vmatprep.subr.bf16.mxu0 %v26583_v26  ;;  %19632 = vmatprep.subr.bf16.mxu1 %v26586_v18  ;;  %v26665_v26 = vld [vmem:[%s27350_s14 + $0x4be0] ss:$16 sps:$4 sm:$0xff]   ;;  %v26668_v18 = vld [vmem:[%s27350_s14 + $0x4be8] ss:$16 sps:$4 sm:$0xff]  }
 0x9da   : > { %17981 = vmatprep.mubr.bf16.mxu0 %v852_v38  ;;  %19662 = vmatprep.mubr.bf16.mxu1 %v852_v38  ;;  %v26674_v38 = vld [vmem:[%s27350_s14 + $0x4c04] ss:$16 sps:$4 sm:$0xff]  }
 0x9dc   : > { %17952 = vmatpush1.bf16.msra.mxu0 %v26581_v5  ;;  %19633 = vmatpush1.bf16.msra.mxu1 %v26584_v21  ;;  %v26677_v5 = vld [vmem:[%s27350_s14 + $0x4c0c] ss:$16 sps:$4 sm:$0xff]   ;;  %v687_v21 = vcombine.high %v30156_v20, %v30156_v20 }
 0x9dd   : > { %17953 = vmatprep.subr.bf16.mxu0 %v26589_v41  ;;  %19634 = vmatprep.subr.bf16.mxu1 %v26592_v8  ;;  %v851_v41 = vpack.c.bf16 %v30082_v30, %v30082_v30  ;;  %v26672_v8 = vld [vmem:[%s27350_s14 + $0x4c00] ss:$16 sps:$4 sm:$0xff]  }
 0x9de   : > { %v26678_v30 = vld [vmem:[%s27350_s14 + $0x4c20] ss:$16 sps:$4 sm:$0xff]  }
 0x9e0   : > { %17954 = vmatpush1.bf16.msra.mxu0 %v26587_v44  ;;  %19635 = vmatpush1.bf16.msra.mxu1 %v26590_v25  ;;  %v26675_v44 = vld [vmem:[%s27350_s14 + $0x4c08] ss:$16 sps:$4 sm:$0xff]   ;;  %v26680_v25 = vld [vmem:[%s27350_s14 + $0x4c24] ss:$16 sps:$4 sm:$0xff]  }
 0x9e1   : > { %17955 = vmatprep.subr.bf16.mxu0 %v26595_v23  ;;  %19636 = vmatprep.subr.bf16.mxu1 %v26598_v46  ;;  %v26683_v23 = vld [vmem:[%s27350_s14 + $0x4c2c] ss:$16 sps:$4 sm:$0xff]   ;;  %v854_v46 = vpack.c.bf16 %v687_v21, %v687_v21  ;;  %v26756_v21 = vld [vmem:[%s27350_s14 + $0x4dc0] ss:$16 sps:$4 sm:$0xff]  }
 0x9e4   : > { %17956 = vmatpush1.bf16.msra.mxu0 %v26593_v34  ;;  %19637 = vmatpush1.bf16.msra.mxu1 %v26596_v29  ;;  %v26681_v34 = vld [vmem:[%s27350_s14 + $0x4c28] ss:$16 sps:$4 sm:$0xff]   ;;  %v26686_v29 = vld [vmem:[%s27350_s14 + $0x4c44] ss:$16 sps:$4 sm:$0xff]  }
 0x9e5   : > { %17957 = vmatprep.subr.bf16.mxu0 %v26601_v33  ;;  %19638 = vmatprep.subr.bf16.mxu1 %v26604_v36  ;;  %v26689_v33 = vld [vmem:[%s27350_s14 + $0x4c4c] ss:$16 sps:$4 sm:$0xff]   ;;  %v26684_v36 = vld [vmem:[%s27350_s14 + $0x4c40] ss:$16 sps:$4 sm:$0xff]  }
 0x9e8   : > { %17958 = vmatpush1.bf16.msra.mxu0 %v26599_v32  ;;  %19639 = vmatpush1.bf16.msra.mxu1 %v26602_v35  ;;  %v26687_v32 = vld [vmem:[%s27350_s14 + $0x4c48] ss:$16 sps:$4 sm:$0xff]   ;;  %v26692_v35 = vld [vmem:[%s27350_s14 + $0x4c64] ss:$16 sps:$4 sm:$0xff]  }
 0x9e9   : > { %17959 = vmatprep.subr.bf16.mxu0 %v26607_v54  ;;  %19640 = vmatprep.subr.bf16.mxu1 %v26610_v37  ;;  %v26695_v54 = vld [vmem:[%s27350_s14 + $0x4c6c] ss:$16 sps:$4 sm:$0xff]   ;;  %v26690_v37 = vld [vmem:[%s27350_s14 + $0x4c60] ss:$16 sps:$4 sm:$0xff]  }
 0x9ec   : > { %17960 = vmatpush1.bf16.msra.mxu0 %v26605_v57  ;;  %19641 = vmatpush1.bf16.msra.mxu1 %v26608_v24  ;;  %v26693_v57 = vld [vmem:[%s27350_s14 + $0x4c68] ss:$16 sps:$4 sm:$0xff]   ;;  %v26698_v24 = vld [vmem:[%s27350_s14 + $0x4c84] ss:$16 sps:$4 sm:$0xff]  }
 0x9ed   : > { %17961 = vmatprep.subr.bf16.mxu0 %v26613_v40  ;;  %19642 = vmatprep.subr.bf16.mxu1 %v26616_v60  ;;  %v26701_v40 = vld [vmem:[%s27350_s14 + $0x4c8c] ss:$16 sps:$4 sm:$0xff]   ;;  %v26696_v60 = vld [vmem:[%s27350_s14 + $0x4c80] ss:$16 sps:$4 sm:$0xff]  }
 0x9f0   : > { %17962 = vmatpush1.bf16.msra.mxu0 %v26611_v28  ;;  %19643 = vmatpush1.bf16.msra.mxu1 %v26614_v61  ;;  %v26699_v28 = vld [vmem:[%s27350_s14 + $0x4c88] ss:$16 sps:$4 sm:$0xff]   ;;  %v26704_v61 = vld [vmem:[%s27350_s14 + $0x4ca4] ss:$16 sps:$4 sm:$0xff]  }
 0x9f1   : > { %17963 = vmatprep.subr.bf16.mxu0 %v26619_v50  ;;  %19644 = vmatprep.subr.bf16.mxu1 %v26622_v45  ;;  %v26707_v50 = vld [vmem:[%s27350_s14 + $0x4cac] ss:$16 sps:$4 sm:$0xff]   ;;  %v26702_v45 = vld [vmem:[%s27350_s14 + $0x4ca0] ss:$16 sps:$4 sm:$0xff]  }
 0x9f4   : > { %17964 = vmatpush1.bf16.msra.mxu0 %v26617_v48  ;;  %19645 = vmatpush1.bf16.msra.mxu1 %v26620_v52  ;;  %v26705_v48 = vld [vmem:[%s27350_s14 + $0x4ca8] ss:$16 sps:$4 sm:$0xff]   ;;  %v26710_v52 = vld [vmem:[%s27350_s14 + $0x4cc4] ss:$16 sps:$4 sm:$0xff]  }
 0x9f5   : > { %17965 = vmatprep.subr.bf16.mxu0 %v26625_v47  ;;  %19646 = vmatprep.subr.bf16.mxu1 %v26628_v51  ;;  %v26713_v47 = vld [vmem:[%s27350_s14 + $0x4ccc] ss:$16 sps:$4 sm:$0xff]   ;;  %v26708_v51 = vld [vmem:[%s27350_s14 + $0x4cc0] ss:$16 sps:$4 sm:$0xff]  }
 0x9f8   : > { %17966 = vmatpush1.bf16.msra.mxu0 %v26623_v4  ;;  %19647 = vmatpush1.bf16.msra.mxu1 %v26626_v53  ;;  %v26711_v4 = vld [vmem:[%s27350_s14 + $0x4cc8] ss:$16 sps:$4 sm:$0xff]   ;;  %v26716_v53 = vld [vmem:[%s27350_s14 + $0x4ce4] ss:$16 sps:$4 sm:$0xff]  }
 0x9f9   : > { %17967 = vmatprep.subr.bf16.mxu0 %v26631_v7  ;;  %19648 = vmatprep.subr.bf16.mxu1 %v26634_v39  ;;  %v26719_v7 = vld [vmem:[%s27350_s14 + $0x4cec] ss:$16 sps:$4 sm:$0xff]   ;;  %v26714_v39 = vld [vmem:[%s27350_s14 + $0x4ce0] ss:$16 sps:$4 sm:$0xff]  }
 0x9fc   : > { %17968 = vmatpush1.bf16.msra.mxu0 %v26629_v56  ;;  %19649 = vmatpush1.bf16.msra.mxu1 %v26632_v11  ;;  %v26717_v56 = vld [vmem:[%s27350_s14 + $0x4ce8] ss:$16 sps:$4 sm:$0xff]   ;;  %v26722_v11 = vld [vmem:[%s27350_s14 + $0x4d04] ss:$16 sps:$4 sm:$0xff]  }
 0x9fd   : > { %17969 = vmatprep.subr.bf16.mxu0 %v26637_v42  ;;  %19650 = vmatprep.subr.bf16.mxu1 %v26640_v12  ;;  %v26725_v42 = vld [vmem:[%s27350_s14 + $0x4d0c] ss:$16 sps:$4 sm:$0xff]   ;;  %v26720_v12 = vld [vmem:[%s27350_s14 + $0x4d00] ss:$16 sps:$4 sm:$0xff]  }
 0xa00   : > { %17970 = vmatpush1.bf16.msra.mxu0 %v26635_v0  ;;  %19651 = vmatpush1.bf16.msra.mxu1 %v26638_v59  ;;  %v26723_v0 = vld [vmem:[%s27350_s14 + $0x4d08] ss:$16 sps:$4 sm:$0xff]   ;;  %v26728_v59 = vld [vmem:[%s27350_s14 + $0x4d24] ss:$16 sps:$4 sm:$0xff]  }
 0xa01   : > { %17971 = vmatprep.subr.bf16.mxu0 %v26643_v63  ;;  %19652 = vmatprep.subr.bf16.mxu1 %v26646_v2  ;;  %v26731_v63 = vld [vmem:[%s27350_s14 + $0x4d2c] ss:$16 sps:$4 sm:$0xff]   ;;  %v26726_v2 = vld [vmem:[%s27350_s14 + $0x4d20] ss:$16 sps:$4 sm:$0xff]  }
 0xa04   : > { %17972 = vmatpush1.bf16.msra.mxu0 %v26641_v62  ;;  %19653 = vmatpush1.bf16.msra.mxu1 %v26644_v1  ;;  %v26729_v62 = vld [vmem:[%s27350_s14 + $0x4d28] ss:$16 sps:$4 sm:$0xff]   ;;  %v26734_v1 = vld [vmem:[%s27350_s14 + $0x4d44] ss:$16 sps:$4 sm:$0xff]  }
 0xa05   : > { %17973 = vmatprep.subr.bf16.mxu0 %v26649_v19  ;;  %19654 = vmatprep.subr.bf16.mxu1 %v26652_v3  ;;  %v26737_v19 = vld [vmem:[%s27350_s14 + $0x4d4c] ss:$16 sps:$4 sm:$0xff]   ;;  %v26732_v3 = vld [vmem:[%s27350_s14 + $0x4d40] ss:$16 sps:$4 sm:$0xff]  }
 0xa08   : > { %17974 = vmatpush1.bf16.msra.mxu0 %v26647_v22  ;;  %19655 = vmatpush1.bf16.msra.mxu1 %v26650_v55  ;;  %v26735_v22 = vld [vmem:[%s27350_s14 + $0x4d48] ss:$16 sps:$4 sm:$0xff]   ;;  %v26740_v55 = vld [vmem:[%s27350_s14 + $0x4d64] ss:$16 sps:$4 sm:$0xff]  }
 0xa09   : > { %17975 = vmatprep.subr.bf16.mxu0 %v26655_v6  ;;  %19656 = vmatprep.subr.bf16.mxu1 %v26658_v9  ;;  %v26743_v6 = vld [vmem:[%s27350_s14 + $0x4d6c] ss:$16 sps:$4 sm:$0xff]   ;;  %v26738_v9 = vld [vmem:[%s27350_s14 + $0x4d60] ss:$16 sps:$4 sm:$0xff]  }
 0xa0c   : > { %17976 = vmatpush1.bf16.msra.mxu0 %v26653_v58  ;;  %19657 = vmatpush1.bf16.msra.mxu1 %v26656_v27  ;;  %v26741_v58 = vld [vmem:[%s27350_s14 + $0x4d68] ss:$16 sps:$4 sm:$0xff]   ;;  %v26746_v27 = vld [vmem:[%s27350_s14 + $0x4d84] ss:$16 sps:$4 sm:$0xff]  }
 0xa0d   : > { %17977 = vmatprep.subr.bf16.mxu0 %v26661_v15  ;;  %19658 = vmatprep.subr.bf16.mxu1 %v26664_v10  ;;  %v26749_v15 = vld [vmem:[%s27350_s14 + $0x4d8c] ss:$16 sps:$4 sm:$0xff]   ;;  %v26744_v10 = vld [vmem:[%s27350_s14 + $0x4d80] ss:$16 sps:$4 sm:$0xff]  }
 0xa10   : > { %17978 = vmatpush1.bf16.msra.mxu0 %v26659_v14  ;;  %19659 = vmatpush1.bf16.msra.mxu1 %v26662_v17  ;;  %v26747_v14 = vld [vmem:[%s27350_s14 + $0x4d88] ss:$16 sps:$4 sm:$0xff]   ;;  %v26752_v17 = vld [vmem:[%s27350_s14 + $0x4da4] ss:$16 sps:$4 sm:$0xff]  }
 0xa11   : > { %17979 = vmatprep.subr.bf16.mxu0 %v26667_v13  ;;  %19660 = vmatprep.subr.bf16.mxu1 %v26670_v16  ;;  %v26755_v13 = vld [vmem:[%s27350_s14 + $0x4dac] ss:$16 sps:$4 sm:$0xff]   ;;  %v26750_v16 = vld [vmem:[%s27350_s14 + $0x4da0] ss:$16 sps:$4 sm:$0xff]  }
 0xa14   : > { %17980 = vmatpush1.bf16.msra.mxu0 %v26665_v26  ;;  %19661 = vmatpush1.bf16.msra.mxu1 %v26668_v18  ;;  %v26753_v26 = vld [vmem:[%s27350_s14 + $0x4da8] ss:$16 sps:$4 sm:$0xff]   ;;  %v26758_v18 = vld [vmem:[%s27350_s14 + $0x4dc4] ss:$16 sps:$4 sm:$0xff]  }
 0xa15   : > { %17990 = vmatprep.subr.bf16.mxu0 %v26674_v38  ;;  %19671 = vmatprep.subr.bf16.mxu1 %v26677_v5  ;;  %v26761_v38 = vld [vmem:[%s27350_s14 + $0x4dcc] ss:$16 sps:$4 sm:$0xff]   ;;  %v672_v5 = vcombine.high %v30148_v31, %v30148_v31  ;;  %v26762_v31 = vld [vmem:[%s27350_s14 + $0x4de0] ss:$16 sps:$4 sm:$0xff]  }
 0xa17   : > { %17982 = vmatmul.mubr.bf16.vlgmr.msra.gmra.mrb[0].mxu0 %v851_v41  ;;  %19663 = vmatmul.mubr.bf16.vlgmr.msra.gmra.mrb[0].mxu1 %v851_v41  ;;  %v26759_v41 = vld [vmem:[%s27350_s14 + $0x4dc8] ss:$16 sps:$4 sm:$0xff]  }
 0xa18   : > { %17991 = vmatpush1.bf16.msra.mxu0 %v26672_v8  ;;  %19672 = vmatpush1.bf16.msra.mxu1 %v26675_v44  ;;  %v26764_v8 = vld [vmem:[%s27350_s14 + $0x4de4] ss:$16 sps:$4 sm:$0xff]   ;;  %v26767_v44 = vld [vmem:[%s27350_s14 + $0x4dec] ss:$16 sps:$4 sm:$0xff]  }
 0xa19   : > { %17992 = vmatprep.subr.bf16.mxu0 %v26680_v25  ;;  %19673 = vmatprep.subr.bf16.mxu1 %v26683_v23  ;;  %v30229_v25 = vrot.slane %v672_v5, %v27416_v49  ;;  %v26765_v23 = vld [vmem:[%s27350_s14 + $0x4de8] ss:$16 sps:$4 sm:$0xff]  }
 0xa1a   : > { %18022 = vmatprep.mubr.bf16.mxu0 %v854_v46  ;;  %19703 = vmatprep.mubr.bf16.mxu1 %v854_v46  ;;  %v26770_v46 = vld [vmem:[%s27350_s14 + $0x4e04] ss:$16 sps:$4 sm:$0xff]   ;;  %v26843_v5 = vld [vmem:[%s27350_s14 + $0x4f88] ss:$16 sps:$4 sm:$0xff]  }
 0xa1c   : > { %17993 = vmatpush1.bf16.msra.mxu0 %v26678_v30  ;;  %19674 = vmatpush1.bf16.msra.mxu1 %v26681_v34  ;;  %v26773_v30 = vld [vmem:[%s27350_s14 + $0x4e0c] ss:$16 sps:$4 sm:$0xff]   ;;  %v688_v34 = vcombine.high %v30229_v25, %v30229_v25 }
 0xa1d   : > { %17994 = vmatprep.subr.bf16.mxu0 %v26686_v29  ;;  %19675 = vmatprep.subr.bf16.mxu1 %v26689_v33  ;;  %v853_v29 = vpack.c.bf16 %v30156_v20, %v30156_v20  ;;  %v26768_v33 = vld [vmem:[%s27350_s14 + $0x4e00] ss:$16 sps:$4 sm:$0xff]  }
 0xa1e   : > { %v26774_v20 = vld [vmem:[%s27350_s14 + $0x4e20] ss:$16 sps:$4 sm:$0xff]  }
 0xa20   : > { %17995 = vmatpush1.bf16.msra.mxu0 %v26684_v36  ;;  %19676 = vmatpush1.bf16.msra.mxu1 %v26687_v32  ;;  %v26771_v36 = vld [vmem:[%s27350_s14 + $0x4e08] ss:$16 sps:$4 sm:$0xff]   ;;  %v26776_v32 = vld [vmem:[%s27350_s14 + $0x4e24] ss:$16 sps:$4 sm:$0xff]  }
 0xa21   : > { %17996 = vmatprep.subr.bf16.mxu0 %v26692_v35  ;;  %19677 = vmatprep.subr.bf16.mxu1 %v26695_v54  ;;  %v26779_v35 = vld [vmem:[%s27350_s14 + $0x4e2c] ss:$16 sps:$4 sm:$0xff]   ;;  %v856_v54 = vpack.c.bf16 %v688_v34, %v688_v34  ;;  %v26860_v34 = vld [vmem:[%s27350_s14 + $0x4fe4] ss:$16 sps:$4 sm:$0xff]  }
 0xa24   : > { %17997 = vmatpush1.bf16.msra.mxu0 %v26690_v37  ;;  %19678 = vmatpush1.bf16.msra.mxu1 %v26693_v57  ;;  %v26777_v37 = vld [vmem:[%s27350_s14 + $0x4e28] ss:$16 sps:$4 sm:$0xff]   ;;  %v26782_v57 = vld [vmem:[%s27350_s14 + $0x4e44] ss:$16 sps:$4 sm:$0xff]  }
 0xa25   : > { %17998 = vmatprep.subr.bf16.mxu0 %v26698_v24  ;;  %19679 = vmatprep.subr.bf16.mxu1 %v26701_v40  ;;  %v26785_v24 = vld [vmem:[%s27350_s14 + $0x4e4c] ss:$16 sps:$4 sm:$0xff]   ;;  %v26780_v40 = vld [vmem:[%s27350_s14 + $0x4e40] ss:$16 sps:$4 sm:$0xff]  }
 0xa28   : > { %17999 = vmatpush1.bf16.msra.mxu0 %v26696_v60  ;;  %19680 = vmatpush1.bf16.msra.mxu1 %v26699_v28  ;;  %v26783_v60 = vld [vmem:[%s27350_s14 + $0x4e48] ss:$16 sps:$4 sm:$0xff]   ;;  %v26788_v28 = vld [vmem:[%s27350_s14 + $0x4e64] ss:$16 sps:$4 sm:$0xff]  }
 0xa29   : > { %18000 = vmatprep.subr.bf16.mxu0 %v26704_v61  ;;  %19681 = vmatprep.subr.bf16.mxu1 %v26707_v50  ;;  %v26791_v61 = vld [vmem:[%s27350_s14 + $0x4e6c] ss:$16 sps:$4 sm:$0xff]   ;;  %v26786_v50 = vld [vmem:[%s27350_s14 + $0x4e60] ss:$16 sps:$4 sm:$0xff]  }
 0xa2c   : > { %18001 = vmatpush1.bf16.msra.mxu0 %v26702_v45  ;;  %19682 = vmatpush1.bf16.msra.mxu1 %v26705_v48  ;;  %v26789_v45 = vld [vmem:[%s27350_s14 + $0x4e68] ss:$16 sps:$4 sm:$0xff]   ;;  %v26794_v48 = vld [vmem:[%s27350_s14 + $0x4e84] ss:$16 sps:$4 sm:$0xff]  }
 0xa2d   : > { %18002 = vmatprep.subr.bf16.mxu0 %v26710_v52  ;;  %19683 = vmatprep.subr.bf16.mxu1 %v26713_v47  ;;  %v26797_v52 = vld [vmem:[%s27350_s14 + $0x4e8c] ss:$16 sps:$4 sm:$0xff]   ;;  %v26792_v47 = vld [vmem:[%s27350_s14 + $0x4e80] ss:$16 sps:$4 sm:$0xff]  }
 0xa30   : > { %18003 = vmatpush1.bf16.msra.mxu0 %v26708_v51  ;;  %19684 = vmatpush1.bf16.msra.mxu1 %v26711_v4  ;;  %v26795_v51 = vld [vmem:[%s27350_s14 + $0x4e88] ss:$16 sps:$4 sm:$0xff]   ;;  %v26800_v4 = vld [vmem:[%s27350_s14 + $0x4ea4] ss:$16 sps:$4 sm:$0xff]  }
 0xa31   : > { %18004 = vmatprep.subr.bf16.mxu0 %v26716_v53  ;;  %19685 = vmatprep.subr.bf16.mxu1 %v26719_v7  ;;  %v26803_v53 = vld [vmem:[%s27350_s14 + $0x4eac] ss:$16 sps:$4 sm:$0xff]   ;;  %v26798_v7 = vld [vmem:[%s27350_s14 + $0x4ea0] ss:$16 sps:$4 sm:$0xff]  }
 0xa34   : > { %18005 = vmatpush1.bf16.msra.mxu0 %v26714_v39  ;;  %19686 = vmatpush1.bf16.msra.mxu1 %v26717_v56  ;;  %v26801_v39 = vld [vmem:[%s27350_s14 + $0x4ea8] ss:$16 sps:$4 sm:$0xff]   ;;  %v26806_v56 = vld [vmem:[%s27350_s14 + $0x4ec4] ss:$16 sps:$4 sm:$0xff]  }
 0xa35   : > { %18006 = vmatprep.subr.bf16.mxu0 %v26722_v11  ;;  %19687 = vmatprep.subr.bf16.mxu1 %v26725_v42  ;;  %v26809_v11 = vld [vmem:[%s27350_s14 + $0x4ecc] ss:$16 sps:$4 sm:$0xff]   ;;  %v26804_v42 = vld [vmem:[%s27350_s14 + $0x4ec0] ss:$16 sps:$4 sm:$0xff]  }
 0xa38   : > { %18007 = vmatpush1.bf16.msra.mxu0 %v26720_v12  ;;  %19688 = vmatpush1.bf16.msra.mxu1 %v26723_v0  ;;  %v26807_v12 = vld [vmem:[%s27350_s14 + $0x4ec8] ss:$16 sps:$4 sm:$0xff]   ;;  %v26812_v0 = vld [vmem:[%s27350_s14 + $0x4ee4] ss:$16 sps:$4 sm:$0xff]  }
 0xa39   : > { %18008 = vmatprep.subr.bf16.mxu0 %v26728_v59  ;;  %19689 = vmatprep.subr.bf16.mxu1 %v26731_v63  ;;  %v26815_v59 = vld [vmem:[%s27350_s14 + $0x4eec] ss:$16 sps:$4 sm:$0xff]   ;;  %v26810_v63 = vld [vmem:[%s27350_s14 + $0x4ee0] ss:$16 sps:$4 sm:$0xff]  }
 0xa3c   : > { %18009 = vmatpush1.bf16.msra.mxu0 %v26726_v2  ;;  %19690 = vmatpush1.bf16.msra.mxu1 %v26729_v62  ;;  %v26813_v2 = vld [vmem:[%s27350_s14 + $0x4ee8] ss:$16 sps:$4 sm:$0xff]   ;;  %v26818_v62 = vld [vmem:[%s27350_s14 + $0x4f04] ss:$16 sps:$4 sm:$0xff]  }
 0xa3d   : > { %18010 = vmatprep.subr.bf16.mxu0 %v26734_v1  ;;  %19691 = vmatprep.subr.bf16.mxu1 %v26737_v19  ;;  %v26821_v1 = vld [vmem:[%s27350_s14 + $0x4f0c] ss:$16 sps:$4 sm:$0xff]   ;;  %v26816_v19 = vld [vmem:[%s27350_s14 + $0x4f00] ss:$16 sps:$4 sm:$0xff]  }
 0xa40   : > { %18011 = vmatpush1.bf16.msra.mxu0 %v26732_v3  ;;  %19692 = vmatpush1.bf16.msra.mxu1 %v26735_v22  ;;  %v26819_v3 = vld [vmem:[%s27350_s14 + $0x4f08] ss:$16 sps:$4 sm:$0xff]   ;;  %v26824_v22 = vld [vmem:[%s27350_s14 + $0x4f24] ss:$16 sps:$4 sm:$0xff]  }
 0xa41   : > { %18012 = vmatprep.subr.bf16.mxu0 %v26740_v55  ;;  %19693 = vmatprep.subr.bf16.mxu1 %v26743_v6  ;;  %v26827_v55 = vld [vmem:[%s27350_s14 + $0x4f2c] ss:$16 sps:$4 sm:$0xff]   ;;  %v26822_v6 = vld [vmem:[%s27350_s14 + $0x4f20] ss:$16 sps:$4 sm:$0xff]  }
 0xa44   : > { %18013 = vmatpush1.bf16.msra.mxu0 %v26738_v9  ;;  %19694 = vmatpush1.bf16.msra.mxu1 %v26741_v58  ;;  %v26825_v9 = vld [vmem:[%s27350_s14 + $0x4f28] ss:$16 sps:$4 sm:$0xff]   ;;  %v26830_v58 = vld [vmem:[%s27350_s14 + $0x4f44] ss:$16 sps:$4 sm:$0xff]  }
 0xa45   : > { %18014 = vmatprep.subr.bf16.mxu0 %v26746_v27  ;;  %19695 = vmatprep.subr.bf16.mxu1 %v26749_v15  ;;  %v26833_v27 = vld [vmem:[%s27350_s14 + $0x4f4c] ss:$16 sps:$4 sm:$0xff]   ;;  %v26828_v15 = vld [vmem:[%s27350_s14 + $0x4f40] ss:$16 sps:$4 sm:$0xff]  }
 0xa48   : > { %18015 = vmatpush1.bf16.msra.mxu0 %v26744_v10  ;;  %19696 = vmatpush1.bf16.msra.mxu1 %v26747_v14  ;;  %v26831_v10 = vld [vmem:[%s27350_s14 + $0x4f48] ss:$16 sps:$4 sm:$0xff]   ;;  %v26836_v14 = vld [vmem:[%s27350_s14 + $0x4f64] ss:$16 sps:$4 sm:$0xff]  }
 0xa49   : > { %18016 = vmatprep.subr.bf16.mxu0 %v26752_v17  ;;  %19697 = vmatprep.subr.bf16.mxu1 %v26755_v13  ;;  %v26839_v17 = vld [vmem:[%s27350_s14 + $0x4f6c] ss:$16 sps:$4 sm:$0xff]   ;;  %v26834_v13 = vld [vmem:[%s27350_s14 + $0x4f60] ss:$16 sps:$4 sm:$0xff]  }
 0xa4c   : > { %18017 = vmatpush1.bf16.msra.mxu0 %v26750_v16  ;;  %19698 = vmatpush1.bf16.msra.mxu1 %v26753_v26  ;;  %v26837_v16 = vld [vmem:[%s27350_s14 + $0x4f68] ss:$16 sps:$4 sm:$0xff]   ;;  %v26842_v26 = vld [vmem:[%s27350_s14 + $0x4f84] ss:$16 sps:$4 sm:$0xff]  }
 0xa4d   : > { %18018 = vmatprep.subr.bf16.mxu0 %v26758_v18  ;;  %19699 = vmatprep.subr.bf16.mxu1 %v26761_v38  ;;  %v26845_v18 = vld [vmem:[%s27350_s14 + $0x4f8c] ss:$16 sps:$4 sm:$0xff]   ;;  %v26840_v38 = vld [vmem:[%s27350_s14 + $0x4f80] ss:$16 sps:$4 sm:$0xff]  }
 0xa50   : > { %18019 = vmatpush1.bf16.msra.mxu0 %v26756_v21  ;;  %19700 = vmatpush1.bf16.msra.mxu1 %v26759_v41  ;;  %v26848_v21 = vld [vmem:[%s27350_s14 + $0x4fa4] ss:$16 sps:$4 sm:$0xff]   ;;  %v26851_v41 = vld [vmem:[%s27350_s14 + $0x4fac] ss:$16 sps:$4 sm:$0xff]  }
 0xa51   : > { %18020 = vmatprep.subr.bf16.mxu0 %v26764_v8  ;;  %19701 = vmatprep.subr.bf16.mxu1 %v26767_v44  ;;  %v26846_v8 = vld [vmem:[%s27350_s14 + $0x4fa0] ss:$16 sps:$4 sm:$0xff]   ;;  %v26849_v44 = vld [vmem:[%s27350_s14 + $0x4fa8] ss:$16 sps:$4 sm:$0xff]  }
 0xa54   : > { %18021 = vmatpush1.bf16.msra.mxu0 %v26762_v31  ;;  %19702 = vmatpush1.bf16.msra.mxu1 %v26765_v23  ;;  %v26854_v31 = vld [vmem:[%s27350_s14 + $0x4fc4] ss:$16 sps:$4 sm:$0xff]   ;;  %v26857_v23 = vld [vmem:[%s27350_s14 + $0x4fcc] ss:$16 sps:$4 sm:$0xff]  }
 0xa55   : > { %18031 = vmatprep.subr.bf16.mxu0 %v26770_v46  ;;  %19712 = vmatprep.subr.bf16.mxu1 %v26773_v30  ;;  %v26852_v46 = vld [vmem:[%s27350_s14 + $0x4fc0] ss:$16 sps:$4 sm:$0xff]   ;;  %v26855_v30 = vld [vmem:[%s27350_s14 + $0x4fc8] ss:$16 sps:$4 sm:$0xff]  }
 0xa57   : > { %18023 = vmatmul.mubr.bf16.vlgmr.msra.gmra.mrb[0].mxu0 %v853_v29  ;;  %19704 = vmatmul.mubr.bf16.vlgmr.msra.gmra.mrb[0].mxu1 %v853_v29  ;;  %v26863_v29 = vld [vmem:[%s27350_s14 + $0x4fec] ss:$16 sps:$4 sm:$0xff]  }
 0xa58   : > { %18032 = vmatpush1.bf16.msra.mxu0 %v26768_v33  ;;  %19713 = vmatpush1.bf16.msra.mxu1 %v26771_v36  ;;  %v26858_v33 = vld [vmem:[%s27350_s14 + $0x4fe0] ss:$16 sps:$4 sm:$0xff]   ;;  %v26861_v36 = vld [vmem:[%s27350_s14 + $0x4fe8] ss:$16 sps:$4 sm:$0xff]  }
 0xa59   : > { %18033 = vmatprep.subr.bf16.mxu0 %v26776_v32  ;;  %19714 = vmatprep.subr.bf16.mxu1 %v26779_v35  ;;  %v26867_v32 = vld [vmem:[%s27350_s14 + $0x5004] ss:$16 sps:$4 sm:$0xff]   ;;  %v26870_v35 = vld [vmem:[%s27350_s14 + $0x500c] ss:$16 sps:$4 sm:$0xff]  }
 0xa5a   : > { %18063 = vmatprep.mubr.bf16.mxu0 %v856_v54  ;;  %19744 = vmatprep.mubr.bf16.mxu1 %v856_v54  ;;  %v855_v54 = vpack.c.bf16 %v30229_v25, %v30229_v25  ;;  %v26874_v25 = vld [vmem:[%s27350_s14 + $0x5028] ss:$16 sps:$4 sm:$0xff]  }
 0xa5c   : > { %18034 = vmatpush1.bf16.msra.mxu0 %v26774_v20  ;;  %19715 = vmatpush1.bf16.msra.mxu1 %v26777_v37  ;;  %v26865_v20 = vld [vmem:[%s27350_s14 + $0x5000] ss:$16 sps:$4 sm:$0xff]   ;;  %v26868_v37 = vld [vmem:[%s27350_s14 + $0x5008] ss:$16 sps:$4 sm:$0xff]  }
 0xa5d   : > { %18035 = vmatprep.subr.bf16.mxu0 %v26782_v57  ;;  %19716 = vmatprep.subr.bf16.mxu1 %v26785_v24  ;;  %v26873_v57 = vld [vmem:[%s27350_s14 + $0x5024] ss:$16 sps:$4 sm:$0xff]   ;;  %v26876_v24 = vld [vmem:[%s27350_s14 + $0x502c] ss:$16 sps:$4 sm:$0xff]  }
 0xa60   : > { %18036 = vmatpush1.bf16.msra.mxu0 %v26780_v40  ;;  %19717 = vmatpush1.bf16.msra.mxu1 %v26783_v60  ;;  %v26871_v40 = vld [vmem:[%s27350_s14 + $0x5020] ss:$16 sps:$4 sm:$0xff]   ;;  %v26879_v60 = vld [vmem:[%s27350_s14 + $0x5044] ss:$16 sps:$4 sm:$0xff]  }
 0xa61   : > { %18037 = vmatprep.subr.bf16.mxu0 %v26788_v28  ;;  %19718 = vmatprep.subr.bf16.mxu1 %v26791_v61  ;;  %v26882_v28 = vld [vmem:[%s27350_s14 + $0x504c] ss:$16 sps:$4 sm:$0xff]   ;;  %v27116_v61 = vmov 0  }
 0xa64   : > { %18038 = vmatpush1.bf16.msra.mxu0 %v26786_v50  ;;  %19719 = vmatpush1.bf16.msra.mxu1 %v26789_v45  ;;  %v26877_v50 = vld [vmem:[%s27350_s14 + $0x5040] ss:$16 sps:$4 sm:$0xff]   ;;  %v26880_v45 = vld [vmem:[%s27350_s14 + $0x5048] ss:$16 sps:$4 sm:$0xff]  }
 0xa65   : > { %18039 = vmatprep.subr.bf16.mxu0 %v26794_v48  ;;  %19720 = vmatprep.subr.bf16.mxu1 %v26797_v52  ;;  %v26885_v48 = vld [vmem:[%s27350_s14 + $0x5064] ss:$16 sps:$4 sm:$0xff]   ;;  %v26888_v52 = vld [vmem:[%s27350_s14 + $0x506c] ss:$16 sps:$4 sm:$0xff]  }
 0xa68   : > { %18040 = vmatpush1.bf16.msra.mxu0 %v26792_v47  ;;  %19721 = vmatpush1.bf16.msra.mxu1 %v26795_v51  ;;  %v26883_v47 = vld [vmem:[%s27350_s14 + $0x5060] ss:$16 sps:$4 sm:$0xff]   ;;  %v26886_v51 = vld [vmem:[%s27350_s14 + $0x5068] ss:$16 sps:$4 sm:$0xff]  }
 0xa69   : > { %18041 = vmatprep.subr.bf16.mxu0 %v26800_v4  ;;  %19722 = vmatprep.subr.bf16.mxu1 %v26803_v53  ;;  %v26891_v4 = vld [vmem:[%s27350_s14 + $0x5084] ss:$16 sps:$4 sm:$0xff]   ;;  %v26894_v53 = vld [vmem:[%s27350_s14 + $0x508c] ss:$16 sps:$4 sm:$0xff]  }
 0xa6c   : > { %18042 = vmatpush1.bf16.msra.mxu0 %v26798_v7  ;;  %19723 = vmatpush1.bf16.msra.mxu1 %v26801_v39  ;;  %v26889_v7 = vld [vmem:[%s27350_s14 + $0x5080] ss:$16 sps:$4 sm:$0xff]   ;;  %v26892_v39 = vld [vmem:[%s27350_s14 + $0x5088] ss:$16 sps:$4 sm:$0xff]  }
 0xa6d   : > { %18043 = vmatprep.subr.bf16.mxu0 %v26806_v56  ;;  %19724 = vmatprep.subr.bf16.mxu1 %v26809_v11  ;;  %v26897_v56 = vld [vmem:[%s27350_s14 + $0x50a4] ss:$16 sps:$4 sm:$0xff]   ;;  %v26900_v11 = vld [vmem:[%s27350_s14 + $0x50ac] ss:$16 sps:$4 sm:$0xff]  }
 0xa70   : > { %18044 = vmatpush1.bf16.msra.mxu0 %v26804_v42  ;;  %19725 = vmatpush1.bf16.msra.mxu1 %v26807_v12  ;;  %v26895_v42 = vld [vmem:[%s27350_s14 + $0x50a0] ss:$16 sps:$4 sm:$0xff]   ;;  %v26898_v12 = vld [vmem:[%s27350_s14 + $0x50a8] ss:$16 sps:$4 sm:$0xff]  }
 0xa71   : > { %18045 = vmatprep.subr.bf16.mxu0 %v26812_v0  ;;  %19726 = vmatprep.subr.bf16.mxu1 %v26815_v59  ;;  %v26903_v0 = vld [vmem:[%s27350_s14 + $0x50c4] ss:$16 sps:$4 sm:$0xff]   ;;  %v26906_v59 = vld [vmem:[%s27350_s14 + $0x50cc] ss:$16 sps:$4 sm:$0xff]  }
 0xa74   : > { %18046 = vmatpush1.bf16.msra.mxu0 %v26810_v63  ;;  %19727 = vmatpush1.bf16.msra.mxu1 %v26813_v2  ;;  %v26901_v63 = vld [vmem:[%s27350_s14 + $0x50c0] ss:$16 sps:$4 sm:$0xff]   ;;  %v26904_v2 = vld [vmem:[%s27350_s14 + $0x50c8] ss:$16 sps:$4 sm:$0xff]  }
 0xa75   : > { %18047 = vmatprep.subr.bf16.mxu0 %v26818_v62  ;;  %19728 = vmatprep.subr.bf16.mxu1 %v26821_v1  ;;  %v26909_v62 = vld [vmem:[%s27350_s14 + $0x50e4] ss:$16 sps:$4 sm:$0xff]   ;;  %v26912_v1 = vld [vmem:[%s27350_s14 + $0x50ec] ss:$16 sps:$4 sm:$0xff]  }
 0xa78   : > { %18048 = vmatpush1.bf16.msra.mxu0 %v26816_v19  ;;  %19729 = vmatpush1.bf16.msra.mxu1 %v26819_v3  ;;  %v26907_v19 = vld [vmem:[%s27350_s14 + $0x50e0] ss:$16 sps:$4 sm:$0xff]   ;;  %v26910_v3 = vld [vmem:[%s27350_s14 + $0x50e8] ss:$16 sps:$4 sm:$0xff]  }
 0xa79   : > { %18049 = vmatprep.subr.bf16.mxu0 %v26824_v22  ;;  %19730 = vmatprep.subr.bf16.mxu1 %v26827_v55  ;;  %v20005_v22 = vld.sshfl [vmem:[#allocation2 + $0xa0] sm:$0x3 pattern:$0x76325410] }
 0xa7a   : > { %v857_v55 = vpack.c.bf16 %v20005_v22, %v20005_v22 }
 0xa7c   : > { %18050 = vmatpush1.bf16.msra.mxu0 %v26822_v6  ;;  %19731 = vmatpush1.bf16.msra.mxu1 %v26825_v9  ;;  %v19798_v6 = vld [vmem:[%s27363_s13] sm:$0xff]  ;;  %v3454_v9 = vsub.s32 0, %v27408_v43 }
 0xa7d   : > { %18051 = vmatprep.subr.bf16.mxu0 %v26830_v58  ;;  %19732 = vmatprep.subr.bf16.mxu1 %v26833_v27  ;;  %v3462_v58 = vsub.s32 2, %v27408_v43  ;;  %v3450_v27 = vld [vmem:[%s27358_s21] sm:$0xf] }
 0xa80   : > { %18052 = vmatpush1.bf16.msra.mxu0 %v26828_v15  ;;  %19733 = vmatpush1.bf16.msra.mxu1 %v26831_v10  ;;  %v19800_v15 = vcombine.high %v19798_v6, %v19798_v6  ;;  %v3458_v10 = vsub.s32 1, %v27408_v43 }
 0xa81   : > { %18053 = vmatprep.subr.bf16.mxu0 %v26836_v14  ;;  %19734 = vmatprep.subr.bf16.mxu1 %v26839_v17  ;;  %v3466_v14 = vsub.s32 3, %v27408_v43  ;;  %v3455_v17 = vrot.slane %v3450_v27, %v3454_v9 }
 0xa84   : > { %18054 = vmatpush1.bf16.msra.mxu0 %v26834_v13  ;;  %19735 = vmatpush1.bf16.msra.mxu1 %v26837_v16  ;;  %v3463_v13 = vrot.slane %v3450_v27, %v3462_v58  ;;  %v19807_v16 = vrot.slane %v19798_v6, %v27416_v49 }
 0xa85   : > { %18055 = vmatprep.subr.bf16.mxu0 %v26842_v26  ;;  %19736 = vmatprep.subr.bf16.mxu1 %v26845_v18  ;;  %v19814_v26 = vrot.slane %v19800_v15, %v27416_v49  ;;  %v3459_v18 = vrot.slane %v3450_v27, %v3458_v10 }
 0xa88   : > { %18056 = vmatpush1.bf16.msra.mxu0 %v26840_v38  ;;  %19737 = vmatpush1.bf16.msra.mxu1 %v26843_v5  ;;  %v3467_v38 = vrot.slane %v3450_v27, %v3466_v14 }
 0xa89   : > { %18057 = vmatprep.subr.bf16.mxu0 %v26848_v21  ;;  %19738 = vmatprep.subr.bf16.mxu1 %v26851_v41 }
 0xa8c   : > { %18058 = vmatpush1.bf16.msra.mxu0 %v26846_v8  ;;  %19739 = vmatpush1.bf16.msra.mxu1 %v26849_v44 }
 0xa8d   : > { %18059 = vmatprep.subr.bf16.mxu0 %v26854_v31  ;;  %19740 = vmatprep.subr.bf16.mxu1 %v26857_v23 }
 0xa90   : > { %18060 = vmatpush1.bf16.msra.mxu0 %v26852_v46  ;;  %19741 = vmatpush1.bf16.msra.mxu1 %v26855_v30  ;;  %v19815_v46 = vcombine.high %v19807_v16, %v19807_v16 }
 0xa91   : > { %18061 = vmatprep.subr.bf16.mxu0 %v26860_v34  ;;  %19742 = vmatprep.subr.bf16.mxu1 %v26863_v29  ;;  %v19816_v34 = vcombine.high %v19814_v26, %v19814_v26 }
 0xa94   : > { %18062 = vmatpush1.bf16.msra.mxu0 %v26858_v33  ;;  %19743 = vmatpush1.bf16.msra.mxu1 %v26861_v36 }
 0xa95   : > { %18072 = vmatprep.subr.bf16.mxu0 %v26867_v32  ;;  %19753 = vmatprep.subr.bf16.mxu1 %v26870_v35 }
 0xa97   : > { %18064 = vmatmul.mubr.bf16.vlgmr.msra.gmra.mrb[0].mxu0 %v855_v54  ;;  %19745 = vmatmul.mubr.bf16.vlgmr.msra.gmra.mrb[0].mxu1 %v855_v54 }
 0xa98   : > { %18073 = vmatpush1.bf16.msra.mxu0 %v26865_v20  ;;  %19754 = vmatpush1.bf16.msra.mxu1 %v26868_v37 }
 0xa99   : > { %18074 = vmatprep.subr.bf16.mxu0 %v26873_v57  ;;  %19755 = vmatprep.subr.bf16.mxu1 %v26876_v24 }
 0xa9a   : > { %18104 = vmatprep.mubr.bf16.mxu0 %v27116_v61  ;;  %19785 = vmatprep.mubr.bf16.mxu1 %v27116_v61 }
 0xa9c   : > { %18075 = vmatpush1.bf16.msra.mxu0 %v26871_v40  ;;  %19756 = vmatpush1.bf16.msra.mxu1 %v26874_v25 }
 0xa9d   : > { %18076 = vmatprep.subr.bf16.mxu0 %v26879_v60  ;;  %19757 = vmatprep.subr.bf16.mxu1 %v26882_v28 }
 0xaa0   : > { %18077 = vmatpush1.bf16.msra.mxu0 %v26877_v50  ;;  %19758 = vmatpush1.bf16.msra.mxu1 %v26880_v45 }
 0xaa1   : > { %18078 = vmatprep.subr.bf16.mxu0 %v26885_v48  ;;  %19759 = vmatprep.subr.bf16.mxu1 %v26888_v52 }
 0xaa4   : > { %18079 = vmatpush1.bf16.msra.mxu0 %v26883_v47  ;;  %19760 = vmatpush1.bf16.msra.mxu1 %v26886_v51 }
 0xaa5   : > { %18080 = vmatprep.subr.bf16.mxu0 %v26891_v4  ;;  %19761 = vmatprep.subr.bf16.mxu1 %v26894_v53 }
 0xaa8   : > { %18081 = vmatpush1.bf16.msra.mxu0 %v26889_v7  ;;  %19762 = vmatpush1.bf16.msra.mxu1 %v26892_v39 }
 0xaa9   : > { %18082 = vmatprep.subr.bf16.mxu0 %v26897_v56  ;;  %19763 = vmatprep.subr.bf16.mxu1 %v26900_v11 }
 0xaac   : > { %18083 = vmatpush1.bf16.msra.mxu0 %v26895_v42  ;;  %19764 = vmatpush1.bf16.msra.mxu1 %v26898_v12 }
 0xaad   : > { %18084 = vmatprep.subr.bf16.mxu0 %v26903_v0  ;;  %19765 = vmatprep.subr.bf16.mxu1 %v26906_v59 }
 0xab0   : > { %18085 = vmatpush1.bf16.msra.mxu0 %v26901_v63  ;;  %19766 = vmatpush1.bf16.msra.mxu1 %v26904_v2 }
 0xab1   : > { %18086 = vmatprep.subr.bf16.mxu0 %v26909_v62  ;;  %19767 = vmatprep.subr.bf16.mxu1 %v26912_v1 }
 0xab4   : > { %18087 = vmatpush1.bf16.msra.mxu0 %v26907_v19  ;;  %19768 = vmatpush1.bf16.msra.mxu1 %v26910_v3 }
 0xab7   : > { %18105 = vmatmul.mubr.bf16.vlgmr.msra.gmra.mrb[0].mxu0 %v857_v55  ;;  %19786 = vmatmul.mubr.bf16.vlgmr.msra.gmra.mrb[0].mxu1 %v857_v55 }
 0xb8a   : > { %v18106_v5 = vpop.f32.mrb[0].mxu0  ;;  %v19787_v21 = vpop.f32.mrb[0].mxu1 }
 0xb8b   : > { %v22607_v41 = vadd.f32 %v18106_v5, %v3455_v17  ;;  %v22609_v8 = vadd.f32 %v19787_v21, %v3463_v13  ;;  %v18108_v44 = vpop.f32.mrb[1].mxu0  ;;  %v19789_v31 = vpop.f32.mrb[1].mxu1 }
 0xb8c   : > { %v22608_v23 = vadd.f32 %v18108_v44, %v3459_v18  ;;  %v22610_v30 = vadd.f32 %v19789_v31, %v3467_v38  ;;  %v18110_v43 = vpop.f32.mrb[2].mxu0  ;;  %v19791_v29 = vpop.f32.mrb[2].mxu1 }
 0xb8d   : > { %v19794_v33 = vmax.f32 %v22607_v41, 0.0  ;;  %v19796_v36 = vmax.f32 %v22609_v8, 0.0  ;;  %v18111_v32 = vpop.f32.mrb[3].mxu0  ;;  %v19792_v35 = vpop.f32.mrb[3].mxu1 }
 0xb8e   : > { %v19795_v54 = vmax.f32 %v22608_v23, 0.0  ;;  %v19797_v20 = vmax.f32 %v22610_v30, 0.0 }
 0xb8f   : > { %v19821_v37 = vmul.f32 %v19807_v16, %v19794_v33  ;;  %v19823_v57 = vmul.f32 %v19814_v26, %v19796_v36 }
 0xb90   : > { %v19822_v24 = vmul.f32 %v19815_v46, %v19795_v54  ;;  %v19824_v40 = vmul.f32 %v19816_v34, %v19797_v20 }
 0xb92   : > { %v19829_v25 = vcombine.low %v19821_v37, %v19822_v24  ;;  %v19830_v60 = vcombine.low %v19823_v57, %v19824_v40 }
 0xb94   : > { %v19837_v28 = vrot.slane %v19829_v25, %v27416_v49  ;;  %v19844_v61 = vrot.slane %v19830_v60, %v27416_v49 }
 0xb96   : > { %v19845_v50 = vcombine.low %v19837_v28, %v19844_v61 }
 0xb98   : > { %19847 = vst [vmem:[%s301_s7] sm:$0xff] %v19845_v50 }
 0xb99   : > { %27045 = shalt.err (!%p27042_p2)
}
 0xb9a   : > { %s27046_s9 = scalar_lea.hbm %s30351_s20, 128  ;;  %s27050_s30 = scalar_lea.hbm %s30398_s4, 1024 }
 0xb9b   : > { %p27047_p1 = scmp.ne.s32.totalorder %s30351_s20, %s27046_s9  ;;  %p27051_p0 = scmp.lt.u32.totalorder %s30351_s20, %s30398_s4 }
 0xb9c   : > { %p27052_p9 = scmp.lt.u32.totalorder %s27050_s30, %s27046_s9  ;;  %p27054_p3 = scmp.lt.u32.totalorder %s27046_s9, %s30351_s20 }
 0xb9d   : > { %p27048_p10 = pnand %p27047_p1, %p30428_p8 }
 0xb9e   : > { %p27053_p13 = por %p27052_p9, %p27051_p0 }
 0xb9f   : > { %p27049_p4 = pneg %p27048_p10 }
 0xba0   : > { %p27055_p11 = por %p27054_p3, %p27053_p13 }
 0xba2   : > { %p27056_p12 = pnand %p27055_p11, %p27049_p4 }
 0xba4   : > { %27059 = shalt.err (!%p27056_p12)
}
 0xba5   : > { %22943 = dma.vmem_to_hbm [thread:$0]  (%p30428_p8), %s30353_s23, 128, %s30351_s20, %s19849_s5  }
 0xba6 PF: > { %p22966_p6 = scmp.ge.s32.totalorder %s27106_s18, 2  ;;  %s19875_s12 = sand.u32 1, %s27094_s15  }
 0xba7   : > { %p30429_p5 = scmp.ne.s32.totalorder %s30418_s6, 0  ;;  %s19876_s21 = scalar_lea.sflag [#allocation4], %s19875_s12 }
 0xba9   : > { %p22960_p7 = pnand %p22966_p6, %p30429_p5 }
 0xbab   : > { %27089 = dma.done.wait (!%p22960_p7), %s19876_s21, 128  }
 0xbac   : > { %27091 = vsyncadd (!%p22960_p7), %s19876_s21, 4294967168  ;;  %s30430_s25 = sld [smem:[#allocation15_spill]]  ;;  %s30431_s17 = sld [smem:[#allocation16_spill]] }
 0xbad   : > { %p21_p2 = scmp.ge.s32.totalorder %s27164_s19, 10   ;;  %s30432_s15 = smov %s27098_s16 }
 0xbae   : > { %s30434_s18 = smov %s27164_s19 }
 0xbaf   :  { %23 = sbr.rel (!%p21_p2) target bundleno = 10 (0xa), region = 110 }
 0xbb2   : > { %s30433_s16 = smov %s30430_s25 }
 0xbb6   :  { %19881 = vsyncpa [#allocation3], 1 }
 0xbb7   :  { %19883 = vsyncpa [#allocation3 + $0x1], 1 }
 0xbb8   :  { %19884 = vsyncpa [#allocation6], 1 }
 0xbb9   :  { %19886 = vsyncpa [#allocation6 + $0x1], 1 }
 0xbba   :  { %19887 = vsyncpa [#allocation9], 1 }
 0xbbb   :  { %19889 = vsyncpa [#allocation9 + $0x1], 1 }
 0xbbc   :  { %19890 = vsyncpa [#allocation4], 1 }
 0xbbd   :  { %19892 = vsyncpa [#allocation4 + $0x1], 1 }

</bundles_post_ra>
